<compile_context>
chip_gen: v6e
topology: v6e:2x2x1
jax: 0.10.0
libtpu: 0.0.40
codegen_flags: <defaults>
</compile_context>

<pallas_src>
import functools

import jax
import jax.numpy as jnp
from jax.experimental import pallas as pl
from jax.experimental.pallas import tpu as pltpu


def _vmem_limit(working_set_bytes):
    """Scoped-VMEM budget: above the 16/32 MiB defaults, <= 48 MiB (v7x-safe)."""
    return int(min(max(2 * working_set_bytes, 32 << 20), 48 << 20))


# ---------------------------------------------------------------------------
# Kernel 1: fused 1x1x1 conv + BN + ReLU for the three heads reading x.
# Single lane-dense output; channel split happens in the consumers.
# ---------------------------------------------------------------------------
def _pointwise_heads_kernel(x_ref, w_ref, s_ref, b_ref, y_ref):
    """x: (tm, Cin), w: (Cin, Ctot_pad), s/b: (1, Ctot_pad), y: (tm, Ctot_pad)."""
    acc = jnp.dot(x_ref[...], w_ref[...], preferred_element_type=jnp.float32)
    y_ref[...] = jnp.maximum(acc * s_ref[...] + b_ref[...], 0.0).astype(y_ref.dtype)


def pointwise_branch_heads(x2d, w_cat, scale_cat, shift_cat, tm=2048):
    """x2d: (M, Cin) bf16 -> (M, Ctot_pad) bf16 (all three heads concatenated)."""
    M, Cin = x2d.shape
    Ctot = w_cat.shape[-1]
    tm = min(tm, M)
    if M >= 128:
        tm = max(128, (tm // 128) * 128)
    grid_m = pl.cdiv(M, tm)
    Mp = grid_m * tm
    if Mp != M:
        x2d = jnp.pad(x2d, ((0, Mp - M), (0, 0)))
    work = 2 * tm * (Cin + Ctot) * 2 + Cin * Ctot * 2 + tm * Ctot * 4
    y = pl.pallas_call(
        _pointwise_heads_kernel,
        out_shape=jax.ShapeDtypeStruct((Mp, Ctot), jnp.bfloat16),
        grid=(grid_m,),
        in_specs=[
            pl.BlockSpec((tm, Cin), lambda i: (i, 0)),
            pl.BlockSpec((Cin, Ctot), lambda i: (0, 0)),
            pl.BlockSpec((1, Ctot), lambda i: (0, 0)),
            pl.BlockSpec((1, Ctot), lambda i: (0, 0)),
        ],
        out_specs=pl.BlockSpec((tm, Ctot), lambda i: (i, 0)),
        compiler_params=pltpu.CompilerParams(
            dimension_semantics=("parallel",),
            vmem_limit_bytes=_vmem_limit(work)),
    )(x2d, w_cat, scale_cat.reshape(1, Ctot), shift_cat.reshape(1, Ctot))
    return y[:M] if Mp != M else y


# ---------------------------------------------------------------------------
# Kernel 2: 3x3x3 SAME conv + BN + ReLU, one batch element per grid step.
# 27 accumulating dots (no im2col slab); kw sublane shifts hoisted (3 total).
# ---------------------------------------------------------------------------
def _conv3x3x3_bn_relu_kernel(x_ref, w_ref, s_ref, b_ref, o_ref):
    """x: (T+2, H+2, W+2, Cin) zero-padded; w: (27, Cin, Cout) taps (kt,kh,kw);
    s/b: (1, Cout); o: (T, H, W, Cout)."""
    T, H, W, Cout = o_ref.shape
    Cin = x_ref.shape[-1]
    M = T * H * W
    x = x_ref[...]
    acc = jnp.zeros((M, Cout), jnp.float32)
    for kw in range(3):
        shifted = x[:, :, kw:kw + W, :]            # hoisted sublane (W) shift
        for kt in range(3):                        # T/H offsets: free row addressing
            for kh in range(3):
                lhs = shifted[kt:kt + T, kh:kh + H].reshape(M, Cin)
                tap = kt * 9 + kh * 3 + kw
                acc = acc + jnp.dot(lhs, w_ref[tap],
                                    preferred_element_type=jnp.float32)
    y = jnp.maximum(acc * s_ref[...] + b_ref[...], 0.0)
    o_ref[...] = y.reshape(T, H, W, Cout).astype(o_ref.dtype)


# ---------------------------------------------------------------------------
# Kernel 3: fused 3x3x3 SAME max-pool (zero pad) + 1x1 conv + BN + ReLU.
# Incremental running max (2 live temporaries), hoisted kw shifts.
# ---------------------------------------------------------------------------
def _maxpool_conv1x1_bn_relu_kernel(x_ref, w_ref, s_ref, b_ref, o_ref):
    """x: (T+2, H+2, W+2, Cin) zero-padded; w: (Cin, Cout); o: (T, H, W, Cout)."""
    T, H, W, Cout = o_ref.shape
    Cin = x_ref.shape[-1]
    M = T * H * W
    x = x_ref[...]
    running = None
    for kw in range(3):
        shifted = x[:, :, kw:kw + W, :]            # hoisted sublane (W) shift
        for kt in range(3):
            for kh in range(3):
                tap = shifted[kt:kt + T, kh:kh + H]
                running = tap if running is None else jnp.maximum(running, tap)
    pooled = running.reshape(M, Cin)
    acc = jnp.dot(pooled, w_ref[...], preferred_element_type=jnp.float32)
    y = jnp.maximum(acc * s_ref[...] + b_ref[...], 0.0)
    o_ref[...] = y.reshape(T, H, W, Cout).astype(o_ref.dtype)


# ---------------------------------------------------------------------------
# Shared wrapper for the two halo'd kernels: grid (N,), the whole zero-padded
# (T+2, H+2, W+2, Cin) block is DMA'd exactly once per batch element.
# ---------------------------------------------------------------------------
def _halo_call(kernel, x_nthwc, w, scale, shift):
    N, T, H, W, Cin = x_nthwc.shape
    Cout = w.shape[-1]
    # TODO(synk): fuse this pad into the producing kernel (offset out_spec).
    xp = jnp.pad(x_nthwc, ((0, 0), (1, 1), (1, 1), (1, 1), (0, 0)))
    Tp, Hp, Wp = T + 2, H + 2, W + 2

    in_block = Tp * Hp * Wp * Cin * 2
    out_block = T * H * W * Cout * 2
    work = 2 * (in_block + out_block) + in_block + w.size * 2 + T * H * W * Cout * 4

    w_map = (lambda n: (0, 0, 0)) if w.ndim == 3 else (lambda n: (0, 0))
    return pl.pallas_call(
        kernel,
        out_shape=jax.ShapeDtypeStruct((N, T, H, W, Cout), jnp.bfloat16),
        grid=(N,),
        in_specs=[
            pl.BlockSpec((None, Tp, Hp, Wp, Cin), lambda n: (n, 0, 0, 0, 0)),
            pl.BlockSpec(w.shape, w_map),
            pl.BlockSpec((1, Cout), lambda n: (0, 0)),
            pl.BlockSpec((1, Cout), lambda n: (0, 0)),
        ],
        out_specs=pl.BlockSpec((None, T, H, W, Cout), lambda n: (n, 0, 0, 0, 0)),
        compiler_params=pltpu.CompilerParams(
            dimension_semantics=("parallel",),
            vmem_limit_bytes=_vmem_limit(work)),
    )(xp, w, scale.reshape(1, Cout), shift.reshape(1, Cout))


def unit3d_3x3(x_nthwc, p):
    return _halo_call(_conv3x3x3_bn_relu_kernel, x_nthwc,
                      p["w"], p["scale"], p["shift"])


def maxpool_then_unit3d_1x1(x_nthwc, p):
    return _halo_call(_maxpool_conv1x1_bn_relu_kernel, x_nthwc,
                      p["w"], p["scale"], p["shift"])


# ---------------------------------------------------------------------------
# InceptionModule forward (functional)
# ---------------------------------------------------------------------------
def inception_forward(x_ncthw, params):
    N, Cin, T, H, W = x_ncthw.shape
    # PyTorch NCTHW -> channels-last NTHWC, bf16 activations.
    x = jnp.transpose(x_ncthw, (0, 2, 3, 4, 1)).astype(jnp.bfloat16)
    M = N * T * H * W

    c0 = params["b0"]["w"].shape[-1]
    c1a = params["b1a"]["w"].shape[-1]
    c2a = params["b2a"]["w"].shape[-1]
    Ctot = c0 + c1a + c2a
    Ctot_pad = ((Ctot + 127) // 128) * 128          # lane-dense output width

    w_cat = jnp.concatenate(
        [params["b0"]["w"], params["b1a"]["w"], params["b2a"]["w"]], axis=-1)
    s_cat = jnp.concatenate(
        [params["b0"]["scale"], params["b1a"]["scale"], params["b2a"]["scale"]])
    b_cat = jnp.concatenate(
        [params["b0"]["shift"], params["b1a"]["shift"], params["b2a"]["shift"]])
    if Ctot_pad != Ctot:
        w_cat = jnp.pad(w_cat, ((0, 0), (0, Ctot_pad - Ctot)))
        s_cat = jnp.pad(s_cat, (0, Ctot_pad - Ctot))
        b_cat = jnp.pad(b_cat, (0, Ctot_pad - Ctot))

    # One pass over x computes all three 1x1 branch heads (lane-dense output).
    y_cat = pointwise_branch_heads(x.reshape(M, Cin), w_cat, s_cat, b_cat)
    y_cat = y_cat.reshape(N, T, H, W, Ctot_pad)

    b0 = y_cat[..., :c0]
    y1a = y_cat[..., c0:c0 + c1a]                    # slice fuses with pad in XLA
    y2a = y_cat[..., c0 + c1a:c0 + c1a + c2a]

    b1 = unit3d_3x3(y1a, params["b1b"])
    b2 = unit3d_3x3(y2a, params["b2b"])
    b3 = maxpool_then_unit3d_1x1(x, params["b3b"])

    out = jnp.concatenate([b0, b1, b2, b3], axis=-1)         # channel concat
    return jnp.transpose(out, (0, 4, 1, 2, 3)).astype(jnp.float32)  # NCTHW


# ---------------------------------------------------------------------------
# Pure-JAX reference (bf16 operands, f32 accumulation — same regime as kernels)
# ---------------------------------------------------------------------------
def _unit1x1_ref(v, p):
    y = jnp.einsum('nthwc,cd->nthwd', v, p["w"],
                   preferred_element_type=jnp.float32)
    return jnp.maximum(y * p["scale"] + p["shift"], 0.0)


def _unit3x3_ref(v, p):
    n, t, h, w_, c = v.shape
    vp = jnp.pad(v, ((0, 0), (1, 1), (1, 1), (1, 1), (0, 0)))
    acc = jnp.zeros((n, t, h, w_, p["w"].shape[-1]), jnp.float32)
    for kt in range(3):
        for kh in range(3):
            for kw in range(3):
                acc = acc + jnp.einsum(
                    'nthwc,cd->nthwd',
                    vp[:, kt:kt + t, kh:kh + h, kw:kw + w_, :],
                    p["w"][kt * 9 + kh * 3 + kw],
                    preferred_element_type=jnp.float32)
    return jnp.maximum(acc * p["scale"] + p["shift"], 0.0)


def _maxpool_ref(v):
    n, t, h, w_, c = v.shape
    vp = jnp.pad(v, ((0, 0), (1, 1), (1, 1), (1, 1), (0, 0)))
    r = None
    for kt in range(3):
        for kh in range(3):
            for kw in range(3):
                tap = vp[:, kt:kt + t, kh:kh + h, kw:kw + w_, :]
                r = tap if r is None else jnp.maximum(r, tap)
    return r


def reference_forward(x_ncthw, params):
    x = jnp.transpose(x_ncthw, (0, 2, 3, 4, 1)).astype(jnp.bfloat16)
    b0 = _unit1x1_ref(x, params["b0"]).astype(jnp.bfloat16)
    y1a = _unit1x1_ref(x, params["b1a"]).astype(jnp.bfloat16)
    y2a = _unit1x1_ref(x, params["b2a"]).astype(jnp.bfloat16)
    b1 = _unit3x3_ref(y1a, params["b1b"]).astype(jnp.bfloat16)
    b2 = _unit3x3_ref(y2a, params["b2b"]).astype(jnp.bfloat16)
    b3 = _unit1x1_ref(_maxpool_ref(x), params["b3b"]).astype(jnp.bfloat16)
    out = jnp.concatenate([b0, b1, b2, b3], axis=-1)
    return jnp.transpose(out, (0, 4, 1, 2, 3)).astype(jnp.float32)


# ---------------------------------------------------------------------------
# Deterministic parameter initialization (shapes from the module's __init__)
# ---------------------------------------------------------------------------
def init_unit3d(key, in_c, out_c, ksize):
    kw_, kg, kb, km, kv = jax.random.split(key, 5)
    K = ksize ** 3
    if ksize == 1:
        w = jax.random.normal(kw_, (in_c, out_c), jnp.float32)
    else:
        # Taps ordered (kt, kh, kw) on the leading axis; no conv bias
        # (use_bias=False in Unit3D).
        w = jax.random.normal(kw_, (K, in_c, out_c), jnp.float32)
    w = (w / jnp.sqrt(float(K * in_c))).astype(jnp.bfloat16)
    # BatchNorm3d(eps=1e-3) folded into a per-channel affine (inference mode).
    gamma = 1.0 + 0.1 * jax.random.normal(kg, (out_c,), jnp.float32)
    beta = 0.1 * jax.random.normal(kb, (out_c,), jnp.float32)
    r_mean = 0.1 * jax.random.normal(km, (out_c,), jnp.float32)
    r_var = 1.0 + 0.1 * jnp.abs(jax.random.normal(kv, (out_c,), jnp.float32))
    eps = 1e-3
    scale = gamma / jnp.sqrt(r_var + eps)
    shift = beta - r_mean * scale
    return {"w": w, "scale": scale, "shift": shift}


if __name__ == "__main__":
    key = jax.random.PRNGKey(0)
    kx, k0, k1a, k1b, k2a, k2b, k3b = jax.random.split(key, 7)

    in_channels = 4
    out_channels = [4, 4, 8, 4, 8, 4]   # InceptionModule(in, out_channels, name)

    params = {
        "b0":  init_unit3d(k0,  in_channels,     out_channels[0], 1),
        "b1a": init_unit3d(k1a, in_channels,     out_channels[1], 1),
        "b1b": init_unit3d(k1b, out_channels[1], out_channels[2], 3),
        "b2a": init_unit3d(k2a, in_channels,     out_channels[3], 1),
        "b2b": init_unit3d(k2b, out_channels[3], out_channels[4], 3),
        "b3b": init_unit3d(k3b, in_channels,     out_channels[5], 1),
    }

    N, T, H, W = 2, 4, 8, 8
    x = jax.random.normal(kx, (N, in_channels, T, H, W), jnp.float32)

    fwd = jax.jit(functools.partial(inception_forward, params=params))
    out = jax.block_until_ready(fwd(x))

    expected_c = (out_channels[0] + out_channels[2]
                  + out_channels[4] + out_channels[5])
    assert out.shape == (N, expected_c, T, H, W), out.shape
    assert bool(jnp.all(jnp.isfinite(out)))

    # Correctness vs a pure-JAX reference (bf16 operands, f32 accumulation):
    # differences are limited to f32 accumulation order + bf16 re-rounding.
    ref = jax.block_until_ready(
        jax.jit(functools.partial(reference_forward, params=params))(x))
    err = jnp.abs(out - ref)
    tol = 5e-2 + 5e-2 * jnp.abs(ref)
    assert bool(jnp.all(err <= tol)), float(jnp.max(err))

    print("KERNEL_OK")
</pallas_src>

<mosaic_0001>
module attributes {stable_mosaic.version = 11 : i64} {
  func.func @_pointwise_heads_kernel(%arg0: i32, %arg1: memref<512x4xbf16, #tpu.memory_space<vmem>>, %arg2: memref<4x128xbf16, #tpu.memory_space<vmem>>, %arg3: memref<1x128xf32, #tpu.memory_space<vmem>>, %arg4: memref<1x128xf32, #tpu.memory_space<vmem>>, %arg5: memref<512x128xbf16, #tpu.memory_space<vmem>>) attributes {dimension_semantics = [#tpu.dimension_semantics<parallel>], iteration_bounds = array<i64: 1>, scalar_prefetch = 0 : i64, scratch_operands = 0 : i64, tpu.core_type = #tpu.core_type<tc>, window_params = [{transform_indices = @transform_0, window_bounds = array<i64: 512, 4>}, {pipeline_mode = #tpu.pipeline_mode<synchronous>, transform_indices = @transform_1, window_bounds = array<i64: 4, 128>}, {pipeline_mode = #tpu.pipeline_mode<synchronous>, transform_indices = @transform_2, window_bounds = array<i64: 1, 128>}, {pipeline_mode = #tpu.pipeline_mode<synchronous>, transform_indices = @transform_3, window_bounds = array<i64: 1, 128>}, {transform_indices = @transform_4, window_bounds = array<i64: 512, 128>}]} {
    %c0 = arith.constant 0 : index
    %c0_0 = arith.constant 0 : index
    %0 = vector.load %arg1[%c0, %c0_0] : memref<512x4xbf16, #tpu.memory_space<vmem>>, vector<512x4xbf16>
    %c0_1 = arith.constant 0 : index
    %c0_2 = arith.constant 0 : index
    %1 = vector.load %arg2[%c0_1, %c0_2] : memref<4x128xbf16, #tpu.memory_space<vmem>>, vector<4x128xbf16>
    %cst = arith.constant dense<0.000000e+00> : vector<512x128xf32>
    %2 = tpu.matmul %0, %1, %cst {dimension_numbers = #tpu.dot_dimension_numbers<[1], [0], [0], [1], [0, 0, 1, 1], [], []>} : vector<512x4xbf16>, vector<4x128xbf16>, vector<512x128xf32> -> vector<512x128xf32>
    %c0_3 = arith.constant 0 : index
    %c0_4 = arith.constant 0 : index
    %3 = vector.load %arg3[%c0_3, %c0_4] : memref<1x128xf32, #tpu.memory_space<vmem>>, vector<1x128xf32>
    %4 = vector.broadcast %3 : vector<1x128xf32> to vector<512x128xf32>
    %5 = arith.mulf %2, %4 : vector<512x128xf32>
    %c0_5 = arith.constant 0 : index
    %c0_6 = arith.constant 0 : index
    %6 = vector.load %arg4[%c0_5, %c0_6] : memref<1x128xf32, #tpu.memory_space<vmem>>, vector<1x128xf32>
    %7 = vector.broadcast %6 : vector<1x128xf32> to vector<512x128xf32>
    %8 = arith.addf %5, %7 : vector<512x128xf32>
    %cst_7 = arith.constant 0.000000e+00 : f32
    %9 = vector.broadcast %cst_7 : f32 to vector<512x128xf32>
    %10 = arith.maximumf %8, %9 : vector<512x128xf32>
    %11 = arith.truncf %10 : vector<512x128xf32> to vector<512x128xbf16>
    %c0_8 = arith.constant 0 : index
    %c0_9 = arith.constant 0 : index
    %12 = vector.load %arg5[%c0_8, %c0_9] : memref<512x128xbf16, #tpu.memory_space<vmem>>, vector<512x128xbf16>
    tpu.vector_store %arg5[%c0_8, %c0_9], %11 {strides = array<i32>} : memref<512x128xbf16, #tpu.memory_space<vmem>>, vector<512x128xbf16>,
    return
  }
  func.func @transform_0(%arg0: i32) -> (i32, i32) {
    %c0_i32 = arith.constant 0 : i32
    %c0_i32_0 = arith.constant 0 : i32
    return %arg0, %c0_i32 : i32, i32
  }
  func.func @transform_1(%arg0: i32) -> (i32, i32) {
    %c0_i32 = arith.constant 0 : i32
    %c0_i32_0 = arith.constant 0 : i32
    %c0_i32_1 = arith.constant 0 : i32
    return %c0_i32, %c0_i32_0 : i32, i32
  }
  func.func @transform_2(%arg0: i32) -> (i32, i32) {
    %c0_i32 = arith.constant 0 : i32
    %c0_i32_0 = arith.constant 0 : i32
    %c0_i32_1 = arith.constant 0 : i32
    return %c0_i32, %c0_i32_0 : i32, i32
  }
  func.func @transform_3(%arg0: i32) -> (i32, i32) {
    %c0_i32 = arith.constant 0 : i32
    %c0_i32_0 = arith.constant 0 : i32
    %c0_i32_1 = arith.constant 0 : i32
    return %c0_i32, %c0_i32_0 : i32, i32
  }
  func.func @transform_4(%arg0: i32) -> (i32, i32) {
    %c0_i32 = arith.constant 0 : i32
    %c0_i32_0 = arith.constant 0 : i32
    return %arg0, %c0_i32 : i32, i32
  }
}

module attributes {stable_mosaic.version = 11 : i64} {
  func.func @_conv3x3x3_bn_relu_kernel(%arg0: i32, %arg1: memref<1x6x10x10x4xbf16, #tpu.memory_space<vmem>>, %arg2: memref<27x4x8xbf16, #tpu.memory_space<vmem>>, %arg3: memref<1x8xf32, #tpu.memory_space<vmem>>, %arg4: memref<1x8xf32, #tpu.memory_space<vmem>>, %arg5: memref<1x4x8x8x8xbf16, #tpu.memory_space<vmem>>) attributes {dimension_semantics = [#tpu.dimension_semantics<parallel>], iteration_bounds = array<i64: 2>, scalar_prefetch = 0 : i64, scratch_operands = 0 : i64, tpu.core_type = #tpu.core_type<tc>, window_params = [{transform_indices = @transform_0, window_bounds = array<i64: 1, 6, 10, 10, 4>}, {pipeline_mode = #tpu.pipeline_mode<synchronous>, transform_indices = @transform_1, window_bounds = array<i64: 27, 4, 8>}, {pipeline_mode = #tpu.pipeline_mode<synchronous>, transform_indices = @transform_2, window_bounds = array<i64: 1, 8>}, {pipeline_mode = #tpu.pipeline_mode<synchronous>, transform_indices = @transform_3, window_bounds = array<i64: 1, 8>}, {transform_indices = @transform_4, window_bounds = array<i64: 1, 4, 8, 8, 8>}]} {
    %c0 = arith.constant 0 : index
    %c0_0 = arith.constant 0 : index
    %c0_1 = arith.constant 0 : index
    %c0_2 = arith.constant 0 : index
    %c0_3 = arith.constant 0 : index
    %0 = vector.load %arg1[%c0, %c0_0, %c0_1, %c0_2, %c0_3] : memref<1x6x10x10x4xbf16, #tpu.memory_space<vmem>>, vector<1x6x10x10x4xbf16>
    %1 = vector.shape_cast %0 : vector<1x6x10x10x4xbf16> to vector<6x10x10x4xbf16>
    %cst = arith.constant 0.000000e+00 : f32
    %2 = vector.broadcast %cst : f32 to vector<256x8xf32>
    %3 = vector.extract_strided_slice %1 {offsets = [0, 0, 0, 0], sizes = [6, 10, 8, 4], strides = [1, 1, 1, 1]} : vector<6x10x10x4xbf16> to vector<6x10x8x4xbf16>
    %4 = vector.extract_strided_slice %3 {offsets = [0, 0, 0, 0], sizes = [4, 8, 8, 4], strides = [1, 1, 1, 1]} : vector<6x10x8x4xbf16> to vector<4x8x8x4xbf16>
    %5 = vector.shape_cast %4 : vector<4x8x8x4xbf16> to vector<256x4xbf16>
    %c0_4 = arith.constant 0 : index
    %c0_5 = arith.constant 0 : index
    %c0_6 = arith.constant 0 : index
    %6 = vector.load %arg2[%c0_4, %c0_5, %c0_6] : memref<27x4x8xbf16, #tpu.memory_space<vmem>>, vector<1x4x8xbf16>
    %7 = vector.shape_cast %6 : vector<1x4x8xbf16> to vector<4x8xbf16>
    %cst_7 = arith.constant dense<0.000000e+00> : vector<256x8xf32>
    %8 = tpu.matmul %5, %7, %cst_7 {dimension_numbers = #tpu.dot_dimension_numbers<[1], [0], [0], [1], [0, 0, 1, 1], [], []>} : vector<256x4xbf16>, vector<4x8xbf16>, vector<256x8xf32> -> vector<256x8xf32>
    %9 = arith.addf %2, %8 : vector<256x8xf32>
    %10 = vector.extract_strided_slice %3 {offsets = [0, 1, 0, 0], sizes = [4, 8, 8, 4], strides = [1, 1, 1, 1]} : vector<6x10x8x4xbf16> to vector<4x8x8x4xbf16>
    %11 = vector.shape_cast %10 : vector<4x8x8x4xbf16> to vector<256x4xbf16>
    %c3 = arith.constant 3 : index
    %c0_8 = arith.constant 0 : index
    %c0_9 = arith.constant 0 : index
    %12 = vector.load %arg2[%c3, %c0_8, %c0_9] : memref<27x4x8xbf16, #tpu.memory_space<vmem>>, vector<1x4x8xbf16>
    %13 = vector.shape_cast %12 : vector<1x4x8xbf16> to vector<4x8xbf16>
    %cst_10 = arith.constant dense<0.000000e+00> : vector<256x8xf32>
    %14 = tpu.matmul %11, %13, %cst_10 {dimension_numbers = #tpu.dot_dimension_numbers<[1], [0], [0], [1], [0, 0, 1, 1], [], []>} : vector<256x4xbf16>, vector<4x8xbf16>, vector<256x8xf32> -> vector<256x8xf32>
    %15 = arith.addf %9, %14 : vector<256x8xf32>
    %16 = vector.extract_strided_slice %3 {offsets = [0, 2, 0, 0], sizes = [4, 8, 8, 4], strides = [1, 1, 1, 1]} : vector<6x10x8x4xbf16> to vector<4x8x8x4xbf16>
    %17 = vector.shape_cast %16 : vector<4x8x8x4xbf16> to vector<256x4xbf16>
    %c6 = arith.constant 6 : index
    %c0_11 = arith.constant 0 : index
    %c0_12 = arith.constant 0 : index
    %18 = vector.load %arg2[%c6, %c0_11, %c0_12] : memref<27x4x8xbf16, #tpu.memory_space<vmem>>, vector<1x4x8xbf16>
    %19 = vector.shape_cast %18 : vector<1x4x8xbf16> to vector<4x8xbf16>
    %cst_13 = arith.constant dense<0.000000e+00> : vector<256x8xf32>
    %20 = tpu.matmul %17, %19, %cst_13 {dimension_numbers = #tpu.dot_dimension_numbers<[1], [0], [0], [1], [0, 0, 1, 1], [], []>} : vector<256x4xbf16>, vector<4x8xbf16>, vector<256x8xf32> -> vector<256x8xf32>
    %21 = arith.addf %15, %20 : vector<256x8xf32>
    %22 = vector.extract_strided_slice %3 {offsets = [1, 0, 0, 0], sizes = [4, 8, 8, 4], strides = [1, 1, 1, 1]} : vector<6x10x8x4xbf16> to vector<4x8x8x4xbf16>
    %23 = vector.shape_cast %22 : vector<4x8x8x4xbf16> to vector<256x4xbf16>
    %c9 = arith.constant 9 : index
    %c0_14 = arith.constant 0 : index
    %c0_15 = arith.constant 0 : index
    %24 = vector.load %arg2[%c9, %c0_14, %c0_15] : memref<27x4x8xbf16, #tpu.memory_space<vmem>>, vector<1x4x8xbf16>
    %25 = vector.shape_cast %24 : vector<1x4x8xbf16> to vector<4x8xbf16>
    %cst_16 = arith.constant dense<0.000000e+00> : vector<256x8xf32>
    %26 = tpu.matmul %23, %25, %cst_16 {dimension_numbers = #tpu.dot_dimension_numbers<[1], [0], [0], [1], [0, 0, 1, 1], [], []>} : vector<256x4xbf16>, vector<4x8xbf16>, vector<256x8xf32> -> vector<256x8xf32>
    %27 = arith.addf %21, %26 : vector<256x8xf32>
    %28 = vector.extract_strided_slice %3 {offsets = [1, 1, 0, 0], sizes = [4, 8, 8, 4], strides = [1, 1, 1, 1]} : vector<6x10x8x4xbf16> to vector<4x8x8x4xbf16>
    %29 = vector.shape_cast %28 : vector<4x8x8x4xbf16> to vector<256x4xbf16>
    %c12 = arith.constant 12 : index
    %c0_17 = arith.constant 0 : index
    %c0_18 = arith.constant 0 : index
    %30 = vector.load %arg2[%c12, %c0_17, %c0_18] : memref<27x4x8xbf16, #tpu.memory_space<vmem>>, vector<1x4x8xbf16>
    %31 = vector.shape_cast %30 : vector<1x4x8xbf16> to vector<4x8xbf16>
    %cst_19 = arith.constant dense<0.000000e+00> : vector<256x8xf32>
    %32 = tpu.matmul %29, %31, %cst_19 {dimension_numbers = #tpu.dot_dimension_numbers<[1], [0], [0], [1], [0, 0, 1, 1], [], []>} : vector<256x4xbf16>, vector<4x8xbf16>, vector<256x8xf32> -> vector<256x8xf32>
    %33 = arith.addf %27, %32 : vector<256x8xf32>
    %34 = vector.extract_strided_slice %3 {offsets = [1, 2, 0, 0], sizes = [4, 8, 8, 4], strides = [1, 1, 1, 1]} : vector<6x10x8x4xbf16> to vector<4x8x8x4xbf16>
    %35 = vector.shape_cast %34 : vector<4x8x8x4xbf16> to vector<256x4xbf16>
    %c15 = arith.constant 15 : index
    %c0_20 = arith.constant 0 : index
    %c0_21 = arith.constant 0 : index
    %36 = vector.load %arg2[%c15, %c0_20, %c0_21] : memref<27x4x8xbf16, #tpu.memory_space<vmem>>, vector<1x4x8xbf16>
    %37 = vector.shape_cast %36 : vector<1x4x8xbf16> to vector<4x8xbf16>
    %cst_22 = arith.constant dense<0.000000e+00> : vector<256x8xf32>
    %38 = tpu.matmul %35, %37, %cst_22 {dimension_numbers = #tpu.dot_dimension_numbers<[1], [0], [0], [1], [0, 0, 1, 1], [], []>} : vector<256x4xbf16>, vector<4x8xbf16>, vector<256x8xf32> -> vector<256x8xf32>
    %39 = arith.addf %33, %38 : vector<256x8xf32>
    %40 = vector.extract_strided_slice %3 {offsets = [2, 0, 0, 0], sizes = [4, 8, 8, 4], strides = [1, 1, 1, 1]} : vector<6x10x8x4xbf16> to vector<4x8x8x4xbf16>
    %41 = vector.shape_cast %40 : vector<4x8x8x4xbf16> to vector<256x4xbf16>
    %c18 = arith.constant 18 : index
    %c0_23 = arith.constant 0 : index
    %c0_24 = arith.constant 0 : index
    %42 = vector.load %arg2[%c18, %c0_23, %c0_24] : memref<27x4x8xbf16, #tpu.memory_space<vmem>>, vector<1x4x8xbf16>
    %43 = vector.shape_cast %42 : vector<1x4x8xbf16> to vector<4x8xbf16>
    %cst_25 = arith.constant dense<0.000000e+00> : vector<256x8xf32>
    %44 = tpu.matmul %41, %43, %cst_25 {dimension_numbers = #tpu.dot_dimension_numbers<[1], [0], [0], [1], [0, 0, 1, 1], [], []>} : vector<256x4xbf16>, vector<4x8xbf16>, vector<256x8xf32> -> vector<256x8xf32>
    %45 = arith.addf %39, %44 : vector<256x8xf32>
    %46 = vector.extract_strided_slice %3 {offsets = [2, 1, 0, 0], sizes = [4, 8, 8, 4], strides = [1, 1, 1, 1]} : vector<6x10x8x4xbf16> to vector<4x8x8x4xbf16>
    %47 = vector.shape_cast %46 : vector<4x8x8x4xbf16> to vector<256x4xbf16>
    %c21 = arith.constant 21 : index
    %c0_26 = arith.constant 0 : index
    %c0_27 = arith.constant 0 : index
    %48 = vector.load %arg2[%c21, %c0_26, %c0_27] : memref<27x4x8xbf16, #tpu.memory_space<vmem>>, vector<1x4x8xbf16>
    %49 = vector.shape_cast %48 : vector<1x4x8xbf16> to vector<4x8xbf16>
    %cst_28 = arith.constant dense<0.000000e+00> : vector<256x8xf32>
    %50 = tpu.matmul %47, %49, %cst_28 {dimension_numbers = #tpu.dot_dimension_numbers<[1], [0], [0], [1], [0, 0, 1, 1], [], []>} : vector<256x4xbf16>, vector<4x8xbf16>, vector<256x8xf32> -> vector<256x8xf32>
    %51 = arith.addf %45, %50 : vector<256x8xf32>
    %52 = vector.extract_strided_slice %3 {offsets = [2, 2, 0, 0], sizes = [4, 8, 8, 4], strides = [1, 1, 1, 1]} : vector<6x10x8x4xbf16> to vector<4x8x8x4xbf16>
    %53 = vector.shape_cast %52 : vector<4x8x8x4xbf16> to vector<256x4xbf16>
    %c24 = arith.constant 24 : index
    %c0_29 = arith.constant 0 : index
    %c0_30 = arith.constant 0 : index
    %54 = vector.load %arg2[%c24, %c0_29, %c0_30] : memref<27x4x8xbf16, #tpu.memory_space<vmem>>, vector<1x4x8xbf16>
    %55 = vector.shape_cast %54 : vector<1x4x8xbf16> to vector<4x8xbf16>
    %cst_31 = arith.constant dense<0.000000e+00> : vector<256x8xf32>
    %56 = tpu.matmul %53, %55, %cst_31 {dimension_numbers = #tpu.dot_dimension_numbers<[1], [0], [0], [1], [0, 0, 1, 1], [], []>} : vector<256x4xbf16>, vector<4x8xbf16>, vector<256x8xf32> -> vector<256x8xf32>
    %57 = arith.addf %51, %56 : vector<256x8xf32>
    %58 = vector.extract_strided_slice %1 {offsets = [0, 0, 1, 0], sizes = [6, 10, 8, 4], strides = [1, 1, 1, 1]} : vector<6x10x10x4xbf16> to vector<6x10x8x4xbf16>
    %59 = vector.extract_strided_slice %58 {offsets = [0, 0, 0, 0], sizes = [4, 8, 8, 4], strides = [1, 1, 1, 1]} : vector<6x10x8x4xbf16> to vector<4x8x8x4xbf16>
    %60 = vector.shape_cast %59 : vector<4x8x8x4xbf16> to vector<256x4xbf16>
    %c1 = arith.constant 1 : index
    %c0_32 = arith.constant 0 : index
    %c0_33 = arith.constant 0 : index
    %61 = vector.load %arg2[%c1, %c0_32, %c0_33] : memref<27x4x8xbf16, #tpu.memory_space<vmem>>, vector<1x4x8xbf16>
    %62 = vector.shape_cast %61 : vector<1x4x8xbf16> to vector<4x8xbf16>
    %cst_34 = arith.constant dense<0.000000e+00> : vector<256x8xf32>
    %63 = tpu.matmul %60, %62, %cst_34 {dimension_numbers = #tpu.dot_dimension_numbers<[1], [0], [0], [1], [0, 0, 1, 1], [], []>} : vector<256x4xbf16>, vector<4x8xbf16>, vector<256x8xf32> -> vector<256x8xf32>
    %64 = arith.addf %57, %63 : vector<256x8xf32>
    %65 = vector.extract_strided_slice %58 {offsets = [0, 1, 0, 0], sizes = [4, 8, 8, 4], strides = [1, 1, 1, 1]} : vector<6x10x8x4xbf16> to vector<4x8x8x4xbf16>
    %66 = vector.shape_cast %65 : vector<4x8x8x4xbf16> to vector<256x4xbf16>
    %c4 = arith.constant 4 : index
    %c0_35 = arith.constant 0 : index
    %c0_36 = arith.constant 0 : index
    %67 = vector.load %arg2[%c4, %c0_35, %c0_36] : memref<27x4x8xbf16, #tpu.memory_space<vmem>>, vector<1x4x8xbf16>
    %68 = vector.shape_cast %67 : vector<1x4x8xbf16> to vector<4x8xbf16>
    %cst_37 = arith.constant dense<0.000000e+00> : vector<256x8xf32>
    %69 = tpu.matmul %66, %68, %cst_37 {dimension_numbers = #tpu.dot_dimension_numbers<[1], [0], [0], [1], [0, 0, 1, 1], [], []>} : vector<256x4xbf16>, vector<4x8xbf16>, vector<256x8xf32> -> vector<256x8xf32>
    %70 = arith.addf %64, %69 : vector<256x8xf32>
    %71 = vector.extract_strided_slice %58 {offsets = [0, 2, 0, 0], sizes = [4, 8, 8, 4], strides = [1, 1, 1, 1]} : vector<6x10x8x4xbf16> to vector<4x8x8x4xbf16>
    %72 = vector.shape_cast %71 : vector<4x8x8x4xbf16> to vector<256x4xbf16>
    %c7 = arith.constant 7 : index
    %c0_38 = arith.constant 0 : index
    %c0_39 = arith.constant 0 : index
    %73 = vector.load %arg2[%c7, %c0_38, %c0_39] : memref<27x4x8xbf16, #tpu.memory_space<vmem>>, vector<1x4x8xbf16>
    %74 = vector.shape_cast %73 : vector<1x4x8xbf16> to vector<4x8xbf16>
    %cst_40 = arith.constant dense<0.000000e+00> : vector<256x8xf32>
    %75 = tpu.matmul %72, %74, %cst_40 {dimension_numbers = #tpu.dot_dimension_numbers<[1], [0], [0], [1], [0, 0, 1, 1], [], []>} : vector<256x4xbf16>, vector<4x8xbf16>, vector<256x8xf32> -> vector<256x8xf32>
    %76 = arith.addf %70, %75 : vector<256x8xf32>
    %77 = vector.extract_strided_slice %58 {offsets = [1, 0, 0, 0], sizes = [4, 8, 8, 4], strides = [1, 1, 1, 1]} : vector<6x10x8x4xbf16> to vector<4x8x8x4xbf16>
    %78 = vector.shape_cast %77 : vector<4x8x8x4xbf16> to vector<256x4xbf16>
    %c10 = arith.constant 10 : index
    %c0_41 = arith.constant 0 : index
    %c0_42 = arith.constant 0 : index
    %79 = vector.load %arg2[%c10, %c0_41, %c0_42] : memref<27x4x8xbf16, #tpu.memory_space<vmem>>, vector<1x4x8xbf16>
    %80 = vector.shape_cast %79 : vector<1x4x8xbf16> to vector<4x8xbf16>
    %cst_43 = arith.constant dense<0.000000e+00> : vector<256x8xf32>
    %81 = tpu.matmul %78, %80, %cst_43 {dimension_numbers = #tpu.dot_dimension_numbers<[1], [0], [0], [1], [0, 0, 1, 1], [], []>} : vector<256x4xbf16>, vector<4x8xbf16>, vector<256x8xf32> -> vector<256x8xf32>
    %82 = arith.addf %76, %81 : vector<256x8xf32>
    %83 = vector.extract_strided_slice %58 {offsets = [1, 1, 0, 0], sizes = [4, 8, 8, 4], strides = [1, 1, 1, 1]} : vector<6x10x8x4xbf16> to vector<4x8x8x4xbf16>
    %84 = vector.shape_cast %83 : vector<4x8x8x4xbf16> to vector<256x4xbf16>
    %c13 = arith.constant 13 : index
    %c0_44 = arith.constant 0 : index
    %c0_45 = arith.constant 0 : index
    %85 = vector.load %arg2[%c13, %c0_44, %c0_45] : memref<27x4x8xbf16, #tpu.memory_space<vmem>>, vector<1x4x8xbf16>
    %86 = vector.shape_cast %85 : vector<1x4x8xbf16> to vector<4x8xbf16>
    %cst_46 = arith.constant dense<0.000000e+00> : vector<256x8xf32>
    %87 = tpu.matmul %84, %86, %cst_46 {dimension_numbers = #tpu.dot_dimension_numbers<[1], [0], [0], [1], [0, 0, 1, 1], [], []>} : vector<256x4xbf16>, vector<4x8xbf16>, vector<256x8xf32> -> vector<256x8xf32>
    %88 = arith.addf %82, %87 : vector<256x8xf32>
    %89 = vector.extract_strided_slice %58 {offsets = [1, 2, 0, 0], sizes = [4, 8, 8, 4], strides = [1, 1, 1, 1]} : vector<6x10x8x4xbf16> to vector<4x8x8x4xbf16>
    %90 = vector.shape_cast %89 : vector<4x8x8x4xbf16> to vector<256x4xbf16>
    %c16 = arith.constant 16 : index
    %c0_47 = arith.constant 0 : index
    %c0_48 = arith.constant 0 : index
    %91 = vector.load %arg2[%c16, %c0_47, %c0_48] : memref<27x4x8xbf16, #tpu.memory_space<vmem>>, vector<1x4x8xbf16>
    %92 = vector.shape_cast %91 : vector<1x4x8xbf16> to vector<4x8xbf16>
    %cst_49 = arith.constant dense<0.000000e+00> : vector<256x8xf32>
    %93 = tpu.matmul %90, %92, %cst_49 {dimension_numbers = #tpu.dot_dimension_numbers<[1], [0], [0], [1], [0, 0, 1, 1], [], []>} : vector<256x4xbf16>, vector<4x8xbf16>, vector<256x8xf32> -> vector<256x8xf32>
    %94 = arith.addf %88, %93 : vector<256x8xf32>
    %95 = vector.extract_strided_slice %58 {offsets = [2, 0, 0, 0], sizes = [4, 8, 8, 4], strides = [1, 1, 1, 1]} : vector<6x10x8x4xbf16> to vector<4x8x8x4xbf16>
    %96 = vector.shape_cast %95 : vector<4x8x8x4xbf16> to vector<256x4xbf16>
    %c19 = arith.constant 19 : index
    %c0_50 = arith.constant 0 : index
    %c0_51 = arith.constant 0 : index
    %97 = vector.load %arg2[%c19, %c0_50, %c0_51] : memref<27x4x8xbf16, #tpu.memory_space<vmem>>, vector<1x4x8xbf16>
    %98 = vector.shape_cast %97 : vector<1x4x8xbf16> to vector<4x8xbf16>
    %cst_52 = arith.constant dense<0.000000e+00> : vector<256x8xf32>
    %99 = tpu.matmul %96, %98, %cst_52 {dimension_numbers = #tpu.dot_dimension_numbers<[1], [0], [0], [1], [0, 0, 1, 1], [], []>} : vector<256x4xbf16>, vector<4x8xbf16>, vector<256x8xf32> -> vector<256x8xf32>
    %100 = arith.addf %94, %99 : vector<256x8xf32>
    %101 = vector.extract_strided_slice %58 {offsets = [2, 1, 0, 0], sizes = [4, 8, 8, 4], strides = [1, 1, 1, 1]} : vector<6x10x8x4xbf16> to vector<4x8x8x4xbf16>
    %102 = vector.shape_cast %101 : vector<4x8x8x4xbf16> to vector<256x4xbf16>
    %c22 = arith.constant 22 : index
    %c0_53 = arith.constant 0 : index
    %c0_54 = arith.constant 0 : index
    %103 = vector.load %arg2[%c22, %c0_53, %c0_54] : memref<27x4x8xbf16, #tpu.memory_space<vmem>>, vector<1x4x8xbf16>
    %104 = vector.shape_cast %103 : vector<1x4x8xbf16> to vector<4x8xbf16>
    %cst_55 = arith.constant dense<0.000000e+00> : vector<256x8xf32>
    %105 = tpu.matmul %102, %104, %cst_55 {dimension_numbers = #tpu.dot_dimension_numbers<[1], [0], [0], [1], [0, 0, 1, 1], [], []>} : vector<256x4xbf16>, vector<4x8xbf16>, vector<256x8xf32> -> vector<256x8xf32>
    %106 = arith.addf %100, %105 : vector<256x8xf32>
    %107 = vector.extract_strided_slice %58 {offsets = [2, 2, 0, 0], sizes = [4, 8, 8, 4], strides = [1, 1, 1, 1]} : vector<6x10x8x4xbf16> to vector<4x8x8x4xbf16>
    %108 = vector.shape_cast %107 : vector<4x8x8x4xbf16> to vector<256x4xbf16>
    %c25 = arith.constant 25 : index
    %c0_56 = arith.constant 0 : index
    %c0_57 = arith.constant 0 : index
    %109 = vector.load %arg2[%c25, %c0_56, %c0_57] : memref<27x4x8xbf16, #tpu.memory_space<vmem>>, vector<1x4x8xbf16>
    %110 = vector.shape_cast %109 : vector<1x4x8xbf16> to vector<4x8xbf16>
    %cst_58 = arith.constant dense<0.000000e+00> : vector<256x8xf32>
    %111 = tpu.matmul %108, %110, %cst_58 {dimension_numbers = #tpu.dot_dimension_numbers<[1], [0], [0], [1], [0, 0, 1, 1], [], []>} : vector<256x4xbf16>, vector<4x8xbf16>, vector<256x8xf32> -> vector<256x8xf32>
    %112 = arith.addf %106, %111 : vector<256x8xf32>
    %113 = vector.extract_strided_slice %1 {offsets = [0, 0, 2, 0], sizes = [6, 10, 8, 4], strides = [1, 1, 1, 1]} : vector<6x10x10x4xbf16> to vector<6x10x8x4xbf16>
    %114 = vector.extract_strided_slice %113 {offsets = [0, 0, 0, 0], sizes = [4, 8, 8, 4], strides = [1, 1, 1, 1]} : vector<6x10x8x4xbf16> to vector<4x8x8x4xbf16>
    %115 = vector.shape_cast %114 : vector<4x8x8x4xbf16> to vector<256x4xbf16>
    %c2 = arith.constant 2 : index
    %c0_59 = arith.constant 0 : index
    %c0_60 = arith.constant 0 : index
    %116 = vector.load %arg2[%c2, %c0_59, %c0_60] : memref<27x4x8xbf16, #tpu.memory_space<vmem>>, vector<1x4x8xbf16>
    %117 = vector.shape_cast %116 : vector<1x4x8xbf16> to vector<4x8xbf16>
    %cst_61 = arith.constant dense<0.000000e+00> : vector<256x8xf32>
    %118 = tpu.matmul %115, %117, %cst_61 {dimension_numbers = #tpu.dot_dimension_numbers<[1], [0], [0], [1], [0, 0, 1, 1], [], []>} : vector<256x4xbf16>, vector<4x8xbf16>, vector<256x8xf32> -> vector<256x8xf32>
    %119 = arith.addf %112, %118 : vector<256x8xf32>
    %120 = vector.extract_strided_slice %113 {offsets = [0, 1, 0, 0], sizes = [4, 8, 8, 4], strides = [1, 1, 1, 1]} : vector<6x10x8x4xbf16> to vector<4x8x8x4xbf16>
    %121 = vector.shape_cast %120 : vector<4x8x8x4xbf16> to vector<256x4xbf16>
    %c5 = arith.constant 5 : index
    %c0_62 = arith.constant 0 : index
    %c0_63 = arith.constant 0 : index
    %122 = vector.load %arg2[%c5, %c0_62, %c0_63] : memref<27x4x8xbf16, #tpu.memory_space<vmem>>, vector<1x4x8xbf16>
    %123 = vector.shape_cast %122 : vector<1x4x8xbf16> to vector<4x8xbf16>
    %cst_64 = arith.constant dense<0.000000e+00> : vector<256x8xf32>
    %124 = tpu.matmul %121, %123, %cst_64 {dimension_numbers = #tpu.dot_dimension_numbers<[1], [0], [0], [1], [0, 0, 1, 1], [], []>} : vector<256x4xbf16>, vector<4x8xbf16>, vector<256x8xf32> -> vector<256x8xf32>
    %125 = arith.addf %119, %124 : vector<256x8xf32>
    %126 = vector.extract_strided_slice %113 {offsets = [0, 2, 0, 0], sizes = [4, 8, 8, 4], strides = [1, 1, 1, 1]} : vector<6x10x8x4xbf16> to vector<4x8x8x4xbf16>
    %127 = vector.shape_cast %126 : vector<4x8x8x4xbf16> to vector<256x4xbf16>
    %c8 = arith.constant 8 : index
    %c0_65 = arith.constant 0 : index
    %c0_66 = arith.constant 0 : index
    %128 = vector.load %arg2[%c8, %c0_65, %c0_66] : memref<27x4x8xbf16, #tpu.memory_space<vmem>>, vector<1x4x8xbf16>
    %129 = vector.shape_cast %128 : vector<1x4x8xbf16> to vector<4x8xbf16>
    %cst_67 = arith.constant dense<0.000000e+00> : vector<256x8xf32>
    %130 = tpu.matmul %127, %129, %cst_67 {dimension_numbers = #tpu.dot_dimension_numbers<[1], [0], [0], [1], [0, 0, 1, 1], [], []>} : vector<256x4xbf16>, vector<4x8xbf16>, vector<256x8xf32> -> vector<256x8xf32>
    %131 = arith.addf %125, %130 : vector<256x8xf32>
    %132 = vector.extract_strided_slice %113 {offsets = [1, 0, 0, 0], sizes = [4, 8, 8, 4], strides = [1, 1, 1, 1]} : vector<6x10x8x4xbf16> to vector<4x8x8x4xbf16>
    %133 = vector.shape_cast %132 : vector<4x8x8x4xbf16> to vector<256x4xbf16>
    %c11 = arith.constant 11 : index
    %c0_68 = arith.constant 0 : index
    %c0_69 = arith.constant 0 : index
    %134 = vector.load %arg2[%c11, %c0_68, %c0_69] : memref<27x4x8xbf16, #tpu.memory_space<vmem>>, vector<1x4x8xbf16>
    %135 = vector.shape_cast %134 : vector<1x4x8xbf16> to vector<4x8xbf16>
    %cst_70 = arith.constant dense<0.000000e+00> : vector<256x8xf32>
    %136 = tpu.matmul %133, %135, %cst_70 {dimension_numbers = #tpu.dot_dimension_numbers<[1], [0], [0], [1], [0, 0, 1, 1], [], []>} : vector<256x4xbf16>, vector<4x8xbf16>, vector<256x8xf32> -> vector<256x8xf32>
    %137 = arith.addf %131, %136 : vector<256x8xf32>
    %138 = vector.extract_strided_slice %113 {offsets = [1, 1, 0, 0], sizes = [4, 8, 8, 4], strides = [1, 1, 1, 1]} : vector<6x10x8x4xbf16> to vector<4x8x8x4xbf16>
    %139 = vector.shape_cast %138 : vector<4x8x8x4xbf16> to vector<256x4xbf16>
    %c14 = arith.constant 14 : index
    %c0_71 = arith.constant 0 : index
    %c0_72 = arith.constant 0 : index
    %140 = vector.load %arg2[%c14, %c0_71, %c0_72] : memref<27x4x8xbf16, #tpu.memory_space<vmem>>, vector<1x4x8xbf16>
    %141 = vector.shape_cast %140 : vector<1x4x8xbf16> to vector<4x8xbf16>
    %cst_73 = arith.constant dense<0.000000e+00> : vector<256x8xf32>
    %142 = tpu.matmul %139, %141, %cst_73 {dimension_numbers = #tpu.dot_dimension_numbers<[1], [0], [0], [1], [0, 0, 1, 1], [], []>} : vector<256x4xbf16>, vector<4x8xbf16>, vector<256x8xf32> -> vector<256x8xf32>
    %143 = arith.addf %137, %142 : vector<256x8xf32>
    %144 = vector.extract_strided_slice %113 {offsets = [1, 2, 0, 0], sizes = [4, 8, 8, 4], strides = [1, 1, 1, 1]} : vector<6x10x8x4xbf16> to vector<4x8x8x4xbf16>
    %145 = vector.shape_cast %144 : vector<4x8x8x4xbf16> to vector<256x4xbf16>
    %c17 = arith.constant 17 : index
    %c0_74 = arith.constant 0 : index
    %c0_75 = arith.constant 0 : index
    %146 = vector.load %arg2[%c17, %c0_74, %c0_75] : memref<27x4x8xbf16, #tpu.memory_space<vmem>>, vector<1x4x8xbf16>
    %147 = vector.shape_cast %146 : vector<1x4x8xbf16> to vector<4x8xbf16>
    %cst_76 = arith.constant dense<0.000000e+00> : vector<256x8xf32>
    %148 = tpu.matmul %145, %147, %cst_76 {dimension_numbers = #tpu.dot_dimension_numbers<[1], [0], [0], [1], [0, 0, 1, 1], [], []>} : vector<256x4xbf16>, vector<4x8xbf16>, vector<256x8xf32> -> vector<256x8xf32>
    %149 = arith.addf %143, %148 : vector<256x8xf32>
    %150 = vector.extract_strided_slice %113 {offsets = [2, 0, 0, 0], sizes = [4, 8, 8, 4], strides = [1, 1, 1, 1]} : vector<6x10x8x4xbf16> to vector<4x8x8x4xbf16>
    %151 = vector.shape_cast %150 : vector<4x8x8x4xbf16> to vector<256x4xbf16>
    %c20 = arith.constant 20 : index
    %c0_77 = arith.constant 0 : index
    %c0_78 = arith.constant 0 : index
    %152 = vector.load %arg2[%c20, %c0_77, %c0_78] : memref<27x4x8xbf16, #tpu.memory_space<vmem>>, vector<1x4x8xbf16>
    %153 = vector.shape_cast %152 : vector<1x4x8xbf16> to vector<4x8xbf16>
    %cst_79 = arith.constant dense<0.000000e+00> : vector<256x8xf32>
    %154 = tpu.matmul %151, %153, %cst_79 {dimension_numbers = #tpu.dot_dimension_numbers<[1], [0], [0], [1], [0, 0, 1, 1], [], []>} : vector<256x4xbf16>, vector<4x8xbf16>, vector<256x8xf32> -> vector<256x8xf32>
    %155 = arith.addf %149, %154 : vector<256x8xf32>
    %156 = vector.extract_strided_slice %113 {offsets = [2, 1, 0, 0], sizes = [4, 8, 8, 4], strides = [1, 1, 1, 1]} : vector<6x10x8x4xbf16> to vector<4x8x8x4xbf16>
    %157 = vector.shape_cast %156 : vector<4x8x8x4xbf16> to vector<256x4xbf16>
    %c23 = arith.constant 23 : index
    %c0_80 = arith.constant 0 : index
    %c0_81 = arith.constant 0 : index
    %158 = vector.load %arg2[%c23, %c0_80, %c0_81] : memref<27x4x8xbf16, #tpu.memory_space<vmem>>, vector<1x4x8xbf16>
    %159 = vector.shape_cast %158 : vector<1x4x8xbf16> to vector<4x8xbf16>
    %cst_82 = arith.constant dense<0.000000e+00> : vector<256x8xf32>
    %160 = tpu.matmul %157, %159, %cst_82 {dimension_numbers = #tpu.dot_dimension_numbers<[1], [0], [0], [1], [0, 0, 1, 1], [], []>} : vector<256x4xbf16>, vector<4x8xbf16>, vector<256x8xf32> -> vector<256x8xf32>
    %161 = arith.addf %155, %160 : vector<256x8xf32>
    %162 = vector.extract_strided_slice %113 {offsets = [2, 2, 0, 0], sizes = [4, 8, 8, 4], strides = [1, 1, 1, 1]} : vector<6x10x8x4xbf16> to vector<4x8x8x4xbf16>
    %163 = vector.shape_cast %162 : vector<4x8x8x4xbf16> to vector<256x4xbf16>
    %c26 = arith.constant 26 : index
    %c0_83 = arith.constant 0 : index
    %c0_84 = arith.constant 0 : index
    %164 = vector.load %arg2[%c26, %c0_83, %c0_84] : memref<27x4x8xbf16, #tpu.memory_space<vmem>>, vector<1x4x8xbf16>
    %165 = vector.shape_cast %164 : vector<1x4x8xbf16> to vector<4x8xbf16>
    %cst_85 = arith.constant dense<0.000000e+00> : vector<256x8xf32>
    %166 = tpu.matmul %163, %165, %cst_85 {dimension_numbers = #tpu.dot_dimension_numbers<[1], [0], [0], [1], [0, 0, 1, 1], [], []>} : vector<256x4xbf16>, vector<4x8xbf16>, vector<256x8xf32> -> vector<256x8xf32>
    %167 = arith.addf %161, %166 : vector<256x8xf32>
    %c0_86 = arith.constant 0 : index
    %c0_87 = arith.constant 0 : index
    %168 = vector.load %arg3[%c0_86, %c0_87] : memref<1x8xf32, #tpu.memory_space<vmem>>, vector<1x8xf32>
    %169 = vector.broadcast %168 : vector<1x8xf32> to vector<256x8xf32>
    %170 = arith.mulf %167, %169 : vector<256x8xf32>
    %c0_88 = arith.constant 0 : index
    %c0_89 = arith.constant 0 : index
    %171 = vector.load %arg4[%c0_88, %c0_89] : memref<1x8xf32, #tpu.memory_space<vmem>>, vector<1x8xf32>
    %172 = vector.broadcast %171 : vector<1x8xf32> to vector<256x8xf32>
    %173 = arith.addf %170, %172 : vector<256x8xf32>
    %cst_90 = arith.constant 0.000000e+00 : f32
    %174 = vector.broadcast %cst_90 : f32 to vector<256x8xf32>
    %175 = arith.maximumf %173, %174 : vector<256x8xf32>
    %176 = vector.shape_cast %175 : vector<256x8xf32> to vector<4x8x8x8xf32>
    %177 = arith.truncf %176 : vector<4x8x8x8xf32> to vector<4x8x8x8xbf16>
    %c0_91 = arith.constant 0 : index
    %c0_92 = arith.constant 0 : index
    %c0_93 = arith.constant 0 : index
    %c0_94 = arith.constant 0 : index
    %c0_95 = arith.constant 0 : index
    %178 = vector.load %arg5[%c0_91, %c0_92, %c0_93, %c0_94, %c0_95] : memref<1x4x8x8x8xbf16, #tpu.memory_space<vmem>>, vector<1x4x8x8x8xbf16>
    %179 = vector.shape_cast %178 : vector<1x4x8x8x8xbf16> to vector<4x8x8x8xbf16>
    %180 = vector.shape_cast %177 : vector<4x8x8x8xbf16> to vector<1x4x8x8x8xbf16>
    tpu.vector_store %arg5[%c0_91, %c0_92, %c0_93, %c0_94, %c0_95], %180 {strides = array<i32>} : memref<1x4x8x8x8xbf16, #tpu.memory_space<vmem>>, vector<1x4x8x8x8xbf16>,
    return
  }
  func.func @transform_0(%arg0: i32) -> (i32, i32, i32, i32, i32) {
    %c0_i32 = arith.constant 0 : i32
    %c0_i32_0 = arith.constant 0 : i32
    %c0_i32_1 = arith.constant 0 : i32
    %c0_i32_2 = arith.constant 0 : i32
    %c0_i32_3 = arith.constant 0 : i32
    return %arg0, %c0_i32, %c0_i32_0, %c0_i32_1, %c0_i32_2 : i32, i32, i32, i32, i32
  }
  func.func @transform_1(%arg0: i32) -> (i32, i32, i32) {
    %c0_i32 = arith.constant 0 : i32
    %c0_i32_0 = arith.constant 0 : i32
    %c0_i32_1 = arith.constant 0 : i32
    %c0_i32_2 = arith.constant 0 : i32
    return %c0_i32, %c0_i32_0, %c0_i32_1 : i32, i32, i32
  }
  func.func @transform_2(%arg0: i32) -> (i32, i32) {
    %c0_i32 = arith.constant 0 : i32
    %c0_i32_0 = arith.constant 0 : i32
    %c0_i32_1 = arith.constant 0 : i32
    return %c0_i32, %c0_i32_0 : i32, i32
  }
  func.func @transform_3(%arg0: i32) -> (i32, i32) {
    %c0_i32 = arith.constant 0 : i32
    %c0_i32_0 = arith.constant 0 : i32
    %c0_i32_1 = arith.constant 0 : i32
    return %c0_i32, %c0_i32_0 : i32, i32
  }
  func.func @transform_4(%arg0: i32) -> (i32, i32, i32, i32, i32) {
    %c0_i32 = arith.constant 0 : i32
    %c0_i32_0 = arith.constant 0 : i32
    %c0_i32_1 = arith.constant 0 : i32
    %c0_i32_2 = arith.constant 0 : i32
    %c0_i32_3 = arith.constant 0 : i32
    return %arg0, %c0_i32, %c0_i32_0, %c0_i32_1, %c0_i32_2 : i32, i32, i32, i32, i32
  }
}

module attributes {stable_mosaic.version = 11 : i64} {
  func.func @_maxpool_conv1x1_bn_relu_kernel(%arg0: i32, %arg1: memref<1x6x10x10x4xbf16, #tpu.memory_space<vmem>>, %arg2: memref<4x4xbf16, #tpu.memory_space<vmem>>, %arg3: memref<1x4xf32, #tpu.memory_space<vmem>>, %arg4: memref<1x4xf32, #tpu.memory_space<vmem>>, %arg5: memref<1x4x8x8x4xbf16, #tpu.memory_space<vmem>>) attributes {dimension_semantics = [#tpu.dimension_semantics<parallel>], iteration_bounds = array<i64: 2>, scalar_prefetch = 0 : i64, scratch_operands = 0 : i64, tpu.core_type = #tpu.core_type<tc>, window_params = [{transform_indices = @transform_0, window_bounds = array<i64: 1, 6, 10, 10, 4>}, {pipeline_mode = #tpu.pipeline_mode<synchronous>, transform_indices = @transform_1, window_bounds = array<i64: 4, 4>}, {pipeline_mode = #tpu.pipeline_mode<synchronous>, transform_indices = @transform_2, window_bounds = array<i64: 1, 4>}, {pipeline_mode = #tpu.pipeline_mode<synchronous>, transform_indices = @transform_3, window_bounds = array<i64: 1, 4>}, {transform_indices = @transform_4, window_bounds = array<i64: 1, 4, 8, 8, 4>}]} {
    %c0 = arith.constant 0 : index
    %c0_0 = arith.constant 0 : index
    %c0_1 = arith.constant 0 : index
    %c0_2 = arith.constant 0 : index
    %c0_3 = arith.constant 0 : index
    %0 = vector.load %arg1[%c0, %c0_0, %c0_1, %c0_2, %c0_3] : memref<1x6x10x10x4xbf16, #tpu.memory_space<vmem>>, vector<1x6x10x10x4xbf16>
    %1 = vector.shape_cast %0 : vector<1x6x10x10x4xbf16> to vector<6x10x10x4xbf16>
    %2 = vector.extract_strided_slice %1 {offsets = [0, 0, 0, 0], sizes = [6, 10, 8, 4], strides = [1, 1, 1, 1]} : vector<6x10x10x4xbf16> to vector<6x10x8x4xbf16>
    %3 = vector.extract_strided_slice %2 {offsets = [0, 0, 0, 0], sizes = [4, 8, 8, 4], strides = [1, 1, 1, 1]} : vector<6x10x8x4xbf16> to vector<4x8x8x4xbf16>
    %4 = vector.extract_strided_slice %2 {offsets = [0, 1, 0, 0], sizes = [4, 8, 8, 4], strides = [1, 1, 1, 1]} : vector<6x10x8x4xbf16> to vector<4x8x8x4xbf16>
    %5 = arith.maximumf %3, %4 : vector<4x8x8x4xbf16>
    %6 = vector.extract_strided_slice %2 {offsets = [0, 2, 0, 0], sizes = [4, 8, 8, 4], strides = [1, 1, 1, 1]} : vector<6x10x8x4xbf16> to vector<4x8x8x4xbf16>
    %7 = arith.maximumf %5, %6 : vector<4x8x8x4xbf16>
    %8 = vector.extract_strided_slice %2 {offsets = [1, 0, 0, 0], sizes = [4, 8, 8, 4], strides = [1, 1, 1, 1]} : vector<6x10x8x4xbf16> to vector<4x8x8x4xbf16>
    %9 = arith.maximumf %7, %8 : vector<4x8x8x4xbf16>
    %10 = vector.extract_strided_slice %2 {offsets = [1, 1, 0, 0], sizes = [4, 8, 8, 4], strides = [1, 1, 1, 1]} : vector<6x10x8x4xbf16> to vector<4x8x8x4xbf16>
    %11 = arith.maximumf %9, %10 : vector<4x8x8x4xbf16>
    %12 = vector.extract_strided_slice %2 {offsets = [1, 2, 0, 0], sizes = [4, 8, 8, 4], strides = [1, 1, 1, 1]} : vector<6x10x8x4xbf16> to vector<4x8x8x4xbf16>
    %13 = arith.maximumf %11, %12 : vector<4x8x8x4xbf16>
    %14 = vector.extract_strided_slice %2 {offsets = [2, 0, 0, 0], sizes = [4, 8, 8, 4], strides = [1, 1, 1, 1]} : vector<6x10x8x4xbf16> to vector<4x8x8x4xbf16>
    %15 = arith.maximumf %13, %14 : vector<4x8x8x4xbf16>
    %16 = vector.extract_strided_slice %2 {offsets = [2, 1, 0, 0], sizes = [4, 8, 8, 4], strides = [1, 1, 1, 1]} : vector<6x10x8x4xbf16> to vector<4x8x8x4xbf16>
    %17 = arith.maximumf %15, %16 : vector<4x8x8x4xbf16>
    %18 = vector.extract_strided_slice %2 {offsets = [2, 2, 0, 0], sizes = [4, 8, 8, 4], strides = [1, 1, 1, 1]} : vector<6x10x8x4xbf16> to vector<4x8x8x4xbf16>
    %19 = arith.maximumf %17, %18 : vector<4x8x8x4xbf16>
    %20 = vector.extract_strided_slice %1 {offsets = [0, 0, 1, 0], sizes = [6, 10, 8, 4], strides = [1, 1, 1, 1]} : vector<6x10x10x4xbf16> to vector<6x10x8x4xbf16>
    %21 = vector.extract_strided_slice %20 {offsets = [0, 0, 0, 0], sizes = [4, 8, 8, 4], strides = [1, 1, 1, 1]} : vector<6x10x8x4xbf16> to vector<4x8x8x4xbf16>
    %22 = arith.maximumf %19, %21 : vector<4x8x8x4xbf16>
    %23 = vector.extract_strided_slice %20 {offsets = [0, 1, 0, 0], sizes = [4, 8, 8, 4], strides = [1, 1, 1, 1]} : vector<6x10x8x4xbf16> to vector<4x8x8x4xbf16>
    %24 = arith.maximumf %22, %23 : vector<4x8x8x4xbf16>
    %25 = vector.extract_strided_slice %20 {offsets = [0, 2, 0, 0], sizes = [4, 8, 8, 4], strides = [1, 1, 1, 1]} : vector<6x10x8x4xbf16> to vector<4x8x8x4xbf16>
    %26 = arith.maximumf %24, %25 : vector<4x8x8x4xbf16>
    %27 = vector.extract_strided_slice %20 {offsets = [1, 0, 0, 0], sizes = [4, 8, 8, 4], strides = [1, 1, 1, 1]} : vector<6x10x8x4xbf16> to vector<4x8x8x4xbf16>
    %28 = arith.maximumf %26, %27 : vector<4x8x8x4xbf16>
    %29 = vector.extract_strided_slice %20 {offsets = [1, 1, 0, 0], sizes = [4, 8, 8, 4], strides = [1, 1, 1, 1]} : vector<6x10x8x4xbf16> to vector<4x8x8x4xbf16>
    %30 = arith.maximumf %28, %29 : vector<4x8x8x4xbf16>
    %31 = vector.extract_strided_slice %20 {offsets = [1, 2, 0, 0], sizes = [4, 8, 8, 4], strides = [1, 1, 1, 1]} : vector<6x10x8x4xbf16> to vector<4x8x8x4xbf16>
    %32 = arith.maximumf %30, %31 : vector<4x8x8x4xbf16>
    %33 = vector.extract_strided_slice %20 {offsets = [2, 0, 0, 0], sizes = [4, 8, 8, 4], strides = [1, 1, 1, 1]} : vector<6x10x8x4xbf16> to vector<4x8x8x4xbf16>
    %34 = arith.maximumf %32, %33 : vector<4x8x8x4xbf16>
    %35 = vector.extract_strided_slice %20 {offsets = [2, 1, 0, 0], sizes = [4, 8, 8, 4], strides = [1, 1, 1, 1]} : vector<6x10x8x4xbf16> to vector<4x8x8x4xbf16>
    %36 = arith.maximumf %34, %35 : vector<4x8x8x4xbf16>
    %37 = vector.extract_strided_slice %20 {offsets = [2, 2, 0, 0], sizes = [4, 8, 8, 4], strides = [1, 1, 1, 1]} : vector<6x10x8x4xbf16> to vector<4x8x8x4xbf16>
    %38 = arith.maximumf %36, %37 : vector<4x8x8x4xbf16>
    %39 = vector.extract_strided_slice %1 {offsets = [0, 0, 2, 0], sizes = [6, 10, 8, 4], strides = [1, 1, 1, 1]} : vector<6x10x10x4xbf16> to vector<6x10x8x4xbf16>
    %40 = vector.extract_strided_slice %39 {offsets = [0, 0, 0, 0], sizes = [4, 8, 8, 4], strides = [1, 1, 1, 1]} : vector<6x10x8x4xbf16> to vector<4x8x8x4xbf16>
    %41 = arith.maximumf %38, %40 : vector<4x8x8x4xbf16>
    %42 = vector.extract_strided_slice %39 {offsets = [0, 1, 0, 0], sizes = [4, 8, 8, 4], strides = [1, 1, 1, 1]} : vector<6x10x8x4xbf16> to vector<4x8x8x4xbf16>
    %43 = arith.maximumf %41, %42 : vector<4x8x8x4xbf16>
    %44 = vector.extract_strided_slice %39 {offsets = [0, 2, 0, 0], sizes = [4, 8, 8, 4], strides = [1, 1, 1, 1]} : vector<6x10x8x4xbf16> to vector<4x8x8x4xbf16>
    %45 = arith.maximumf %43, %44 : vector<4x8x8x4xbf16>
    %46 = vector.extract_strided_slice %39 {offsets = [1, 0, 0, 0], sizes = [4, 8, 8, 4], strides = [1, 1, 1, 1]} : vector<6x10x8x4xbf16> to vector<4x8x8x4xbf16>
    %47 = arith.maximumf %45, %46 : vector<4x8x8x4xbf16>
    %48 = vector.extract_strided_slice %39 {offsets = [1, 1, 0, 0], sizes = [4, 8, 8, 4], strides = [1, 1, 1, 1]} : vector<6x10x8x4xbf16> to vector<4x8x8x4xbf16>
    %49 = arith.maximumf %47, %48 : vector<4x8x8x4xbf16>
    %50 = vector.extract_strided_slice %39 {offsets = [1, 2, 0, 0], sizes = [4, 8, 8, 4], strides = [1, 1, 1, 1]} : vector<6x10x8x4xbf16> to vector<4x8x8x4xbf16>
    %51 = arith.maximumf %49, %50 : vector<4x8x8x4xbf16>
    %52 = vector.extract_strided_slice %39 {offsets = [2, 0, 0, 0], sizes = [4, 8, 8, 4], strides = [1, 1, 1, 1]} : vector<6x10x8x4xbf16> to vector<4x8x8x4xbf16>
    %53 = arith.maximumf %51, %52 : vector<4x8x8x4xbf16>
    %54 = vector.extract_strided_slice %39 {offsets = [2, 1, 0, 0], sizes = [4, 8, 8, 4], strides = [1, 1, 1, 1]} : vector<6x10x8x4xbf16> to vector<4x8x8x4xbf16>
    %55 = arith.maximumf %53, %54 : vector<4x8x8x4xbf16>
    %56 = vector.extract_strided_slice %39 {offsets = [2, 2, 0, 0], sizes = [4, 8, 8, 4], strides = [1, 1, 1, 1]} : vector<6x10x8x4xbf16> to vector<4x8x8x4xbf16>
    %57 = arith.maximumf %55, %56 : vector<4x8x8x4xbf16>
    %58 = vector.shape_cast %57 : vector<4x8x8x4xbf16> to vector<256x4xbf16>
    %c0_4 = arith.constant 0 : index
    %c0_5 = arith.constant 0 : index
    %59 = vector.load %arg2[%c0_4, %c0_5] : memref<4x4xbf16, #tpu.memory_space<vmem>>, vector<4x4xbf16>
    %cst = arith.constant dense<0.000000e+00> : vector<256x4xf32>
    %60 = tpu.matmul %58, %59, %cst {dimension_numbers = #tpu.dot_dimension_numbers<[1], [0], [0], [1], [0, 0, 1, 1], [], []>} : vector<256x4xbf16>, vector<4x4xbf16>, vector<256x4xf32> -> vector<256x4xf32>
    %c0_6 = arith.constant 0 : index
    %c0_7 = arith.constant 0 : index
    %61 = vector.load %arg3[%c0_6, %c0_7] : memref<1x4xf32, #tpu.memory_space<vmem>>, vector<1x4xf32>
    %62 = vector.broadcast %61 : vector<1x4xf32> to vector<256x4xf32>
    %63 = arith.mulf %60, %62 : vector<256x4xf32>
    %c0_8 = arith.constant 0 : index
    %c0_9 = arith.constant 0 : index
    %64 = vector.load %arg4[%c0_8, %c0_9] : memref<1x4xf32, #tpu.memory_space<vmem>>, vector<1x4xf32>
    %65 = vector.broadcast %64 : vector<1x4xf32> to vector<256x4xf32>
    %66 = arith.addf %63, %65 : vector<256x4xf32>
    %cst_10 = arith.constant 0.000000e+00 : f32
    %67 = vector.broadcast %cst_10 : f32 to vector<256x4xf32>
    %68 = arith.maximumf %66, %67 : vector<256x4xf32>
    %69 = vector.shape_cast %68 : vector<256x4xf32> to vector<4x8x8x4xf32>
    %70 = arith.truncf %69 : vector<4x8x8x4xf32> to vector<4x8x8x4xbf16>
    %c0_11 = arith.constant 0 : index
    %c0_12 = arith.constant 0 : index
    %c0_13 = arith.constant 0 : index
    %c0_14 = arith.constant 0 : index
    %c0_15 = arith.constant 0 : index
    %71 = vector.load %arg5[%c0_11, %c0_12, %c0_13, %c0_14, %c0_15] : memref<1x4x8x8x4xbf16, #tpu.memory_space<vmem>>, vector<1x4x8x8x4xbf16>
    %72 = vector.shape_cast %71 : vector<1x4x8x8x4xbf16> to vector<4x8x8x4xbf16>
    %73 = vector.shape_cast %70 : vector<4x8x8x4xbf16> to vector<1x4x8x8x4xbf16>
    tpu.vector_store %arg5[%c0_11, %c0_12, %c0_13, %c0_14, %c0_15], %73 {strides = array<i32>} : memref<1x4x8x8x4xbf16, #tpu.memory_space<vmem>>, vector<1x4x8x8x4xbf16>,
    return
  }
  func.func @transform_0(%arg0: i32) -> (i32, i32, i32, i32, i32) {
    %c0_i32 = arith.constant 0 : i32
    %c0_i32_0 = arith.constant 0 : i32
    %c0_i32_1 = arith.constant 0 : i32
    %c0_i32_2 = arith.constant 0 : i32
    %c0_i32_3 = arith.constant 0 : i32
    return %arg0, %c0_i32, %c0_i32_0, %c0_i32_1, %c0_i32_2 : i32, i32, i32, i32, i32
  }
  func.func @transform_1(%arg0: i32) -> (i32, i32) {
    %c0_i32 = arith.constant 0 : i32
    %c0_i32_0 = arith.constant 0 : i32
    %c0_i32_1 = arith.constant 0 : i32
    return %c0_i32, %c0_i32_0 : i32, i32
  }
  func.func @transform_2(%arg0: i32) -> (i32, i32) {
    %c0_i32 = arith.constant 0 : i32
    %c0_i32_0 = arith.constant 0 : i32
    %c0_i32_1 = arith.constant 0 : i32
    return %c0_i32, %c0_i32_0 : i32, i32
  }
  func.func @transform_3(%arg0: i32) -> (i32, i32) {
    %c0_i32 = arith.constant 0 : i32
    %c0_i32_0 = arith.constant 0 : i32
    %c0_i32_1 = arith.constant 0 : i32
    return %c0_i32, %c0_i32_0 : i32, i32
  }
  func.func @transform_4(%arg0: i32) -> (i32, i32, i32, i32, i32) {
    %c0_i32 = arith.constant 0 : i32
    %c0_i32_0 = arith.constant 0 : i32
    %c0_i32_1 = arith.constant 0 : i32
    %c0_i32_2 = arith.constant 0 : i32
    %c0_i32_3 = arith.constant 0 : i32
    return %arg0, %c0_i32, %c0_i32_0, %c0_i32_1, %c0_i32_2 : i32, i32, i32, i32, i32
  }
}

</mosaic_0001>

<bundles_post_ra>
// kernel: inception_forward.4
= control target key start
LH: loop header
LB: loop body
LE: loop exit
PB: predicated region body
PF: predicated region fallthrough
CT: control target
= control target key end

     0   :  { %vm340_vm0 = vcmask 1041408   ;;  %vm243_vm1 = vcmask 31744   ;;  %s2073_s1 = inlined_call_operand.vmem [shape: bf16[4,128], index: 1, kind: input, shape index: {}]   ;;  %s2074_s0 = inlined_call_operand.vmem [shape: bf16[512,4], index: 0, kind: input, shape index: {}]   ;;  %s2075_s2 = inlined_call_operand.vmem [shape: f32[1,128], index: 2, kind: input, shape index: {}]   ;;  %s2076_s3 = inlined_call_operand.vmem [shape: f32[1,128], index: 3, kind: input, shape index: {}]   ;;  %s2077_s4 = inlined_call_operand.vmem [shape: bf16[512,128], index: 4, kind: output, shape index: {}]  }
   0x1   :  { %v82_v0 = vld [vmem:[%s2073_s1] sm:$0x3]  ;;  %v1653_v4 = vld [vmem:[%s2074_s0 + $0x8] sm:$0xff]   ;;  %v1655_v6 = vld [vmem:[%s2074_s0 + $0x10] sm:$0xff]  }
   0x2   :  { %1649 = vmatprep.subr.msk.bf16.mxu0 %vm340_vm0, %v82_v0  ;;  %1650 = vmatprep.subr.msk.bf16.mxu1 %vm340_vm0, %v82_v0  ;;  %v342_v1 = vsel %vm340_vm0, %v82_v0, 0  ;;  %v1651_v2 = vld [vmem:[%s2074_s0] sm:$0xff]   ;;  %v1654_v5 = vld [vmem:[%s2074_s0 + $0x88] sm:$0xff]   ;;  %v1656_v7 = vld [vmem:[%s2074_s0 + $0x90] sm:$0xff]  }
   0x3   :  { %1582 = vmatpush3.bf16.msra.mxu0 %v342_v1  ;;  %1648 = vmatpush3.bf16.msra.mxu1 %v342_v1  ;;  %v1652_v3 = vld [vmem:[%s2074_s0 + $0x80] sm:$0xff]   ;;  %v1657_v8 = vld [vmem:[%s2074_s0 + $0x18] sm:$0xff]   ;;  %v1661_v12 = vld [vmem:[%s2074_s0 + $0x28] sm:$0xff]  }
   0x4   :  { %1583 = vmatprep.mubr.msk.bf16.mxu0 %vm243_vm1, %v1651_v2  ;;  %1615 = vmatprep.mubr.msk.bf16.mxu1 %vm243_vm1, %v1652_v3  ;;  %v1658_v9 = vld [vmem:[%s2074_s0 + $0x98] sm:$0xff]   ;;  %v1659_v10 = vld [vmem:[%s2074_s0 + $0x20] sm:$0xff]   ;;  %v1662_v13 = vld [vmem:[%s2074_s0 + $0xa8] sm:$0xff]  }
   0x5   :  { %v1660_v11 = vld [vmem:[%s2074_s0 + $0xa0] sm:$0xff]   ;;  %v1663_v14 = vld [vmem:[%s2074_s0 + $0x30] sm:$0xff]   ;;  %v1665_v16 = vld [vmem:[%s2074_s0 + $0x38] sm:$0xff]  }
   0x6   :  { %1584 = vmatmul.mubr.msk.bf16.vlgmr.msra.gmra.mxu0 %vm243_vm1, %v1653_v4  ;;  %1616 = vmatmul.mubr.msk.bf16.vlgmr.msra.gmra.mxu1 %vm243_vm1, %v1654_v5  ;;  %v1664_v15 = vld [vmem:[%s2074_s0 + $0xb0] sm:$0xff]   ;;  %v1666_v17 = vld [vmem:[%s2074_s0 + $0xb8] sm:$0xff]   ;;  %v1667_v18 = vld [vmem:[%s2074_s0 + $0x40] sm:$0xff]  }
   0x7   :  { %1587 = vmatprep.mubr.msk.bf16.mxu0 %vm243_vm1, %v1655_v6  ;;  %1619 = vmatprep.mubr.msk.bf16.mxu1 %vm243_vm1, %v1656_v7  ;;  %v1668_v19 = vld [vmem:[%s2074_s0 + $0xc0] sm:$0xff]   ;;  %v1669_v20 = vld [vmem:[%s2074_s0 + $0x48] sm:$0xff]   ;;  %v1671_v22 = vld [vmem:[%s2074_s0 + $0x50] sm:$0xff]  }
   0x8   :  { %v1670_v21 = vld [vmem:[%s2074_s0 + $0xc8] sm:$0xff]   ;;  %v1672_v23 = vld [vmem:[%s2074_s0 + $0xd0] sm:$0xff]   ;;  %v1673_v24 = vld [vmem:[%s2074_s0 + $0x58] sm:$0xff]  }
   0x9   :  { %v1674_v25 = vld [vmem:[%s2074_s0 + $0xd8] sm:$0xff]   ;;  %v1675_v26 = vld [vmem:[%s2074_s0 + $0x60] sm:$0xff]   ;;  %v1677_v28 = vld [vmem:[%s2074_s0 + $0x68] sm:$0xff]  }
   0xa   :  { %v1676_v27 = vld [vmem:[%s2074_s0 + $0xe0] sm:$0xff]   ;;  %v1678_v29 = vld [vmem:[%s2074_s0 + $0xe8] sm:$0xff]   ;;  %v1679_v30 = vld [vmem:[%s2074_s0 + $0x70] sm:$0xff]  }
   0xb   :  { %v1680_v31 = vld [vmem:[%s2074_s0 + $0xf0] sm:$0xff]   ;;  %v1681_v32 = vld [vmem:[%s2074_s0 + $0x78] sm:$0xff]   ;;  %v1842_v34 = vld [vmem:[%s2075_s2] ss:$0 sm:$0xff] }
   0xc   :  { %v1682_v33 = vld [vmem:[%s2074_s0 + $0xf8] sm:$0xff]   ;;  %v1848_v38 = vld [vmem:[%s2076_s3] ss:$0 sm:$0xff] }
   0xe   :  { %1588 = vmatmul.mubr.msk.bf16.gmra.mxu0 %vm243_vm1, %v1657_v8  ;;  %1620 = vmatmul.mubr.msk.bf16.gmra.mxu1 %vm243_vm1, %v1658_v9 }
   0xf   :  { %1591 = vmatprep.mubr.msk.bf16.mxu0 %vm243_vm1, %v1659_v10  ;;  %1623 = vmatprep.mubr.msk.bf16.mxu1 %vm243_vm1, %v1660_v11 }
  0x16   :  { %1592 = vmatmul.mubr.msk.bf16.gmra.mxu0 %vm243_vm1, %v1661_v12  ;;  %1624 = vmatmul.mubr.msk.bf16.gmra.mxu1 %vm243_vm1, %v1662_v13 }
  0x17   :  { %1595 = vmatprep.mubr.msk.bf16.mxu0 %vm243_vm1, %v1663_v14  ;;  %1627 = vmatprep.mubr.msk.bf16.mxu1 %vm243_vm1, %v1664_v15 }
  0x1e   :  { %1596 = vmatmul.mubr.msk.bf16.gmra.mxu0 %vm243_vm1, %v1665_v16  ;;  %1628 = vmatmul.mubr.msk.bf16.gmra.mxu1 %vm243_vm1, %v1666_v17 }
  0x1f   :  { %1599 = vmatprep.mubr.msk.bf16.mxu0 %vm243_vm1, %v1667_v18  ;;  %1631 = vmatprep.mubr.msk.bf16.mxu1 %vm243_vm1, %v1668_v19 }
  0x26   :  { %1600 = vmatmul.mubr.msk.bf16.gmra.mxu0 %vm243_vm1, %v1669_v20  ;;  %1632 = vmatmul.mubr.msk.bf16.gmra.mxu1 %vm243_vm1, %v1670_v21 }
  0x27   :  { %1603 = vmatprep.mubr.msk.bf16.mxu0 %vm243_vm1, %v1671_v22  ;;  %1635 = vmatprep.mubr.msk.bf16.mxu1 %vm243_vm1, %v1672_v23 }
  0x2e   :  { %1604 = vmatmul.mubr.msk.bf16.gmra.mxu0 %vm243_vm1, %v1673_v24  ;;  %1636 = vmatmul.mubr.msk.bf16.gmra.mxu1 %vm243_vm1, %v1674_v25 }
  0x2f   :  { %1607 = vmatprep.mubr.msk.bf16.mxu0 %vm243_vm1, %v1675_v26  ;;  %1639 = vmatprep.mubr.msk.bf16.mxu1 %vm243_vm1, %v1676_v27 }
  0x36   :  { %1608 = vmatmul.mubr.msk.bf16.gmra.mxu0 %vm243_vm1, %v1677_v28  ;;  %1640 = vmatmul.mubr.msk.bf16.gmra.mxu1 %vm243_vm1, %v1678_v29 }
  0x37   :  { %1611 = vmatprep.mubr.msk.bf16.mxu0 %vm243_vm1, %v1679_v30  ;;  %1643 = vmatprep.mubr.msk.bf16.mxu1 %vm243_vm1, %v1680_v31 }
  0x3e   :  { %1612 = vmatmul.mubr.msk.bf16.gmra.mxu0 %vm243_vm1, %v1681_v32  ;;  %1644 = vmatmul.mubr.msk.bf16.gmra.mxu1 %vm243_vm1, %v1682_v33 }
  0xc6   :  { %v1585_v35 = vpop.f32.mrf.mxu0  ;;  %v1617_v37 = vpop.f32.mrf.mxu1 }
  0xc7   :  { %v642_v36 = vmul.f32 %v1585_v35, %v1842_v34  ;;  %v674_v39 = vmul.f32 %v1617_v37, %v1842_v34 }
  0xc8   :  { %v378_v40 = vpop.f32.mrf.mxu0  ;;  %v506_v42 = vpop.f32.mrf.mxu1 }
  0xc9   :  { %v640_v41 = vmul.f32 %v1842_v34, %v378_v40  ;;  %v672_v43 = vmul.f32 %v1842_v34, %v506_v42  ;;  %v713_v45 = vadd.f32 %v1848_v38, %v642_v36  ;;  %v745_v48 = vadd.f32 %v1848_v38, %v674_v39 }
  0xca   :  { %v1586_v44 = vpop.f32.mrf.mxu0  ;;  %v1618_v47 = vpop.f32.mrf.mxu1 }
  0xcb   :  { %v643_v46 = vmul.f32 %v1586_v44, %v1842_v34  ;;  %v675_v49 = vmul.f32 %v1618_v47, %v1842_v34  ;;  %v711_v51 = vadd.f32 %v1848_v38, %v640_v41  ;;  %v743_v55 = vadd.f32 %v1848_v38, %v672_v43 }
  0xcc   :  { %v381_v50 = vpop.f32.mrf.mxu0  ;;  %v509_v54 = vpop.f32.mrf.mxu1  ;;  %v777_v59 = vmax.f32 %v713_v45, 0.0  ;;  %v809_v0 = vmax.f32 %v745_v48, 0.0 }
  0xcd   :  { %v714_v52 = vadd.f32 %v1848_v38, %v643_v46  ;;  %v641_v53 = vmul.f32 %v1842_v34, %v381_v50  ;;  %v746_v56 = vadd.f32 %v1848_v38, %v675_v49  ;;  %v673_v57 = vmul.f32 %v1842_v34, %v509_v54 }
  0xce   :  { %v1589_v58 = vpop.f32.mrf.mxu0  ;;  %v1621_v63 = vpop.f32.mrf.mxu1  ;;  %v775_v5 = vmax.f32 %v711_v51, 0.0  ;;  %v807_v10 = vmax.f32 %v743_v55, 0.0 }
  0xcf   :  { %v778_v60 = vmax.f32 %v714_v52, 0.0  ;;  %v712_v61 = vadd.f32 %v1848_v38, %v641_v53  ;;  %v646_v62 = vmul.f32 %v1589_v58, %v1842_v34  ;;  %v810_v1 = vmax.f32 %v746_v56, 0.0 }
  0xd0   :  { %v744_v2 = vadd.f32 %v1848_v38, %v673_v57  ;;  %v678_v3 = vmul.f32 %v1621_v63, %v1842_v34  ;;  %v394_v4 = vpop.f32.mrf.mxu0  ;;  %v522_v9 = vpop.f32.mrf.mxu1 }
  0xd1   :  { %v1365_v6 = vpack.c.bf16 %v778_v60, %v777_v59  ;;  %v776_v7 = vmax.f32 %v712_v61, 0.0  ;;  %v644_v8 = vmul.f32 %v1842_v34, %v394_v4  ;;  %v1445_v11 = vpack.c.bf16 %v810_v1, %v809_v0 }
  0xd2   :  { %v808_v12 = vmax.f32 %v744_v2, 0.0  ;;  %v676_v13 = vmul.f32 %v1842_v34, %v522_v9  ;;  %v1590_v14 = vpop.f32.mrf.mxu0  ;;  %v717_v16 = vadd.f32 %v1848_v38, %v646_v62  ;;  %v1622_v18 = vpop.f32.mrf.mxu1  ;;  %v749_v20 = vadd.f32 %v1848_v38, %v678_v3 }
  0xd3   :  { %1517 = vst [vmem:[%s2077_s4 + $0x8] sm:$0xff] %v1365_v6   ;;  %v1360_v15 = vpack.c.bf16 %v776_v7, %v775_v5  ;;  %v647_v17 = vmul.f32 %v1590_v14, %v1842_v34  ;;  %1533 = vst [vmem:[%s2077_s4 + $0x88] sm:$0xff] %v1445_v11   ;;  %v679_v21 = vmul.f32 %v1622_v18, %v1842_v34 }
  0xd4   :  { %v1440_v19 = vpack.c.bf16 %v808_v12, %v807_v10  ;;  %v397_v22 = vpop.f32.mrf.mxu0  ;;  %v715_v23 = vadd.f32 %v1848_v38, %v644_v8  ;;  %v525_v26 = vpop.f32.mrf.mxu1  ;;  %v747_v27 = vadd.f32 %v1848_v38, %v676_v13  ;;  %v781_v31 = vmax.f32 %v717_v16, 0.0 }
  0xd5   :  { %1361 = vst [vmem:[%s2077_s4] sm:$0xff] %v1360_v15   ;;  %v718_v24 = vadd.f32 %v1848_v38, %v647_v17  ;;  %v645_v25 = vmul.f32 %v1842_v34, %v397_v22  ;;  %v750_v28 = vadd.f32 %v1848_v38, %v679_v21  ;;  %v677_v29 = vmul.f32 %v1842_v34, %v525_v26 }
  0xd6   :  { %1532 = vst [vmem:[%s2077_s4 + $0x80] sm:$0xff] %v1440_v19   ;;  %v1593_v30 = vpop.f32.mrf.mxu0  ;;  %v1625_v36 = vpop.f32.mrf.mxu1  ;;  %v813_v37 = vmax.f32 %v749_v20, 0.0  ;;  %v779_v43 = vmax.f32 %v715_v23, 0.0  ;;  %v811_v48 = vmax.f32 %v747_v27, 0.0 }
  0xd7   :  { %v782_v32 = vmax.f32 %v718_v24, 0.0  ;;  %v716_v33 = vadd.f32 %v1848_v38, %v645_v25  ;;  %v650_v35 = vmul.f32 %v1593_v30, %v1842_v34  ;;  %v814_v39 = vmax.f32 %v750_v28, 0.0 }
  0xd8   :  { %v748_v40 = vadd.f32 %v1848_v38, %v677_v29  ;;  %v682_v41 = vmul.f32 %v1625_v36, %v1842_v34  ;;  %v410_v42 = vpop.f32.mrf.mxu0  ;;  %v538_v47 = vpop.f32.mrf.mxu1 }
  0xd9   :  { %v1375_v44 = vpack.c.bf16 %v782_v32, %v781_v31  ;;  %v780_v45 = vmax.f32 %v716_v33, 0.0  ;;  %v648_v46 = vmul.f32 %v1842_v34, %v410_v42  ;;  %v1455_v49 = vpack.c.bf16 %v814_v39, %v813_v37 }
  0xda   :  { %v812_v50 = vmax.f32 %v748_v40, 0.0  ;;  %v680_v51 = vmul.f32 %v1842_v34, %v538_v47  ;;  %v1594_v52 = vpop.f32.mrf.mxu0  ;;  %v721_v54 = vadd.f32 %v1848_v38, %v650_v35  ;;  %v1626_v56 = vpop.f32.mrf.mxu1  ;;  %v753_v58 = vadd.f32 %v1848_v38, %v682_v41 }
  0xdb   :  { %1519 = vst [vmem:[%s2077_s4 + $0x18] sm:$0xff] %v1375_v44   ;;  %v1370_v53 = vpack.c.bf16 %v780_v45, %v779_v43  ;;  %v651_v55 = vmul.f32 %v1594_v52, %v1842_v34  ;;  %1535 = vst [vmem:[%s2077_s4 + $0x98] sm:$0xff] %v1455_v49   ;;  %v683_v59 = vmul.f32 %v1626_v56, %v1842_v34 }
  0xdc   :  { %v1450_v57 = vpack.c.bf16 %v812_v50, %v811_v48  ;;  %v413_v60 = vpop.f32.mrf.mxu0  ;;  %v719_v61 = vadd.f32 %v1848_v38, %v648_v46  ;;  %v541_v0 = vpop.f32.mrf.mxu1  ;;  %v751_v1 = vadd.f32 %v1848_v38, %v680_v51  ;;  %v785_v5 = vmax.f32 %v721_v54, 0.0 }
  0xdd   :  { %1518 = vst [vmem:[%s2077_s4 + $0x10] sm:$0xff] %v1370_v53   ;;  %v722_v62 = vadd.f32 %v1848_v38, %v651_v55  ;;  %v649_v63 = vmul.f32 %v1842_v34, %v413_v60  ;;  %v754_v2 = vadd.f32 %v1848_v38, %v683_v59  ;;  %v681_v3 = vmul.f32 %v1842_v34, %v541_v0 }
  0xde   :  { %1534 = vst [vmem:[%s2077_s4 + $0x90] sm:$0xff] %v1450_v57   ;;  %v1597_v4 = vpop.f32.mrf.mxu0  ;;  %v1629_v9 = vpop.f32.mrf.mxu1  ;;  %v817_v10 = vmax.f32 %v753_v58, 0.0  ;;  %v783_v15 = vmax.f32 %v719_v61, 0.0  ;;  %v815_v20 = vmax.f32 %v751_v1, 0.0 }
  0xdf   :  { %v786_v6 = vmax.f32 %v722_v62, 0.0  ;;  %v720_v7 = vadd.f32 %v1848_v38, %v649_v63  ;;  %v654_v8 = vmul.f32 %v1597_v4, %v1842_v34  ;;  %v818_v11 = vmax.f32 %v754_v2, 0.0 }
  0xe0   :  { %v752_v12 = vadd.f32 %v1848_v38, %v681_v3  ;;  %v686_v13 = vmul.f32 %v1629_v9, %v1842_v34  ;;  %v426_v14 = vpop.f32.mrf.mxu0  ;;  %v554_v19 = vpop.f32.mrf.mxu1 }
  0xe1   :  { %v1385_v16 = vpack.c.bf16 %v786_v6, %v785_v5  ;;  %v784_v17 = vmax.f32 %v720_v7, 0.0  ;;  %v652_v18 = vmul.f32 %v1842_v34, %v426_v14  ;;  %v1465_v21 = vpack.c.bf16 %v818_v11, %v817_v10 }
  0xe2   :  { %v816_v22 = vmax.f32 %v752_v12, 0.0  ;;  %v684_v23 = vmul.f32 %v1842_v34, %v554_v19  ;;  %v1598_v24 = vpop.f32.mrf.mxu0  ;;  %v725_v26 = vadd.f32 %v1848_v38, %v654_v8  ;;  %v1630_v28 = vpop.f32.mrf.mxu1  ;;  %v757_v30 = vadd.f32 %v1848_v38, %v686_v13 }
  0xe3   :  { %1521 = vst [vmem:[%s2077_s4 + $0x28] sm:$0xff] %v1385_v16   ;;  %v1380_v25 = vpack.c.bf16 %v784_v17, %v783_v15  ;;  %v655_v27 = vmul.f32 %v1598_v24, %v1842_v34  ;;  %1537 = vst [vmem:[%s2077_s4 + $0xa8] sm:$0xff] %v1465_v21   ;;  %v687_v31 = vmul.f32 %v1630_v28, %v1842_v34 }
  0xe4   :  { %v1460_v29 = vpack.c.bf16 %v816_v22, %v815_v20  ;;  %v429_v32 = vpop.f32.mrf.mxu0  ;;  %v723_v33 = vadd.f32 %v1848_v38, %v652_v18  ;;  %v557_v37 = vpop.f32.mrf.mxu1  ;;  %v755_v39 = vadd.f32 %v1848_v38, %v684_v23  ;;  %v789_v43 = vmax.f32 %v725_v26, 0.0 }
  0xe5   :  { %1520 = vst [vmem:[%s2077_s4 + $0x20] sm:$0xff] %v1380_v25   ;;  %v726_v35 = vadd.f32 %v1848_v38, %v655_v27  ;;  %v653_v36 = vmul.f32 %v1842_v34, %v429_v32  ;;  %v758_v40 = vadd.f32 %v1848_v38, %v687_v31  ;;  %v685_v41 = vmul.f32 %v1842_v34, %v557_v37 }
  0xe6   :  { %1536 = vst [vmem:[%s2077_s4 + $0xa0] sm:$0xff] %v1460_v29   ;;  %v1601_v42 = vpop.f32.mrf.mxu0  ;;  %v1633_v47 = vpop.f32.mrf.mxu1  ;;  %v821_v48 = vmax.f32 %v757_v30, 0.0  ;;  %v787_v53 = vmax.f32 %v723_v33, 0.0  ;;  %v819_v58 = vmax.f32 %v755_v39, 0.0 }
  0xe7   :  { %v790_v44 = vmax.f32 %v726_v35, 0.0  ;;  %v724_v45 = vadd.f32 %v1848_v38, %v653_v36  ;;  %v658_v46 = vmul.f32 %v1601_v42, %v1842_v34  ;;  %v822_v49 = vmax.f32 %v758_v40, 0.0 }
  0xe8   :  { %v756_v50 = vadd.f32 %v1848_v38, %v685_v41  ;;  %v690_v51 = vmul.f32 %v1633_v47, %v1842_v34  ;;  %v442_v52 = vpop.f32.mrf.mxu0  ;;  %v570_v57 = vpop.f32.mrf.mxu1 }
  0xe9   :  { %v1395_v54 = vpack.c.bf16 %v790_v44, %v789_v43  ;;  %v788_v55 = vmax.f32 %v724_v45, 0.0  ;;  %v656_v56 = vmul.f32 %v1842_v34, %v442_v52  ;;  %v1475_v59 = vpack.c.bf16 %v822_v49, %v821_v48 }
  0xea   :  { %v820_v60 = vmax.f32 %v756_v50, 0.0  ;;  %v688_v61 = vmul.f32 %v1842_v34, %v570_v57  ;;  %v1602_v62 = vpop.f32.mrf.mxu0  ;;  %v729_v0 = vadd.f32 %v1848_v38, %v658_v46  ;;  %v1634_v2 = vpop.f32.mrf.mxu1  ;;  %v761_v4 = vadd.f32 %v1848_v38, %v690_v51 }
  0xeb   :  { %1523 = vst [vmem:[%s2077_s4 + $0x38] sm:$0xff] %v1395_v54   ;;  %v1390_v63 = vpack.c.bf16 %v788_v55, %v787_v53  ;;  %v659_v1 = vmul.f32 %v1602_v62, %v1842_v34  ;;  %1539 = vst [vmem:[%s2077_s4 + $0xb8] sm:$0xff] %v1475_v59   ;;  %v691_v5 = vmul.f32 %v1634_v2, %v1842_v34 }
  0xec   :  { %v1470_v3 = vpack.c.bf16 %v820_v60, %v819_v58  ;;  %v445_v6 = vpop.f32.mrf.mxu0  ;;  %v727_v7 = vadd.f32 %v1848_v38, %v656_v56  ;;  %v573_v10 = vpop.f32.mrf.mxu1  ;;  %v759_v11 = vadd.f32 %v1848_v38, %v688_v61  ;;  %v793_v15 = vmax.f32 %v729_v0, 0.0 }
  0xed   :  { %1522 = vst [vmem:[%s2077_s4 + $0x30] sm:$0xff] %v1390_v63   ;;  %v730_v8 = vadd.f32 %v1848_v38, %v659_v1  ;;  %v657_v9 = vmul.f32 %v1842_v34, %v445_v6  ;;  %v762_v12 = vadd.f32 %v1848_v38, %v691_v5  ;;  %v689_v13 = vmul.f32 %v1842_v34, %v573_v10 }
  0xee   :  { %1538 = vst [vmem:[%s2077_s4 + $0xb0] sm:$0xff] %v1470_v3   ;;  %v1605_v14 = vpop.f32.mrf.mxu0  ;;  %v1637_v19 = vpop.f32.mrf.mxu1  ;;  %v825_v20 = vmax.f32 %v761_v4, 0.0  ;;  %v791_v25 = vmax.f32 %v727_v7, 0.0  ;;  %v823_v30 = vmax.f32 %v759_v11, 0.0 }
  0xef   :  { %v794_v16 = vmax.f32 %v730_v8, 0.0  ;;  %v728_v17 = vadd.f32 %v1848_v38, %v657_v9  ;;  %v662_v18 = vmul.f32 %v1605_v14, %v1842_v34  ;;  %v826_v21 = vmax.f32 %v762_v12, 0.0 }
  0xf0   :  { %v760_v22 = vadd.f32 %v1848_v38, %v689_v13  ;;  %v694_v23 = vmul.f32 %v1637_v19, %v1842_v34  ;;  %v458_v24 = vpop.f32.mrf.mxu0  ;;  %v586_v29 = vpop.f32.mrf.mxu1 }
  0xf1   :  { %v1405_v26 = vpack.c.bf16 %v794_v16, %v793_v15  ;;  %v792_v27 = vmax.f32 %v728_v17, 0.0  ;;  %v660_v28 = vmul.f32 %v1842_v34, %v458_v24  ;;  %v1485_v31 = vpack.c.bf16 %v826_v21, %v825_v20 }
  0xf2   :  { %v824_v32 = vmax.f32 %v760_v22, 0.0  ;;  %v692_v33 = vmul.f32 %v1842_v34, %v586_v29  ;;  %v1606_v35 = vpop.f32.mrf.mxu0  ;;  %v733_v37 = vadd.f32 %v1848_v38, %v662_v18  ;;  %v1638_v40 = vpop.f32.mrf.mxu1  ;;  %v765_v42 = vadd.f32 %v1848_v38, %v694_v23 }
  0xf3   :  { %1525 = vst [vmem:[%s2077_s4 + $0x48] sm:$0xff] %v1405_v26   ;;  %v1400_v36 = vpack.c.bf16 %v792_v27, %v791_v25  ;;  %v663_v39 = vmul.f32 %v1606_v35, %v1842_v34  ;;  %1541 = vst [vmem:[%s2077_s4 + $0xc8] sm:$0xff] %v1485_v31   ;;  %v695_v43 = vmul.f32 %v1638_v40, %v1842_v34 }
  0xf4   :  { %v1480_v41 = vpack.c.bf16 %v824_v32, %v823_v30  ;;  %v461_v44 = vpop.f32.mrf.mxu0  ;;  %v731_v45 = vadd.f32 %v1848_v38, %v660_v28  ;;  %v589_v48 = vpop.f32.mrf.mxu1  ;;  %v763_v49 = vadd.f32 %v1848_v38, %v692_v33  ;;  %v797_v53 = vmax.f32 %v733_v37, 0.0 }
  0xf5   :  { %1524 = vst [vmem:[%s2077_s4 + $0x40] sm:$0xff] %v1400_v36   ;;  %v734_v46 = vadd.f32 %v1848_v38, %v663_v39  ;;  %v661_v47 = vmul.f32 %v1842_v34, %v461_v44  ;;  %v766_v50 = vadd.f32 %v1848_v38, %v695_v43  ;;  %v693_v51 = vmul.f32 %v1842_v34, %v589_v48 }
  0xf6   :  { %1540 = vst [vmem:[%s2077_s4 + $0xc0] sm:$0xff] %v1480_v41   ;;  %v1609_v52 = vpop.f32.mrf.mxu0  ;;  %v1641_v57 = vpop.f32.mrf.mxu1  ;;  %v829_v58 = vmax.f32 %v765_v42, 0.0  ;;  %v795_v63 = vmax.f32 %v731_v45, 0.0  ;;  %v827_v4 = vmax.f32 %v763_v49, 0.0 }
  0xf7   :  { %v798_v54 = vmax.f32 %v734_v46, 0.0  ;;  %v732_v55 = vadd.f32 %v1848_v38, %v661_v47  ;;  %v666_v56 = vmul.f32 %v1609_v52, %v1842_v34  ;;  %v830_v59 = vmax.f32 %v766_v50, 0.0 }
  0xf8   :  { %v764_v60 = vadd.f32 %v1848_v38, %v693_v51  ;;  %v698_v61 = vmul.f32 %v1641_v57, %v1842_v34  ;;  %v474_v62 = vpop.f32.mrf.mxu0  ;;  %v602_v3 = vpop.f32.mrf.mxu1 }
  0xf9   :  { %v1415_v0 = vpack.c.bf16 %v798_v54, %v797_v53  ;;  %v796_v1 = vmax.f32 %v732_v55, 0.0  ;;  %v664_v2 = vmul.f32 %v1842_v34, %v474_v62  ;;  %v1495_v5 = vpack.c.bf16 %v830_v59, %v829_v58 }
  0xfa   :  { %v828_v6 = vmax.f32 %v764_v60, 0.0  ;;  %v696_v7 = vmul.f32 %v1842_v34, %v602_v3  ;;  %v1610_v8 = vpop.f32.mrf.mxu0  ;;  %v737_v10 = vadd.f32 %v1848_v38, %v666_v56  ;;  %v1642_v12 = vpop.f32.mrf.mxu1  ;;  %v769_v14 = vadd.f32 %v1848_v38, %v698_v61 }
  0xfb   :  { %1527 = vst [vmem:[%s2077_s4 + $0x58] sm:$0xff] %v1415_v0   ;;  %v1410_v9 = vpack.c.bf16 %v796_v1, %v795_v63  ;;  %v667_v11 = vmul.f32 %v1610_v8, %v1842_v34  ;;  %1543 = vst [vmem:[%s2077_s4 + $0xd8] sm:$0xff] %v1495_v5   ;;  %v699_v15 = vmul.f32 %v1642_v12, %v1842_v34 }
  0xfc   :  { %v1490_v13 = vpack.c.bf16 %v828_v6, %v827_v4  ;;  %v477_v16 = vpop.f32.mrf.mxu0  ;;  %v735_v17 = vadd.f32 %v1848_v38, %v664_v2  ;;  %v605_v20 = vpop.f32.mrf.mxu1  ;;  %v767_v21 = vadd.f32 %v1848_v38, %v696_v7  ;;  %v801_v25 = vmax.f32 %v737_v10, 0.0 }
  0xfd   :  { %1526 = vst [vmem:[%s2077_s4 + $0x50] sm:$0xff] %v1410_v9   ;;  %v738_v18 = vadd.f32 %v1848_v38, %v667_v11  ;;  %v665_v19 = vmul.f32 %v1842_v34, %v477_v16  ;;  %v770_v22 = vadd.f32 %v1848_v38, %v699_v15  ;;  %v697_v23 = vmul.f32 %v1842_v34, %v605_v20 }
  0xfe   :  { %1542 = vst [vmem:[%s2077_s4 + $0xd0] sm:$0xff] %v1490_v13   ;;  %v1613_v24 = vpop.f32.mrf.mxu0  ;;  %v1645_v29 = vpop.f32.mrf.mxu1  ;;  %v833_v30 = vmax.f32 %v769_v14, 0.0  ;;  %v799_v36 = vmax.f32 %v735_v17, 0.0  ;;  %v831_v42 = vmax.f32 %v767_v21, 0.0 }
  0xff   :  { %v802_v26 = vmax.f32 %v738_v18, 0.0  ;;  %v736_v27 = vadd.f32 %v1848_v38, %v665_v19  ;;  %v670_v28 = vmul.f32 %v1613_v24, %v1842_v34  ;;  %v834_v31 = vmax.f32 %v770_v22, 0.0 }
 0x100   :  { %v768_v32 = vadd.f32 %v1848_v38, %v697_v23  ;;  %v702_v33 = vmul.f32 %v1645_v29, %v1842_v34  ;;  %v490_v35 = vpop.f32.mrf.mxu0  ;;  %v618_v41 = vpop.f32.mrf.mxu1 }
 0x101   :  { %v1425_v37 = vpack.c.bf16 %v802_v26, %v801_v25  ;;  %v800_v39 = vmax.f32 %v736_v27, 0.0  ;;  %v668_v40 = vmul.f32 %v1842_v34, %v490_v35  ;;  %v1505_v43 = vpack.c.bf16 %v834_v31, %v833_v30 }
 0x102   :  { %v832_v44 = vmax.f32 %v768_v32, 0.0  ;;  %v700_v45 = vmul.f32 %v1842_v34, %v618_v41  ;;  %v1614_v46 = vpop.f32.mrf.mxu0  ;;  %v741_v48 = vadd.f32 %v1848_v38, %v670_v28  ;;  %v1646_v50 = vpop.f32.mrf.mxu1  ;;  %v773_v52 = vadd.f32 %v1848_v38, %v702_v33 }
 0x103   :  { %1529 = vst [vmem:[%s2077_s4 + $0x68] sm:$0xff] %v1425_v37   ;;  %v1420_v47 = vpack.c.bf16 %v800_v39, %v799_v36  ;;  %v671_v49 = vmul.f32 %v1614_v46, %v1842_v34  ;;  %1545 = vst [vmem:[%s2077_s4 + $0xe8] sm:$0xff] %v1505_v43   ;;  %v703_v53 = vmul.f32 %v1646_v50, %v1842_v34 }
 0x104   :  { %v1500_v51 = vpack.c.bf16 %v832_v44, %v831_v42  ;;  %v493_v54 = vpop.f32.mrf.mxu0  ;;  %v739_v55 = vadd.f32 %v1848_v38, %v668_v40  ;;  %v621_v58 = vpop.f32.mrf.mxu1  ;;  %v771_v59 = vadd.f32 %v1848_v38, %v700_v45  ;;  %v805_v62 = vmax.f32 %v741_v48, 0.0 }
 0x105   :  { %1528 = vst [vmem:[%s2077_s4 + $0x60] sm:$0xff] %v1420_v47   ;;  %v742_v56 = vadd.f32 %v1848_v38, %v671_v49  ;;  %v669_v57 = vmul.f32 %v1842_v34, %v493_v54  ;;  %v774_v60 = vadd.f32 %v1848_v38, %v703_v53  ;;  %v701_v61 = vmul.f32 %v1842_v34, %v621_v58 }
 0x106   :  { %1544 = vst [vmem:[%s2077_s4 + $0xe0] sm:$0xff] %v1500_v51   ;;  %v837_v1 = vmax.f32 %v773_v52, 0.0  ;;  %v803_v4 = vmax.f32 %v739_v55, 0.0  ;;  %v835_v7 = vmax.f32 %v771_v59, 0.0 }
 0x107   :  { %v806_v63 = vmax.f32 %v742_v56, 0.0  ;;  %v740_v0 = vadd.f32 %v1848_v38, %v669_v57  ;;  %v838_v2 = vmax.f32 %v774_v60, 0.0  ;;  %v772_v3 = vadd.f32 %v1848_v38, %v701_v61 }
 0x109   :  { %v1435_v5 = vpack.c.bf16 %v806_v63, %v805_v62  ;;  %v804_v6 = vmax.f32 %v740_v0, 0.0  ;;  %v1515_v8 = vpack.c.bf16 %v838_v2, %v837_v1  ;;  %v836_v9 = vmax.f32 %v772_v3, 0.0 }
 0x10b   :  { %1531 = vst [vmem:[%s2077_s4 + $0x78] sm:$0xff] %v1435_v5   ;;  %v1430_v10 = vpack.c.bf16 %v804_v6, %v803_v4  ;;  %1547 = vst [vmem:[%s2077_s4 + $0xf8] sm:$0xff] %v1515_v8   ;;  %v1510_v34 = vpack.c.bf16 %v836_v9, %v835_v7 }
 0x10d   :  { %1530 = vst [vmem:[%s2077_s4 + $0x70] sm:$0xff] %v1430_v10   ;;  %1546 = vst [vmem:[%s2077_s4 + $0xf0] sm:$0xff] %v1510_v34  }

// kernel: inception_forward.7
= control target key start
LH: loop header
LB: loop body
LE: loop exit
PB: predicated region body
PF: predicated region fallthrough
CT: control target
= control target key end

     0   :  { %s3256_s15 = smov 0   ;;  %s5529_s0 = inlined_call_operand.vmem [shape: bf16[2,6,10,10,4], index: 0, kind: input, shape index: {}]   ;;  %s5530_s1 = inlined_call_operand.vmem [shape: bf16[4,4], index: 1, kind: input, shape index: {}]   ;;  %s5531_s2 = inlined_call_operand.vmem [shape: f32[1,4], index: 2, kind: input, shape index: {}]   ;;  %s5532_s3 = inlined_call_operand.vmem [shape: f32[1,4], index: 3, kind: input, shape index: {}]   ;;  %s5533_s4 = inlined_call_operand.vmem [shape: bf16[2,4,8,8,4], index: 4, kind: output, shape index: {}]  }
   0x1 LB: > { %s3002_s16 = sadd.s32 4294967295, %s3229_s15   ;;  %p3006_p0 = scmp.ge.s32.totalorder %s3229_s15, 1  ;;  %s3229_s15 = sphi %s3256_s15, %s14_s15  }
   0x2   : > { %p162_p1 = scmp.lt.s32.totalorder %s3229_s15, 3 }
   0x4   : > { %p163_p2 = pnand %p3006_p0, %p162_p1 }
   0x6   : > { %166 = sbr.rel (%p163_p2) target bundleno = 622 (0x26e), region = 36 }
   0xb   : > { %v2477_v0 = vld [vmem:[%s5530_s1] sm:$0x3]  ;;  %vm2607_vm0 = vcmask 1041408   ;;  %p188_p3 = scmp.lt.s32.totalorder %s3002_s16, 1  ;;  %vm575_vm1 = vsmask.f32 3328 }
   0xc   : > { %3160 = vmatprep.subr.msk.bf16.mxu0 %vm2607_vm0, %v2477_v0  ;;  %3161 = vmatprep.subr.msk.bf16.mxu1 %vm2607_vm0, %v2477_v0  ;;  %v2609_v1 = vsel %vm2607_vm0, %v2477_v0, 0  ;;  %vm576_vm2 = vsmask.f32 7440  ;;  %vm1830_vm4 = vcmask 1042432   ;;  %vm1831_vm5 = vcmask 1046532  }
   0xd   : > { %3125 = vmatpush3.bf16.msra.mxu0 %v2609_v1  ;;  %3159 = vmatpush3.bf16.msra.mxu1 %v2609_v1  ;;  %s5664_s16 = smov (!%p188_p3, %s3002_s16), 1  ;;  %vm3612_vm3 = vmor %vm575_vm1, %vm576_vm2  ;;  %vm2558_vm7 = vcmask 31744   ;;  %vm2914_vm8 = vcmask 27648  }
   0xe   : > { %s3162_s19 = smul.u32 480, %s5664_s16  ;;  %vm4049_vm6 = vmor %vm1830_vm4, %vm1831_vm5  ;;  %s3106_s27 = sshll.u32 %s5664_s16, 7 }
   0xf   : > { %s5401_s30 = scalar_lea.vmem %s5533_s4, %s3106_s27 }
  0x10   : > { %s3273_s22 = scalar_lea.vmem %s5529_s0, %s3162_s19 }
  0x11   : > { %v3276_v2 = vld [vmem:[%s3273_s22] sm:$0xf]  ;;  %v3279_v3 = vld [vmem:[%s3273_s22 + $0x8] sm:$0xf]  ;;  %v3282_v4 = vld [vmem:[%s3273_s22 + $0x10] sm:$0xf] }
  0x12   : > { %v319_v5 = vmax.bf16 %v3279_v3, %v3276_v2  ;;  %v3287_v6 = vld [vmem:[%s3273_s22 + $0x18] sm:$0xf]  ;;  %v3290_v7 = vld [vmem:[%s3273_s22 + $0x20] sm:$0xf]  ;;  %v320_v8 = vmax.bf16 %v3282_v4, %v3279_v3  ;;  %v3302_v12 = vld [vmem:[%s3273_s22 + $0x28] sm:$0xf] }
  0x13   : > { %v321_v9 = vmax.bf16 %v3287_v6, %v3282_v4  ;;  %v322_v10 = vmax.bf16 %v3290_v7, %v3287_v6  ;;  %v3305_v13 = vld [vmem:[%s3273_s22 + $0x50] sm:$0xf]  ;;  %v3308_v14 = vld [vmem:[%s3273_s22 + $0x58] sm:$0xf]  ;;  %v3314_v16 = vld [vmem:[%s3273_s22 + $0x60] sm:$0xf]  ;;  %v323_v17 = vmax.bf16 %v3302_v12, %v3290_v7 }
  0x14   : > { %v3299_v11 = vmax.bf16 %v319_v5, %v3282_v4  ;;  %v3311_v15 = vmax.bf16 %v320_v8, %v3287_v6  ;;  %v327_v18 = vmax.bf16 %v3308_v14, %v3305_v13  ;;  %v3328_v21 = vmax.bf16 %v3314_v16, %v3308_v14  ;;  %v3331_v22 = vld [vmem:[%s3273_s22 + $0x68] sm:$0xf]  ;;  %v3334_v23 = vld [vmem:[%s3273_s22 + $0x70] sm:$0xf]  ;;  %v3349_v28 = vld [vmem:[%s3273_s22 + $0x78] sm:$0xf] }
  0x15   : > { %v3321_v19 = vmax.bf16 %v321_v9, %v3290_v7  ;;  %v3324_v20 = vmax.bf16 %v322_v10, %v3302_v12  ;;  %v3342_v26 = vmax.bf16 %v3331_v22, %v3314_v16  ;;  %v3346_v27 = vmax.bf16 %v3334_v23, %v3331_v22  ;;  %v3356_v31 = vld [vmem:[%s3273_s22 + $0xa0] sm:$0xf]  ;;  %v3359_v32 = vld [vmem:[%s3273_s22 + $0xa8] sm:$0xf]  ;;  %v3369_v36 = vld [vmem:[%s3273_s22 + $0xb0] sm:$0xf] }
  0x16   : > { %v324_v29 = vmax.bf16 %v3349_v28, %v3302_v12  ;;  %v355_v30 = vmax.bf16 %v3349_v28, %v3334_v23  ;;  %v3362_v33 = vmax.bf16 %v327_v18, %v3314_v16  ;;  %v447_v34 = vmax.bf16 %v3328_v21, %v3356_v31  ;;  %v3378_v40 = vld [vmem:[%s3273_s22 + $0xb8] sm:$0xf]  ;;  %v3381_v41 = vld [vmem:[%s3273_s22 + $0xc0] sm:$0xf]  ;;  %v3394_v49 = vld [vmem:[%s3273_s22 + $0xc8] sm:$0xf] }
  0x17   : > { %v448_v35 = vmax.bf16 %v3342_v26, %v3359_v32  ;;  %v335_v37 = vmax.bf16 %v3359_v32, %v3356_v31  ;;  %v449_v39 = vmax.bf16 %v3346_v27, %v3369_v36  ;;  %v336_v42 = vmax.bf16 %v3369_v36, %v3359_v32  ;;  %5560 = vst [vmem:[#allocation2_spill] sm:$0xff] %v3394_v49  ;;  %v3414_v58 = vld [vmem:[%s3273_s22 + $0xf0] sm:$0xf]  ;;  %v3417_v59 = vld [vmem:[%s3273_s22 + $0xf8] sm:$0xf] }
  0x18   : > { %v479_v45 = vmax.bf16 %v447_v34, %v3359_v32  ;;  %v450_v47 = vmax.bf16 %v355_v30, %v3378_v40  ;;  %v387_v48 = vmax.bf16 %v355_v30, %v3381_v41  ;;  %v363_v51 = vmax.bf16 %v3394_v49, %v3381_v41  ;;  %v3420_v60 = vld [vmem:[%s3273_s22 + $0x100] sm:$0xf]  ;;  %v3431_v1 = vld [vmem:[%s3273_s22 + $0x108] sm:$0xf]  ;;  %v3434_v5 = vld [vmem:[%s3273_s22 + $0x110] sm:$0xf] }
  0x19   : > { %v480_v46 = vmax.bf16 %v448_v35, %v3369_v36  ;;  %v3397_v50 = vmax.bf16 %v449_v39, %v3378_v40  ;;  %v3402_v52 = vmax.bf16 %v324_v29, %v3394_v49  ;;  %v3405_v53 = vmax.bf16 %v335_v37, %v3369_v36  ;;  %5561 = vst [vmem:[#allocation3_spill] sm:$0xff] %v3434_v5  ;;  %v3451_v34 = vld [vmem:[%s3273_s22 + $0x118] sm:$0xf]  ;;  %v3457_v39 = vld [vmem:[%s3273_s22 + $0x140] sm:$0xf] }
  0x1a   : > { %v511_v54 = vmax.bf16 %v479_v45, %v3369_v36  ;;  %v3410_v56 = vmax.bf16 %v450_v47, %v3381_v41  ;;  %v419_v57 = vmax.bf16 %v387_v48, %v3394_v49  ;;  %v455_v62 = vmax.bf16 %v3414_v58, %v3369_v36  ;;  %5562 = vst [vmem:[#allocation4_spill] sm:$0xff] %v3451_v34  ;;  %v3460_v45 = vld [vmem:[%s3273_s22 + $0x148] sm:$0xf] }
  0x1b   : > { %v512_v55 = vmax.bf16 %v480_v46, %v3378_v40  ;;  %v513_v61 = vmax.bf16 %v3397_v50, %v3381_v41  ;;  %v456_v63 = vmax.bf16 %v3417_v59, %v3378_v40  ;;  %v457_v0 = vmax.bf16 %v3420_v60, %v3381_v41  ;;  %5563 = vst [vmem:[#allocation5_spill] sm:$0xff] %v3460_v45  ;;  %v3463_v46 = vld [vmem:[%s3273_s22 + $0x150] sm:$0xf] }
  0x1c   : > { %v514_v8 = vmax.bf16 %v3410_v56, %v3394_v49  ;;  %v458_v9 = vmax.bf16 %v3431_v1, %v3394_v49  ;;  %v3441_v10 = vmax.bf16 %v455_v62, %v3417_v59  ;;  %v3448_v30 = vmax.bf16 %v363_v51, %v3434_v5  ;;  %5564 = vst [vmem:[#allocation6_spill] sm:$0xff] %v3463_v46  ;;  %v3473_v56 = vld [vmem:[%s3273_s22 + $0x158] sm:$0xf] }
  0x1d   : > { %v3444_v18 = vmax.bf16 %v456_v63, %v3420_v60  ;;  %v489_v29 = vmax.bf16 %v457_v0, %v3431_v1  ;;  %v3481_v0 = vld [vmem:[%s3273_s22 + $0x1a8] sm:$0xf]  ;;  %v3495_v63 = vld [vmem:[%s3273_s22 + $0x1a0] sm:$0xf]  ;;  %v3500_v51 = vmax.bf16 %v419_v57, %v323_v17  ;;  %v343_v44 = vmax.bf16 %v3417_v59, %v3414_v58 }
  0x1e   : > { %v490_v35 = vmax.bf16 %v458_v9, %v3434_v5  ;;  %v519_v47 = vmax.bf16 %v3441_v10, %v3420_v60  ;;  %v495_v9 = vmax.bf16 %v3460_v45, %v3457_v39  ;;  %v377_v10 = vmax.bf16 %v3463_v46, %v3434_v5 }
  0x1f   : > { %v520_v48 = vmax.bf16 %v3444_v18, %v3431_v1  ;;  %v521_v50 = vmax.bf16 %v489_v29, %v3434_v5  ;;  %v496_v18 = vmax.bf16 %v3463_v46, %v3460_v45  ;;  %v378_v29 = vmax.bf16 %v3473_v56, %v3451_v34 }
  0x20   : > { %v3476_v62 = vmax.bf16 %v490_v35, %v3451_v34  ;;  %v527_v43 = vmax.bf16 %v495_v9, %v3463_v46  ;;  %v409_v38 = vmax.bf16 %v377_v10, %v3473_v56  ;;  %v344_v5 = vmax.bf16 %v3420_v60, %v3417_v59 }
  0x21   : > { %v465_v35 = vmax.bf16 %v521_v50, %v3463_v46  ;;  %v528_v25 = vmax.bf16 %v496_v18, %v3473_v56  ;;  %v3508_v24 = vmax.bf16 %v378_v29, %v3481_v0  ;;  %v368_v17 = vmax.bf16 %v336_v42, %v3378_v40 }
  0x22   : > { %v375_v57 = vmax.bf16 %v343_v44, %v3420_v60  ;;  %v441_v49 = vmax.bf16 %v409_v38, %v3495_v63  ;;  %v5566_v9 = vmax.bf16 %v3299_v11, %v3305_v13  ;;  %v5567_v18 = vmax.bf16 %v3311_v15, %v3308_v14 }
  0x23   : > { %5565 = vst [vmem:[#allocation7_spill] sm:$0xff] %v3508_v24  ;;  %v3511_v37 = vmax.bf16 %v465_v35, %v3473_v56  ;;  %v385_v35 = vmax.bf16 %v3321_v19, %v3314_v16  ;;  %v376_v24 = vmax.bf16 %v344_v5, %v3431_v1  ;;  %v386_v42 = vmax.bf16 %v3324_v20, %v3331_v22 }
  0x24   : > { %v3521_v10 = vmax.bf16 %v511_v54, %v5566_v9  ;;  %v3526_v29 = vmax.bf16 %v512_v55, %v5567_v18  ;;  %v391_v38 = vmax.bf16 %v3362_v33, %v3356_v31  ;;  %v5568_v11 = vmax.bf16 %v3328_v21, %v3331_v22 }
  0x25   : > { %v3540_v15 = vmax.bf16 %v441_v49, %v3481_v0  ;;  %v3542_v54 = vmax.bf16 %v513_v61, %v385_v35  ;;  %v5569_v19 = vmax.bf16 %v3342_v26, %v3334_v23  ;;  %v5570_v20 = vmax.bf16 %v3346_v27, %v3349_v28  ;;  %v3563_v35 = vld [vmem:[%s3273_s22 + $0x4] sm:$0x1] }
  0x26   : > { %v392_v44 = vmax.bf16 %v5568_v11, %v3359_v32  ;;  %v3552_v21 = vmax.bf16 %v514_v8, %v386_v42  ;;  %v399_v49 = vmax.bf16 %v3405_v53, %v3414_v58  ;;  %v400_v61 = vmax.bf16 %v368_v17, %v3417_v59  ;;  %5571 = vst [vmem:[#allocation8_spill] sm:$0xff] %v3563_v35 }
  0x27   : > { %v393_v55 = vmax.bf16 %v5569_v19, %v3369_v36  ;;  %v394_v33 = vmax.bf16 %v5570_v20, %v3378_v40  ;;  %v407_v5 = vmax.bf16 %v375_v57, %v3457_v39  ;;  %v408_v26 = vmax.bf16 %v376_v24, %v3460_v45  ;;  %v299_v57 = vld [vmem:[%s3273_s22 + $0x190] sm:$0xf]  ;;  %v301_v19 = vld [vmem:[%s3273_s22 + $0x198] sm:$0xf] }
  0x28   : > { %v423_v9 = vmax.bf16 %v391_v38, %v3359_v32  ;;  %v424_v27 = vmax.bf16 %v392_v44, %v3369_v36  ;;  %v431_v53 = vmax.bf16 %v399_v49, %v3417_v59  ;;  %v432_v17 = vmax.bf16 %v400_v61, %v3420_v60  ;;  %v3585_v61 = vld [vmem:[%s3273_s22 + $0xc] sm:$0x1] }
  0x29   : > { %v425_v18 = vmax.bf16 %v393_v55, %v3378_v40  ;;  %v426_v8 = vmax.bf16 %v394_v33, %v3381_v41  ;;  %v439_v42 = vmax.bf16 %v407_v5, %v3460_v45  ;;  %v440_v44 = vmax.bf16 %v408_v26, %v3463_v46 }
  0x2a   : > { %v3570_v11 = vmax.bf16 %v519_v47, %v423_v9  ;;  %v3572_v24 = vmax.bf16 %v520_v48, %v424_v27  ;;  %v463_v20 = vmax.bf16 %v431_v53, %v3420_v60  ;;  %v464_v33 = vmax.bf16 %v432_v17, %v3431_v1 }
  0x2b   : > { %v3574_v38 = vmax.bf16 %v521_v50, %v425_v18  ;;  %v3579_v55 = vmax.bf16 %v3476_v62, %v426_v8  ;;  %v471_v49 = vmax.bf16 %v439_v42, %v3463_v46  ;;  %v472_v47 = vmax.bf16 %v440_v44, %v3473_v56  ;;  %v3597_v8 = vld [vmem:[%s3273_s22 + $0x14] sm:$0x1] }
  0x2c   : > { %v579_v48 = vshrl.u32 %v3276_v2, 16  ;;  %v582_v50 = vshll.u32 %v3276_v2, 16  ;;  %v588_v5 = vshll.u32 %v3563_v35, 16  ;;  %v3591_v26 = vmax.bf16 %v527_v43, %v463_v20  ;;  %5572 = vst [vmem:[#allocation9_spill] sm:$0xff] %v3597_v8 }
  0x2d   : > { %v3593_v9 = vmax.bf16 %v528_v25, %v464_v33  ;;  %v503_v27 = vmax.bf16 %v471_v49, %v299_v57  ;;  %v593_v18 = vshrl.u32 %v3279_v3, 16  ;;  %v504_v53 = vmax.bf16 %v472_v47, %v301_v19  ;;  %v3605_v33 = vld [vmem:[%s3273_s22 + $0x1c] sm:$0x1] }
  0x2e   : > { %v581_v17 = vrot.slane %v579_v48, 4  ;;  %v584_v42 = vrot.slane %v582_v50, 5  ;;  %v590_v44 = vrot.slane %v588_v5, 5  ;;  %v596_v2 = vshll.u32 %v3279_v3, 16 }
  0x2f   : > { %v535_v46 = vmax.bf16 %v503_v27, %v301_v19  ;;  %v595_v45 = vrot.slane %v593_v18, 4  ;;  %v602_v35 = vshll.u32 %v3585_v61, 16  ;;  %v536_v43 = vmax.bf16 %v504_v53, %v3495_v63 }
  0x30   : > { %v585_v25 = vor.u32 %v584_v42, %v581_v17  ;;  %v607_v20 = vshrl.u32 %v3282_v4, 16  ;;  %v610_v57 = vshll.u32 %v3282_v4, 16  ;;  %v598_v3 = vrot.slane %v596_v2, 5  ;;  %v3623_v17 = vld [vmem:[%s3273_s22 + $0x24] sm:$0x1] }
  0x31   : > { %v3608_v49 = vmax.bf16 %v535_v46, %v3495_v63  ;;  %v604_v47 = vrot.slane %v602_v35, 5  ;;  %v616_v48 = vshll.u32 %v3597_v8, 16  ;;  %v3618_v50 = vmax.bf16 %v536_v43, %v3481_v0 }
  0x32   : > { %v586_v5 = vrot.slane %v585_v25, 4  ;;  %v609_v4 = vrot.slane %v607_v20, 4  ;;  %v612_v27 = vrot.slane %v610_v57, 5  ;;  %v599_v18 = vor.u32 %v598_v3, %v595_v45 }
  0x33   : > { %v618_v53 = vrot.slane %v616_v48, 5  ;;  %v621_v46 = vshrl.u32 %v3287_v6, 16  ;;  %v624_v63 = vshll.u32 %v3287_v6, 16  ;;  %v630_v2 = vshll.u32 %v3605_v33, 16 }
  0x34   : > { %v591_v42 = vsel %vm3612_vm3, %v586_v5, %v590_v44  ;;  %v613_v35 = vor.u32 %v612_v27, %v609_v4  ;;  %v635_v0 = vshrl.u32 %v3290_v7, 16  ;;  %v600_v25 = vrot.slane %v599_v18, 4  ;;  %v210_v27 = vld [vmem:[%s3273_s22 + $0x2c] sm:$0x1] }
  0x35   : > { %v1058_v43 = vmax.bf16 %v591_v42, %v3521_v10  ;;  %v623_v45 = vrot.slane %v621_v46, 4  ;;  %v626_v20 = vrot.slane %v624_v63, 5  ;;  %v632_v3 = vrot.slane %v630_v2, 5 }
  0x36   : > { %v614_v57 = vrot.slane %v613_v35, 4  ;;  %v637_v48 = vrot.slane %v635_v0, 4  ;;  %v638_v6 = vshll.u32 %v3290_v7, 16  ;;  %v605_v8 = vsel %vm3612_vm3, %v600_v25, %v604_v47 }
  0x37   : > { %v627_v44 = vor.u32 %v626_v20, %v623_v45  ;;  %v644_v5 = vshll.u32 %v3623_v17, 16  ;;  %v649_v4 = vshrl.u32 %v3302_v12, 16  ;;  %v1059_v10 = vmax.bf16 %v605_v8, %v3526_v29  ;;  %v3646_v20 = vld [vmem:[%s3273_s22 + $0x54] sm:$0x1] }
  0x38   : > { %v1150_v18 = vmax.bf16 %v1058_v43, %v605_v8  ;;  %v619_v46 = vsel %vm3612_vm3, %v614_v57, %v618_v53  ;;  %v640_v63 = vrot.slane %v638_v6, 5  ;;  %v652_v45 = vshll.u32 %v3302_v12, 16  ;;  %5575 = vst [vmem:[#allocation10_spill] sm:$0xff] %v3646_v20 }
  0x39   : > { %v1060_v42 = vmax.bf16 %v619_v46, %v3542_v54  ;;  %v628_v7 = vrot.slane %v627_v44, 4  ;;  %v646_v35 = vrot.slane %v644_v5, 5  ;;  %v651_v2 = vrot.slane %v649_v4, 4 }
  0x3a   : > { %v3640_v47 = vmax.bf16 %v1059_v10, %v619_v46  ;;  %v3642_v0 = vmax.bf16 %v1150_v18, %v619_v46  ;;  %v641_v25 = vor.u32 %v640_v63, %v637_v48  ;;  %v658_v8 = vshll.u32 %v210_v27, 16  ;;  %v3657_v10 = vld [vmem:[%s3273_s22 + $0x5c] sm:$0x1]  ;;  %v3665_v18 = vld [vmem:[%s3273_s22 + $0x64] sm:$0x1] }
  0x3b   : > { %v633_v29 = vsel %vm3612_vm3, %v628_v7, %v632_v3  ;;  %v691_v54 = vshrl.u32 %v3305_v13, 16  ;;  %v694_v53 = vshll.u32 %v3305_v13, 16  ;;  %v654_v44 = vrot.slane %v652_v45, 5 }
  0x3c   : > { %v1061_v43 = vmax.bf16 %v633_v29, %v3552_v21  ;;  %v3653_v57 = vmax.bf16 %v1060_v42, %v633_v29  ;;  %v1243_v6 = vmax.bf16 %v3640_v47, %v633_v29  ;;  %v642_v48 = vrot.slane %v641_v25, 4 }
  0x3d   : > { %v660_v12 = vrot.slane %v658_v8, 5  ;;  %v693_v5 = vrot.slane %v691_v54, 4  ;;  %v696_v4 = vrot.slane %v694_v53, 5  ;;  %v700_v27 = vshll.u32 %v3646_v20, 16  ;;  %v3677_v20 = vld [vmem:[%s3273_s22 + $0x6c] sm:$0x1] }
  0x3e   : > { %v647_v3 = vsel %vm3612_vm3, %v642_v48, %v646_v35  ;;  %v705_v13 = vshrl.u32 %v3308_v14, 16  ;;  %v708_v21 = vshll.u32 %v3308_v14, 16  ;;  %v655_v7 = vor.u32 %v654_v44, %v651_v2 }
  0x3f   : > { %v483_v46 = vmax.bf16 %v647_v3, %v3500_v51  ;;  %v3668_v63 = vmax.bf16 %v1061_v43, %v647_v3  ;;  %v1244_v42 = vmax.bf16 %v3653_v57, %v647_v3  ;;  %v697_v47 = vor.u32 %v696_v4, %v693_v5 }
  0x40   : > { %v702_v25 = vrot.slane %v700_v27, 5  ;;  %v707_v45 = vrot.slane %v705_v13, 4  ;;  %v710_v35 = vrot.slane %v708_v21, 5  ;;  %v656_v29 = vrot.slane %v655_v7, 4 }
  0x41   : > { %v714_v8 = vshll.u32 %v3657_v10, 16  ;;  %v719_v54 = vshrl.u32 %v3314_v16, 16  ;;  %v722_v14 = vshll.u32 %v3314_v16, 16  ;;  %v698_v53 = vrot.slane %v697_v47, 4 }
  0x42   : > { %v711_v48 = vor.u32 %v710_v35, %v707_v45  ;;  %v728_v51 = vshll.u32 %v3665_v18, 16  ;;  %v733_v43 = vshrl.u32 %v3331_v22, 16  ;;  %v3681_v2 = vsel %vm3612_vm3, %v656_v29, %v660_v12 }
  0x43   : > { %v716_v57 = vrot.slane %v714_v8, 5  ;;  %v721_v44 = vrot.slane %v719_v54, 4  ;;  %v724_v5 = vrot.slane %v722_v14, 5  ;;  %v388_v4 = vmax.bf16 %v3681_v2, %v3402_v52 }
  0x44   : > { %v3686_v16 = vmax.bf16 %v3681_v2, %v483_v46  ;;  %v1245_v3 = vmax.bf16 %v3668_v63, %v3681_v2  ;;  %v703_v27 = vsel %vm3612_vm3, %v698_v53, %v702_v25  ;;  %v712_v21 = vrot.slane %v711_v48, 4  ;;  %v230_v48 = vld [vmem:[%s3273_s22 + $0x7c] sm:$0x1] }
  0x45   : > { %v1066_v13 = vmax.bf16 %v703_v27, %v3570_v11  ;;  %v1394_v12 = vmax.bf16 %v3642_v0, %v703_v27  ;;  %v725_v7 = vor.u32 %v724_v5, %v721_v44  ;;  %v730_v47 = vrot.slane %v728_v51, 5  ;;  %v228_v11 = vld [vmem:[%s3273_s22 + $0x74] sm:$0x1] }
  0x46   : > { %v735_v45 = vrot.slane %v733_v43, 4  ;;  %v736_v35 = vshll.u32 %v3331_v22, 16  ;;  %v742_v46 = vshll.u32 %v3677_v20, 16  ;;  %v717_v29 = vsel %vm3612_vm3, %v712_v21, %v716_v57 }
  0x47   : > { %v726_v63 = vrot.slane %v725_v7, 4  ;;  %v747_v8 = vshrl.u32 %v3334_v23, 16  ;;  %v750_v25 = vshll.u32 %v3334_v23, 16  ;;  %v1067_v0 = vmax.bf16 %v717_v29, %v3572_v24 }
  0x48   : > { %v3702_v54 = vmax.bf16 %v1066_v13, %v717_v29  ;;  %v1395_v14 = vmax.bf16 %v1243_v6, %v717_v29  ;;  %v3704_v53 = vmax.bf16 %v1394_v12, %v717_v29  ;;  %v738_v51 = vrot.slane %v736_v35, 5 }
  0x49   : > { %v3709_v22 = vsel %vm3612_vm3, %v726_v63, %v730_v47  ;;  %v744_v43 = vrot.slane %v742_v46, 5  ;;  %v749_v57 = vrot.slane %v747_v8, 4  ;;  %v752_v12 = vrot.slane %v750_v25, 5 }
  0x4a   : > { %v1068_v44 = vmax.bf16 %v3709_v22, %v3574_v38  ;;  %v3714_v23 = vmax.bf16 %v1067_v0, %v3709_v22  ;;  %v1250_v24 = vmax.bf16 %v3702_v54, %v3709_v22  ;;  %v1396_v6 = vmax.bf16 %v1244_v42, %v3709_v22 }
  0x4b   : > { %v1442_v5 = vmax.bf16 %v1395_v14, %v3709_v22  ;;  %v1488_v27 = vmax.bf16 %v3704_v53, %v3709_v22  ;;  %v739_v13 = vor.u32 %v738_v51, %v735_v45  ;;  %v756_v21 = vshll.u32 %v228_v11, 16 }
  0x4c   : > { %v761_v7 = vshrl.u32 %v3349_v28, 16  ;;  %v764_v38 = vshll.u32 %v3349_v28, 16  ;;  %v770_v47 = vshll.u32 %v230_v48, 16  ;;  %v753_v46 = vor.u32 %v752_v12, %v749_v57  ;;  %v3742_v12 = vld [vmem:[%s3273_s22 + $0xac] sm:$0x1] }
  0x4d   : > { %v740_v35 = vrot.slane %v739_v13, 4  ;;  %v803_v29 = vshrl.u32 %v3356_v31, 16  ;;  %v806_v42 = vshll.u32 %v3356_v31, 16  ;;  %v758_v63 = vrot.slane %v756_v21, 5  ;;  %v3739_v13 = vld [vmem:[%s3273_s22 + $0xa4] sm:$0x1] }
  0x4e   : > { %v763_v8 = vrot.slane %v761_v7, 4  ;;  %v766_v0 = vrot.slane %v764_v38, 5  ;;  %v772_v14 = vrot.slane %v770_v47, 5  ;;  %v754_v25 = vrot.slane %v753_v46, 4  ;;  %5576 = vst [vmem:[#allocation11_spill] sm:$0xff] %v3739_v13  ;;  %5577 = vst [vmem:[#allocation12_spill] sm:$0xff] %v3742_v12 }
  0x4f   : > { %v3728_v45 = vsel %vm3612_vm3, %v740_v35, %v744_v43  ;;  %v805_v11 = vrot.slane %v803_v29, 4  ;;  %v808_v28 = vrot.slane %v806_v42, 5  ;;  %v5578_v7 = vmax.bf16 %v3448_v30, %v3451_v34  ;;  %v3805_v31 = vld [vmem:[%s3273_s22 + $0xbc] sm:$0x1] }
  0x50   : > { %v1069_v48 = vmax.bf16 %v3728_v45, %v3579_v55  ;;  %v3733_v51 = vmax.bf16 %v1068_v44, %v3728_v45  ;;  %v1397_v57 = vmax.bf16 %v1245_v3, %v3728_v45  ;;  %v1443_v43 = vmax.bf16 %v1396_v6, %v3728_v45 }
  0x51   : > { %v3746_v21 = vmax.bf16 %v1442_v5, %v3728_v45  ;;  %v3750_v55 = vsel %vm3612_vm3, %v754_v25, %v758_v63  ;;  %v767_v44 = vor.u32 %v766_v0, %v763_v8  ;;  %v809_v30 = vor.u32 %v808_v28, %v805_v11  ;;  %v5580_v11 = vld [vmem:[#allocation2_spill] sm:$0xff] }
  0x52   : > { %v3756_v38 = vmax.bf16 %v3750_v55, %v5578_v7  ;;  %v3759_v3 = vmax.bf16 %v1069_v48, %v3750_v55  ;;  %v1252_v6 = vmax.bf16 %v3733_v51, %v3750_v55  ;;  %v547_v5 = vmax.bf16 %v3750_v55, %v3686_v16  ;;  %v3780_v51 = vld [vmem:[%s3273_s22 + $0xb4] sm:$0x1] }
  0x53   : > { %v1444_v47 = vmax.bf16 %v1397_v57, %v3750_v55  ;;  %v3767_v35 = vmax.bf16 %v1443_v43, %v3750_v55  ;;  %v768_v46 = vrot.slane %v767_v44, 4  ;;  %v812_v29 = vshll.u32 %v3739_v13, 16  ;;  %5579 = vst [vmem:[#allocation13_spill] sm:$0xff] %v3780_v51 }
  0x54   : > { %v817_v42 = vshrl.u32 %v3359_v32, 16  ;;  %v820_v63 = vshll.u32 %v3359_v32, 16  ;;  %v826_v8 = vshll.u32 %v3742_v12, 16  ;;  %v810_v16 = vrot.slane %v809_v30, 4 }
  0x55   : > { %v3775_v0 = vsel %vm3612_vm3, %v768_v46, %v772_v14  ;;  %v831_v25 = vshrl.u32 %v3369_v36, 16  ;;  %v834_v48 = vshll.u32 %v3369_v36, 16  ;;  %v5581_v28 = vmax.bf16 %v3451_v34, %v5580_v11 }
  0x56   : > { %v1253_v14 = vmax.bf16 %v3759_v3, %v3775_v0  ;;  %v3796_v36 = vmax.bf16 %v3775_v0, %v388_v4  ;;  %v3799_v43 = vmax.bf16 %v3775_v0, %v547_v5  ;;  %v3802_v55 = vmax.bf16 %v1444_v47, %v3775_v0  ;;  %v3813_v5 = vld [vmem:[%s3273_s22 + $0xc4] sm:$0x1] }
  0x57   : > { %v3786_v57 = vmax.bf16 %v3775_v0, %v5581_v28  ;;  %v814_v44 = vrot.slane %v812_v29, 5  ;;  %v819_v7 = vrot.slane %v817_v42, 4  ;;  %v822_v46 = vrot.slane %v820_v63, 5 }
  0x58   : > { %v828_v30 = vrot.slane %v826_v8, 5  ;;  %v833_v28 = vrot.slane %v831_v25, 4  ;;  %v836_v32 = vrot.slane %v834_v48, 5  ;;  %v840_v2 = vshll.u32 %v3780_v51, 16 }
  0x59   : > { %5582 = vst [vmem:[#allocation2_spill] sm:$0xff] %v3786_v57  ;;  %v815_v52 = vsel %vm3612_vm3, %v810_v16, %v814_v44  ;;  %v845_v4 = vshrl.u32 %v3378_v40, 16  ;;  %v848_v3 = vshll.u32 %v3378_v40, 16  ;;  %v823_v63 = vor.u32 %v822_v46, %v819_v7 }
  0x5a   : > { %v1402_v47 = vmax.bf16 %v1250_v24, %v815_v52  ;;  %v1074_v29 = vmax.bf16 %v815_v52, %v3591_v26  ;;  %v1640_v42 = vmax.bf16 %v1488_v27, %v815_v52  ;;  %v837_v8 = vor.u32 %v836_v32, %v833_v28 }
  0x5b   : > { %v842_v16 = vrot.slane %v840_v2, 5  ;;  %v847_v25 = vrot.slane %v845_v4, 4  ;;  %v850_v48 = vrot.slane %v848_v3, 5  ;;  %v824_v44 = vrot.slane %v823_v63, 4 }
  0x5c   : > { %v854_v40 = vshll.u32 %v3805_v31, 16  ;;  %v859_v51 = vshrl.u32 %v3381_v41, 16  ;;  %v862_v12 = vshll.u32 %v3381_v41, 16  ;;  %v838_v54 = vrot.slane %v837_v8, 4  ;;  %v3865_v8 = vld [vmem:[%s3273_s22 + $0xcc] sm:$0x1] }
  0x5d   : > { %v851_v24 = vor.u32 %v850_v48, %v847_v25  ;;  %v868_v26 = vshll.u32 %v3813_v5, 16  ;;  %v873_v13 = vshrl.u32 %v5580_v11, 16  ;;  %v829_v53 = vsel %vm3612_vm3, %v824_v44, %v828_v30  ;;  %5584 = vst [vmem:[#allocation14_spill] sm:$0xff] %v3865_v8 }
  0x5e   : > { %v856_v22 = vrot.slane %v854_v40, 5  ;;  %v861_v27 = vrot.slane %v859_v51, 4  ;;  %v864_v32 = vrot.slane %v862_v12, 5  ;;  %v5583_v7 = vmax.bf16 %v3714_v23, %v3728_v45 }
  0x5f   : > { %v1449_v28 = vmax.bf16 %v1402_v47, %v829_v53  ;;  %v1075_v52 = vmax.bf16 %v829_v53, %v3593_v9  ;;  %v3833_v41 = vmax.bf16 %v1074_v29, %v829_v53  ;;  %v1641_v2 = vmax.bf16 %v3746_v21, %v829_v53 }
  0x60   : > { %v1403_v46 = vmax.bf16 %v5583_v7, %v829_v53  ;;  %v1687_v4 = vmax.bf16 %v1640_v42, %v829_v53  ;;  %v3838_v30 = vsel %vm3612_vm3, %v838_v54, %v842_v16  ;;  %v852_v51 = vrot.slane %v851_v24, 4 }
  0x61   : > { %v1404_v12 = vmax.bf16 %v1252_v6, %v3838_v30  ;;  %v3843_v45 = vmax.bf16 %v1449_v28, %v3838_v30  ;;  %v529_v9 = vmax.bf16 %v3838_v30, %v3511_v37  ;;  %v1642_v21 = vmax.bf16 %v3767_v35, %v3838_v30  ;;  %v3868_v35 = vld [vmem:[%s3273_s22 + $0xf4] sm:$0x1] }
  0x62   : > { %v1450_v23 = vmax.bf16 %v1403_v46, %v3838_v30  ;;  %v3850_v3 = vmax.bf16 %v1075_v52, %v3838_v30  ;;  %v1258_v47 = vmax.bf16 %v3833_v41, %v3838_v30  ;;  %v3855_v29 = vmax.bf16 %v1641_v2, %v3838_v30 }
  0x63   : > { %v3858_v6 = vmax.bf16 %v1687_v4, %v3838_v30  ;;  %v3862_v42 = vsel %vm3612_vm3, %v852_v51, %v856_v22  ;;  %v865_v37 = vor.u32 %v864_v32, %v861_v27  ;;  %v870_v63 = vrot.slane %v868_v26, 5  ;;  %v5587_v51 = vld [vmem:[#allocation3_spill] sm:$0xff] }
  0x64   : > { %v1405_v16 = vmax.bf16 %v1253_v14, %v3862_v42  ;;  %v1451_v25 = vmax.bf16 %v1404_v12, %v3862_v42  ;;  %v3873_v48 = vmax.bf16 %v1450_v23, %v3862_v42  ;;  %v5585_v44 = vmax.bf16 %v3476_v62, %v3473_v56 }
  0x65   : > { %v3880_v54 = vmax.bf16 %v3862_v42, %v529_v9  ;;  %v1643_v24 = vmax.bf16 %v3802_v55, %v3862_v42  ;;  %v3885_v26 = vmax.bf16 %v1642_v21, %v3862_v42  ;;  %v866_v22 = vrot.slane %v865_v37, 4  ;;  %v3919_v9 = vld [vmem:[%s3273_s22 + $0xfc] sm:$0x1]  ;;  %v3930_v37 = vld [vmem:[%s3273_s22 + $0x104] sm:$0x1] }
  0x66   : > { %v498_v40 = vmax.bf16 %v3862_v42, %v5585_v44  ;;  %v875_v56 = vrot.slane %v873_v13, 4  ;;  %v876_v62 = vshll.u32 %v5580_v11, 16  ;;  %v882_v27 = vshll.u32 %v3865_v8, 16 }
  0x67   : > { %v915_v32 = vshrl.u32 %v3414_v58, 16  ;;  %v918_v55 = vshll.u32 %v3414_v58, 16  ;;  %v924_v7 = vshll.u32 %v3868_v35, 16  ;;  %v3898_v46 = vsel %vm3612_vm3, %v866_v22, %v870_v63  ;;  %v3171_v63 = vld [vmem:[%s3273_s22] sm:$0xf] }
  0x68   : > { %v878_v28 = vrot.slane %v876_v62, 5  ;;  %v929_v52 = vshrl.u32 %v3417_v59, 16  ;;  %v932_v13 = vshll.u32 %v3417_v59, 16  ;;  %v5586_v11 = vmax.bf16 %v3775_v0, %v3756_v38 }
  0x69   : > { %v1452_v4 = vmax.bf16 %v1405_v16, %v3898_v46  ;;  %v3910_v58 = vmax.bf16 %v1451_v25, %v3898_v46  ;;  %v5588_v12 = vmax.bf16 %v3451_v34, %v5587_v51  ;;  %v1154_v59 = vmax.bf16 %v3799_v43, %v3898_v46 }
  0x6a   : > { %v3906_v2 = vmax.bf16 %v3898_v46, %v5586_v11  ;;  %v530_v38 = vmax.bf16 %v3898_v46, %v498_v40  ;;  %v1076_v0 = vmax.bf16 %v3898_v46, %v3880_v54  ;;  %v3927_v21 = vmax.bf16 %v1643_v24, %v3898_v46 }
  0x6b   : > { %v3916_v23 = vmax.bf16 %v3898_v46, %v5588_v12  ;;  %v879_v16 = vor.u32 %v878_v28, %v875_v56  ;;  %v884_v25 = vrot.slane %v882_v27, 5  ;;  %v917_v44 = vrot.slane %v915_v32, 4  ;;  %v3944_v28 = vld [vmem:[%s3273_s22 + $0x10c] sm:$0x1] }
  0x6c   : > { %v920_v22 = vrot.slane %v918_v55, 5  ;;  %v926_v62 = vrot.slane %v924_v7, 5  ;;  %v931_v43 = vrot.slane %v929_v52, 4  ;;  %v934_v11 = vrot.slane %v932_v13, 5 }
  0x6d   : > { %v880_v40 = vrot.slane %v879_v16, 4  ;;  %v938_v51 = vshll.u32 %v3919_v9, 16  ;;  %v943_v54 = vshrl.u32 %v3420_v60, 16  ;;  %v946_v24 = vshll.u32 %v3420_v60, 16 }
  0x6e   : > { %v921_v12 = vor.u32 %v920_v22, %v917_v44  ;;  %v935_v53 = vor.u32 %v934_v11, %v931_v43  ;;  %v952_v14 = vshll.u32 %v3930_v37, 16  ;;  %v957_v56 = vshrl.u32 %v3431_v1, 16 }
  0x6f   : > { %v3941_v27 = vsel %vm3612_vm3, %v880_v40, %v884_v25  ;;  %v940_v32 = vrot.slane %v938_v51, 5  ;;  %v945_v55 = vrot.slane %v943_v54, 4  ;;  %v948_v7 = vrot.slane %v946_v24, 5 }
  0x70   : > { %v3951_v13 = vmax.bf16 %v1452_v4, %v3941_v27  ;;  %v3960_v22 = vmax.bf16 %v1154_v59, %v3941_v27  ;;  %v3963_v43 = vmax.bf16 %v3941_v27, %v530_v38  ;;  %v922_v4 = vrot.slane %v921_v12, 4 }
  0x71   : > { %v936_v40 = vrot.slane %v935_v53, 4  ;;  %v949_v51 = vor.u32 %v948_v7, %v945_v55  ;;  %v954_v54 = vrot.slane %v952_v14, 5  ;;  %v959_v24 = vrot.slane %v957_v56, 4 }
  0x72   : > { %v960_v16 = vshll.u32 %v3431_v1, 16  ;;  %v966_v52 = vshll.u32 %v3944_v28, 16  ;;  %v927_v59 = vsel %vm3612_vm3, %v922_v4, %v926_v62  ;;  %v1275_v60 = vshrl.u32 %v3457_v39, 16 }
  0x73   : > { %v941_v38 = vsel %vm3612_vm3, %v936_v40, %v940_v32  ;;  %v950_v44 = vrot.slane %v949_v51, 4  ;;  %v1648_v12 = vmax.bf16 %v3843_v45, %v927_v59  ;;  %v1410_v14 = vmax.bf16 %v1258_v47, %v927_v59  ;;  %v3988_v45 = vld [vmem:[%s3273_s22 + $0x144] sm:$0x1] }
  0x74   : > { %v1649_v53 = vmax.bf16 %v3873_v48, %v941_v38  ;;  %v5589_v1 = vmax.bf16 %v3850_v3, %v3862_v42  ;;  %v962_v32 = vrot.slane %v960_v16, 5  ;;  %v968_v55 = vrot.slane %v966_v52, 5  ;;  %v4004_v16 = vld [vmem:[%s3273_s22 + $0x14c] sm:$0x1] }
  0x75   : > { %v3984_v62 = vsel %vm3612_vm3, %v950_v44, %v954_v54  ;;  %v1082_v7 = vmax.bf16 %v927_v59, %v3608_v49  ;;  %v3990_v4 = vmax.bf16 %v1648_v12, %v941_v38  ;;  %v1457_v41 = vmax.bf16 %v1410_v14, %v941_v38  ;;  %v5590_v14 = vld [vmem:[#allocation5_spill] sm:$0xff] }
  0x76   : > { %v1411_v56 = vmax.bf16 %v5589_v1, %v941_v38  ;;  %v505_v30 = vmax.bf16 %v3984_v62, %v3540_v15  ;;  %v1650_v3 = vmax.bf16 %v3910_v58, %v3984_v62  ;;  %v3997_v47 = vmax.bf16 %v1649_v53, %v3984_v62 }
  0x77   : > { %v4000_v48 = vmax.bf16 %v1076_v0, %v3984_v62  ;;  %v963_v52 = vor.u32 %v962_v32, %v959_v24  ;;  %v1504_v15 = vmax.bf16 %v1457_v41, %v3984_v62  ;;  %v1083_v58 = vmax.bf16 %v941_v38, %v3618_v50  ;;  %v4022_v32 = vld [vmem:[%s3273_s22 + $0x154] sm:$0x1] }
  0x78   : > { %v1458_v49 = vmax.bf16 %v1411_v56, %v3984_v62  ;;  %v1174_v40 = vmax.bf16 %v1082_v7, %v941_v38  ;;  %v1277_v54 = vrot.slane %v1275_v60, 4  ;;  %v1278_v59 = vshll.u32 %v3457_v39, 16  ;;  %v5591_v39 = vld [vmem:[#allocation7_spill] sm:$0xff] }
  0x79   : > { %v964_v51 = vrot.slane %v963_v52, 4  ;;  %v1284_v0 = vshll.u32 %v3988_v45, 16  ;;  %v1175_v12 = vmax.bf16 %v1083_v58, %v3984_v62  ;;  %v1289_v53 = vshrl.u32 %v5590_v14, 16 }
  0x7a   : > { %v1266_v24 = vmax.bf16 %v1174_v40, %v3984_v62  ;;  %v1292_v1 = vshll.u32 %v5590_v14, 16  ;;  %v1280_v50 = vrot.slane %v1278_v59, 5  ;;  %v1298_v60 = vshll.u32 %v4004_v16, 16 }
  0x7b   : > { %v4018_v56 = vsel %vm3612_vm3, %v964_v51, %v968_v55  ;;  %v1286_v38 = vrot.slane %v1284_v0, 5  ;;  %v1291_v14 = vrot.slane %v1289_v53, 4  ;;  %v1312_v55 = vshll.u32 %v4022_v32, 16 }
  0x7c   : > { %v4027_v41 = vmax.bf16 %v4018_v56, %v505_v30  ;;  %v4032_v58 = vmax.bf16 %v1650_v3, %v4018_v56  ;;  %v1260_v51 = vmax.bf16 %v4000_v48, %v4018_v56  ;;  %v1505_v59 = vmax.bf16 %v1458_v49, %v4018_v56  ;;  %v5592_v3 = vld [vmem:[#allocation6_spill] sm:$0xff]  ;;  %v5593_v48 = vld [vmem:[#allocation8_spill] sm:$0xff] }
  0x7d   : > { %v1267_v30 = vmax.bf16 %v1175_v12, %v4018_v56  ;;  %v1281_v0 = vor.u32 %v1280_v50, %v1277_v54  ;;  %v1294_v25 = vrot.slane %v1292_v1, 5  ;;  %v1300_v7 = vrot.slane %v1298_v60, 5  ;;  %v3172_v1 = vld [vmem:[%s3273_s22 + $0x8] sm:$0xf] }
  0x7e   : > { %v1303_v52 = vshrl.u32 %v5592_v3, 16  ;;  %v1306_v44 = vshll.u32 %v5592_v3, 16  ;;  %v3010_v34 = vrot.slane %v3171_v63, 9  ;;  %v1835_v57 = vrot.slane %v5593_v48, 5  ;;  %v5596_v48 = vld [vmem:[#allocation9_spill] sm:$0xff] }
  0x7f   : > { %v1282_v11 = vrot.slane %v1281_v0, 4  ;;  %v1295_v40 = vor.u32 %v1294_v25, %v1291_v14  ;;  %v1314_v54 = vrot.slane %v1312_v55, 5  ;;  %v3011_v50 = vrot.slane %v3172_v1, 9 }
  0x80   : > { %v1305_v49 = vrot.slane %v1303_v52, 4  ;;  %v1308_v12 = vrot.slane %v1306_v44, 5  ;;  %v1836_v63 = vsel %vm4049_vm6, %v3010_v34, %v1835_v57  ;;  %v1839_v52 = vrot.slane %v3585_v61, 5 }
  0x81   : > { %v1287_v60 = vsel %vm3612_vm3, %v1282_v11, %v1286_v38  ;;  %v1296_v25 = vrot.slane %v1295_v40, 4  ;;  %v1993_v14 = vmax.bf16 %v1836_v63, %v3858_v6  ;;  %v3173_v38 = vld [vmem:[%s3273_s22 + $0x10] sm:$0xf]  ;;  %v1843_v34 = vrot.slane %v5596_v48, 5 }
  0x82   : > { %v1656_v0 = vmax.bf16 %v1504_v15, %v1287_v60  ;;  %v1309_v44 = vor.u32 %v1308_v12, %v1305_v49  ;;  %v4059_v55 = vmax.bf16 %v1287_v60, %v1266_v24  ;;  %v1840_v11 = vsel %vm4049_vm6, %v3011_v50, %v1839_v52  ;;  %v3174_v60 = vld [vmem:[%s3273_s22 + $0x18] sm:$0xf] }
  0x83   : > { %v4064_v3 = vsel %vm3612_vm3, %v1296_v25, %v1300_v7  ;;  %v3012_v40 = vrot.slane %v3173_v38, 9  ;;  %v5597_v7 = vmax.bf16 %v3855_v29, %v3862_v42  ;;  %v2053_v12 = vmax.bf16 %v1993_v14, %v1840_v11 }
  0x84   : > { %v1657_v61 = vmax.bf16 %v1505_v59, %v4064_v3  ;;  %v4072_v57 = vmax.bf16 %v1656_v0, %v4064_v3  ;;  %v1310_v15 = vrot.slane %v1309_v44, 4  ;;  %v4075_v6 = vmax.bf16 %v4064_v3, %v1267_v30 }
  0x85   : > { %v1994_v49 = vmax.bf16 %v1840_v11, %v5597_v7  ;;  %v1844_v1 = vsel %vm4049_vm6, %v3012_v40, %v1843_v34  ;;  %v5598_v30 = vmax.bf16 %v3885_v26, %v3898_v46  ;;  %v3013_v25 = vrot.slane %v3174_v60, 9  ;;  %v3176_v40 = vld [vmem:[%s3273_s22 + $0x50] sm:$0xf] }
  0x86   : > { %v4086_v59 = vsel %vm3612_vm3, %v1310_v15, %v1314_v54  ;;  %v1847_v63 = vrot.slane %v3605_v33, 5  ;;  %v2113_v46 = vmax.bf16 %v2053_v12, %v1844_v1  ;;  %v3175_v33 = vld [vmem:[%s3273_s22 + $0x20] sm:$0xf]  ;;  %v5599_v14 = vmax.bf16 %v3927_v21, %v3941_v27  ;;  %v3177_v15 = vld [vmem:[%s3273_s22 + $0x58] sm:$0xf] }
  0x87   : > { %v1995_v50 = vmax.bf16 %v1844_v1, %v5598_v30  ;;  %v569_v29 = vmax.bf16 %v4086_v59, %v4027_v41  ;;  %v4096_v42 = vmax.bf16 %v4086_v59, %v1260_v51  ;;  %v4099_v52 = vmax.bf16 %v1657_v61, %v4086_v59  ;;  %v5600_v61 = vld [vmem:[#allocation10_spill] sm:$0xff] }
  0x88   : > { %v1750_v54 = vmax.bf16 %v4072_v57, %v4086_v59  ;;  %v2054_v26 = vmax.bf16 %v1994_v49, %v1844_v1  ;;  %v1848_v0 = vsel %vm4049_vm6, %v3013_v25, %v1847_v63  ;;  %v3014_v44 = vrot.slane %v3175_v33, 9  ;;  %v3178_v1 = vld [vmem:[%s3273_s22 + $0x60] sm:$0xf] }
  0x89   : > { %v1996_v51 = vmax.bf16 %v1848_v0, %v5599_v14  ;;  %v2055_v11 = vmax.bf16 %v1995_v50, %v1848_v0  ;;  %v1851_v38 = vrot.slane %v3623_v17, 5  ;;  %v3018_v48 = vrot.slane %v3176_v40, 9  ;;  %v3179_v50 = vld [vmem:[%s3273_s22 + $0x68] sm:$0xf] }
  0x8a   : > { %v2114_v34 = vmax.bf16 %v2054_v26, %v1848_v0  ;;  %v1867_v57 = vrot.slane %v5600_v61, 5  ;;  %v3019_v7 = vrot.slane %v3177_v15, 9  ;;  %v1871_v49 = vrot.slane %v3657_v10, 5 }
  0x8b   : > { %v4116_v12 = vsel %vm4049_vm6, %v3014_v44, %v1851_v38  ;;  %v3020_v30 = vrot.slane %v3178_v1, 9  ;;  %v1875_v21 = vrot.slane %v3665_v18, 5  ;;  %v3021_v60 = vrot.slane %v3179_v50, 9  ;;  %v3181_v1 = vld [vmem:[%s3273_s22 + $0xa8] sm:$0xf] }
  0x8c   : > { %v2056_v25 = vmax.bf16 %v1996_v51, %v4116_v12  ;;  %v2115_v63 = vmax.bf16 %v2055_v11, %v4116_v12  ;;  %v1868_v10 = vsel %vm4049_vm6, %v3018_v48, %v1867_v57  ;;  %v5601_v26 = vmax.bf16 %v3990_v4, %v3984_v62  ;;  %v3180_v4 = vld [vmem:[%s3273_s22 + $0xa0] sm:$0xf] }
  0x8d   : > { %v2201_v33 = vmax.bf16 %v2113_v46, %v1868_v10  ;;  %v1872_v18 = vsel %vm4049_vm6, %v3019_v7, %v1871_v49  ;;  %v1876_v44 = vsel %vm4049_vm6, %v3020_v30, %v1875_v21  ;;  %v5602_v14 = vmax.bf16 %v3997_v47, %v4018_v56  ;;  %v5603_v7 = vld [vmem:[#allocation11_spill] sm:$0xff] }
  0x8e   : > { %v2001_v0 = vmax.bf16 %v1868_v10, %v5601_v26  ;;  %v2202_v11 = vmax.bf16 %v2114_v34, %v1872_v18  ;;  %v1744_v38 = vmax.bf16 %v1876_v44, %v4032_v58  ;;  %v2203_v40 = vmax.bf16 %v2115_v63, %v1876_v44  ;;  %v5604_v34 = vld [vmem:[#allocation12_spill] sm:$0xff] }
  0x8f   : > { %v2002_v51 = vmax.bf16 %v1872_v18, %v5602_v14  ;;  %v2240_v61 = vmax.bf16 %v2201_v33, %v1872_v18  ;;  %v1879_v62 = vrot.slane %v3677_v20, 5  ;;  %v3026_v46 = vrot.slane %v3180_v4, 9 }
  0x90   : > { %v2061_v48 = vmax.bf16 %v2001_v0, %v1872_v18  ;;  %v2241_v15 = vmax.bf16 %v2202_v11, %v1876_v44  ;;  %v1899_v49 = vrot.slane %v5603_v7, 5  ;;  %v3027_v30 = vrot.slane %v3181_v1, 9 }
  0x91   : > { %v2062_v57 = vmax.bf16 %v2002_v51, %v1876_v44  ;;  %v2279_v50 = vmax.bf16 %v2240_v61, %v1876_v44  ;;  %v1880_v47 = vsel %vm4049_vm6, %v3021_v60, %v1879_v62  ;;  %v1903_v58 = vrot.slane %v5604_v34, 5  ;;  %v4158_v61 = vld [vmem:[%s3273_s22 + $0xb0] sm:$0xf] }
  0x92   : > { %v2121_v21 = vmax.bf16 %v2061_v48, %v1876_v44  ;;  %v5605_v63 = vmax.bf16 %v3951_v13, %v4018_v56  ;;  %v2003_v10 = vmax.bf16 %v1880_v47, %v1744_v38  ;;  %v4150_v0 = vmax.bf16 %v2056_v25, %v1880_v47  ;;  %5606 = vst [vmem:[#allocation3_spill] sm:$0xff] %v4158_v61 }
  0x93   : > { %v2122_v26 = vmax.bf16 %v2062_v57, %v1880_v47  ;;  %v2242_v33 = vmax.bf16 %v2203_v40, %v1880_v47  ;;  %v2280_v18 = vmax.bf16 %v2241_v15, %v1880_v47  ;;  %v1900_v44 = vsel %vm4049_vm6, %v3026_v46, %v1899_v49  ;;  %v5607_v40 = vld [vmem:[#allocation13_spill] sm:$0xff] }
  0x94   : > { %v4148_v20 = vmax.bf16 %v1880_v47, %v5605_v63  ;;  %v1904_v60 = vsel %vm4049_vm6, %v3027_v30, %v1903_v58  ;;  %v2209_v14 = vmax.bf16 %v2121_v21, %v1900_v44  ;;  %v2009_v51 = vmax.bf16 %v1900_v44, %v1750_v54  ;;  %v4165_v15 = vld [vmem:[%s3273_s22 + $0xb8] sm:$0xf]  ;;  %v4169_v54 = vld [vmem:[%s3273_s22 + $0x160] sm:$0xf]  ;;  %v300_v47 = vld [vmem:[%s3273_s22 + $0x194] sm:$0x1] }
  0x95   : > { %v2367_v11 = vmax.bf16 %v2279_v50, %v1900_v44  ;;  %v2210_v13 = vmax.bf16 %v2122_v26, %v1904_v60  ;;  %v1751_v48 = vmax.bf16 %v1904_v60, %v4099_v52  ;;  %v2368_v38 = vmax.bf16 %v2280_v18, %v1904_v60  ;;  %5608 = vst [vmem:[#allocation5_spill] sm:$0xff] %v4165_v15  ;;  %v4214_v44 = vld [vmem:[%s3273_s22 + $0x1b0] sm:$0xf] }
  0x96   : > { %v3028_v25 = vrot.slane %v4158_v61, 9  ;;  %v1907_v62 = vrot.slane %v5607_v40, 5  ;;  %v4162_v4 = vmax.bf16 %v2209_v14, %v1904_v60  ;;  %v2069_v46 = vmax.bf16 %v2009_v51, %v1904_v60  ;;  %5609 = vst [vmem:[#allocation7_spill] sm:$0xff] %v4169_v54 }
  0x97   : > { %v2406_v57 = vmax.bf16 %v2367_v11, %v1904_v60  ;;  %v3029_v7 = vrot.slane %v4165_v15, 9  ;;  %v1911_v49 = vrot.slane %v3805_v31, 5  ;;  %v5610_v1 = vmax.bf16 %v4018_v56, %v5591_v39 }
  0x98   : > { %v4173_v52 = vsel %vm4049_vm6, %v3028_v25, %v1907_v62  ;;  %v379_v40 = vmax.bf16 %v4214_v44, %v4169_v54  ;;  %v1331_v41 = vshrl.u32 %v4169_v54, 16  ;;  %v1334_v24 = vshll.u32 %v4169_v54, 16 }
  0x99   : > { %v4180_v30 = vmax.bf16 %v5610_v1, %v4169_v54  ;;  %v2063_v21 = vmax.bf16 %v2003_v10, %v4173_v52  ;;  %v4184_v50 = vmax.bf16 %v2210_v13, %v4173_v52  ;;  %v1459_v34 = vmax.bf16 %v4173_v52, %v4096_v42 }
  0x9a   : > { %v2281_v31 = vmax.bf16 %v2242_v33, %v4173_v52  ;;  %v4192_v58 = vmax.bf16 %v4173_v52, %v1751_v48  ;;  %v4195_v39 = vmax.bf16 %v2069_v46, %v4173_v52  ;;  %v2407_v63 = vmax.bf16 %v2368_v38, %v4173_v52  ;;  %v4240_v38 = vld [vmem:[%s3273_s22 + $0x114] sm:$0x1] }
  0x9b   : > { %v2445_v10 = vmax.bf16 %v2406_v57, %v4173_v52  ;;  %v4201_v26 = vsel %vm4049_vm6, %v3029_v7, %v1911_v49  ;;  %v1084_v42 = vmax.bf16 %v569_v29, %v4169_v54  ;;  %v5611_v33 = vmax.bf16 %v3941_v27, %v3916_v23  ;;  %5614 = vst [vmem:[#allocation8_spill] sm:$0xff] %v4240_v38  ;;  %v4256_v7 = vld [vmem:[%s3273_s22 + $0x100] sm:$0xf]  ;;  %v4259_v49 = vld [vmem:[%s3273_s22 + $0x108] sm:$0xf] }
  0x9c   : > { %v4219_v14 = vmax.bf16 %v2063_v21, %v4201_v26  ;;  %v5612_v29 = vmax.bf16 %v4018_v56, %v3963_v43  ;;  %v4230_v51 = vmax.bf16 %v4201_v26, %v1459_v34  ;;  %v4235_v13 = vmax.bf16 %v2281_v31, %v4201_v26  ;;  %v4244_v56 = vld [vmem:[%s3273_s22 + $0x15c] sm:$0x1]  ;;  %v4264_v21 = vld [vmem:[%s3273_s22 + $0x110] sm:$0xf] }
  0x9d   : > { %v4211_v18 = vmax.bf16 %v5611_v33, %v4169_v54  ;;  %v2446_v43 = vmax.bf16 %v2407_v63, %v4201_v26  ;;  %v506_v62 = vmax.bf16 %v4180_v30, %v4214_v44  ;;  %v1176_v57 = vmax.bf16 %v1084_v42, %v4214_v44  ;;  %5615 = vst [vmem:[#allocation9_spill] sm:$0xff] %v4264_v21  ;;  %v4268_v63 = vld [vmem:[%s3273_s22 + $0x164] sm:$0x1]  ;;  %v4273_v42 = vld [vmem:[%s3273_s22 + $0x158] sm:$0xf] }
  0x9e   : > { %v4227_v23 = vmax.bf16 %v4201_v26, %v5612_v29  ;;  %5613 = vst [vmem:[#allocation6_spill] sm:$0xff] %v4235_v13  ;;  %v1658_v46 = vmax.bf16 %v4230_v51, %v4169_v54  ;;  %v345_v1 = vmax.bf16 %v4259_v49, %v4256_v7  ;;  %v971_v34 = vshrl.u32 %v4264_v21, 16  ;;  %5616 = vst [vmem:[#allocation10_spill] sm:$0xff] %v4268_v63 }
  0x9f   : > { %v3070_v31 = vcombine.low %v2445_v10, %v2446_v43  ;;  %v974_v30 = vshll.u32 %v4264_v21, 16  ;;  %v980_v33 = vshll.u32 %v4240_v38, 16  ;;  %v1317_v44 = vshrl.u32 %v4273_v42, 16  ;;  %v3188_v21 = vld [vmem:[%s3273_s22 + $0x190] sm:$0xf] }
  0xa0   : > { %v1261_v25 = vmax.bf16 %v4227_v23, %v4169_v54  ;;  %v1268_v29 = vmax.bf16 %v1176_v57, %v345_v1  ;;  %v973_v23 = vrot.slane %v971_v34, 4  ;;  %v1320_v51 = vshll.u32 %v4273_v42, 16 }
  0xa1   : > { %v1326_v11 = vshll.u32 %v4244_v56, 16  ;;  %3126 = vmatprep.mubr.msk.bf16.mxu0 %vm2558_vm7, %v3070_v31  ;;  %v976_v17 = vrot.slane %v974_v30, 5  ;;  %v982_v10 = vrot.slane %v980_v33, 5  ;;  %v1319_v43 = vrot.slane %v1317_v44, 4 }
  0xa2   : > { %v1322_v48 = vrot.slane %v1320_v51, 5  ;;  %v1340_v57 = vshll.u32 %v4268_v63, 16  ;;  %v1333_v34 = vrot.slane %v1331_v41, 4  ;;  %v1466_v38 = vmax.bf16 %v4075_v6, %v4086_v59  ;;  %v3189_v63 = vld [vmem:[%s3273_s22 + $0x198] sm:$0xf] }
  0xa3   : > { %v1328_v60 = vrot.slane %v1326_v11, 5  ;;  %v977_v1 = vor.u32 %v976_v17, %v973_v23  ;;  %v5617_v31 = vmax.bf16 %v4059_v55, %v4064_v3  ;;  %v1336_v44 = vrot.slane %v1334_v24, 5 }
  0xa4   : > { %v1323_v33 = vor.u32 %v1322_v48, %v1319_v43  ;;  %v1342_v51 = vrot.slane %v1340_v57, 5  ;;  %v1521_v11 = vshrl.u32 %v3188_v21, 16  ;;  %v1524_v54 = vshll.u32 %v3188_v21, 16 }
  0xa5   : > { %v4289_v30 = vmax.bf16 %v5617_v31, %v4086_v59  ;;  %v978_v15 = vrot.slane %v977_v1, 4  ;;  %v1530_v61 = vshll.u32 %v300_v47, 16  ;;  %v1535_v17 = vshrl.u32 %v3189_v63, 16 }
  0xa6   : > { %v1324_v41 = vrot.slane %v1323_v33, 4  ;;  %v1337_v23 = vor.u32 %v1336_v44, %v1333_v34  ;;  %v1523_v13 = vrot.slane %v1521_v11, 4  ;;  %v1538_v6 = vshll.u32 %v3189_v63, 16  ;;  %v302_v33 = vld [vmem:[%s3273_s22 + $0x19c] sm:$0x1] }
  0xa7   : > { %v4295_v8 = vsel %vm3612_vm3, %v978_v15, %v982_v10  ;;  %v1526_v55 = vrot.slane %v1524_v54, 5  ;;  %v1532_v3 = vrot.slane %v1530_v61, 5  ;;  %v1537_v59 = vrot.slane %v1535_v17, 4 }
  0xa8   : > { %v4298_v24 = vmax.bf16 %v4295_v8, %v379_v40  ;;  %v5618_v48 = vmax.bf16 %v3941_v27, %v3906_v2  ;;  %v538_v21 = vmax.bf16 %v4295_v8, %v506_v62  ;;  %v1420_v63 = vmax.bf16 %v1268_v29, %v4295_v8 }
  0xa9   : > { %v5619_v61 = vmax.bf16 %v4201_v26, %v4148_v20  ;;  %v2211_v54 = vmax.bf16 %v4219_v14, %v4295_v8  ;;  %v499_v2 = vmax.bf16 %v4295_v8, %v4211_v18  ;;  %v1413_v40 = vmax.bf16 %v1261_v25, %v4295_v8  ;;  %v304_v18 = vld [vmem:[%s3273_s22 + $0x1a4] sm:$0x1] }
  0xaa   : > { %v4304_v47 = vmax.bf16 %v4295_v8, %v5618_v48  ;;  %v1705_v10 = vmax.bf16 %v1658_v46, %v4295_v8  ;;  %v1329_v62 = vsel %vm3612_vm3, %v1324_v41, %v1328_v60  ;;  %v1338_v29 = vrot.slane %v1337_v23, 4 }
  0xab   : > { %v4312_v15 = vmax.bf16 %v5619_v61, %v4295_v8  ;;  %v1527_v43 = vor.u32 %v1526_v55, %v1523_v13  ;;  %v570_v57 = vmax.bf16 %v1329_v62, %v538_v21  ;;  %v1467_v20 = vmax.bf16 %v1420_v63, %v1329_v62  ;;  %v306_v13 = vld [vmem:[%s3273_s22 + $0x1ac] sm:$0x1]  ;;  %v3190_v21 = vld [vmem:[%s3273_s22 + $0x1a0] sm:$0xf] }
  0xac   : > { %v1460_v1 = vmax.bf16 %v1413_v40, %v1329_v62  ;;  %v5620_v34 = vmax.bf16 %v4192_v58, %v4201_v26  ;;  %v1752_v44 = vmax.bf16 %v1705_v10, %v1329_v62  ;;  %v4331_v25 = vsel %vm3612_vm3, %v1338_v29, %v1342_v51 }
  0xad   : > { %v1513_v46 = vmax.bf16 %v1466_v38, %v1329_v62  ;;  %v1528_v60 = vrot.slane %v1527_v43, 4  ;;  %v4337_v17 = vmax.bf16 %v4331_v25, %v570_v57  ;;  %v1514_v58 = vmax.bf16 %v1467_v20, %v4331_v25 }
  0xae   : > { %v4325_v31 = vmax.bf16 %v5620_v34, %v1329_v62  ;;  %v4341_v41 = vmax.bf16 %v4331_v25, %v499_v2  ;;  %v4344_v23 = vmax.bf16 %v1460_v1, %v4331_v25  ;;  %v4347_v51 = vmax.bf16 %v1752_v44, %v4331_v25  ;;  %v3191_v62 = vld [vmem:[%s3273_s22 + $0x1a8] sm:$0xf] }
  0xaf   : > { %v1533_v38 = vsel %vm3612_vm3, %v1528_v60, %v1532_v3  ;;  %v1540_v55 = vrot.slane %v1538_v6, 5  ;;  %v1544_v48 = vshll.u32 %v302_v33, 16  ;;  %v1549_v63 = vshrl.u32 %v3190_v21, 16 }
  0xb0   : > { %v1552_v61 = vshll.u32 %v3190_v21, 16  ;;  %v1558_v40 = vshll.u32 %v304_v18, 16  ;;  %v1563_v2 = vshrl.u32 %v3191_v62, 16  ;;  %v1566_v29 = vshll.u32 %v3191_v62, 16  ;;  %v3192_v21 = vld [vmem:[%s3273_s22 + $0xf0] sm:$0xf] }
  0xb1   : > { %v1541_v10 = vor.u32 %v1540_v55, %v1537_v59  ;;  %v1572_v43 = vshll.u32 %v306_v13, 16  ;;  %v1546_v57 = vrot.slane %v1544_v48, 5  ;;  %v1551_v20 = vrot.slane %v1549_v63, 4  ;;  %v3193_v62 = vld [vmem:[%s3273_s22 + $0xf8] sm:$0xf] }
  0xb2   : > { %v1554_v1 = vrot.slane %v1552_v61, 5  ;;  %v1560_v34 = vrot.slane %v1558_v40, 5  ;;  %v1565_v11 = vrot.slane %v1563_v2, 4  ;;  %v1568_v3 = vrot.slane %v1566_v29, 5 }
  0xb3   : > { %v1542_v44 = vrot.slane %v1541_v10, 4  ;;  %v1574_v6 = vrot.slane %v1572_v43, 5  ;;  %v1664_v60 = vmax.bf16 %v1533_v38, %v4289_v30  ;;  %v3034_v18 = vrot.slane %v3192_v21, 9 }
  0xb4   : > { %v1555_v33 = vor.u32 %v1554_v1, %v1551_v20  ;;  %v1931_v59 = vrot.slane %v3868_v35, 5  ;;  %v1569_v13 = vor.u32 %v1568_v3, %v1565_v11  ;;  %v3035_v48 = vrot.slane %v3193_v62, 9 }
  0xb5   : > { %v1547_v55 = vsel %vm3612_vm3, %v1542_v44, %v1546_v57  ;;  %v1935_v63 = vrot.slane %v3919_v9, 5  ;;  %v5621_v30 = vmax.bf16 %v4162_v4, %v4173_v52  ;;  %v5622_v9 = vmax.bf16 %v4184_v50, %v4201_v26 }
  0xb6   : > { %v1556_v61 = vrot.slane %v1555_v33, 4  ;;  %v1665_v40 = vmax.bf16 %v1547_v55, %v1513_v46  ;;  %v1711_v10 = vmax.bf16 %v1664_v60, %v1547_v55  ;;  %v1932_v2 = vsel %vm4049_vm6, %v3034_v18, %v1931_v59  ;;  %v3194_v18 = vld [vmem:[%s3273_s22 + $0x140] sm:$0xf] }
  0xb7   : > { %v1570_v29 = vrot.slane %v1569_v13, 4  ;;  %v2375_v38 = vmax.bf16 %v5621_v30, %v1932_v2  ;;  %v2217_v35 = vmax.bf16 %v4195_v39, %v1932_v2  ;;  %v1936_v11 = vsel %vm4049_vm6, %v3035_v48, %v1935_v63  ;;  %v3195_v30 = vld [vmem:[%s3273_s22 + $0x148] sm:$0xf] }
  0xb8   : > { %v1561_v43 = vsel %vm3612_vm3, %v1556_v61, %v1560_v34  ;;  %v2376_v46 = vmax.bf16 %v5622_v9, %v1936_v11  ;;  %v2218_v57 = vmax.bf16 %v4325_v31, %v1936_v11  ;;  %v3036_v20 = vrot.slane %v4256_v7, 9  ;;  %v3196_v9 = vld [vmem:[%s3273_s22 + $0x150] sm:$0xf] }
  0xb9   : > { %v1666_v1 = vmax.bf16 %v1561_v43, %v1514_v58  ;;  %v1575_v4 = vsel %vm3612_vm3, %v1570_v29, %v1574_v6  ;;  %v1712_v52 = vmax.bf16 %v1665_v40, %v1561_v43  ;;  %v1758_v39 = vmax.bf16 %v1711_v10, %v1561_v43 }
  0xba   : > { %v1177_v44 = vmax.bf16 %v1575_v4, %v4337_v17  ;;  %v2414_v3 = vmax.bf16 %v2375_v38, %v1936_v11  ;;  %v2256_v33 = vmax.bf16 %v2217_v35, %v1936_v11  ;;  %v1939_v34 = vrot.slane %v3930_v37, 5 }
  0xbb   : > { %v1713_v60 = vmax.bf16 %v1666_v1, %v1575_v4  ;;  %v1759_v50 = vmax.bf16 %v1712_v52, %v1575_v4  ;;  %v3037_v21 = vrot.slane %v4259_v49, 9  ;;  %v1943_v31 = vrot.slane %v3944_v28, 5 }
  0xbc   : > { %v1940_v7 = vsel %vm4049_vm6, %v3036_v20, %v1939_v34  ;;  %v2017_v58 = vmax.bf16 %v1932_v2, %v1758_v39  ;;  %v3050_v6 = vrot.slane %v3194_v18, 9  ;;  %v2163_v59 = vrot.slane %v3988_v45, 5  ;;  %v3197_v39 = vld [vmem:[%s3273_s22 + $0x28] sm:$0xf] }
  0xbd   : > { %v1760_v55 = vmax.bf16 %v1940_v7, %v1713_v60  ;;  %v4388_v17 = vmax.bf16 %v2211_v54, %v1940_v7  ;;  %v2415_v37 = vmax.bf16 %v2376_v46, %v1940_v7  ;;  %v4390_v13 = vmax.bf16 %v2414_v3, %v1940_v7  ;;  %v3198_v3 = vld [vmem:[%s3273_s22 + $0x2c] sm:$0x1] }
  0xbe   : > { %v2071_v28 = vmax.bf16 %v4347_v51, %v1940_v7  ;;  %v2257_v49 = vmax.bf16 %v2218_v57, %v1940_v7  ;;  %v2295_v62 = vmax.bf16 %v2256_v33, %v1940_v7  ;;  %v4395_v48 = vsel %vm4049_vm6, %v3037_v21, %v1943_v31 }
  0xbf   : > { %v4398_v45 = vmax.bf16 %v4395_v48, %v1177_v44  ;;  %v2019_v8 = vmax.bf16 %v4395_v48, %v1760_v55  ;;  %v2064_v14 = vmax.bf16 %v4312_v15, %v4395_v48  ;;  %v2289_v54 = vmax.bf16 %v4388_v17, %v4395_v48 }
  0xc0   : > { %v4406_v51 = vmax.bf16 %v2415_v37, %v4395_v48  ;;  %v1659_v63 = vmax.bf16 %v4395_v48, %v4344_v23  ;;  %v2131_v61 = vmax.bf16 %v2071_v28, %v4395_v48  ;;  %v2296_v40 = vmax.bf16 %v2257_v49, %v4395_v48 }
  0xc1   : > { %v2018_v10 = vmax.bf16 %v1936_v11, %v1759_v50  ;;  %v2077_v2 = vmax.bf16 %v2017_v58, %v1936_v11  ;;  %v2164_v29 = vsel %vm4049_vm6, %v3050_v6, %v2163_v59  ;;  %v3051_v38 = vrot.slane %v3195_v30, 9 }
  0xc2   : > { %v2383_v35 = vmax.bf16 %v2295_v62, %v2164_v29  ;;  %v2167_v43 = vrot.slane %v4004_v16, 5  ;;  %v3052_v46 = vrot.slane %v3196_v9, 9  ;;  %v2171_v23 = vrot.slane %v4022_v32, 5 }
  0xc3   : > { %v2078_v57 = vmax.bf16 %v2018_v10, %v1940_v7  ;;  %v2137_v20 = vmax.bf16 %v2077_v2, %v1940_v7  ;;  %v3053_v1 = vrot.slane %v4273_v42, 9  ;;  %v2175_v4 = vrot.slane %v4244_v56, 5 }
  0xc4   : > { %v2168_v11 = vsel %vm4049_vm6, %v3051_v38, %v2167_v43  ;;  %v2172_v52 = vsel %vm4049_vm6, %v3052_v46, %v2171_v23  ;;  %v3015_v44 = vrot.slane %v3197_v39, 9  ;;  %v1855_v16 = vrot.slane %v3198_v3, 5  ;;  %v3200_v38 = vld [vmem:[%s3273_s22 + $0x74] sm:$0x1]  ;;  %v3202_v46 = vld [vmem:[%s3273_s22 + $0x7c] sm:$0x1] }
  0xc5   : > { %v2138_v33 = vmax.bf16 %v2078_v57, %v4395_v48  ;;  %v2384_v34 = vmax.bf16 %v2296_v40, %v2168_v11  ;;  %v2422_v32 = vmax.bf16 %v2383_v35, %v2168_v11  ;;  %v4427_v60 = vmax.bf16 %v2172_v52, %v2019_v8  ;;  %v4469_v57 = vld [vmem:[%s3273_s22 + $0xc8] sm:$0xf]  ;;  %v5628_v3 = vld [vmem:[#allocation6_spill] sm:$0xff] }
  0xc6   : > { %v2219_v50 = vmax.bf16 %v2172_v52, %v2131_v61  ;;  %v4431_v56 = vsel %vm4049_vm6, %v3053_v1, %v2175_v4  ;;  %v2225_v42 = vmax.bf16 %v2164_v29, %v2137_v20  ;;  %v1856_v21 = vsel %vm4049_vm6, %v3015_v44, %v1855_v16  ;;  %v3199_v29 = vld [vmem:[%s3273_s22 + $0x70] sm:$0xf]  ;;  %v5627_v1 = vld [vmem:[#allocation14_spill] sm:$0xff] }
  0xc7   : > { %v2423_v31 = vmax.bf16 %v2384_v34, %v2172_v52  ;;  %v2461_v7 = vmax.bf16 %v2422_v32, %v2172_v52  ;;  %v1421_v58 = vmax.bf16 %v4431_v56, %v4398_v45  ;;  %v2139_v18 = vmax.bf16 %v4431_v56, %v4427_v60 }
  0xc8   : > { %v1706_v6 = vmax.bf16 %v4431_v56, %v1659_v63  ;;  %v4441_v59 = vmax.bf16 %v2219_v50, %v4431_v56  ;;  %v2226_v55 = vmax.bf16 %v2168_v11, %v2138_v33  ;;  %v2264_v37 = vmax.bf16 %v2225_v42, %v2168_v11 }
  0xc9   : > { %v2462_v28 = vmax.bf16 %v2423_v31, %v4431_v56  ;;  %v5623_v49 = vmax.bf16 %v3941_v27, %v3796_v36  ;;  %v5624_v8 = vmax.bf16 %v4116_v12, %v3960_v22  ;;  %v5625_v63 = vmax.bf16 %v4150_v0, %v4201_v26  ;;  %v3201_v36 = vld [vmem:[%s3273_s22 + $0x78] sm:$0xf]  ;;  %v4462_v22 = vld [vmem:[%s3273_s22 + $0xc0] sm:$0xf] }
  0xca   : > { %v4453_v10 = vmax.bf16 %v2226_v55, %v2172_v52  ;;  %v4455_v2 = vmax.bf16 %v2264_v37, %v2172_v52  ;;  %v3022_v30 = vrot.slane %v3199_v29, 9  ;;  %v1883_v35 = vrot.slane %v3200_v38, 5 }
  0xcb   : > { %v484_v62 = vmax.bf16 %v1856_v21, %v5623_v49  ;;  %v1445_v61 = vmax.bf16 %v1856_v21, %v5624_v8  ;;  %v2243_v40 = vmax.bf16 %v5625_v63, %v1856_v21  ;;  %v3078_v43 = vcombine.low %v2461_v7, %v2462_v28 }
  0xcc   : > { %5626 = vst [vmem:[#allocation11_spill] sm:$0xff] %v4455_v2  ;;  %v3023_v9 = vrot.slane %v3201_v36, 9  ;;  %v1887_v23 = vrot.slane %v3202_v46, 5  ;;  %v3030_v12 = vrot.slane %v4462_v22, 9  ;;  %v1884_v0 = vsel %vm4049_vm6, %v3022_v30, %v1883_v35  ;;  %v4534_v36 = vld [vmem:[%s3273_s22 + $0x168] sm:$0xf] }
  0xcd   : > { %v1915_v26 = vrot.slane %v3813_v5, 5  ;;  %v3031_v20 = vrot.slane %v4469_v57, 9  ;;  %v1919_v4 = vrot.slane %v5627_v1, 5  ;;  %3142 = vmatprep.mubr.msk.bf16.mxu1 %vm2558_vm7, %v3078_v43  ;;  %v1162_v11 = vmax.bf16 %v1884_v0, %v4304_v47  ;;  %v5629_v47 = vld [vmem:[#allocation2_spill] sm:$0xff]  ;;  %v270_v43 = vld [vmem:[%s3273_s22 + $0x11c] sm:$0x1] }
  0xce   : > { %v2124_v52 = vmax.bf16 %v2064_v14, %v1884_v0  ;;  %v4481_v39 = vmax.bf16 %v2289_v54, %v1884_v0  ;;  %v1492_v5 = vmax.bf16 %v1884_v0, %v1445_v61  ;;  %v2282_v44 = vmax.bf16 %v2243_v40, %v1884_v0  ;;  %v5634_v1 = vld [vmem:[#allocation3_spill] sm:$0xff] }
  0xcf   : > { %v2408_v16 = vmax.bf16 %v5628_v3, %v1884_v0  ;;  %v1888_v33 = vsel %vm4049_vm6, %v3023_v9, %v1887_v23  ;;  %v4488_v34 = vsel %vm4049_vm6, %v3030_v12, %v1915_v26  ;;  %v5630_v15 = vmax.bf16 %v3941_v27, %v5629_v47 }
  0xd0   : > { %v1254_v32 = vmax.bf16 %v1888_v33, %v1162_v11  ;;  %v2212_v17 = vmax.bf16 %v2124_v52, %v1888_v33  ;;  %v516_v48 = vmax.bf16 %v1888_v33, %v484_v62  ;;  %v1644_v54 = vmax.bf16 %v1888_v33, %v1492_v5  ;;  %v3205_v52 = vld [vmem:[%s3273_s22 + $0x118] sm:$0xf] }
  0xd1   : > { %v4493_v14 = vmax.bf16 %v1888_v33, %v5630_v15  ;;  %v2370_v50 = vmax.bf16 %v2282_v44, %v1888_v33  ;;  %v2416_v42 = vmax.bf16 %v4481_v39, %v4488_v34  ;;  %v563_v21 = vmax.bf16 %v4488_v34, %v4341_v41 }
  0xd2   : > { %v1406_v31 = vmax.bf16 %v4488_v34, %v1254_v32  ;;  %v4501_v7 = vmax.bf16 %v2212_v17, %v4488_v34  ;;  %v1753_v55 = vmax.bf16 %v4488_v34, %v1706_v6  ;;  %v2297_v37 = vmax.bf16 %v4441_v59, %v4488_v34  ;;  %v5631_v59 = vld [vmem:[#allocation4_spill] sm:$0xff]  ;;  %v5636_v17 = vld [vmem:[#allocation9_spill] sm:$0xff] }
  0xd3   : > { %v1691_v28 = vmax.bf16 %v4488_v34, %v1644_v54  ;;  %v2409_v49 = vmax.bf16 %v2370_v50, %v4488_v34  ;;  %v2447_v62 = vmax.bf16 %v2408_v16, %v4488_v34  ;;  %v4511_v41 = vsel %vm4049_vm6, %v3031_v20, %v1919_v4  ;;  %v4549_v20 = vld [vmem:[%s3273_s22 + $0x16c] sm:$0x1]  ;;  %v5635_v4 = vld [vmem:[#allocation5_spill] sm:$0xff]  ;;  %v5637_v54 = vld [vmem:[#allocation8_spill] sm:$0xff] }
  0xd4   : > { %v492_v8 = vmax.bf16 %v4511_v41, %v4493_v14  ;;  %v4516_v61 = vmax.bf16 %v4511_v41, %v1406_v31  ;;  %v2290_v6 = vmax.bf16 %v4501_v7, %v4511_v41  ;;  %v5632_v63 = vmax.bf16 %v3941_v27, %v5631_v59 }
  0xd5   : > { %v1078_v29 = vmax.bf16 %v4511_v41, %v563_v21  ;;  %v4526_v30 = vmax.bf16 %v4511_v41, %v516_v48  ;;  %v4529_v38 = vmax.bf16 %v4511_v41, %v1691_v28  ;;  %v2012_v35 = vmax.bf16 %v4511_v41, %v1753_v55 }
  0xd6   : > { %v404_v40 = vmax.bf16 %v4511_v41, %v5632_v63  ;;  %v2448_v9 = vmax.bf16 %v2409_v49, %v4511_v41  ;;  %v5633_v27 = vmax.bf16 %v4331_v25, %v4298_v24  ;;  %v1468_v23 = vmax.bf16 %v1421_v58, %v4534_v36  ;;  %v5638_v49 = vld [vmem:[#allocation7_spill] sm:$0xff]  ;;  %v5639_v41 = vld [vmem:[#allocation10_spill] sm:$0xff] }
  0xd7   : > { %v1170_v0 = vmax.bf16 %v1078_v29, %v4534_v36  ;;  %v2072_v26 = vmax.bf16 %v2012_v35, %v4534_v36  ;;  %v337_v11 = vmax.bf16 %v5635_v4, %v5634_v1  ;;  %v338_v24 = vmax.bf16 %v4462_v22, %v5635_v4 }
  0xd8   : > { %v475_v46 = vmax.bf16 %v5633_v27, %v4534_v36  ;;  %v436_v12 = vmax.bf16 %v404_v40, %v4534_v36  ;;  %v3071_v25 = vcombine.low %v2447_v62, %v2448_v9  ;;  %v985_v39 = vshrl.u32 %v3205_v52, 16 }
  0xd9   : > { %v988_v5 = vshll.u32 %v3205_v52, 16  ;;  %v994_v45 = vshll.u32 %v270_v43, 16  ;;  %v2385_v58 = vmax.bf16 %v2297_v37, %v337_v11  ;;  %v2132_v44 = vmax.bf16 %v2072_v26, %v338_v24 }
  0xda   : > { %v1345_v3 = vshrl.u32 %v4534_v36, 16  ;;  %v1348_v16 = vshll.u32 %v4534_v36, 16  ;;  %3127 = vmatmul.mubr.msk.bf16.vlgmr.msra.gmra.mxu0 %vm2558_vm7, %v3071_v25  ;;  %v987_v33 = vrot.slane %v985_v39, 4  ;;  %v1354_v15 = vshll.u32 %v4549_v20, 16 }
  0xdb   : > { %v990_v34 = vrot.slane %v988_v5, 5  ;;  %v996_v47 = vrot.slane %v994_v45, 5  ;;  %v3038_v48 = vrot.slane %v5636_v17, 9  ;;  %v1947_v50 = vrot.slane %v5637_v54, 5 }
  0xdc   : > { %v1347_v14 = vrot.slane %v1345_v3, 4  ;;  %v1350_v32 = vrot.slane %v1348_v16, 5  ;;  %v1356_v31 = vrot.slane %v1354_v15, 5  ;;  %v3039_v7 = vrot.slane %v3205_v52, 9 }
  0xdd   : > { %v991_v21 = vor.u32 %v990_v34, %v987_v33  ;;  %v1951_v55 = vrot.slane %v270_v43, 5  ;;  %v1948_v28 = vsel %vm4049_vm6, %v3038_v48, %v1947_v50  ;;  %v3054_v62 = vrot.slane %v5638_v49, 9  ;;  %v4606_v49 = vld [vmem:[%s3273_s22 + $0x80] sm:$0xf] }
  0xde   : > { %v1351_v37 = vor.u32 %v1350_v32, %v1347_v14  ;;  %v2179_v59 = vrot.slane %v5639_v41, 5  ;;  %v4569_v40 = vmax.bf16 %v2139_v18, %v1948_v28  ;;  %v4571_v29 = vmax.bf16 %v2416_v42, %v1948_v28 }
  0xdf   : > { %v992_v63 = vrot.slane %v991_v21, 4  ;;  %v2424_v35 = vmax.bf16 %v2385_v58, %v1948_v28  ;;  %v1952_v43 = vsel %vm4049_vm6, %v3039_v7, %v1951_v55  ;;  %v3055_v26 = vrot.slane %v4534_v36, 9 }
  0xe0   : > { %5640 = vst [vmem:[#allocation12_spill] sm:$0xff] %v4569_v40  ;;  %5641 = vst [vmem:[#allocation13_spill] sm:$0xff] %v4571_v29  ;;  %v1352_v9 = vrot.slane %v1351_v37, 4  ;;  %v4577_v27 = vsel %vm4049_vm6, %v3054_v62, %v2179_v59  ;;  %v2183_v42 = vrot.slane %v4549_v20, 5  ;;  %v4609_v62 = vld [vmem:[%s3273_s22 + $0x88] sm:$0xf] }
  0xe1   : > { %5642 = vst [vmem:[#allocation14_spill] sm:$0xff] %v4577_v27  ;;  %v997_v1 = vsel %vm3612_vm3, %v992_v63, %v996_v47  ;;  %v4585_v18 = vmax.bf16 %v2424_v35, %v4577_v27  ;;  %v4614_v63 = vld [vmem:[%s3273_s22 + $0x38] sm:$0xf] }
  0xe2   : > { %v380_v4 = vmax.bf16 %v997_v1, %v4534_v36  ;;  %v507_v11 = vmax.bf16 %v997_v1, %v475_v46  ;;  %v524_v24 = vmax.bf16 %v997_v1, %v492_v8  ;;  %v1500_v25 = vmax.bf16 %v4516_v61, %v997_v1 }
  0xe3   : > { %v1515_v52 = vmax.bf16 %v1468_v23, %v997_v1  ;;  %v2378_v39 = vmax.bf16 %v2290_v6, %v997_v1  ;;  %v468_v5 = vmax.bf16 %v997_v1, %v436_v12  ;;  %v1262_v45 = vmax.bf16 %v1170_v0, %v997_v1 }
  0xe4   : > { %v2220_v58 = vmax.bf16 %v2132_v44, %v997_v1  ;;  %v1357_v3 = vsel %vm3612_vm3, %v1352_v9, %v1356_v31  ;;  %v1652_v16 = vmax.bf16 %v1948_v28, %v1500_v25  ;;  %v556_v33 = vmax.bf16 %v1952_v43, %v524_v24  ;;  %v4599_v31 = vld [vmem:[%s3273_s22 + $0x30] sm:$0xf] }
  0xe5   : > { %v412_v34 = vmax.bf16 %v1357_v3, %v380_v4  ;;  %v539_v47 = vmax.bf16 %v1357_v3, %v507_v11  ;;  %v1667_v15 = vmax.bf16 %v1515_v52, %v1357_v3  ;;  %v500_v20 = vmax.bf16 %v1357_v3, %v468_v5  ;;  %v4637_v24 = vld [vmem:[%s3273_s22 + $0xd0] sm:$0xf] }
  0xe6   : > { %v1414_v14 = vmax.bf16 %v1357_v3, %v1262_v45  ;;  %v2259_v36 = vmax.bf16 %v2220_v58, %v1357_v3  ;;  %v2417_v8 = vmax.bf16 %v2378_v39, %v1948_v28  ;;  %v1699_v46 = vmax.bf16 %v1952_v43, %v1652_v16  ;;  %v4642_v45 = vld [vmem:[%s3273_s22 + $0xd8] sm:$0xf]  ;;  %v4645_v58 = vld [vmem:[%s3273_s22 + $0x34] sm:$0x1] }
  0xe7   : > { %v571_v61 = vmax.bf16 %v1948_v28, %v539_v47  ;;  %v1714_v23 = vmax.bf16 %v1948_v28, %v1667_v15  ;;  %v444_v6 = vmax.bf16 %v1952_v43, %v412_v34  ;;  %v532_v12 = vmax.bf16 %v1952_v43, %v500_v20  ;;  %v4657_v15 = vld [vmem:[%s3273_s22 + $0x3c] sm:$0x1] }
  0xe8   : > { %v1461_v0 = vmax.bf16 %v1948_v28, %v1414_v14  ;;  %v2298_v44 = vmax.bf16 %v2259_v36, %v1948_v28  ;;  %v4592_v32 = vmax.bf16 %v2417_v8, %v1952_v43  ;;  %v2184_v17 = vsel %vm4049_vm6, %v3055_v26, %v2183_v42 }
  0xe9   : > { %v1086_v48 = vmax.bf16 %v1952_v43, %v571_v61  ;;  %v1761_v54 = vmax.bf16 %v1952_v43, %v1714_v23  ;;  %v4596_v50 = vmax.bf16 %v2184_v17, %v444_v6  ;;  %v564_v21 = vmax.bf16 %v2184_v17, %v532_v12 }
  0xea   : > { %5643 = vst [vmem:[#allocation6_spill] sm:$0xff] %v4592_v32  ;;  %v1508_v7 = vmax.bf16 %v1952_v43, %v1461_v0  ;;  %v2386_v55 = vmax.bf16 %v2298_v44, %v1952_v43  ;;  %v1063_v37 = vmax.bf16 %v4526_v30, %v4599_v31  ;;  %v1997_v28 = vmax.bf16 %v4529_v38, %v4599_v31  ;;  %v4683_v44 = vld [vmem:[%s3273_s22 + $0x84] sm:$0x1] }
  0xeb   : > { %v1178_v41 = vmax.bf16 %v4577_v27, %v1086_v48  ;;  %v2020_v59 = vmax.bf16 %v4577_v27, %v1761_v54  ;;  %v4617_v35 = vmax.bf16 %v1699_v46, %v4606_v49  ;;  %v1071_v30 = vmax.bf16 %v556_v33, %v4609_v62 }
  0xec   : > { %v1660_v38 = vmax.bf16 %v4577_v27, %v1508_v7  ;;  %v2425_v9 = vmax.bf16 %v2386_v55, %v4577_v27  ;;  %v1155_v43 = vmax.bf16 %v1063_v37, %v4614_v63  ;;  %v4624_v26 = vmax.bf16 %v1997_v28, %v4606_v49  ;;  %v4690_v7 = vld [vmem:[%s3273_s22 + $0x8c] sm:$0x1] }
  0xed   : > { %v4626_v1 = vmax.bf16 %v2184_v17, %v1178_v41  ;;  %v4628_v42 = vmax.bf16 %v2184_v17, %v2020_v59  ;;  %v326_v4 = vmax.bf16 %v4609_v62, %v4614_v63  ;;  %v4634_v11 = vmax.bf16 %v4609_v62, %v4606_v49 }
  0xee   : > { %v1707_v25 = vmax.bf16 %v2184_v17, %v1660_v38  ;;  %v2464_v52 = vmax.bf16 %v2425_v9, %v2184_v17  ;;  %v1247_v39 = vmax.bf16 %v1155_v43, %v4606_v49  ;;  %v1163_v5 = vmax.bf16 %v1071_v30, %v4637_v24 }
  0xef   : > { %5644 = vst [vmem:[#allocation2_spill] sm:$0xff] %v4628_v42  ;;  %v2005_v3 = vmax.bf16 %v4617_v35, %v4637_v24  ;;  %v421_v16 = vmax.bf16 %v4634_v11, %v4637_v24  ;;  %v2117_v33 = vmax.bf16 %v4624_v26, %v4637_v24  ;;  %v4665_v36 = vmax.bf16 %v4642_v45, %v4637_v24 }
  0xf0   : > { %v3079_v47 = vcombine.low %v4585_v18, %v2464_v52  ;;  %v1399_v20 = vmax.bf16 %v1247_v39, %v4609_v62  ;;  %v4661_v14 = vmax.bf16 %v1707_v25, %v4637_v24  ;;  %v4668_v8 = vmax.bf16 %v1163_v5, %v4642_v45  ;;  %v4697_v52 = vld [vmem:[%s3273_s22 + $0xd4] sm:$0x1] }
  0xf1   : > { %v4671_v46 = vmax.bf16 %v326_v4, %v4642_v45  ;;  %v453_v18 = vmax.bf16 %v421_v16, %v4642_v45  ;;  %v4675_v61 = vmax.bf16 %v564_v21, %v4642_v45  ;;  %v663_v6 = vshrl.u32 %v4599_v31, 16 }
  0xf2   : > { %3143 = vmatmul.mubr.msk.bf16.vlgmr.msra.gmra.mxu1 %vm2558_vm7, %v3079_v47  ;;  %v1446_v23 = vmax.bf16 %v1399_v20, %v4637_v24  ;;  %v666_v12 = vshll.u32 %v4599_v31, 16  ;;  %v672_v0 = vshll.u32 %v4645_v58, 16  ;;  %v677_v17 = vshrl.u32 %v4614_v63, 16 }
  0xf3   : > { %v680_v48 = vshll.u32 %v4614_v63, 16  ;;  %v686_v54 = vshll.u32 %v4657_v15, 16  ;;  %v775_v21 = vshrl.u32 %v4606_v49, 16  ;;  %v665_v37 = vrot.slane %v663_v6, 4 }
  0xf4   : > { %v1493_v55 = vmax.bf16 %v1446_v23, %v4642_v45  ;;  %v668_v28 = vrot.slane %v666_v12, 5  ;;  %v674_v41 = vrot.slane %v672_v0, 5  ;;  %v679_v59 = vrot.slane %v677_v17, 4 }
  0xf5   : > { %v682_v30 = vrot.slane %v680_v48, 5  ;;  %v688_v38 = vrot.slane %v686_v54, 5  ;;  %v777_v9 = vrot.slane %v775_v21, 4  ;;  %v778_v26 = vshll.u32 %v4606_v49, 16 }
  0xf6   : > { %v669_v43 = vor.u32 %v668_v28, %v665_v37  ;;  %v784_v4 = vshll.u32 %v4683_v44, 16  ;;  %v789_v25 = vshrl.u32 %v4609_v62, 16  ;;  %v792_v5 = vshll.u32 %v4609_v62, 16 }
  0xf7   : > { %v683_v39 = vor.u32 %v682_v30, %v679_v59  ;;  %v798_v16 = vshll.u32 %v4690_v7, 16  ;;  %v887_v47 = vshrl.u32 %v4637_v24, 16  ;;  %v780_v23 = vrot.slane %v778_v26, 5 }
  0xf8   : > { %v670_v20 = vrot.slane %v669_v43, 4  ;;  %v786_v6 = vrot.slane %v784_v4, 5  ;;  %v791_v12 = vrot.slane %v789_v25, 4  ;;  %v794_v17 = vrot.slane %v792_v5, 5 }
  0xf9   : > { %v684_v0 = vrot.slane %v683_v39, 4  ;;  %v800_v48 = vrot.slane %v798_v16, 5  ;;  %v889_v54 = vrot.slane %v887_v47, 4  ;;  %v781_v37 = vor.u32 %v780_v23, %v777_v9 }
  0xfa   : > { %v675_v21 = vsel %vm3612_vm3, %v670_v20, %v674_v41  ;;  %v890_v28 = vshll.u32 %v4637_v24, 16  ;;  %v896_v59 = vshll.u32 %v4697_v52, 16  ;;  %v795_v25 = vor.u32 %v794_v17, %v791_v12 }
  0xfb   : > { %v485_v30 = vmax.bf16 %v675_v21, %v453_v18  ;;  %v1645_v60 = vmax.bf16 %v1493_v55, %v675_v21  ;;  %v2205_v34 = vmax.bf16 %v2117_v33, %v675_v21  ;;  %v689_v43 = vsel %vm3612_vm3, %v684_v0, %v688_v38 }
  0xfc   : > { %v390_v26 = vmax.bf16 %v689_v43, %v4671_v46  ;;  %v782_v4 = vrot.slane %v781_v37, 4  ;;  %v892_v39 = vrot.slane %v890_v28, 5  ;;  %v898_v47 = vrot.slane %v896_v59, 5  ;;  %v4724_v59 = vld [vmem:[%s3273_s22 + $0xdc] sm:$0x1] }
  0xfd   : > { %v517_v5 = vmax.bf16 %v689_v43, %v485_v30  ;;  %v1692_v16 = vmax.bf16 %v1645_v60, %v689_v43  ;;  %v901_v41 = vshrl.u32 %v4642_v45, 16  ;;  %v796_v18 = vrot.slane %v795_v25, 4 }
  0xfe   : > { %v787_v9 = vsel %vm3612_vm3, %v782_v4, %v786_v6  ;;  %v893_v55 = vor.u32 %v892_v39, %v889_v54  ;;  %v904_v33 = vshll.u32 %v4642_v45, 16  ;;  %v5645_v17 = vmax.bf16 %v4642_v45, %v4609_v62 }
  0xff   : > { %v429_v38 = vmax.bf16 %v787_v9, %v4665_v36  ;;  %v1407_v46 = vmax.bf16 %v4668_v8, %v787_v9  ;;  %v2065_v20 = vmax.bf16 %v2005_v3, %v787_v9  ;;  %v549_v60 = vmax.bf16 %v787_v9, %v517_v5 }
 0x100   : > { %v1739_v23 = vmax.bf16 %v1692_v16, %v787_v9  ;;  %v2244_v12 = vmax.bf16 %v2205_v34, %v787_v9  ;;  %v801_v0 = vsel %vm3612_vm3, %v796_v18, %v800_v48  ;;  %v894_v6 = vrot.slane %v893_v55, 4 }
 0x101   : > { %v366_v54 = vmax.bf16 %v801_v0, %v5645_v17  ;;  %v461_v21 = vmax.bf16 %v801_v0, %v429_v38  ;;  %v1454_v37 = vmax.bf16 %v1407_v46, %v801_v0  ;;  %v422_v28 = vmax.bf16 %v801_v0, %v390_v26 }
 0x102   : > { %v1064_v8 = vmax.bf16 %v801_v0, %v549_v60  ;;  %v1998_v30 = vmax.bf16 %v1739_v23, %v801_v0  ;;  %v899_v35 = vsel %vm3612_vm3, %v894_v6, %v898_v47  ;;  %v903_v3 = vrot.slane %v901_v41, 4 }
 0x103   : > { %v493_v34 = vmax.bf16 %v899_v35, %v461_v21  ;;  %v1501_v43 = vmax.bf16 %v1454_v37, %v899_v35  ;;  %v2125_v4 = vmax.bf16 %v2065_v20, %v899_v35  ;;  %v1171_v48 = vmax.bf16 %v4675_v61, %v899_v35  ;;  %v4754_v37 = vld [vmem:[%s3273_s22 + $0x120] sm:$0xf] }
 0x104   : > { %v1156_v25 = vmax.bf16 %v1064_v8, %v899_v35  ;;  %v2013_v39 = vmax.bf16 %v4661_v14, %v899_v35  ;;  %v2058_v5 = vmax.bf16 %v1998_v30, %v899_v35  ;;  %v2283_v16 = vmax.bf16 %v2244_v12, %v899_v35  ;;  %v4757_v8 = vld [vmem:[%s3273_s22 + $0x128] sm:$0xf] }
 0x105   : > { %v906_v9 = vrot.slane %v904_v33, 5  ;;  %v910_v26 = vshll.u32 %v4724_v59, 16  ;;  %v3016_v18 = vrot.slane %v4599_v31, 9  ;;  %v1859_v55 = vrot.slane %v4645_v58, 5 }
 0x106   : > { %v3017_v47 = vrot.slane %v4614_v63, 9  ;;  %v1863_v41 = vrot.slane %v4657_v15, 5  ;;  %v3024_v38 = vrot.slane %v4606_v49, 9  ;;  %v1891_v61 = vrot.slane %v4683_v44, 5 }
 0x107   : > { %v907_v46 = vor.u32 %v906_v9, %v903_v3  ;;  %v912_v14 = vrot.slane %v910_v26, 5  ;;  %v1860_v33 = vsel %vm4049_vm6, %v3016_v18, %v1859_v55  ;;  %v3025_v20 = vrot.slane %v4609_v62, 9 }
 0x108   : > { %v2371_v60 = vmax.bf16 %v2283_v16, %v1860_v33  ;;  %v1864_v58 = vsel %vm4049_vm6, %v3017_v47, %v1863_v41  ;;  %v1892_v15 = vsel %vm4049_vm6, %v3024_v38, %v1891_v61  ;;  %v1895_v49 = vrot.slane %v4690_v7, 5 }
 0x109   : > { %v908_v23 = vrot.slane %v907_v46, 4  ;;  %v2213_v44 = vmax.bf16 %v2125_v4, %v1892_v15  ;;  %v3032_v12 = vrot.slane %v4637_v24, 9  ;;  %v1923_v0 = vrot.slane %v4697_v52, 5 }
 0x10a   : > { %v4747_v6 = vmax.bf16 %v2371_v60, %v1892_v15  ;;  %v1896_v62 = vsel %vm4049_vm6, %v3025_v20, %v1895_v49  ;;  %v3033_v17 = vrot.slane %v4642_v45, 9  ;;  %v1927_v21 = vrot.slane %v4724_v59, 5 }
 0x10b   : > { %v4761_v7 = vsel %vm3612_vm3, %v908_v23, %v912_v14  ;;  %v4765_v52 = vsel %vm4049_vm6, %v3032_v12, %v1923_v0  ;;  %v1422_v30 = vmax.bf16 %v4626_v1, %v4754_v37  ;;  %v508_v3 = vmax.bf16 %v4596_v50, %v4757_v8 }
 0x10c   : > { %v398_v59 = vmax.bf16 %v4761_v7, %v366_v54  ;;  %v525_v4 = vmax.bf16 %v4761_v7, %v493_v34  ;;  %v1653_v16 = vmax.bf16 %v1501_v43, %v4761_v7  ;;  %v405_v9 = vmax.bf16 %v4761_v7, %v899_v35 }
 0x10d   : > { %v454_v26 = vmax.bf16 %v4761_v7, %v422_v28  ;;  %v1248_v18 = vmax.bf16 %v1156_v25, %v4761_v7  ;;  %v1263_v55 = vmax.bf16 %v1171_v48, %v4761_v7  ;;  %v2118_v47 = vmax.bf16 %v2058_v5, %v4761_v7 }
 0x10e   : > { %v557_v1 = vmax.bf16 %v1892_v15, %v525_v4  ;;  %v1700_v41 = vmax.bf16 %v1892_v15, %v1653_v16  ;;  %v430_v38 = vmax.bf16 %v1896_v62, %v398_v59  ;;  %v2252_v50 = vmax.bf16 %v2213_v44, %v4765_v52 }
 0x10f   : > { %v1400_v54 = vmax.bf16 %v1860_v33, %v1248_v18  ;;  %v2206_v61 = vmax.bf16 %v2118_v47, %v1860_v33  ;;  %v486_v34 = vmax.bf16 %v1864_v58, %v454_v26  ;;  %v437_v43 = vmax.bf16 %v4765_v52, %v405_v9  ;;  %v4811_v47 = vld [vmem:[%s3273_s22 + $0x170] sm:$0xf] }
 0x110   : > { %v1072_v46 = vmax.bf16 %v1896_v62, %v557_v1  ;;  %v1747_v35 = vmax.bf16 %v1896_v62, %v1700_v41  ;;  %v1415_v28 = vmax.bf16 %v4765_v52, %v1263_v55  ;;  %v2073_v25 = vmax.bf16 %v2013_v39, %v4765_v52 }
 0x111   : > { %v1447_v14 = vmax.bf16 %v1864_v58, %v1400_v54  ;;  %v2245_v48 = vmax.bf16 %v2206_v61, %v1864_v58  ;;  %v518_v20 = vmax.bf16 %v1896_v62, %v486_v34  ;;  %v2449_v5 = vmax.bf16 %v4747_v6, %v4765_v52 }
 0x112   : > { %v1164_v60 = vmax.bf16 %v4765_v52, %v1072_v46  ;;  %v2006_v49 = vmax.bf16 %v4765_v52, %v1747_v35  ;;  %v4789_v33 = vsel %vm4049_vm6, %v3033_v17, %v1927_v21  ;;  %v4792_v23 = vmax.bf16 %v2252_v50, %v4754_v37  ;;  %v4832_v46 = vld [vmem:[%s3273_s22 + $0x124] sm:$0x1] }
 0x113   : > { %v1494_v44 = vmax.bf16 %v1892_v15, %v1447_v14  ;;  %v2284_v39 = vmax.bf16 %v2245_v48, %v1892_v15  ;;  %v462_v58 = vmax.bf16 %v4789_v33, %v430_v38  ;;  %v469_v12 = vmax.bf16 %v4789_v33, %v437_v43 }
 0x114   : > { %v1256_v0 = vmax.bf16 %v4789_v33, %v1164_v60  ;;  %v2066_v6 = vmax.bf16 %v2006_v49, %v4789_v33  ;;  %v4799_v59 = vmax.bf16 %v4789_v33, %v518_v20  ;;  %v1462_v17 = vmax.bf16 %v4789_v33, %v1415_v28  ;;  %v4837_v28 = vld [vmem:[%s3273_s22 + $0x178] sm:$0xf] }
 0x115   : > { %v1646_v21 = vmax.bf16 %v1896_v62, %v1494_v44  ;;  %v2372_v4 = vmax.bf16 %v2284_v39, %v1896_v62  ;;  %v501_v16 = vmax.bf16 %v469_v12, %v4754_v37  ;;  %v2133_v9 = vmax.bf16 %v2073_v25, %v4754_v37  ;;  %v4840_v25 = vld [vmem:[%s3273_s22 + $0x12c] sm:$0x1] }
 0x116   : > { %v1408_v15 = vmax.bf16 %v1256_v0, %v4754_v37  ;;  %v2126_v26 = vmax.bf16 %v2066_v6, %v4754_v37  ;;  %v1509_v18 = vmax.bf16 %v1462_v17, %v4754_v37  ;;  %v4808_v55 = vmax.bf16 %v462_v58, %v4757_v8  ;;  %v4859_v17 = vld [vmem:[%s3273_s22 + $0x174] sm:$0x1] }
 0x117   : > { %v1693_v62 = vmax.bf16 %v4765_v52, %v1646_v21  ;;  %v2411_v1 = vmax.bf16 %v2372_v4, %v4765_v52  ;;  %v533_v41 = vmax.bf16 %v501_v16, %v4757_v8  ;;  %v540_v38 = vmax.bf16 %v508_v3, %v4811_v47 }
 0x118   : > { %v4818_v50 = vmax.bf16 %v1408_v15, %v4757_v8  ;;  %v4821_v54 = vmax.bf16 %v2126_v26, %v4757_v8  ;;  %v1661_v61 = vmax.bf16 %v1509_v18, %v4757_v8  ;;  %v4825_v34 = vmax.bf16 %v1422_v30, %v4811_v47 }
 0x119   : > { %v4828_v43 = vmax.bf16 %v4789_v33, %v1693_v62  ;;  %v2450_v52 = vmax.bf16 %v2411_v1, %v4789_v33  ;;  %v565_v3 = vmax.bf16 %v533_v41, %v4811_v47  ;;  %v2221_v35 = vmax.bf16 %v2133_v9, %v4811_v47 }
 0x11a   : > { %v1708_v14 = vmax.bf16 %v1661_v61, %v4811_v47  ;;  %v381_v30 = vmax.bf16 %v4837_v28, %v4811_v47  ;;  %v572_v48 = vmax.bf16 %v540_v38, %v4837_v28  ;;  %v339_v20 = vmax.bf16 %v4469_v57, %v4462_v22 }
 0x11b   : > { %v3072_v60 = vcombine.low %v2449_v5, %v2450_v52  ;;  %v1080_v49 = vmax.bf16 %v565_v3, %v4837_v28  ;;  %v340_v44 = vmax.bf16 %v4469_v57, %v4637_v24  ;;  %v999_v39 = vshrl.u32 %v4754_v37, 16  ;;  %v4865_v24 = vld [vmem:[%s3273_s22 + $0x17c] sm:$0x1] }
 0x11c   : > { %v1755_v58 = vmax.bf16 %v1708_v14, %v4837_v28  ;;  %v4853_v12 = vmax.bf16 %v2221_v35, %v339_v20  ;;  %v1002_v0 = vshll.u32 %v4754_v37, 16  ;;  %v1008_v6 = vshll.u32 %v4832_v46, 16 }
 0x11d   : > { %3130 = vmatprep.mubr.msk.bf16.mxu0 %vm2558_vm7, %v3072_v60  ;;  %v1001_v22 = vrot.slane %v999_v39, 4  ;;  %v1013_v5 = vshrl.u32 %v4757_v8, 16  ;;  %v1016_v21 = vshll.u32 %v4757_v8, 16  ;;  %v1022_v57 = vshll.u32 %v4840_v25, 16 }
 0x11e   : > { %v2014_v4 = vmax.bf16 %v1755_v58, %v340_v44  ;;  %v1004_v16 = vrot.slane %v1002_v0, 5  ;;  %v1010_v9 = vrot.slane %v1008_v6, 5  ;;  %v1359_v15 = vshrl.u32 %v4811_v47, 16 }
 0x11f   : > { %v1015_v26 = vrot.slane %v1013_v5, 4  ;;  %v1018_v18 = vrot.slane %v1016_v21, 5  ;;  %v1024_v62 = vrot.slane %v1022_v57, 5  ;;  %v1362_v1 = vshll.u32 %v4811_v47, 16 }
 0x120   : > { %v1005_v41 = vor.u32 %v1004_v16, %v1001_v22  ;;  %v1361_v38 = vrot.slane %v1359_v15, 4  ;;  %v1368_v61 = vshll.u32 %v4859_v17, 16  ;;  %v1373_v52 = vshrl.u32 %v4837_v28, 16 }
 0x121   : > { %v1019_v3 = vor.u32 %v1018_v18, %v1015_v26  ;;  %v1364_v35 = vrot.slane %v1362_v1, 5  ;;  %v1376_v14 = vshll.u32 %v4837_v28, 16  ;;  %v1382_v20 = vshll.u32 %v4865_v24, 16 }
 0x122   : > { %v1006_v60 = vrot.slane %v1005_v41, 4  ;;  %v1370_v44 = vrot.slane %v1368_v61, 5  ;;  %v1375_v39 = vrot.slane %v1373_v52, 4  ;;  %v3040_v58 = vrot.slane %v4754_v37, 9 }
 0x123   : > { %v1020_v0 = vrot.slane %v1019_v3, 4  ;;  %v1365_v6 = vor.u32 %v1364_v35, %v1361_v38  ;;  %v1378_v5 = vrot.slane %v1376_v14, 5  ;;  %v1384_v22 = vrot.slane %v1382_v20, 5 }
 0x124   : > { %v1011_v21 = vsel %vm3612_vm3, %v1006_v60, %v1010_v9  ;;  %v1955_v57 = vrot.slane %v4832_v46, 5  ;;  %v3041_v16 = vrot.slane %v4757_v8, 9  ;;  %v1959_v15 = vrot.slane %v4840_v25, 5 }
 0x125   : > { %v413_v26 = vmax.bf16 %v1011_v21, %v381_v30  ;;  %v1502_v18 = vmax.bf16 %v4818_v50, %v1011_v21  ;;  %v1087_v1 = vmax.bf16 %v1011_v21, %v572_v48  ;;  %v1516_v41 = vmax.bf16 %v4825_v34, %v1011_v21 }
 0x126   : > { %v2253_v37 = vmax.bf16 %v4821_v54, %v1011_v21  ;;  %v2379_v38 = vmax.bf16 %v4792_v23, %v1011_v21  ;;  %v1172_v61 = vmax.bf16 %v1080_v49, %v1011_v21  ;;  %v2074_v52 = vmax.bf16 %v2014_v4, %v1011_v21 }
 0x127   : > { %v2299_v9 = vmax.bf16 %v4853_v12, %v1011_v21  ;;  %v4886_v46 = vsel %vm3612_vm3, %v1020_v0, %v1024_v62  ;;  %v1366_v3 = vrot.slane %v1365_v6, 4  ;;  %v1379_v25 = vor.u32 %v1378_v5, %v1375_v39 }
 0x128   : > { %v414_v50 = vmax.bf16 %v4886_v46, %v4837_v28  ;;  %v445_v30 = vmax.bf16 %v4886_v46, %v413_v26  ;;  %v526_v54 = vmax.bf16 %v4886_v46, %v4808_v55  ;;  %v1654_v23 = vmax.bf16 %v1502_v18, %v4886_v46 }
 0x129   : > { %v1179_v34 = vmax.bf16 %v1087_v1, %v4886_v46  ;;  %v2292_v48 = vmax.bf16 %v2253_v37, %v4886_v46  ;;  %v1264_v49 = vmax.bf16 %v1172_v61, %v4886_v46  ;;  %v2134_v12 = vmax.bf16 %v2074_v52, %v4886_v46 }
 0x12a   : > { %v1371_v4 = vsel %vm3612_vm3, %v1366_v3, %v1370_v44  ;;  %v1380_v62 = vrot.slane %v1379_v25, 4  ;;  %v1956_v35 = vsel %vm4049_vm6, %v3040_v58, %v1955_v57  ;;  %v4904_v55 = vsel %vm4049_vm6, %v3041_v16, %v1959_v15 }
 0x12b   : > { %v477_v14 = vmax.bf16 %v1371_v4, %v445_v30  ;;  %v1271_v20 = vmax.bf16 %v1371_v4, %v1179_v34  ;;  %v1668_v60 = vmax.bf16 %v1516_v41, %v1371_v4  ;;  %v1416_v39 = vmax.bf16 %v1371_v4, %v1264_v49 }
 0x12c   : > { %v2222_v0 = vmax.bf16 %v2134_v12, %v1371_v4  ;;  %v2387_v6 = vmax.bf16 %v2299_v9, %v1371_v4  ;;  %v4908_v5 = vsel %vm3612_vm3, %v1380_v62, %v1384_v22  ;;  %v1701_v21 = vmax.bf16 %v1956_v35, %v1654_v23  ;;  %v4934_v4 = vld [vmem:[%s3273_s22 + $0x90] sm:$0xf] }
 0x12d   : > { %v446_v44 = vmax.bf16 %v4908_v5, %v414_v50  ;;  %v509_v58 = vmax.bf16 %v4908_v5, %v477_v14  ;;  %v1423_v57 = vmax.bf16 %v4908_v5, %v1271_v20  ;;  %v1463_v16 = vmax.bf16 %v1416_v39, %v4908_v5  ;;  %v4921_v50 = vld [vmem:[%s3273_s22 + $0x40] sm:$0xf]  ;;  %v4940_v14 = vld [vmem:[%s3273_s22 + $0x48] sm:$0xf] }
 0x12e   : > { %v2261_v15 = vmax.bf16 %v2222_v0, %v4908_v5  ;;  %v1715_v26 = vmax.bf16 %v1956_v35, %v1668_v60  ;;  %v2380_v18 = vmax.bf16 %v2292_v48, %v1956_v35  ;;  %v4915_v1 = vmax.bf16 %v2379_v38, %v1956_v35  ;;  %v4946_v39 = vld [vmem:[%s3273_s22 + $0xe0] sm:$0xf] }
 0x12f   : > { %v541_v41 = vmax.bf16 %v1956_v35, %v509_v58  ;;  %v1470_v37 = vmax.bf16 %v1956_v35, %v1423_v57  ;;  %v1510_v22 = vmax.bf16 %v1956_v35, %v1463_v16  ;;  %v2426_v61 = vmax.bf16 %v2387_v6, %v1956_v35 }
 0x130   : > { %5646 = vst [vmem:[#allocation4_spill] sm:$0xff] %v4915_v1  ;;  %v2300_v52 = vmax.bf16 %v2261_v15, %v1956_v35  ;;  %v478_v9 = vmax.bf16 %v4904_v55, %v446_v44  ;;  %v558_v3 = vmax.bf16 %v4904_v55, %v526_v54  ;;  %v1748_v25 = vmax.bf16 %v4904_v55, %v1701_v21 }
 0x131   : > { %v573_v30 = vmax.bf16 %v4904_v55, %v541_v41  ;;  %v1517_v38 = vmax.bf16 %v4904_v55, %v1470_v37  ;;  %v4926_v23 = vmax.bf16 %v2380_v18, %v4904_v55  ;;  %v1662_v34 = vmax.bf16 %v4904_v55, %v1510_v22 }
 0x132   : > { %v2388_v48 = vmax.bf16 %v2300_v52, %v4904_v55  ;;  %v3056_v49 = vrot.slane %v4811_v47, 9  ;;  %v2187_v54 = vrot.slane %v4859_v17, 5  ;;  %v3057_v12 = vrot.slane %v4837_v28, 9  ;;  %v4980_v52 = vld [vmem:[%s3273_s22 + $0x180] sm:$0xf] }
 0x133   : > { %5647 = vst [vmem:[#allocation3_spill] sm:$0xff] %v4926_v23  ;;  %v2191_v62 = vrot.slane %v4865_v24, 5  ;;  %v1065_v35 = vmax.bf16 %v4799_v59, %v4921_v50  ;;  %v1073_v20 = vmax.bf16 %v558_v3, %v4934_v4  ;;  %v1999_v60 = vmax.bf16 %v4828_v43, %v4934_v4 }
 0x134   : > { %v2188_v47 = vsel %vm4049_vm6, %v3056_v49, %v2187_v54  ;;  %v2007_v17 = vmax.bf16 %v1748_v25, %v4946_v39  ;;  %v325_v24 = vmax.bf16 %v4614_v63, %v4599_v31  ;;  %v4991_v49 = vld [vmem:[%s3273_s22 + $0xe8] sm:$0xf] }
 0x135   : > { %v1088_v0 = vmax.bf16 %v2188_v47, %v573_v30  ;;  %v4953_v59 = vmax.bf16 %v2188_v47, %v1517_v38  ;;  %v4955_v6 = vmax.bf16 %v2188_v47, %v1715_v26  ;;  %v1709_v21 = vmax.bf16 %v2188_v47, %v1662_v34  ;;  %v4968_v26 = vld [vmem:[%s3273_s22 + $0x98] sm:$0xf]  ;;  %v4994_v54 = vld [vmem:[%s3273_s22 + $0x188] sm:$0xf] }
 0x136   : > { %v2427_v43 = vmax.bf16 %v2388_v48, %v2188_v47  ;;  %v2465_v44 = vmax.bf16 %v2426_v61, %v2188_v47  ;;  %v4959_v58 = vsel %vm4049_vm6, %v3057_v12, %v2191_v62  ;;  %v1157_v57 = vmax.bf16 %v1065_v35, %v4940_v14  ;;  %v4977_v61 = vld [vmem:[%s3273_s22 + $0x130] sm:$0xf] }
 0x137   : > { %5648 = vst [vmem:[#allocation5_spill] sm:$0xff] %v4955_v6  ;;  %v510_v16 = vmax.bf16 %v4959_v58, %v478_v9  ;;  %v1180_v31 = vmax.bf16 %v4959_v58, %v1088_v0  ;;  %v1756_v15 = vmax.bf16 %v4959_v58, %v1709_v21  ;;  %v1165_v37 = vmax.bf16 %v1073_v20, %v4968_v26  ;;  %v5011_v21 = vld [vmem:[%s3273_s22 + $0x44] sm:$0x1] }
 0x138   : > { %v2466_v18 = vmax.bf16 %v2427_v43, %v4959_v58  ;;  %v1249_v41 = vmax.bf16 %v1157_v57, %v4934_v4  ;;  %v4974_v22 = vmax.bf16 %v1999_v60, %v4946_v39  ;;  %v2067_v3 = vmax.bf16 %v2007_v17, %v4977_v61  ;;  %v5014_v43 = vld [vmem:[%s3273_s22 + $0x138] sm:$0xf] }
 0x139   : > { %v4983_v9 = vmax.bf16 %v1180_v31, %v4977_v61  ;;  %v2015_v25 = vmax.bf16 %v1756_v15, %v4977_v61  ;;  %v542_v30 = vmax.bf16 %v510_v16, %v4980_v52  ;;  %v1257_v48 = vmax.bf16 %v1165_v37, %v4946_v39  ;;  %v5023_v31 = vld [vmem:[%s3273_s22 + $0x94] sm:$0x1] }
 0x13a   : > { %v3080_v38 = vcombine.low %v2465_v44, %v2466_v18  ;;  %v1401_v34 = vmax.bf16 %v1249_v41, %v4968_v26  ;;  %v342_v20 = vmax.bf16 %v4946_v39, %v4642_v45  ;;  %v350_v17 = vmax.bf16 %v4977_v61, %v4757_v8 }
 0x13b   : > { %v2075_v62 = vmax.bf16 %v2015_v25, %v4980_v52  ;;  %v5000_v35 = vmax.bf16 %v542_v30, %v4994_v54  ;;  %v1409_v47 = vmax.bf16 %v1257_v48, %v4991_v49  ;;  %v357_v0 = vmax.bf16 %v325_v24, %v4921_v50 }
 0x13c   : > { %3146 = vmatprep.mubr.msk.bf16.mxu1 %vm2558_vm7, %v3080_v38  ;;  %v1448_v60 = vmax.bf16 %v1401_v34, %v4946_v39  ;;  %v365_v44 = vmax.bf16 %v4634_v11, %v4934_v4  ;;  %v373_v45 = vmax.bf16 %v4665_v36, %v4946_v39  ;;  %v374_v57 = vmax.bf16 %v342_v20, %v4991_v49 }
 0x13d   : > { %v1091_v16 = vshrl.u32 %v4921_v50, 16  ;;  %v1456_v24 = vmax.bf16 %v1409_v47, %v4977_v61  ;;  %v2119_v18 = vmax.bf16 %v4974_v22, %v357_v0  ;;  %v5029_v41 = vmax.bf16 %v350_v17, %v5014_v43  ;;  %v5040_v22 = vld [vmem:[%s3273_s22 + $0xe4] sm:$0x1] }
 0x13e   : > { %v1495_v15 = vmax.bf16 %v1448_v60, %v4991_v49  ;;  %v2127_v11 = vmax.bf16 %v2067_v3, %v365_v44  ;;  %v5031_v37 = vmax.bf16 %v2075_v62, %v373_v45  ;;  %v406_v36 = vmax.bf16 %v374_v57, %v4757_v8  ;;  %v5049_v44 = vld [vmem:[%s3273_s22 + $0x134] sm:$0x1] }
 0x13f   : > { %v1093_v25 = vrot.slane %v1091_v16, 4  ;;  %v1503_v30 = vmax.bf16 %v1456_v24, %v5014_v43  ;;  %v1094_v34 = vshll.u32 %v4921_v50, 16  ;;  %v1100_v48 = vshll.u32 %v5011_v21, 16 }
 0x140   : > { %v438_v20 = vmax.bf16 %v406_v36, %v4977_v61  ;;  %v1105_v3 = vshrl.u32 %v4934_v4, 16  ;;  %v1108_v62 = vshll.u32 %v4934_v4, 16  ;;  %v1114_v8 = vshll.u32 %v5023_v31, 16 }
 0x141   : > { %v1096_v60 = vrot.slane %v1094_v34, 5  ;;  %v1102_v47 = vrot.slane %v1100_v48, 5  ;;  %v1119_v17 = vshrl.u32 %v4946_v39, 16  ;;  %v1122_v0 = vshll.u32 %v4946_v39, 16 }
 0x142   : > { %v470_v45 = vmax.bf16 %v438_v20, %v5014_v43  ;;  %v1107_v57 = vrot.slane %v1105_v3, 4  ;;  %v1110_v16 = vrot.slane %v1108_v62, 5  ;;  %v1116_v24 = vrot.slane %v1114_v8, 5 }
 0x143   : > { %v1097_v36 = vor.u32 %v1096_v60, %v1093_v25  ;;  %v1121_v63 = vrot.slane %v1119_v17, 4  ;;  %v1124_v12 = vrot.slane %v1122_v0, 5  ;;  %v1128_v38 = vshll.u32 %v5040_v22, 16 }
 0x144   : > { %v502_v23 = vmax.bf16 %v470_v45, %v4837_v28  ;;  %v1111_v34 = vor.u32 %v1110_v16, %v1107_v57  ;;  %v1133_v48 = vshrl.u32 %v4977_v61, 16  ;;  %v1136_v1 = vshll.u32 %v4977_v61, 16 }
 0x145   : > { %v1098_v6 = vrot.slane %v1097_v36, 4  ;;  %v1125_v42 = vor.u32 %v1124_v12, %v1121_v63  ;;  %v1130_v27 = vrot.slane %v1128_v38, 5  ;;  %v1142_v20 = vshll.u32 %v5049_v44, 16  ;;  %v5067_v36 = vld [vmem:[%s3273_s22 + $0x4c] sm:$0x1] }
 0x146   : > { %v534_v3 = vmax.bf16 %v502_v23, %v4980_v52  ;;  %v1112_v25 = vrot.slane %v1111_v34, 4  ;;  %v1135_v62 = vrot.slane %v1133_v48, 4  ;;  %v1138_v8 = vrot.slane %v1136_v1, 5 }
 0x147   : > { %v1103_v60 = vsel %vm3612_vm3, %v1098_v6, %v1102_v47  ;;  %v1126_v28 = vrot.slane %v1125_v42, 4  ;;  %v1144_v17 = vrot.slane %v1142_v20, 5  ;;  %v1183_v0 = vshrl.u32 %v4940_v14, 16 }
 0x148   : > { %v566_v45 = vmax.bf16 %v534_v3, %v4994_v54  ;;  %v1647_v57 = vmax.bf16 %v1495_v15, %v1103_v60  ;;  %v2207_v63 = vmax.bf16 %v2119_v18, %v1103_v60  ;;  %v1117_v12 = vsel %vm3612_vm3, %v1112_v25, %v1116_v24  ;;  %v5079_v3 = vld [vmem:[%s3273_s22 + $0x9c] sm:$0x1] }
 0x149   : > { %v1655_v38 = vmax.bf16 %v1503_v30, %v1117_v12  ;;  %v2215_v23 = vmax.bf16 %v2127_v11, %v1117_v12  ;;  %v1131_v1 = vsel %vm3612_vm3, %v1126_v28, %v1130_v27  ;;  %v1139_v16 = vor.u32 %v1138_v8, %v1135_v62  ;;  %v5089_v8 = vld [vmem:[%s3273_s22 + $0xec] sm:$0x1] }
 0x14a   : > { %v1081_v42 = vmax.bf16 %v4761_v7, %v566_v45  ;;  %v1694_v6 = vmax.bf16 %v1647_v57, %v1117_v12  ;;  %v2246_v47 = vmax.bf16 %v2207_v63, %v1117_v12  ;;  %v2223_v15 = vmax.bf16 %v5031_v37, %v1131_v1 }
 0x14b   : > { %v1702_v18 = vmax.bf16 %v1655_v38, %v1131_v1  ;;  %v5071_v34 = vmax.bf16 %v2215_v23, %v1131_v1  ;;  %v1140_v24 = vrot.slane %v1139_v16, 4  ;;  %v1185_v30 = vrot.slane %v1183_v0, 4  ;;  %v5113_v16 = vld [vmem:[%s3273_s22 + $0x13c] sm:$0x1] }
 0x14c   : > { %v1741_v11 = vmax.bf16 %v1694_v6, %v1131_v1  ;;  %v5073_v48 = vmax.bf16 %v2246_v47, %v1131_v1  ;;  %v5075_v20 = vmax.bf16 %v1131_v1, %v1081_v42  ;;  %v1186_v27 = vshll.u32 %v4940_v14, 16 }
 0x14d   : > { %v5083_v7 = vsel %vm3612_vm3, %v1140_v24, %v1144_v17  ;;  %v1192_v37 = vshll.u32 %v5067_v36, 16  ;;  %v1197_v25 = vshrl.u32 %v4968_v26, 16  ;;  %v1200_v62 = vshll.u32 %v4968_v26, 16 }
 0x14e   : > { %v5649_v60 = vmax.bf16 %v5000_v35, %v5029_v41  ;;  %v5650_v17 = vmax.bf16 %v4983_v9, %v4980_v52  ;;  %v1749_v45 = vmax.bf16 %v1702_v18, %v5083_v7  ;;  %v5107_v63 = vmax.bf16 %v2223_v15, %v5083_v7  ;;  %v5119_v18 = vld [vmem:[%s3273_s22 + $0x184] sm:$0x1] }
 0x14f   : > { %v1188_v12 = vrot.slane %v1186_v27, 5  ;;  %v1194_v35 = vrot.slane %v1192_v37, 5  ;;  %v1199_v41 = vrot.slane %v1197_v25, 4  ;;  %v1202_v38 = vrot.slane %v1200_v62, 5 }
 0x150   : > { %v5095_v28 = vmax.bf16 %v5083_v7, %v5649_v60  ;;  %v5101_v0 = vmax.bf16 %v5650_v17, %v5083_v7  ;;  %v1206_v23 = vshll.u32 %v5079_v3, 16  ;;  %v1211_v1 = vshrl.u32 %v4991_v49, 16 }
 0x151   : > { %v1214_v9 = vshll.u32 %v4991_v49, 16  ;;  %v1189_v42 = vor.u32 %v1188_v12, %v1185_v30  ;;  %v1220_v6 = vshll.u32 %v5089_v8, 16  ;;  %v1225_v47 = vshrl.u32 %v5014_v43, 16 }
 0x152   : > { %v1228_v15 = vshll.u32 %v5014_v43, 16  ;;  %v1203_v24 = vor.u32 %v1202_v38, %v1199_v41  ;;  %v1208_v27 = vrot.slane %v1206_v23, 5  ;;  %v1213_v37 = vrot.slane %v1211_v1, 4 }
 0x153   : > { %v1216_v25 = vrot.slane %v1214_v9, 5  ;;  %v1190_v62 = vrot.slane %v1189_v42, 4  ;;  %v1222_v60 = vrot.slane %v1220_v6, 5  ;;  %v1227_v17 = vrot.slane %v1225_v47, 4 }
 0x154   : > { %v1230_v57 = vrot.slane %v1228_v15, 5  ;;  %v1204_v40 = vrot.slane %v1203_v24, 4  ;;  %v1234_v30 = vshll.u32 %v5113_v16, 16  ;;  %v1427_v12 = vshrl.u32 %v4980_v52, 16 }
 0x155   : > { %v1217_v29 = vor.u32 %v1216_v25, %v1213_v37  ;;  %v1195_v32 = vsel %vm3612_vm3, %v1190_v62, %v1194_v35  ;;  %v1430_v41 = vshll.u32 %v4980_v52, 16  ;;  %v1436_v38 = vshll.u32 %v5119_v18, 16  ;;  %v5130_v37 = vld [vmem:[%s3273_s22 + $0x18c] sm:$0x1] }
 0x156   : > { %v1231_v2 = vor.u32 %v1230_v57, %v1227_v17  ;;  %v2000_v23 = vmax.bf16 %v1741_v11, %v1195_v32  ;;  %v1209_v1 = vsel %vm3612_vm3, %v1204_v40, %v1208_v27  ;;  %v1236_v42 = vrot.slane %v1234_v30, 5 }
 0x157   : > { %v1218_v9 = vrot.slane %v1217_v29, 4  ;;  %v2008_v6 = vmax.bf16 %v1749_v45, %v1209_v1  ;;  %v1429_v15 = vrot.slane %v1427_v12, 4  ;;  %v1432_v24 = vrot.slane %v1430_v41, 5 }
 0x158   : > { %v1232_v47 = vrot.slane %v1231_v2, 4  ;;  %v2060_v25 = vmax.bf16 %v2000_v23, %v1209_v1  ;;  %v1438_v35 = vrot.slane %v1436_v38, 5  ;;  %v1474_v62 = vshrl.u32 %v4994_v54, 16 }
 0x159   : > { %v1223_v57 = vsel %vm3612_vm3, %v1218_v9, %v1222_v60  ;;  %v1433_v29 = vor.u32 %v1432_v24, %v1429_v15  ;;  %v1477_v27 = vshll.u32 %v4994_v54, 16  ;;  %v1483_v41 = vshll.u32 %v5130_v37, 16 }
 0x15a   : > { %v2068_v17 = vmax.bf16 %v2008_v6, %v1223_v57  ;;  %v1237_v32 = vsel %vm3612_vm3, %v1232_v47, %v1236_v42  ;;  %v1265_v40 = vmax.bf16 %v1223_v57, %v5075_v20  ;;  %v2120_v11 = vmax.bf16 %v2060_v25, %v1223_v57 }
 0x15b   : > { %v1273_v2 = vmax.bf16 %v1237_v32, %v5095_v28  ;;  %v1476_v45 = vrot.slane %v1474_v62, 4  ;;  %v1434_v60 = vrot.slane %v1433_v29, 4  ;;  %v1479_v38 = vrot.slane %v1477_v27, 5 }
 0x15c   : > { %v2128_v30 = vmax.bf16 %v2068_v17, %v1237_v32  ;;  %v1417_v12 = vmax.bf16 %v1265_v40, %v4886_v46  ;;  %v3042_v23 = vrot.slane %v4921_v50, 9  ;;  %v2035_v1 = vrot.slane %v5011_v21, 5 }
 0x15d   : > { %v3043_v20 = vrot.slane %v4934_v4, 9  ;;  %v1439_v9 = vsel %vm3612_vm3, %v1434_v60, %v1438_v35  ;;  %v1485_v42 = vrot.slane %v1483_v41, 5  ;;  %v2039_v6 = vrot.slane %v5023_v31, 5  ;;  %v5185_v60 = vld [vmem:[%s3273_s22 + $0x1c8] sm:$0xf] }
 0x15e   : > { %v1464_v28 = vmax.bf16 %v1417_v12, %v5083_v7  ;;  %v1425_v47 = vmax.bf16 %v1439_v9, %v1273_v2  ;;  %v1518_v46 = vmax.bf16 %v5101_v0, %v1439_v9  ;;  %v2301_v15 = vmax.bf16 %v5107_v63, %v1439_v9 }
 0x15f   : > { %v1480_v24 = vor.u32 %v1479_v38, %v1476_v45  ;;  %v2036_v50 = vsel %vm4049_vm6, %v3042_v23, %v2035_v1  ;;  %v2040_v4 = vsel %vm4049_vm6, %v3043_v20, %v2039_v6  ;;  %v3044_v21 = vrot.slane %v4946_v39, 9  ;;  %v5201_v6 = vld [vmem:[%s3273_s22 + $0x1cc] sm:$0x1] }
 0x160   : > { %v1511_v25 = vmax.bf16 %v1464_v28, %v1237_v32  ;;  %v2208_v35 = vmax.bf16 %v2120_v11, %v2036_v50  ;;  %v2373_v62 = vmax.bf16 %v5073_v48, %v2036_v50  ;;  %v2216_v31 = vmax.bf16 %v2128_v30, %v2040_v4 }
 0x161   : > { %v1481_v57 = vrot.slane %v1480_v24, 4  ;;  %v5651_v0 = vmax.bf16 %v5071_v34, %v5083_v7  ;;  %v2043_v32 = vrot.slane %v5040_v22, 5  ;;  %v3046_v40 = vrot.slane %v4940_v14, 9 }
 0x162   : > { %v1663_v17 = vmax.bf16 %v1511_v25, %v4908_v5  ;;  %v2247_v39 = vmax.bf16 %v2208_v35, %v2040_v4  ;;  %v2412_v11 = vmax.bf16 %v2373_v62, %v2040_v4  ;;  %v2095_v48 = vrot.slane %v5067_v36, 5  ;;  %v5212_v25 = vld [vmem:[%s3273_s22 + $0x1d4] sm:$0x1] }
 0x163   : > { %v5161_v63 = vmax.bf16 %v5651_v0, %v2040_v4  ;;  %v1486_v29 = vsel %vm3612_vm3, %v1481_v57, %v1485_v42  ;;  %v5170_v5 = vsel %vm4049_vm6, %v3044_v21, %v2043_v32  ;;  %v3047_v34 = vrot.slane %v4968_v26, 9 }
 0x164   : > { %v1472_v2 = vmax.bf16 %v1486_v29, %v1425_v47  ;;  %v1710_v45 = vmax.bf16 %v1663_v17, %v1439_v9  ;;  %v2255_v22 = vmax.bf16 %v2216_v31, %v5170_v5  ;;  %v5177_v7 = vmax.bf16 %v2301_v15, %v5170_v5  ;;  %v5222_v17 = vld [vmem:[%s3273_s22 + $0x1dc] sm:$0x1] }
 0x165   : > { %v2420_v14 = vmax.bf16 %v5161_v63, %v5170_v5  ;;  %v2286_v36 = vmax.bf16 %v2247_v39, %v5170_v5  ;;  %v2451_v30 = vmax.bf16 %v2412_v11, %v5170_v5  ;;  %v2096_v12 = vsel %vm4049_vm6, %v3046_v40, %v2095_v48 }
 0x166   : > { %v1757_v27 = vmax.bf16 %v1710_v45, %v1486_v29  ;;  %v2099_v26 = vrot.slane %v5079_v3, 5  ;;  %v3048_v38 = vrot.slane %v4991_v49, 9  ;;  %v2103_v23 = vrot.slane %v5089_v8, 5  ;;  %v5204_v49 = vld [vmem:[%s3273_s22 + $0x1d0] sm:$0xf] }
 0x167   : > { %v2374_v41 = vmax.bf16 %v2286_v36, %v2096_v12  ;;  %v1519_v1 = vmax.bf16 %v1472_v2, %v5185_v60  ;;  %v1670_v28 = vmax.bf16 %v1518_v46, %v5185_v60  ;;  %v5652_v3 = vmax.bf16 %v4959_v58, %v4953_v59  ;;  %v5215_v59 = vld [vmem:[%s3273_s22 + $0x1d8] sm:$0xf] }
 0x168   : > { %v2016_v20 = vmax.bf16 %v4789_v33, %v1757_v27  ;;  %v2100_v9 = vsel %vm4049_vm6, %v3047_v34, %v2099_v26  ;;  %v2104_v33 = vsel %vm4049_vm6, %v3048_v38, %v2103_v23  ;;  %v1619_v50 = vshrl.u32 %v5185_v60, 16 }
 0x169   : > { %v5198_v42 = vmax.bf16 %v5652_v3, %v5185_v60  ;;  %v2294_v8 = vmax.bf16 %v2255_v22, %v2100_v9  ;;  %v2413_v47 = vmax.bf16 %v2374_v41, %v2100_v9  ;;  %v1671_v15 = vmax.bf16 %v1519_v1, %v5204_v49 }
 0x16a   : > { %v2076_v46 = vmax.bf16 %v5170_v5, %v2016_v20  ;;  %v1717_v24 = vmax.bf16 %v1670_v28, %v5204_v49  ;;  %v1622_v4 = vshll.u32 %v5185_v60, 16  ;;  %v1628_v62 = vshll.u32 %v5201_v6, 16 }
 0x16b   : > { %v2382_v21 = vmax.bf16 %v2294_v8, %v2104_v33  ;;  %v2452_v57 = vmax.bf16 %v2413_v47, %v2104_v33  ;;  %v1718_v35 = vmax.bf16 %v1671_v15, %v5215_v59  ;;  %v1621_v0 = vrot.slane %v1619_v50, 4 }
 0x16c   : > { %v2136_v31 = vmax.bf16 %v2104_v33, %v2076_v46  ;;  %v1624_v32 = vrot.slane %v1622_v4, 5  ;;  %v1673_v40 = vshrl.u32 %v5204_v49, 16  ;;  %v1630_v39 = vrot.slane %v1628_v62, 5 }
 0x16d   : > { %v3073_v29 = vcombine.low %v2451_v30, %v2452_v57  ;;  %v1676_v11 = vshll.u32 %v5204_v49, 16  ;;  %v1682_v48 = vshll.u32 %v5212_v25, 16  ;;  %v1720_v22 = vshrl.u32 %v5215_v59, 16 }
 0x16e   : > { %v2224_v2 = vmax.bf16 %v2136_v31, %v4904_v55  ;;  %v1625_v45 = vor.u32 %v1624_v32, %v1621_v0  ;;  %v1675_v34 = vrot.slane %v1673_v40, 4  ;;  %v1723_v12 = vshll.u32 %v5215_v59, 16 }
 0x16f   : > { %3131 = vmatmul.mubr.msk.bf16.gmra.mxu0 %vm2558_vm7, %v3073_v29  ;;  %v1678_v36 = vrot.slane %v1676_v11, 5  ;;  %v1684_v27 = vrot.slane %v1682_v48, 5  ;;  %v1729_v26 = vshll.u32 %v5222_v17, 16  ;;  %v1722_v41 = vrot.slane %v1720_v22, 4  ;;  %v3206_v48 = vld [vmem:[%s3273_s22 + $0x190] sm:$0xf] }
 0x170   : > { %v1626_v30 = vrot.slane %v1625_v45, 4  ;;  %v3045_v38 = vrot.slane %v4977_v61, 9  ;;  %v2047_v23 = vrot.slane %v5049_v44, 5  ;;  %v1725_v55 = vrot.slane %v1723_v12, 5  ;;  %v3208_v45 = vld [vmem:[%s3273_s22 + $0x198] sm:$0xf] }
 0x171   : > { %v1679_v1 = vor.u32 %v1678_v36, %v1675_v34  ;;  %v1731_v20 = vrot.slane %v1729_v26, 5  ;;  %v3049_v9 = vrot.slane %v5014_v43, 9  ;;  %v2107_v8 = vrot.slane %v5113_v16, 5  ;;  %v3209_v36 = vld [vmem:[%s3273_s22 + $0x19c] sm:$0x1] }
 0x172   : > { %v5237_v28 = vsel %vm3612_vm3, %v1626_v30, %v1630_v39  ;;  %v2048_v3 = vsel %vm4049_vm6, %v3045_v38, %v2047_v23  ;;  %v3058_v47 = vrot.slane %v4980_v52, 9  ;;  %v1726_v43 = vor.u32 %v1725_v55, %v1722_v41  ;;  %v3211_v26 = vld [vmem:[%s3273_s22 + $0x1a4] sm:$0x1]  ;;  %v3212_v41 = vld [vmem:[%s3273_s22 + $0x1a8] sm:$0xf] }
 0x173   : > { %v1765_v61 = vmax.bf16 %v1718_v35, %v5237_v28  ;;  %v1764_v44 = vmax.bf16 %v1717_v24, %v5237_v28  ;;  %v2022_v33 = vmax.bf16 %v5198_v42, %v5237_v28  ;;  %v1680_v15 = vrot.slane %v1679_v1, 4  ;;  %v3213_v23 = vld [vmem:[%s3273_s22 + $0x1ac] sm:$0x1]  ;;  %v3216_v42 = vld [vmem:[%s3273_s22 + $0x118] sm:$0xf] }
 0x174   : > { %v2421_v46 = vmax.bf16 %v2382_v21, %v2048_v3  ;;  %v5250_v50 = vmax.bf16 %v2420_v14, %v2048_v3  ;;  %v2428_v4 = vmax.bf16 %v5177_v7, %v2048_v3  ;;  %v2108_v16 = vsel %vm4049_vm6, %v3049_v9, %v2107_v8 }
 0x175   : > { %v1685_v52 = vsel %vm3612_vm3, %v1680_v15, %v1684_v27  ;;  %v2237_v24 = vrot.slane %v5119_v18, 5  ;;  %v2263_v57 = vmax.bf16 %v2224_v2, %v2048_v3  ;;  %v1727_v31 = vrot.slane %v1726_v43, 4  ;;  %v5654_v15 = vld [vmem:[#allocation6_spill] sm:$0xff]  ;;  %v5655_v43 = vld [vmem:[#allocation13_spill] sm:$0xff] }
 0x176   : > { %v2024_v35 = vmax.bf16 %v1765_v61, %v1685_v52  ;;  %v2023_v62 = vmax.bf16 %v1764_v44, %v1685_v52  ;;  %v5258_v21 = vmax.bf16 %v2421_v46, %v2108_v16  ;;  %v3059_v5 = vrot.slane %v4994_v54, 9 }
 0x177   : > { %v5262_v63 = vsel %vm4049_vm6, %v3058_v47, %v2237_v24  ;;  %v2276_v14 = vrot.slane %v5130_v37, 5  ;;  %v2302_v7 = vmax.bf16 %v2263_v57, %v2108_v16  ;;  %v1732_v18 = vsel %vm3612_vm3, %v1727_v31, %v1731_v20  ;;  %v5657_v24 = vld [vmem:[#allocation14_spill] sm:$0xff] }
 0x178   : > { %v5268_v0 = vmax.bf16 %v2048_v3, %v2023_v62  ;;  %v2467_v32 = vmax.bf16 %v2428_v4, %v5262_v63  ;;  %v3074_v40 = vcombine.low %v4390_v13, %v4406_v51  ;;  %v2084_v29 = vmax.bf16 %v2024_v35, %v1732_v18  ;;  %v3207_v13 = vld [vmem:[%s3273_s22 + $0x194] sm:$0x1]  ;;  %v5659_v62 = vld [vmem:[#allocation2_spill] sm:$0xff] }
 0x179   : > { %v2277_v54 = vsel %vm4049_vm6, %v3059_v5, %v2276_v14  ;;  %v2390_v37 = vmax.bf16 %v2302_v7, %v4959_v58  ;;  %v2304_v39 = vmax.bf16 %v4453_v10, %v4431_v56  ;;  %v3060_v2 = vrot.slane %v3206_v48, 9  ;;  %v3210_v56 = vld [vmem:[%s3273_s22 + $0x1a0] sm:$0xf]  ;;  %v309_v5 = vld [vmem:[%s3273_s22 + $0x1b8] sm:$0xf] }
 0x17a   : > { %v2143_v11 = vmax.bf16 %v5262_v63, %v5268_v0  ;;  %3134 = vmatprep.mubr.msk.bf16.mxu0 %vm2558_vm7, %v3074_v40  ;;  %v2329_v51 = vrot.slane %v3207_v13, 5  ;;  %v3061_v34 = vrot.slane %v3208_v45, 9  ;;  %v2144_v22 = vmax.bf16 %v2084_v29, %v2048_v3  ;;  %v5653_v3 = vld [vmem:[#allocation11_spill] sm:$0xff]  ;;  %v308_v18 = vld [vmem:[%s3273_s22 + $0x1b4] sm:$0x1]  ;;  %v5660_v40 = vld [vmem:[#allocation5_spill] sm:$0xff] }
 0x17b   : > { %v2429_v58 = vmax.bf16 %v2390_v37, %v5262_v63  ;;  %v2333_v27 = vrot.slane %v3209_v36, 5  ;;  %v3062_v10 = vrot.slane %v3210_v56, 9  ;;  %v2337_v30 = vrot.slane %v3211_v26, 5  ;;  %v3215_v13 = vld [vmem:[%s3273_s22 + $0x110] sm:$0xf] }
 0x17c   : > { %v2330_v12 = vsel %vm4049_vm6, %v3060_v2, %v2329_v51  ;;  %v3063_v38 = vrot.slane %v3212_v41, 9  ;;  %v2341_v1 = vrot.slane %v3213_v23, 5  ;;  %v2232_v55 = vmax.bf16 %v2144_v22, %v2108_v16  ;;  %v5656_v16 = vld [vmem:[#allocation12_spill] sm:$0xff]  ;;  %v3214_v2 = vld [vmem:[%s3273_s22 + $0x108] sm:$0xf] }
 0x17d   : > { %v2468_v20 = vmax.bf16 %v2429_v58, %v2277_v54  ;;  %v2334_v9 = vsel %vm4049_vm6, %v3061_v34, %v2333_v27  ;;  %v2391_v8 = vmax.bf16 %v2330_v12, %v5653_v3  ;;  %v2338_v47 = vsel %vm4049_vm6, %v3062_v10, %v2337_v30  ;;  %v310_v58 = vld [vmem:[%s3273_s22 + $0x1bc] sm:$0x1] }
 0x17e   : > { %v5299_v61 = vsel %vm4049_vm6, %v3063_v38, %v2341_v1  ;;  %v2392_v44 = vmax.bf16 %v2334_v9, %v2304_v39  ;;  %v3075_v46 = vcombine.low %v5655_v43, %v5654_v15  ;;  %v2271_v4 = vmax.bf16 %v5262_v63, %v2232_v55  ;;  %v5332_v43 = vld [vmem:[%s3273_s22 + $0x1c0] sm:$0xf] }
 0x17f   : > { %v3081_v52 = vcombine.low %v2467_v32, %v2468_v20  ;;  %v5658_v57 = vmax.bf16 %v5656_v16, %v5657_v24  ;;  %v2140_v31 = vmax.bf16 %v5299_v61, %v5659_v62  ;;  %v2430_v14 = vmax.bf16 %v2391_v8, %v2334_v9  ;;  %v3220_v16 = vld [vmem:[%s3273_s22 + $0x78] sm:$0xf]  ;;  %v312_v62 = vld [vmem:[%s3273_s22 + $0x1c4] sm:$0x1] }
 0x180   : > { %v2431_v7 = vmax.bf16 %v2392_v44, %v2338_v47  ;;  %3135 = vmatmul.mubr.msk.bf16.gmra.mxu0 %vm2558_vm7, %v3075_v46  ;;  %v2082_v32 = vmax.bf16 %v2022_v33, %v309_v5  ;;  %v2021_v29 = vmax.bf16 %v5660_v40, %v309_v5  ;;  %v5318_v37 = vmax.bf16 %v2277_v54, %v2271_v4  ;;  %v3217_v33 = vld [vmem:[%s3273_s22 + $0x120] sm:$0xf]  ;;  %v3218_v54 = vld [vmem:[%s3273_s22 + $0x1b0] sm:$0xf]  ;;  %v5662_v40 = vld [vmem:[#allocation3_spill] sm:$0xff] }
 0x181   : > { %v5307_v35 = vmax.bf16 %v2338_v47, %v5658_v57  ;;  %3147 = vmatmul.mubr.msk.bf16.gmra.mxu1 %vm2558_vm7, %v3081_v52  ;;  %v2228_v48 = vmax.bf16 %v2140_v31, %v309_v5  ;;  %v346_v51 = vmax.bf16 %v3215_v13, %v3214_v2  ;;  %v2469_v45 = vmax.bf16 %v2430_v14, %v2338_v47  ;;  %v3219_v52 = vld [vmem:[%s3273_s22 + $0x70] sm:$0xf]  ;;  %v3221_v57 = vld [vmem:[%s3273_s22 + $0x80] sm:$0xf] }
 0x182   : > { %v2470_v34 = vmax.bf16 %v2431_v7, %v5299_v61  ;;  %v347_v28 = vmax.bf16 %v3216_v42, %v3215_v13  ;;  %v348_v22 = vmax.bf16 %v3217_v33, %v3216_v42  ;;  %v1577_v27 = vshrl.u32 %v3218_v54, 16 }
 0x183   : > { %v2393_v39 = vmax.bf16 %v5299_v61, %v5307_v35  ;;  %v2267_v36 = vmax.bf16 %v2228_v48, %v346_v51  ;;  %v1580_v56 = vshll.u32 %v3218_v54, 16  ;;  %v1586_v10 = vshll.u32 %v308_v18, 16  ;;  %v3222_v48 = vld [vmem:[%s3273_s22 + $0x128] sm:$0xf] }
 0x184   : > { %v3082_v12 = vcombine.low %v2469_v45, %v2470_v34  ;;  %v2081_v26 = vmax.bf16 %v2021_v29, %v347_v28  ;;  %v2142_v30 = vmax.bf16 %v2082_v32, %v348_v22  ;;  %v1591_v41 = vshrl.u32 %v309_v5, 16 }
 0x185   : > { %v1579_v38 = vrot.slane %v1577_v27, 4  ;;  %v1582_v23 = vrot.slane %v1580_v56, 5  ;;  %v1588_v1 = vrot.slane %v1586_v10, 5  ;;  %v1594_v55 = vshll.u32 %v309_v5, 16 }
 0x186   : > { %3150 = vmatprep.mubr.msk.bf16.mxu1 %vm2558_vm7, %v3082_v12  ;;  %v1593_v20 = vrot.slane %v1591_v41, 4  ;;  %v1600_v9 = vshll.u32 %v310_v58, 16  ;;  %v3064_v3 = vrot.slane %v3218_v54, 9  ;;  %v2345_v8 = vrot.slane %v308_v18, 5  ;;  %v5661_v18 = vld [vmem:[#allocation4_spill] sm:$0xff] }
 0x187   : > { %v1583_v47 = vor.u32 %v1582_v23, %v1579_v38  ;;  %v1596_v61 = vrot.slane %v1594_v55, 5  ;;  %v3065_v44 = vrot.slane %v309_v5, 9  ;;  %v2349_v15 = vrot.slane %v310_v58, 5 }
 0x188   : > { %v1602_v46 = vrot.slane %v1600_v9, 5  ;;  %v2346_v4 = vsel %vm4049_vm6, %v3064_v3, %v2345_v8  ;;  %v331_v24 = vmax.bf16 %v3220_v16, %v3219_v52  ;;  %v332_v35 = vmax.bf16 %v3221_v57, %v3220_v16 }
 0x189   : > { %v1584_v31 = vrot.slane %v1583_v47, 4  ;;  %v1597_v14 = vor.u32 %v1596_v61, %v1593_v20  ;;  %v2350_v7 = vsel %vm4049_vm6, %v3065_v44, %v2349_v15  ;;  %v2231_v5 = vmax.bf16 %v2143_v11, %v5332_v43 }
 0x18a   : > { %v2457_v32 = vmax.bf16 %v5661_v18, %v331_v24  ;;  %v2458_v29 = vmax.bf16 %v5662_v40, %v332_v35  ;;  %v349_v2 = vmax.bf16 %v3222_v48, %v3217_v33  ;;  %v1605_v13 = vshrl.u32 %v5332_v43, 16  ;;  %v5388_v18 = vld [vmem:[%s5532_s3] ss:$0 sm:$0xff] }
 0x18b   : > { %v1589_v51 = vsel %vm3612_vm3, %v1584_v31, %v1588_v1  ;;  %v1598_v45 = vrot.slane %v1597_v14, 4  ;;  %v1608_v34 = vshll.u32 %v5332_v43, 16  ;;  %v1614_v42 = vshll.u32 %v312_v62, 16 }
 0x18c   : > { %v2141_v28 = vmax.bf16 %v2081_v26, %v1589_v51  ;;  %v2306_v22 = vmax.bf16 %v2267_v36, %v1589_v51  ;;  %v2432_v58 = vmax.bf16 %v2393_v39, %v1589_v51  ;;  %v3076_v63 = vcombine.low %v2457_v32, %v2458_v29 }
 0x18d   : > { %v1603_v0 = vsel %vm3612_vm3, %v1598_v45, %v1602_v46  ;;  %v2270_v11 = vmax.bf16 %v2231_v5, %v349_v2  ;;  %v1607_v54 = vrot.slane %v1605_v13, 4  ;;  %v1610_v27 = vrot.slane %v1608_v34, 5 }
 0x18e   : > { %v2230_v33 = vmax.bf16 %v2142_v30, %v1603_v0  ;;  %v2229_v56 = vmax.bf16 %v2141_v28, %v1603_v0  ;;  %v2394_v10 = vmax.bf16 %v2306_v22, %v1603_v0  ;;  %v2471_v12 = vmax.bf16 %v2432_v58, %v2346_v4  ;;  %3138 = vmatprep.mubr.msk.bf16.mxu0 %vm2558_vm7, %v3076_v63 }
 0x18f   : > { %v1611_v41 = vor.u32 %v1610_v27, %v1607_v54  ;;  %v1616_v38 = vrot.slane %v1614_v42, 5  ;;  %v3066_v23 = vrot.slane %v5332_v43, 9  ;;  %v2353_v26 = vrot.slane %v312_v62, 5 }
 0x190   : > { %v2268_v36 = vmax.bf16 %v2346_v4, %v2229_v56  ;;  %v2433_v39 = vmax.bf16 %v2394_v10, %v2346_v4  ;;  %v2269_v1 = vmax.bf16 %v2350_v7, %v2230_v33  ;;  %v3067_v55 = vrot.slane %v5185_v60, 9 }
 0x191   : > { %v1612_v20 = vrot.slane %v1611_v41, 4  ;;  %v2354_v9 = vsel %vm4049_vm6, %v3066_v23, %v2353_v26  ;;  %v2357_v30 = vrot.slane %v5201_v6, 5  ;;  %v3077_v3 = vcombine.low %v5250_v50, %v5258_v21 }
 0x192   : > { %v2307_v8 = vmax.bf16 %v2350_v7, %v2268_v36  ;;  %v2472_v47 = vmax.bf16 %v2433_v39, %v2350_v7  ;;  %v2308_v61 = vmax.bf16 %v2269_v1, %v5332_v43  ;;  %v3068_v44 = vrot.slane %v5204_v49, 9 }
 0x193   : > { %v1617_v15 = vsel %vm3612_vm3, %v1612_v20, %v1616_v38  ;;  %v2358_v60 = vsel %vm4049_vm6, %v3067_v55, %v2357_v30  ;;  %3139 = vmatmul.mubr.msk.bf16.gmra.mxu0 %vm2558_vm7, %v3077_v3  ;;  %v2403_v46 = vrot.slane %v5212_v25, 5  ;;  %v3069_v6 = vrot.slane %v5215_v59, 9 }
 0x194   : > { %v3083_v4 = vcombine.low %v2471_v12, %v2472_v47  ;;  %v2395_v50 = vmax.bf16 %v2307_v8, %v5332_v43  ;;  %v2309_v21 = vmax.bf16 %v2270_v11, %v1617_v15  ;;  %v2396_v52 = vmax.bf16 %v2308_v61, %v1617_v15 }
 0x195   : > { %v2398_v16 = vmax.bf16 %v2358_v60, %v5318_v37  ;;  %v2404_v19 = vsel %vm4049_vm6, %v3068_v44, %v2403_v46  ;;  %v2442_v49 = vrot.slane %v5222_v17, 5  ;;  %v5383_v37 = vld [vmem:[%s5531_s2] ss:$0 sm:$0xff] }
 0x196   : > { %3151 = vmatmul.mubr.msk.bf16.gmra.mxu1 %vm2558_vm7, %v3083_v4  ;;  %v2434_v24 = vmax.bf16 %v2395_v50, %v1617_v15  ;;  %v2397_v57 = vmax.bf16 %v2354_v9, %v2309_v21  ;;  %v2435_v35 = vmax.bf16 %v2396_v52, %v2354_v9 }
 0x197   : > { %v2437_v25 = vmax.bf16 %v2404_v19, %v2398_v16  ;;  %v2443_v59 = vsel %vm4049_vm6, %v3069_v6, %v2442_v49 }
 0x198   : > { %v2473_v43 = vmax.bf16 %v2434_v24, %v2354_v9  ;;  %v2436_v62 = vmax.bf16 %v2397_v57, %v2358_v60  ;;  %v2474_v31 = vmax.bf16 %v2435_v35, %v2358_v60 }
 0x199   : > { %v2476_v14 = vmax.bf16 %v2443_v59, %v2437_v25 }
 0x19a   : > { %v3084_v17 = vcombine.low %v2473_v43, %v2474_v31  ;;  %v2475_v7 = vmax.bf16 %v2436_v62, %v2404_v19  ;;  %v3128_v5 = vpop.f32.mrf.mxu0 }
 0x19b   : > { %v2781_v32 = vmul.f32 %v3128_v5, %v5383_v37 }
 0x19c   : > { %3154 = vmatprep.mubr.msk.bf16.mxu1 %vm2558_vm7, %v3084_v17  ;;  %v3085_v53 = vcombine.low %v2475_v7, %v2476_v14  ;;  %v2645_v40 = vpop.f32.mrf.mxu0 }
 0x19d   : > { %v2820_v29 = vadd.f32 %v5388_v18, %v2781_v32  ;;  %v2779_v48 = vmul.f32 %v5383_v37, %v2645_v40 }
 0x19e   : > { %3155 = vmatmul.mubr.msk.bf16.gmra.mxu1 %vm2558_vm7, %v3085_v53  ;;  %v3129_v2 = vpop.f32.mrf.mxu0 }
 0x19f   : > { %v2852_v13 = vmax.f32 %v2820_v29, 0.0  ;;  %v2818_v51 = vadd.f32 %v5388_v18, %v2779_v48  ;;  %v2782_v45 = vmul.f32 %v3129_v2, %v5383_v37 }
 0x1a0   : > { %v2648_v34 = vpop.f32.mrf.mxu0 }
 0x1a1   : > { %v2884_v42 = vpack.c.bf16 %v2852_v13, %v2852_v13  ;;  %v2850_v28 = vmax.f32 %v2818_v51, 0.0  ;;  %v2821_v22 = vadd.f32 %v5388_v18, %v2782_v45  ;;  %v2780_v58 = vmul.f32 %v5383_v37, %v2648_v34 }
 0x1a3   : > { %2917 = vst.msk [vmem:[%s5401_s30 + $0x8] sm:$0xf] %vm2914_vm8, %v2884_v42  ;;  %v2882_v63 = vpack.c.bf16 %v2850_v28, %v2850_v28  ;;  %v2853_v0 = vmax.f32 %v2821_v22, 0.0  ;;  %v2819_v11 = vadd.f32 %v5388_v18, %v2780_v58 }
 0x1a5   : > { %2915 = vst.msk [vmem:[%s5401_s30] sm:$0xf] %vm2914_vm8, %v2882_v63  ;;  %v2885_v54 = vpack.c.bf16 %v2853_v0, %v2853_v0  ;;  %v2851_v27 = vmax.f32 %v2819_v11, 0.0 }
 0x1a7   : > { %2918 = vst.msk [vmem:[%s5401_s30 + $0xc] sm:$0xf] %vm2914_vm8, %v2885_v54  ;;  %v2883_v33 = vpack.c.bf16 %v2851_v27, %v2851_v27 }
 0x1a9   : > { %2916 = vst.msk [vmem:[%s5401_s30 + $0x4] sm:$0xf] %vm2914_vm8, %v2883_v33 }
 0x1b2   : > { %v3144_v56 = vpop.f32.mrf.mxu1 }
 0x1b3   : > { %v2797_v10 = vmul.f32 %v3144_v56, %v5383_v37 }
 0x1b4   : > { %v2709_v12 = vpop.f32.mrf.mxu1 }
 0x1b5   : > { %v2836_v41 = vadd.f32 %v5388_v18, %v2797_v10  ;;  %v2795_v38 = vmul.f32 %v5383_v37, %v2709_v12 }
 0x1b6   : > { %v3145_v23 = vpop.f32.mrf.mxu1 }
 0x1b7   : > { %v2868_v26 = vmax.f32 %v2836_v41, 0.0  ;;  %v2834_v36 = vadd.f32 %v5388_v18, %v2795_v38  ;;  %v2798_v39 = vmul.f32 %v3145_v23, %v5383_v37 }
 0x1b8   : > { %v2712_v1 = vpop.f32.mrf.mxu1 }
 0x1b9   : > { %v2900_v55 = vpack.c.bf16 %v2868_v26, %v2868_v26  ;;  %v2866_v20 = vmax.f32 %v2834_v36, 0.0  ;;  %v2837_v9 = vadd.f32 %v5388_v18, %v2798_v39  ;;  %v2796_v30 = vmul.f32 %v5383_v37, %v2712_v1 }
 0x1bb   : > { %2933 = vst.msk [vmem:[%s5401_s30 + $0x48] sm:$0xf] %vm2914_vm8, %v2900_v55  ;;  %v2898_v3 = vpack.c.bf16 %v2866_v20, %v2866_v20  ;;  %v2869_v8 = vmax.f32 %v2837_v9, 0.0  ;;  %v2835_v47 = vadd.f32 %v5388_v18, %v2796_v30 }
 0x1bd   : > { %2931 = vst.msk [vmem:[%s5401_s30 + $0x40] sm:$0xf] %vm2914_vm8, %v2898_v3  ;;  %v2901_v61 = vpack.c.bf16 %v2869_v8, %v2869_v8  ;;  %v2867_v44 = vmax.f32 %v2835_v47, 0.0 }
 0x1bf   : > { %2934 = vst.msk [vmem:[%s5401_s30 + $0x4c] sm:$0xf] %vm2914_vm8, %v2901_v61  ;;  %v2899_v15 = vpack.c.bf16 %v2867_v44, %v2867_v44 }
 0x1c1   : > { %2932 = vst.msk [vmem:[%s5401_s30 + $0x44] sm:$0xf] %vm2914_vm8, %v2899_v15 }
 0x22f   : > { %v3132_v60 = vpop.f32.mrf.mxu0 }
 0x230   : > { %v2785_v46 = vmul.f32 %v3132_v60, %v5383_v37 }
 0x231   : > { %v2661_v6 = vpop.f32.mrf.mxu0 }
 0x232   : > { %v2824_v4 = vadd.f32 %v5388_v18, %v2785_v46  ;;  %v2783_v50 = vmul.f32 %v5383_v37, %v2661_v6 }
 0x233   : > { %v3133_v21 = vpop.f32.mrf.mxu0 }
 0x234   : > { %v2856_v52 = vmax.f32 %v2824_v4, 0.0  ;;  %v2822_v16 = vadd.f32 %v5388_v18, %v2783_v50  ;;  %v2786_v19 = vmul.f32 %v3133_v21, %v5383_v37 }
 0x235   : > { %v2664_v49 = vpop.f32.mrf.mxu0 }
 0x236   : > { %v2888_v24 = vpack.c.bf16 %v2856_v52, %v2856_v52  ;;  %v2854_v57 = vmax.f32 %v2822_v16, 0.0  ;;  %v2825_v35 = vadd.f32 %v5388_v18, %v2786_v19  ;;  %v2784_v25 = vmul.f32 %v5383_v37, %v2664_v49 }
 0x238   : > { %2921 = vst.msk [vmem:[%s5401_s30 + $0x18] sm:$0xf] %vm2914_vm8, %v2888_v24  ;;  %v2886_v59 = vpack.c.bf16 %v2854_v57, %v2854_v57  ;;  %v2857_v43 = vmax.f32 %v2825_v35, 0.0  ;;  %v2823_v62 = vadd.f32 %v5388_v18, %v2784_v25 }
 0x23a   : > { %2919 = vst.msk [vmem:[%s5401_s30 + $0x10] sm:$0xf] %vm2914_vm8, %v2886_v59  ;;  %v2889_v31 = vpack.c.bf16 %v2857_v43, %v2857_v43  ;;  %v2855_v14 = vmax.f32 %v2823_v62, 0.0 }
 0x23c   : > { %2922 = vst.msk [vmem:[%s5401_s30 + $0x1c] sm:$0xf] %vm2914_vm8, %v2889_v31  ;;  %v2887_v17 = vpack.c.bf16 %v2855_v14, %v2855_v14 }
 0x23e   : > { %2920 = vst.msk [vmem:[%s5401_s30 + $0x14] sm:$0xf] %vm2914_vm8, %v2887_v17 }
 0x240   : > { %v3136_v7 = vpop.f32.mrf.mxu0 }
 0x241   : > { %v3148_v5 = vpop.f32.mrf.mxu1  ;;  %v2789_v53 = vmul.f32 %v3136_v7, %v5383_v37 }
 0x242   : > { %v2801_v32 = vmul.f32 %v3148_v5, %v5383_v37  ;;  %v2677_v40 = vpop.f32.mrf.mxu0 }
 0x243   : > { %v2725_v29 = vpop.f32.mrf.mxu1  ;;  %v2828_v48 = vadd.f32 %v5388_v18, %v2789_v53  ;;  %v2787_v2 = vmul.f32 %v5383_v37, %v2677_v40 }
 0x244   : > { %v2840_v13 = vadd.f32 %v5388_v18, %v2801_v32  ;;  %v2799_v51 = vmul.f32 %v5383_v37, %v2725_v29  ;;  %v3137_v45 = vpop.f32.mrf.mxu0 }
 0x245   : > { %v3149_v34 = vpop.f32.mrf.mxu1  ;;  %v2860_v42 = vmax.f32 %v2828_v48, 0.0  ;;  %v2826_v28 = vadd.f32 %v5388_v18, %v2787_v2  ;;  %v2790_v22 = vmul.f32 %v3137_v45, %v5383_v37 }
 0x246   : > { %v2872_v58 = vmax.f32 %v2840_v13, 0.0  ;;  %v2838_v63 = vadd.f32 %v5388_v18, %v2799_v51  ;;  %v2802_v0 = vmul.f32 %v3149_v34, %v5383_v37  ;;  %v2680_v11 = vpop.f32.mrf.mxu0 }
 0x247   : > { %v2728_v54 = vpop.f32.mrf.mxu1  ;;  %v2892_v27 = vpack.c.bf16 %v2860_v42, %v2860_v42  ;;  %v2858_v33 = vmax.f32 %v2826_v28, 0.0  ;;  %v2829_v56 = vadd.f32 %v5388_v18, %v2790_v22  ;;  %v2788_v10 = vmul.f32 %v5383_v37, %v2680_v11 }
 0x248   : > { %v2904_v12 = vpack.c.bf16 %v2872_v58, %v2872_v58  ;;  %v2870_v41 = vmax.f32 %v2838_v63, 0.0  ;;  %v2841_v38 = vadd.f32 %v5388_v18, %v2802_v0  ;;  %v2800_v23 = vmul.f32 %v5383_v37, %v2728_v54 }
 0x249   : > { %2925 = vst.msk [vmem:[%s5401_s30 + $0x28] sm:$0xf] %vm2914_vm8, %v2892_v27  ;;  %v2890_v26 = vpack.c.bf16 %v2858_v33, %v2858_v33  ;;  %v2861_v36 = vmax.f32 %v2829_v56, 0.0  ;;  %v2827_v39 = vadd.f32 %v5388_v18, %v2788_v10 }
 0x24a   : > { %2937 = vst.msk [vmem:[%s5401_s30 + $0x58] sm:$0xf] %vm2914_vm8, %v2904_v12  ;;  %v2902_v1 = vpack.c.bf16 %v2870_v41, %v2870_v41  ;;  %v2873_v55 = vmax.f32 %v2841_v38, 0.0  ;;  %v2839_v20 = vadd.f32 %v5388_v18, %v2800_v23 }
 0x24b   : > { %2923 = vst.msk [vmem:[%s5401_s30 + $0x20] sm:$0xf] %vm2914_vm8, %v2890_v26  ;;  %v2893_v9 = vpack.c.bf16 %v2861_v36, %v2861_v36  ;;  %v2859_v30 = vmax.f32 %v2827_v39, 0.0 }
 0x24c   : > { %2935 = vst.msk [vmem:[%s5401_s30 + $0x50] sm:$0xf] %vm2914_vm8, %v2902_v1  ;;  %v2905_v3 = vpack.c.bf16 %v2873_v55, %v2873_v55  ;;  %v2871_v8 = vmax.f32 %v2839_v20, 0.0 }
 0x24d   : > { %2926 = vst.msk [vmem:[%s5401_s30 + $0x2c] sm:$0xf] %vm2914_vm8, %v2893_v9  ;;  %v2891_v47 = vpack.c.bf16 %v2859_v30, %v2859_v30 }
 0x24e   : > { %2938 = vst.msk [vmem:[%s5401_s30 + $0x5c] sm:$0xf] %vm2914_vm8, %v2905_v3  ;;  %v2903_v61 = vpack.c.bf16 %v2871_v8, %v2871_v8 }
 0x24f   : > { %2924 = vst.msk [vmem:[%s5401_s30 + $0x24] sm:$0xf] %vm2914_vm8, %v2891_v47 }
 0x250   : > { %2936 = vst.msk [vmem:[%s5401_s30 + $0x54] sm:$0xf] %vm2914_vm8, %v2903_v61 }
 0x253   : > { %v3140_v44 = vpop.f32.mrf.mxu0 }
 0x254   : > { %v2793_v15 = vmul.f32 %v3140_v44, %v5383_v37 }
 0x255   : > { %v2693_v60 = vpop.f32.mrf.mxu0 }
 0x256   : > { %v3152_v46 = vpop.f32.mrf.mxu1  ;;  %v2832_v6 = vadd.f32 %v5388_v18, %v2793_v15  ;;  %v2791_v4 = vmul.f32 %v5383_v37, %v2693_v60 }
 0x257   : > { %v2805_v50 = vmul.f32 %v3152_v46, %v5383_v37  ;;  %v3141_v21 = vpop.f32.mrf.mxu0 }
 0x258   : > { %v2741_v52 = vpop.f32.mrf.mxu1  ;;  %v2864_v16 = vmax.f32 %v2832_v6, 0.0  ;;  %v2830_v19 = vadd.f32 %v5388_v18, %v2791_v4  ;;  %v2794_v49 = vmul.f32 %v3141_v21, %v5383_v37 }
 0x259   : > { %v2844_v24 = vadd.f32 %v5388_v18, %v2805_v50  ;;  %v2803_v57 = vmul.f32 %v5383_v37, %v2741_v52  ;;  %v2696_v35 = vpop.f32.mrf.mxu0 }
 0x25a   : > { %v3153_v25 = vpop.f32.mrf.mxu1  ;;  %v2896_v59 = vpack.c.bf16 %v2864_v16, %v2864_v16  ;;  %v2862_v43 = vmax.f32 %v2830_v19, 0.0  ;;  %v2833_v62 = vadd.f32 %v5388_v18, %v2794_v49  ;;  %v2792_v31 = vmul.f32 %v5383_v37, %v2696_v35 }
 0x25b   : > { %v2876_v14 = vmax.f32 %v2844_v24, 0.0  ;;  %v2842_v17 = vadd.f32 %v5388_v18, %v2803_v57  ;;  %v2806_v7 = vmul.f32 %v3153_v25, %v5383_v37 }
 0x25c   : > { %v2744_v5 = vpop.f32.mrf.mxu1  ;;  %2929 = vst.msk [vmem:[%s5401_s30 + $0x38] sm:$0xf] %vm2914_vm8, %v2896_v59  ;;  %v2894_v53 = vpack.c.bf16 %v2862_v43, %v2862_v43  ;;  %v2865_v32 = vmax.f32 %v2833_v62, 0.0  ;;  %v2831_v40 = vadd.f32 %v5388_v18, %v2792_v31 }
 0x25d   : > { %v2908_v29 = vpack.c.bf16 %v2876_v14, %v2876_v14  ;;  %v2874_v48 = vmax.f32 %v2842_v17, 0.0  ;;  %v2845_v2 = vadd.f32 %v5388_v18, %v2806_v7  ;;  %v2804_v13 = vmul.f32 %v5383_v37, %v2744_v5 }
 0x25e   : > { %v3156_v51 = vpop.f32.mrf.mxu1  ;;  %2927 = vst.msk [vmem:[%s5401_s30 + $0x30] sm:$0xf] %vm2914_vm8, %v2894_v53  ;;  %v2897_v45 = vpack.c.bf16 %v2865_v32, %v2865_v32  ;;  %v2863_v34 = vmax.f32 %v2831_v40, 0.0 }
 0x25f   : > { %2941 = vst.msk [vmem:[%s5401_s30 + $0x68] sm:$0xf] %vm2914_vm8, %v2908_v29  ;;  %v2906_v42 = vpack.c.bf16 %v2874_v48, %v2874_v48  ;;  %v2877_v28 = vmax.f32 %v2845_v2, 0.0  ;;  %v2843_v22 = vadd.f32 %v5388_v18, %v2804_v13  ;;  %v2809_v58 = vmul.f32 %v3156_v51, %v5383_v37 }
 0x260   : > { %v2757_v63 = vpop.f32.mrf.mxu1  ;;  %2930 = vst.msk [vmem:[%s5401_s30 + $0x3c] sm:$0xf] %vm2914_vm8, %v2897_v45  ;;  %v2895_v0 = vpack.c.bf16 %v2863_v34, %v2863_v34 }
 0x261   : > { %2939 = vst.msk [vmem:[%s5401_s30 + $0x60] sm:$0xf] %vm2914_vm8, %v2906_v42  ;;  %v2909_v11 = vpack.c.bf16 %v2877_v28, %v2877_v28  ;;  %v2875_v54 = vmax.f32 %v2843_v22, 0.0  ;;  %v2848_v27 = vadd.f32 %v5388_v18, %v2809_v58  ;;  %v2807_v33 = vmul.f32 %v5383_v37, %v2757_v63 }
 0x262   : > { %v3157_v56 = vpop.f32.mrf.mxu1  ;;  %2928 = vst.msk [vmem:[%s5401_s30 + $0x34] sm:$0xf] %vm2914_vm8, %v2895_v0 }
 0x263   : > { %2942 = vst.msk [vmem:[%s5401_s30 + $0x6c] sm:$0xf] %vm2914_vm8, %v2909_v11  ;;  %v2907_v10 = vpack.c.bf16 %v2875_v54, %v2875_v54  ;;  %v2880_v12 = vmax.f32 %v2848_v27, 0.0  ;;  %v2846_v41 = vadd.f32 %v5388_v18, %v2807_v33  ;;  %v2810_v38 = vmul.f32 %v3157_v56, %v5383_v37 }
 0x264   : > { %v2760_v23 = vpop.f32.mrf.mxu1 }
 0x265   : > { %2940 = vst.msk [vmem:[%s5401_s30 + $0x64] sm:$0xf] %vm2914_vm8, %v2907_v10  ;;  %v2912_v26 = vpack.c.bf16 %v2880_v12, %v2880_v12  ;;  %v2878_v36 = vmax.f32 %v2846_v41, 0.0  ;;  %v2849_v39 = vadd.f32 %v5388_v18, %v2810_v38  ;;  %v2808_v1 = vmul.f32 %v5383_v37, %v2760_v23 }
 0x267   : > { %2945 = vst.msk [vmem:[%s5401_s30 + $0x78] sm:$0xf] %vm2914_vm8, %v2912_v26  ;;  %v2910_v55 = vpack.c.bf16 %v2878_v36, %v2878_v36  ;;  %v2881_v20 = vmax.f32 %v2849_v39, 0.0  ;;  %v2847_v9 = vadd.f32 %v5388_v18, %v2808_v1 }
 0x269   : > { %2943 = vst.msk [vmem:[%s5401_s30 + $0x70] sm:$0xf] %vm2914_vm8, %v2910_v55  ;;  %v2913_v30 = vpack.c.bf16 %v2881_v20, %v2881_v20  ;;  %v2879_v3 = vmax.f32 %v2847_v9, 0.0 }
 0x26b   : > { %2946 = vst.msk [vmem:[%s5401_s30 + $0x7c] sm:$0xf] %vm2914_vm8, %v2913_v30  ;;  %v2911_v8 = vpack.c.bf16 %v2879_v3, %v2879_v3 }
 0x26d   : > { %2944 = vst.msk [vmem:[%s5401_s30 + $0x74] sm:$0xf] %vm2914_vm8, %v2911_v8 }
 0x26e PF: > { %s14_s15 = sadd.s32 1, %s3229_s15  }
 0x26f   : > { %p11_p4 = scmp.ge.s32.totalorder %s14_s15, 4  }
 0x271   :  { %13 = sbr.rel (!%p11_p4) target bundleno = 1 (0x1), region = 66 }

// kernel: inception_forward.6
= control target key start
LH: loop header
LB: loop body
LE: loop exit
PB: predicated region body
PF: predicated region fallthrough
CT: control target
= control target key end

     0   :  { %s10215_s15 = smov 0   ;;  %s14180_s0 = inlined_call_operand.vmem [shape: bf16[2,6,10,10,4], index: 0, kind: input, shape index: {}]   ;;  %s14181_s1 = inlined_call_operand.vmem [shape: bf16[27,4,8], index: 1, kind: input, shape index: {}]   ;;  %s14182_s2 = inlined_call_operand.vmem [shape: f32[1,8], index: 2, kind: input, shape index: {}]   ;;  %s14183_s3 = inlined_call_operand.vmem [shape: f32[1,8], index: 3, kind: input, shape index: {}]   ;;  %s14184_s4 = inlined_call_operand.vmem [shape: bf16[2,4,8,8,8], index: 4, kind: output, shape index: {}]  }
   0x1 LB: > { %s7866_s16 = sadd.s32 4294967295, %s10188_s15   ;;  %p7870_p0 = scmp.ge.s32.totalorder %s10188_s15, 1  ;;  %s10188_s15 = sphi %s10215_s15, %s14_s15  }
   0x2   : > { %p162_p1 = scmp.lt.s32.totalorder %s10188_s15, 3 }
   0x4   : > { %p163_p2 = pnand %p7870_p0, %p162_p1 }
   0x6   : > { %166 = sbr.rel (%p163_p2) target bundleno = 1092 (0x444), region = 36 }
   0xb   : > { %v7874_v0 = vld [vmem:[%s14181_s1 + $0x6] sm:$0x3]  ;;  %vm451_vm0 = vcmask 1041408   ;;  %p188_p3 = scmp.lt.s32.totalorder %s7866_s16, 1  ;;  %v319_v2 = vld [vmem:[%s14181_s1] sm:$0x3] }
   0xc   : > { %9939 = vmatprep.subr.msk.bf16.mxu1 %vm451_vm0, %v7874_v0  ;;  %9938 = vmatprep.subr.msk.bf16.mxu0 %vm451_vm0, %v7874_v0  ;;  %v453_v1 = vsel %vm451_vm0, %v7874_v0, 0  ;;  %v7939_v3 = vld [vmem:[%s14181_s1 + $0xc] sm:$0x3]  ;;  %vm402_vm1 = vcmask 31744   ;;  %v689_v17 = vsel %vm451_vm0, %v319_v2, 0  ;;  %vm5307_vm2 = vcmask 1042432  }
   0xd   : > { %9937 = vmatpush3.bf16.msra.mxu1 %v453_v1  ;;  %9019 = vmatpush3.bf16.msra.mxu0 %v453_v1  ;;  %s14949_s16 = smov (!%p188_p3, %s7866_s16), 1  ;;  %v879_v15 = vsel %vm451_vm0, %v7939_v3, 0  ;;  %v7960_v23 = vld [vmem:[%s14181_s1 + $0x12] sm:$0x3]  ;;  %v7981_v27 = vld [vmem:[%s14181_s1 + $0x18] sm:$0x3] }
   0xe   : > { %9940 = vmatprep.subr.msk.bf16.mxu1 %vm451_vm0, %v319_v2  ;;  %9941 = vmatprep.subr.msk.bf16.mxu0 %vm451_vm0, %v7939_v3  ;;  %s9966_s23 = smul.u32 480, %s14949_s16  ;;  %v1325_v60 = vsel %vm451_vm0, %v7981_v27, 0  ;;  %v1109_v61 = vsel %vm451_vm0, %v7960_v23, 0  ;;  %v8002_v63 = vld [vmem:[%s14181_s1 + $0x1e] sm:$0x3]  ;;  %vm5308_vm3 = vcmask 1046532  }
   0xf   : > { %v8020_v1 = vld [vmem:[%s14181_s1 + $0x24] sm:$0x3]  ;;  %vm10713_vm4 = vmor %vm5307_vm2, %vm5308_vm3  ;;  %vm2374_vm5 = vsmask.f32 3328  ;;  %vm2375_vm6 = vsmask.f32 7440 }
  0x10   : > { %s10243_s26 = scalar_lea.vmem %s14180_s0, %s9966_s23  ;;  %vm10957_vm7 = vmor %vm2374_vm5, %vm2375_vm6  ;;  %s8558_s6 = sshll.u32 %s14949_s16, 7  ;;  %vm7778_vm8 = vcmask 60416  }
  0x11   : > { %v10246_v4 = vld [vmem:[%s10243_s26 + $0x8] sm:$0xf]  ;;  %v10249_v5 = vld [vmem:[%s10243_s26 + $0x10] sm:$0xf]  ;;  %v10264_v10 = vld [vmem:[%s10243_s26 + $0x18] sm:$0xf]  ;;  %s13981_s8 = scalar_lea.vmem %s14184_s4, %s8558_s6 }
  0x12   : > { %v10252_v6 = vld [vmem:[%s10243_s26 + $0xa8] sm:$0xf]  ;;  %v7875_v7 = vcombine.low %v10246_v4, %v10249_v5  ;;  %v10257_v8 = vld [vmem:[%s10243_s26 + $0xb0] sm:$0xf]  ;;  %v10268_v11 = vld [vmem:[%s10243_s26 + $0x20] sm:$0xf]  ;;  %v7908_v57 = vcombine.low %v10249_v5, %v10264_v10 }
  0x13   : > { %v10261_v9 = vcombine.low %v10252_v6, %v10257_v8  ;;  %v7876_v12 = vcombine.low %v10264_v10, %v10268_v11  ;;  %v10275_v13 = vld [vmem:[%s10243_s26 + $0xb8] sm:$0xf]  ;;  %v10278_v14 = vld [vmem:[%s10243_s26 + $0xc0] sm:$0xf]  ;;  %v10287_v18 = vld [vmem:[%s10243_s26 + $0x28] sm:$0xf] }
  0x14   : > { %9020 = vmatprep.mubr.msk.bf16.mxu0 %vm402_vm1, %v7875_v7  ;;  %v10283_v16 = vcombine.low %v10275_v13, %v10278_v14  ;;  %v10290_v19 = vld [vmem:[%s10243_s26 + $0x30] sm:$0xf]  ;;  %v10296_v21 = vld [vmem:[%s10243_s26 + $0xc8] sm:$0xf]  ;;  %v10311_v25 = vld [vmem:[%s10243_s26 + $0x38] sm:$0xf]  ;;  %v7909_v59 = vcombine.low %v10268_v11, %v10287_v18 }
  0x15   : > { %9036 = vmatprep.mubr.msk.bf16.mxu1 %vm402_vm1, %v10261_v9  ;;  %9021 = vmatmul.mubr.msk.bf16.vlgmr.msra.gmra.mxu0 %vm402_vm1, %v7876_v12  ;;  %v7877_v20 = vcombine.low %v10287_v18, %v10290_v19  ;;  %v10299_v22 = vld [vmem:[%s10243_s26 + $0xd0] sm:$0xf]  ;;  %v10314_v26 = vld [vmem:[%s10243_s26 + $0x40] sm:$0xf]  ;;  %v10321_v28 = vld [vmem:[%s10243_s26 + $0xd8] sm:$0xf]  ;;  %v7910_v62 = vcombine.low %v10290_v19, %v10311_v25 }
  0x16   : > { %9037 = vmatmul.mubr.msk.bf16.vlgmr.msra.gmra.mxu1 %vm402_vm1, %v10283_v16  ;;  %9087 = vmatpush3.bf16.msra.mxu0 %v879_v15  ;;  %v10308_v24 = vcombine.low %v10296_v21, %v10299_v22  ;;  %v10324_v29 = vld [vmem:[%s10243_s26 + $0xe0] sm:$0xf]  ;;  %v10329_v30 = vld [vmem:[%s10243_s26 + $0x58] sm:$0xf]  ;;  %v7878_v31 = vcombine.low %v10311_v25, %v10314_v26  ;;  %v10362_v38 = vld [vmem:[%s10243_s26 + $0x68] sm:$0xf] }
  0x17   : > { %9053 = vmatpush3.bf16.msra.mxu1 %v689_v17  ;;  %9024 = vmatprep.mubr.msk.bf16.mxu0 %vm402_vm1, %v7877_v20  ;;  %14338 = vst [vmem:[#allocation2_spill] sm:$0xff] %v10324_v29  ;;  %v10335_v32 = vld [vmem:[%s10243_s26 + $0x60] sm:$0xf]  ;;  %v10338_v33 = vld [vmem:[%s10243_s26 + $0xf8] sm:$0xf]  ;;  %v10346_v35 = vcombine.low %v10321_v28, %v10324_v29  ;;  %14339 = vst [vmem:[#allocation3_spill] sm:$0xff] %v10362_v38 }
  0x18   : > { %9040 = vmatprep.mubr.msk.bf16.mxu1 %vm402_vm1, %v10308_v24  ;;  %9942 = vmatprep.subr.msk.bf16.mxu1 %vm451_vm0, %v7960_v23  ;;  %v10341_v34 = vld [vmem:[%s10243_s26 + $0x100] sm:$0xf]  ;;  %v10350_v36 = vcombine.low %v10329_v30, %v10335_v32  ;;  %v10365_v39 = vld [vmem:[%s10243_s26 + $0x70] sm:$0xf]  ;;  %v10368_v40 = vld [vmem:[%s10243_s26 + $0x108] sm:$0xf]  ;;  %v10460_v7 = vcombine.low %v10335_v32, %v10362_v38 }
  0x19   : > { %9943 = vmatprep.subr.msk.bf16.mxu0 %vm451_vm0, %v7981_v27  ;;  %v10354_v37 = vcombine.low %v10338_v33, %v10341_v34  ;;  %14340 = vst [vmem:[#allocation4_spill] sm:$0xff] %v10365_v39  ;;  %v10373_v41 = vld [vmem:[%s10243_s26 + $0x110] sm:$0xf]  ;;  %v229_v42 = vld [vmem:[%s10243_s26 + $0x78] sm:$0xf]  ;;  %v10385_v46 = vcombine.low %v10362_v38, %v10365_v39 }
  0x1a   : > { %v231_v43 = vld [vmem:[%s10243_s26 + $0x80] sm:$0xf]  ;;  %v10378_v44 = vld [vmem:[%s10243_s26 + $0x118] sm:$0xf]  ;;  %v10389_v47 = vcombine.low %v10368_v40, %v10373_v41  ;;  %v233_v50 = vld [vmem:[%s10243_s26 + $0x88] sm:$0xf]  ;;  %v10470_v15 = vcombine.low %v10365_v39, %v229_v42 }
  0x1b   : > { %v10381_v45 = vld [vmem:[%s10243_s26 + $0x120] sm:$0xf]  ;;  %v10391_v48 = vcombine.low %v229_v42, %v231_v43  ;;  %v10405_v51 = vld [vmem:[%s10243_s26 + $0x90] sm:$0xf]  ;;  %v10410_v52 = vld [vmem:[%s10243_s26 + $0x128] sm:$0xf]  ;;  %v10472_v17 = vcombine.low %v231_v43, %v233_v50 }
  0x1c   : > { %14341 = vst [vmem:[#allocation5_spill] sm:$0xff] %v10389_v47  ;;  %v10395_v49 = vcombine.low %v10378_v44, %v10381_v45  ;;  %14343 = vst [vmem:[#allocation7_spill] sm:$0xff] %v10405_v51  ;;  %v10413_v53 = vld [vmem:[%s10243_s26 + $0x130] sm:$0xf]  ;;  %v10416_v54 = vld [vmem:[%s10243_s26] sm:$0xf]  ;;  %v10419_v55 = vcombine.low %v233_v50, %v10405_v51 }
  0x1d   : > { %9025 = vmatmul.mubr.msk.bf16.gmra.mxu0 %vm402_vm1, %v7878_v31  ;;  %v10423_v56 = vcombine.low %v10410_v52, %v10413_v53  ;;  %v7907_v58 = vcombine.low %v10416_v54, %v10246_v4  ;;  %v217_v0 = vld [vmem:[%s10243_s26 + $0x48] sm:$0xf]  ;;  %v10453_v2 = vld [vmem:[%s10243_s26 + $0x50] sm:$0xf]  ;;  %v10481_v20 = vld [vmem:[%s10243_s26 + $0x98] sm:$0xf]  ;;  %v10494_v31 = vcombine.low %v10257_v8, %v10275_v13  ;;  %v10510_v8 = vcombine.low %v10278_v14, %v10296_v21 }
  0x1e   : > { %9041 = vmatmul.mubr.msk.bf16.gmra.mxu1 %vm402_vm1, %v10346_v35  ;;  %9028 = vmatprep.mubr.msk.bf16.mxu0 %vm402_vm1, %v10350_v36  ;;  %14342 = vst [vmem:[#allocation6_spill] sm:$0xff] %v10395_v49  ;;  %v7940_v3 = vcombine.low %v10314_v26, %v217_v0  ;;  %v7911_v12 = vcombine.low %v10453_v2, %v10329_v30  ;;  %v10486_v23 = vld [vmem:[%s10243_s26 + $0xa0] sm:$0xf]  ;;  %v10523_v13 = vld [vmem:[%s10243_s26 + $0xe8] sm:$0xf]  ;;  %v1529_v50 = vsel %vm451_vm0, %v8002_v63, 0 }
  0x1f   : > { %9044 = vmatprep.mubr.msk.bf16.mxu1 %vm402_vm1, %v10354_v37  ;;  %14344 = vst [vmem:[#allocation8_spill] sm:$0xff] %v10423_v56  ;;  %14345 = vst [vmem:[#allocation9_spill] sm:$0xff] %v10486_v23  ;;  %v10490_v27 = vcombine.low %v10405_v51, %v10481_v20  ;;  %v10498_v42 = vcombine.low %v10486_v23, %v10252_v6  ;;  %v10514_v6 = vcombine.low %v10299_v22, %v10321_v28  ;;  %v10528_v14 = vld [vmem:[%s10243_s26 + $0xf0] sm:$0xf]  ;;  %v297_v51 = vld [vmem:[%s10243_s26 + $0x188] sm:$0xf] }
  0x20   : > { %14346 = vst [vmem:[#allocation10_spill] sm:$0xff] %v10528_v14  ;;  %v10532_v22 = vcombine.low %v10324_v29, %v10523_v13  ;;  %v10536_v28 = vcombine.low %v10341_v34, %v10368_v40  ;;  %v10540_v43 = vcombine.low %v10528_v14, %v10338_v33  ;;  %v10552_v34 = vcombine.low %v10373_v41, %v10378_v44  ;;  %v10565_v40 = vld [vmem:[%s10243_s26 + $0x138] sm:$0xf] }
  0x21   : > { %v10556_v33 = vcombine.low %v10381_v45, %v10410_v52  ;;  %v10571_v41 = vcombine.low %v10413_v53, %v10565_v40  ;;  %v1759_v45 = vsel %vm451_vm0, %v8020_v1, 0  ;;  %v8041_v52 = vld [vmem:[%s14181_s1 + $0x2a] sm:$0x3]  ;;  %v279_v53 = vld [vmem:[%s10243_s26 + $0x140] sm:$0xf]  ;;  %v2378_v39 = vshrl.u32 %v10416_v54, 16 }
  0x22   : > { %14347 = vst [vmem:[#allocation11_spill] sm:$0xff] %v10552_v34  ;;  %v2381_v38 = vshll.u32 %v10416_v54, 16 }
  0x23   : > { %14348 = vst [vmem:[#allocation12_spill] sm:$0xff] %v10556_v33  ;;  %14349 = vst [vmem:[#allocation13_spill] sm:$0xff] %v10571_v41 }
  0x25   : > { %9029 = vmatmul.mubr.msk.bf16.gmra.mxu0 %vm402_vm1, %v10385_v46 }
  0x26   : > { %9045 = vmatmul.mubr.msk.bf16.gmra.mxu1 %vm402_vm1, %v10389_v47  ;;  %9032 = vmatprep.mubr.msk.bf16.mxu0 %vm402_vm1, %v10391_v48 }
  0x27   : > { %9048 = vmatprep.mubr.msk.bf16.mxu1 %vm402_vm1, %v10395_v49 }
  0x2d   : > { %9033 = vmatmul.mubr.msk.bf16.gmra.mxu0 %vm402_vm1, %v10419_v55 }
  0x2e   : > { %9049 = vmatmul.mubr.msk.bf16.gmra.mxu1 %vm402_vm1, %v10423_v56  ;;  %9088 = vmatprep.mubr.msk.bf16.mxu0 %vm402_vm1, %v7908_v57 }
  0x2f   : > { %9054 = vmatprep.mubr.msk.bf16.mxu1 %vm402_vm1, %v7907_v58  ;;  %v10642_v58 = vld [vmem:[%s10243_s26 + $0x158] sm:$0xf] }
  0x30   : > { %14351 = vst [vmem:[#allocation15_spill] sm:$0xff] %v10642_v58 }
  0x35   : > { %9089 = vmatmul.mubr.msk.bf16.vlgmr.msra.gmra.mxu0 %vm402_vm1, %v7909_v59 }
  0x36   : > { %9055 = vmatmul.mubr.msk.bf16.vlgmr.msra.gmra.mxu1 %vm402_vm1, %v7908_v57  ;;  %9155 = vmatpush3.bf16.msra.mxu0 %v1325_v60  ;;  %v289_v60 = vld [vmem:[%s10243_s26 + $0x168] sm:$0xf] }
  0x37   : > { %9121 = vmatpush3.bf16.msra.mxu1 %v1109_v61  ;;  %9058 = vmatprep.mubr.msk.bf16.mxu1 %vm402_vm1, %v7909_v59  ;;  %v10645_v59 = vld [vmem:[%s10243_s26 + $0x160] sm:$0xf]  ;;  %v291_v61 = vld [vmem:[%s10243_s26 + $0x170] sm:$0xf] }
  0x38   : > { %9092 = vmatprep.mubr.msk.bf16.mxu0 %vm402_vm1, %v7910_v62  ;;  %9944 = vmatprep.subr.msk.bf16.mxu1 %vm451_vm0, %v8002_v63  ;;  %14352 = vst [vmem:[#allocation16_spill] sm:$0xff] %v10645_v59  ;;  %v10657_v0 = vcombine.low %v289_v60, %v291_v61 }
  0x39   : > { %9945 = vmatprep.subr.msk.bf16.mxu0 %vm451_vm0, %v8020_v1  ;;  %v10660_v1 = vcombine.low %v10645_v59, %v289_v60  ;;  %v8289_v60 = vrot.slane %v10249_v5, 9 }
  0x3a   : > { %14355 = vst [vmem:[#allocation19_spill] sm:$0xff] %v10657_v0 }
  0x3b   : > { %14356 = vst [vmem:[#allocation20_spill] sm:$0xff] %v10660_v1 }
  0x3d   : > { %9093 = vmatmul.mubr.msk.bf16.gmra.mxu0 %vm402_vm1, %v7940_v3  ;;  %v293_v3 = vld [vmem:[%s10243_s26 + $0x178] sm:$0xf] }
  0x3e   : > { %9059 = vmatmul.mubr.msk.bf16.gmra.mxu1 %vm402_vm1, %v7910_v62  ;;  %9096 = vmatprep.mubr.msk.bf16.mxu0 %vm402_vm1, %v10460_v7  ;;  %v10652_v62 = vcombine.low %v10642_v58, %v10645_v59 }
  0x3f   : > { %9062 = vmatprep.mubr.msk.bf16.mxu1 %vm402_vm1, %v7911_v12 }
  0x40   : > { %14353 = vst [vmem:[#allocation17_spill] sm:$0xff] %v10652_v62 }
  0x45   : > { %9097 = vmatmul.mubr.msk.bf16.gmra.mxu0 %vm402_vm1, %v10470_v15 }
  0x46   : > { %9063 = vmatmul.mubr.msk.bf16.gmra.mxu1 %vm402_vm1, %v10460_v7  ;;  %9100 = vmatprep.mubr.msk.bf16.mxu0 %vm402_vm1, %v10472_v17 }
  0x47   : > { %9066 = vmatprep.mubr.msk.bf16.mxu1 %vm402_vm1, %v10470_v15 }
  0x4d   : > { %9101 = vmatmul.mubr.msk.bf16.gmra.mxu0 %vm402_vm1, %v10490_v27 }
  0x4e   : > { %9067 = vmatmul.mubr.msk.bf16.gmra.mxu1 %vm402_vm1, %v10472_v17  ;;  %9104 = vmatprep.mubr.msk.bf16.mxu0 %vm402_vm1, %v10494_v31 }
  0x4f   : > { %9070 = vmatprep.mubr.msk.bf16.mxu1 %vm402_vm1, %v10498_v42 }
  0x55   : > { %9105 = vmatmul.mubr.msk.bf16.gmra.mxu0 %vm402_vm1, %v10510_v8 }
  0x56   : > { %9071 = vmatmul.mubr.msk.bf16.gmra.mxu1 %vm402_vm1, %v10494_v31  ;;  %9108 = vmatprep.mubr.msk.bf16.mxu0 %vm402_vm1, %v10514_v6 }
  0x57   : > { %9074 = vmatprep.mubr.msk.bf16.mxu1 %vm402_vm1, %v10510_v8 }
  0x5d   : > { %9109 = vmatmul.mubr.msk.bf16.gmra.mxu0 %vm402_vm1, %v10532_v22 }
  0x5e   : > { %9075 = vmatmul.mubr.msk.bf16.gmra.mxu1 %vm402_vm1, %v10514_v6  ;;  %9112 = vmatprep.mubr.msk.bf16.mxu0 %vm402_vm1, %v10536_v28 }
  0x5f   : > { %9078 = vmatprep.mubr.msk.bf16.mxu1 %vm402_vm1, %v10540_v43 }
  0x65   : > { %9113 = vmatmul.mubr.msk.bf16.gmra.mxu0 %vm402_vm1, %v10552_v34 }
  0x66   : > { %9079 = vmatmul.mubr.msk.bf16.gmra.mxu1 %vm402_vm1, %v10536_v28  ;;  %9116 = vmatprep.mubr.msk.bf16.mxu0 %vm402_vm1, %v10556_v33 }
  0x67   : > { %9082 = vmatprep.mubr.msk.bf16.mxu1 %vm402_vm1, %v10552_v34 }
  0x6d   : > { %9117 = vmatmul.mubr.msk.bf16.gmra.mxu0 %vm402_vm1, %v10571_v41 }
  0x6e   : > { %9083 = vmatmul.mubr.msk.bf16.gmra.mxu1 %vm402_vm1, %v10556_v33  ;;  %9156 = vmatprep.mubr.msk.bf16.mxu0 %vm402_vm1, %v10350_v36  ;;  %v8062_v36 = vld [vmem:[%s14181_s1 + $0x30] sm:$0x3] }
  0x6f   : > { %9122 = vmatprep.mubr.msk.bf16.mxu1 %vm402_vm1, %v7911_v12  ;;  %v10670_v12 = vld [vmem:[%s10243_s26 + $0x180] sm:$0xf] }
  0x75   : > { %9157 = vmatmul.mubr.msk.bf16.vlgmr.msra.gmra.mxu0 %vm402_vm1, %v10385_v46  ;;  %v281_v46 = vld [vmem:[%s10243_s26 + $0x148] sm:$0xf] }
  0x76   : > { %9123 = vmatmul.mubr.msk.bf16.vlgmr.msra.gmra.mxu1 %vm402_vm1, %v10460_v7  ;;  %9223 = vmatpush3.bf16.msra.mxu0 %v1759_v45  ;;  %v7961_v57 = vcombine.low %v279_v53, %v281_v46  ;;  %v10675_v45 = vcombine.low %v293_v3, %v10670_v12  ;;  %v10694_v53 = vld [vmem:[%s14181_s1 + $0x2] sm:$0x3] }
  0x77   : > { %9189 = vmatpush3.bf16.msra.mxu1 %v1529_v50  ;;  %9126 = vmatprep.mubr.msk.bf16.mxu1 %vm402_vm1, %v10470_v15  ;;  %v10677_v50 = vcombine.low %v291_v61, %v293_v3  ;;  %v10763_v61 = vld [vmem:[%s10243_s26 + $0x198] sm:$0xf] }
  0x78   : > { %9160 = vmatprep.mubr.msk.bf16.mxu0 %vm402_vm1, %v10391_v48  ;;  %9946 = vmatprep.subr.msk.bf16.mxu1 %vm451_vm0, %v8041_v52  ;;  %v283_v48 = vld [vmem:[%s10243_s26 + $0x150] sm:$0xf]  ;;  %14357 = vst [vmem:[#allocation21_spill] sm:$0xff] %v10675_v45  ;;  %14364 = vst [vmem:[#allocation26_spill] sm:$0xff] %v10763_v61 }
  0x79   : > { %9947 = vmatprep.subr.msk.bf16.mxu0 %vm451_vm0, %v8062_v36  ;;  %v10655_v63 = vcombine.low %v283_v48, %v10642_v58  ;;  %14358 = vst [vmem:[#allocation22_spill] sm:$0xff] %v10677_v50 }
  0x7b   : > { %14354 = vst [vmem:[#allocation18_spill] sm:$0xff] %v10655_v63 }
  0x7d   : > { %9161 = vmatmul.mubr.msk.bf16.gmra.mxu0 %vm402_vm1, %v10419_v55  ;;  %v10633_v55 = vcombine.low %v281_v46, %v283_v48  ;;  %v2179_v46 = vsel %vm451_vm0, %v8062_v36, 0  ;;  %v1975_v48 = vsel %vm451_vm0, %v8041_v52, 0 }
  0x7e   : > { %9127 = vmatmul.mubr.msk.bf16.gmra.mxu1 %vm402_vm1, %v10472_v17  ;;  %9164 = vmatprep.mubr.msk.bf16.mxu0 %vm402_vm1, %v10261_v9 }
  0x7f   : > { %9130 = vmatprep.mubr.msk.bf16.mxu1 %vm402_vm1, %v10498_v42  ;;  %14350 = vst [vmem:[#allocation14_spill] sm:$0xff] %v10633_v55 }
  0x85   : > { %9165 = vmatmul.mubr.msk.bf16.gmra.mxu0 %vm402_vm1, %v10283_v16 }
  0x86   : > { %9131 = vmatmul.mubr.msk.bf16.gmra.mxu1 %vm402_vm1, %v10494_v31  ;;  %9168 = vmatprep.mubr.msk.bf16.mxu0 %vm402_vm1, %v10308_v24 }
  0x87   : > { %9134 = vmatprep.mubr.msk.bf16.mxu1 %vm402_vm1, %v10510_v8 }
  0x8d   : > { %9169 = vmatmul.mubr.msk.bf16.gmra.mxu0 %vm402_vm1, %v10346_v35 }
  0x8e   : > { %9135 = vmatmul.mubr.msk.bf16.gmra.mxu1 %vm402_vm1, %v10514_v6  ;;  %9172 = vmatprep.mubr.msk.bf16.mxu0 %vm402_vm1, %v10354_v37 }
  0x8f   : > { %9138 = vmatprep.mubr.msk.bf16.mxu1 %vm402_vm1, %v10540_v43 }
  0x95   : > { %9173 = vmatmul.mubr.msk.bf16.gmra.mxu0 %vm402_vm1, %v10389_v47 }
  0x96   : > { %9139 = vmatmul.mubr.msk.bf16.gmra.mxu1 %vm402_vm1, %v10536_v28  ;;  %9176 = vmatprep.mubr.msk.bf16.mxu0 %vm402_vm1, %v10395_v49 }
  0x97   : > { %9142 = vmatprep.mubr.msk.bf16.mxu1 %vm402_vm1, %v10552_v34 }
  0x9d   : > { %9177 = vmatmul.mubr.msk.bf16.gmra.mxu0 %vm402_vm1, %v10423_v56 }
  0x9e   : > { %9143 = vmatmul.mubr.msk.bf16.gmra.mxu1 %vm402_vm1, %v10556_v33  ;;  %9180 = vmatprep.mubr.msk.bf16.mxu0 %vm402_vm1, %v10633_v55 }
  0x9f   : > { %9146 = vmatprep.mubr.msk.bf16.mxu1 %vm402_vm1, %v7961_v57 }
  0xa5   : > { %9181 = vmatmul.mubr.msk.bf16.gmra.mxu0 %vm402_vm1, %v10652_v62 }
  0xa6   : > { %9147 = vmatmul.mubr.msk.bf16.gmra.mxu1 %vm402_vm1, %v10655_v63  ;;  %9184 = vmatprep.mubr.msk.bf16.mxu0 %vm402_vm1, %v10657_v0 }
  0xa7   : > { %9150 = vmatprep.mubr.msk.bf16.mxu1 %vm402_vm1, %v10660_v1 }
  0xad   : > { %9185 = vmatmul.mubr.msk.bf16.gmra.mxu0 %vm402_vm1, %v10675_v45  ;;  %v2672_v45 = vshrl.u32 %v10296_v21, 16 }
  0xae   : > { %9151 = vmatmul.mubr.msk.bf16.gmra.mxu1 %vm402_vm1, %v10677_v50  ;;  %9224 = vmatprep.mubr.msk.bf16.mxu0 %vm402_vm1, %v10498_v42  ;;  %v10707_v42 = vld [vmem:[%s10243_s26 + $0x14] sm:$0x1] }
  0xaf   : > { %9190 = vmatprep.mubr.msk.bf16.mxu1 %vm402_vm1, %v10460_v7  ;;  %v10702_v7 = vld [vmem:[%s14181_s1 + $0x8] sm:$0x3]  ;;  %v5320_v52 = vrot.slane %v10707_v42, 5 }
  0xb5   : > { %9225 = vmatmul.mubr.msk.bf16.vlgmr.msra.gmra.mxu0 %vm402_vm1, %v10494_v31 }
  0xb6   : > { %9191 = vmatmul.mubr.msk.bf16.vlgmr.msra.gmra.mxu1 %vm402_vm1, %v10470_v15  ;;  %9291 = vmatpush3.bf16.msra.mxu0 %v2179_v46  ;;  %v14359_v15 = vmov 0  ;;  %v2392_v46 = vshrl.u32 %v10246_v4, 16 }
  0xb7   : > { %9257 = vmatpush3.bf16.msra.mxu1 %v1975_v48  ;;  %9194 = vmatprep.mubr.msk.bf16.mxu1 %vm402_vm1, %v10472_v17  ;;  %v14360_v15 = vsel %vm10713_vm4, 4294967295, %v14359_v15  ;;  %v10722_v17 = vsel %vm10713_vm4, %v8289_v60, %v5320_v52  ;;  %v2395_v48 = vshll.u32 %v10246_v4, 16  ;;  %v2406_v52 = vshrl.u32 %v10249_v5, 16 }
  0xb8   : > { %9228 = vmatprep.mubr.msk.bf16.mxu0 %vm402_vm1, %v10510_v8  ;;  %9948 = vmatprep.subr.msk.bf16.mxu1 %vm451_vm0, %v10694_v53  ;;  %14361 = vst [vmem:[#allocation23_spill] sm:$0xff] %v14360_v15  ;;  %14362 = vst [vmem:[#allocation24_spill] sm:$0xff] %v10722_v17  ;;  %v2409_v17 = vshll.u32 %v10249_v5, 16  ;;  %v2784_v4 = vshrl.u32 %v10378_v44, 16  ;;  %v10784_v5 = vrot.slane %v2392_v46, 4 }
  0xb9   : > { %9949 = vmatprep.subr.msk.bf16.mxu0 %vm451_vm0, %v10702_v7  ;;  %v10792_v55 = vrot.slane %v2406_v52, 4  ;;  %v10805_v46 = vld [vmem:[%s10243_s26 + $0x1a8] sm:$0xf]  ;;  %v10818_v52 = vld [vmem:[%s10243_s26 + $0x1b8] sm:$0xf] }
  0xba   : > { %14370 = vst [vmem:[#allocation32_spill] sm:$0xff] %v10805_v46  ;;  %14373 = vst [vmem:[#allocation35_spill] sm:$0xff] %v10818_v52 }
  0xbd   : > { %9229 = vmatmul.mubr.msk.bf16.gmra.mxu0 %vm402_vm1, %v10514_v6 }
  0xbe   : > { %9195 = vmatmul.mubr.msk.bf16.gmra.mxu1 %vm402_vm1, %v10490_v27  ;;  %9232 = vmatprep.mubr.msk.bf16.mxu0 %vm402_vm1, %v10540_v43 }
  0xbf   : > { %9198 = vmatprep.mubr.msk.bf16.mxu1 %vm402_vm1, %v10494_v31 }
  0xc5   : > { %9233 = vmatmul.mubr.msk.bf16.gmra.mxu0 %vm402_vm1, %v10536_v28 }
  0xc6   : > { %9199 = vmatmul.mubr.msk.bf16.gmra.mxu1 %vm402_vm1, %v10510_v8  ;;  %9236 = vmatprep.mubr.msk.bf16.mxu0 %vm402_vm1, %v10552_v34 }
  0xc7   : > { %9202 = vmatprep.mubr.msk.bf16.mxu1 %vm402_vm1, %v10514_v6 }
  0xcd   : > { %9237 = vmatmul.mubr.msk.bf16.gmra.mxu0 %vm402_vm1, %v10556_v33 }
  0xce   : > { %9203 = vmatmul.mubr.msk.bf16.gmra.mxu1 %vm402_vm1, %v10532_v22  ;;  %9240 = vmatprep.mubr.msk.bf16.mxu0 %vm402_vm1, %v7961_v57  ;;  %v299_v57 = vld [vmem:[%s10243_s26 + $0x190] sm:$0xf] }
  0xcf   : > { %9206 = vmatprep.mubr.msk.bf16.mxu1 %vm402_vm1, %v10536_v28  ;;  %v8021_v59 = vcombine.low %v299_v57, %v10763_v61 }
  0xd5   : > { %v10747_v27 = vpop.f32.mrf.mxu0  ;;  %9241 = vmatmul.mubr.msk.bf16.gmra.mxu0 %vm402_vm1, %v10655_v63 }
  0xd6   : > { %v10751_v43 = vpop.f32.mrf.mxu1  ;;  %9207 = vmatmul.mubr.msk.bf16.gmra.mxu1 %vm402_vm1, %v10552_v34  ;;  %9244 = vmatprep.mubr.msk.bf16.mxu0 %vm402_vm1, %v10660_v1 }
  0xd7   : > { %14363 = vst [vmem:[#allocation25_spill] sm:$0xff] %v10751_v43  ;;  %v10757_v36 = vpop.f32.mrf.mxu0  ;;  %9210 = vmatprep.mubr.msk.bf16.mxu1 %vm402_vm1, %v10556_v33  ;;  %v2787_v43 = vshll.u32 %v10378_v44, 16  ;;  %v10802_v44 = vld [vmem:[%s10243_s26 + $0x1a0] sm:$0xf] }
  0xd8   : > { %v10765_v3 = vpop.f32.mrf.mxu1  ;;  %14369 = vst [vmem:[#allocation31_spill] sm:$0xff] %v10802_v44 }
  0xd9   : > { %14365 = vst [vmem:[#allocation27_spill] sm:$0xff] %v10765_v3  ;;  %v10769_v60 = vpop.f32.mrf.mxu0  ;;  %v2675_v3 = vshll.u32 %v10296_v21, 16  ;;  %v10794_v21 = vrot.slane %v2409_v17, 5  ;;  %v10815_v17 = vld [vmem:[%s10243_s26 + $0x1b0] sm:$0xf] }
  0xda   : > { %v10773_v15 = vpop.f32.mrf.mxu1  ;;  %14372 = vst [vmem:[#allocation34_spill] sm:$0xff] %v10815_v17  ;;  %v10845_v54 = vcombine.low %v10815_v17, %v10818_v52 }
  0xdb   : > { %14366 = vst [vmem:[#allocation28_spill] sm:$0xff] %v10773_v15  ;;  %v10777_v0 = vpop.f32.mrf.mxu0  ;;  %v10786_v15 = vrot.slane %v2395_v48, 5  ;;  %v10807_v48 = vrot.slane %v2672_v45, 4  ;;  %v3459_v45 = vshll.u32 %v10481_v20, 16 }
  0xdc   : > { %v10782_v62 = vpop.f32.mrf.mxu1  ;;  %14381 = vst [vmem:[#allocation43_spill] sm:$0xff] %v10845_v54 }
  0xdd   : > { %14367 = vst [vmem:[#allocation29_spill] sm:$0xff] %v10782_v62  ;;  %v10788_v57 = vpop.f32.mrf.mxu0  ;;  %9245 = vmatmul.mubr.msk.bf16.gmra.mxu0 %vm402_vm1, %v10677_v50  ;;  %14371 = vst [vmem:[#allocation33_spill] sm:$0xff] %v10807_v48  ;;  %v3456_v62 = vshrl.u32 %v10481_v20, 16  ;;  %v3487_v20 = vshll.u32 %v10565_v40, 16  ;;  %v10854_v47 = vrot.slane %v3459_v45, 5 }
  0xde   : > { %v10796_v56 = vpop.f32.mrf.mxu1  ;;  %9211 = vmatmul.mubr.msk.bf16.gmra.mxu1 %vm402_vm1, %v10571_v41  ;;  %9248 = vmatprep.mubr.msk.bf16.mxu0 %vm402_vm1, %v8021_v59  ;;  %v10822_v59 = vrot.slane %v2784_v4, 4  ;;  %v10824_v41 = vrot.slane %v2787_v43, 5  ;;  %v3473_v43 = vshll.u32 %v10523_v13, 16  ;;  %v3484_v4 = vshrl.u32 %v10565_v40, 16  ;;  %v10870_v45 = vld [vmem:[%s10243_s26 + $0x1c8] sm:$0xf] }
  0xdf   : > { %14368 = vst [vmem:[#allocation30_spill] sm:$0xff] %v10796_v56  ;;  %v10810_v29 = vpop.f32.mrf.mxu0  ;;  %9214 = vmatprep.mubr.msk.bf16.mxu1 %vm402_vm1, %v10655_v63  ;;  %v10820_v56 = vrot.slane %v2675_v3, 5  ;;  %v3470_v63 = vshrl.u32 %v10523_v13, 16  ;;  %v10836_v3 = vcombine.low %v10802_v44, %v10805_v46  ;;  %14384 = vst [vmem:[#allocation46_spill] sm:$0xff] %v10870_v45  ;;  %v2380_v13 = vrot.slane %v2378_v39, 4 }
  0xe0   : > { %14375 = vst [vmem:[#allocation37_spill] sm:$0xff] %v10822_v59  ;;  %14376 = vst [vmem:[#allocation38_spill] sm:$0xff] %v10824_v41  ;;  %v10827_v48 = vpop.f32.mrf.mxu1  ;;  %v2383_v40 = vrot.slane %v2381_v38, 5  ;;  %v10876_v34 = vrot.slane %v3484_v4, 4  ;;  %v10878_v14 = vrot.slane %v3487_v20, 5  ;;  %v2437_v20 = vshll.u32 %v10268_v11, 16 }
  0xe1   : > { %14374 = vst [vmem:[#allocation36_spill] sm:$0xff] %v10820_v56  ;;  %14377 = vst [vmem:[#allocation39_spill] sm:$0xff] %v10827_v48  ;;  %v10832_v49 = vpop.f32.mrf.mxu0  ;;  %v10849_v48 = vrot.slane %v3456_v62, 4  ;;  %v10867_v62 = vld [vmem:[%s10243_s26 + $0x1c0] sm:$0xf]  ;;  %v10872_v56 = vrot.slane %v3470_v63, 4 }
  0xe2   : > { %14378 = vst [vmem:[#allocation40_spill] sm:$0xff] %v10832_v49  ;;  %14379 = vst [vmem:[#allocation41_spill] sm:$0xff] %v10836_v3  ;;  %v10841_v41 = vpop.f32.mrf.mxu1  ;;  %v200_v38 = vld [vmem:[%s10243_s26 + $0x4] sm:$0x1]  ;;  %v202_v39 = vld [vmem:[%s10243_s26 + $0xc] sm:$0x1]  ;;  %v2384_v4 = vor.u32 %v2383_v40, %v2380_v13 }
  0xe3   : > { %14380 = vst [vmem:[#allocation42_spill] sm:$0xff] %v10841_v41  ;;  %v10852_v33 = vpop.f32.mrf.mxu0  ;;  %14383 = vst [vmem:[#allocation45_spill] sm:$0xff] %v10867_v62  ;;  %v10874_v41 = vrot.slane %v3473_v43, 5  ;;  %v2420_v63 = vshrl.u32 %v10264_v10, 16  ;;  %v2423_v43 = vshll.u32 %v10264_v10, 16  ;;  %v10913_v10 = vsel %vm451_vm0, %v10702_v7, 0 }
  0xe4   : > { %v10859_v49 = vpop.f32.mrf.mxu1  ;;  %14385 = vst [vmem:[#allocation47_spill] sm:$0xff] %v10872_v56  ;;  %14387 = vst [vmem:[#allocation49_spill] sm:$0xff] %v10876_v34  ;;  %v10899_v34 = vcombine.low %v10670_v12, %v297_v51  ;;  %v2387_v12 = vshll.u32 %v200_v38, 16  ;;  %v2401_v58 = vshll.u32 %v202_v39, 16  ;;  %v206_v56 = vld [vmem:[%s10243_s26 + $0x1c] sm:$0x1] }
  0xe5   : > { %14382 = vst [vmem:[#allocation44_spill] sm:$0xff] %v10859_v49  ;;  %v10862_v59 = vpop.f32.mrf.mxu0  ;;  %9249 = vmatmul.mubr.msk.bf16.gmra.mxu0 %vm402_vm1, %v10836_v3  ;;  %14386 = vst [vmem:[#allocation48_spill] sm:$0xff] %v10874_v41  ;;  %v10909_v3 = vsel %vm451_vm0, %v10694_v53, 0  ;;  %v2412_v41 = vor.u32 %v10794_v21, %v10792_v55  ;;  %v2425_v7 = vrot.slane %v2423_v43, 5  ;;  %v2385_v21 = vrot.slane %v2384_v4, 4 }
  0xe6   : > { %14388 = vst [vmem:[#allocation50_spill] sm:$0xff] %v10878_v14  ;;  %v10880_v49 = vpop.f32.mrf.mxu1  ;;  %9215 = vmatmul.mubr.msk.bf16.gmra.mxu1 %vm402_vm1, %v10660_v1  ;;  %9252 = vmatprep.mubr.msk.bf16.mxu0 %vm402_vm1, %v10845_v54  ;;  %14391 = vst [vmem:[#allocation53_spill] sm:$0xff] %v10899_v34  ;;  %v2434_v1 = vshrl.u32 %v10268_v11, 16  ;;  %v2415_v38 = vshll.u32 %v10707_v42, 16  ;;  %v2403_v43 = vrot.slane %v2401_v58, 5  ;;  %v2439_v58 = vrot.slane %v2437_v20, 5 }
  0xe7   : > { %14389 = vst [vmem:[#allocation51_spill] sm:$0xff] %v10880_v49  ;;  %v10886_v23 = vpop.f32.mrf.mxu0  ;;  %9218 = vmatprep.mubr.msk.bf16.mxu1 %vm402_vm1, %v10677_v50  ;;  %v10903_v49 = vcombine.low %v10867_v62, %v10870_v45  ;;  %v2422_v50 = vrot.slane %v2420_v63, 4  ;;  %v10953_v42 = vld [vmem:[%s10243_s26 + $0x1d0] sm:$0xf]  ;;  %v2462_v62 = vshrl.u32 %v10290_v19, 16  ;;  %v2476_v44 = vshrl.u32 %v10311_v25, 16 }
  0xe8   : > { %v10896_v14 = vpop.f32.mrf.mxu1  ;;  %v210_v46 = vld [vmem:[%s10243_s26 + $0x2c] sm:$0x1] }
  0xe9   : > { %14390 = vst [vmem:[#allocation52_spill] sm:$0xff] %v10896_v14  ;;  %14392 = vst [vmem:[#allocation54_spill] sm:$0xff] %v10903_v49  ;;  %v10905_v54 = vpop.f32.mrf.mxu0  ;;  %v2398_v14 = vor.u32 %v10786_v15, %v10784_v5  ;;  %v2448_v15 = vshrl.u32 %v10287_v18, 16  ;;  %v2451_v5 = vshll.u32 %v10287_v18, 16  ;;  %v2389_v18 = vrot.slane %v2387_v12, 5 }
  0xea   : > { %v10917_v51 = vpop.f32.mrf.mxu1  ;;  %v2429_v12 = vshll.u32 %v206_v56, 16  ;;  %v2479_v56 = vshll.u32 %v10311_v25, 16  ;;  %v2457_v45 = vshll.u32 %v210_v46, 16 }
  0xeb   : > { %14393 = vst [vmem:[#allocation55_spill] sm:$0xff] %v10917_v51  ;;  %v10923_v53 = vpop.f32.mrf.mxu0  ;;  %v2399_v63 = vrot.slane %v2398_v14, 4  ;;  %v2413_v51 = vrot.slane %v2412_v41, 4  ;;  %v2436_v14 = vrot.slane %v2434_v1, 4  ;;  %v2450_v41 = vrot.slane %v2448_v15, 4 }
  0xec   : > { %v10928_v13 = vpop.f32.mrf.mxu1  ;;  %v2390_v20 = vsel %vm10957_vm7, %v2385_v21, %v2389_v18  ;;  %v212_v21 = vld [vmem:[%s10243_s26 + $0x34] sm:$0x1]  ;;  %v2464_v18 = vrot.slane %v2462_v62, 4  ;;  %v214_v62 = vld [vmem:[%s10243_s26 + $0x3c] sm:$0x1] }
  0xed   : > { %14394 = vst [vmem:[#allocation56_spill] sm:$0xff] %v10928_v13  ;;  %v10932_v40 = vpop.f32.mrf.mxu0  ;;  %9253 = vmatmul.mubr.msk.bf16.gmra.mxu0 %vm402_vm1, %v10903_v49  ;;  %v208_v13 = vld [vmem:[%s10243_s26 + $0x24] sm:$0x1]  ;;  %v2417_v49 = vrot.slane %v2415_v38, 5  ;;  %v2431_v38 = vrot.slane %v2429_v12, 5 }
  0xee   : > { %v10941_v39 = vpop.f32.mrf.mxu1  ;;  %9219 = vmatmul.mubr.msk.bf16.gmra.mxu1 %vm402_vm1, %v10899_v34  ;;  %9292 = vmatprep.mubr.msk.bf16.mxu0 %vm402_vm1, %v10494_v31  ;;  %v2426_v31 = vor.u32 %v2425_v7, %v2422_v50  ;;  %v2443_v17 = vshll.u32 %v208_v13, 16  ;;  %v3123_v7 = vshll.u32 %v10314_v26, 16  ;;  %v10981_v13 = vld [vmem:[%s10243_s26 + $0x1d8] sm:$0xf] }
  0xef   : > { %14395 = vst [vmem:[#allocation57_spill] sm:$0xff] %v10941_v39  ;;  %v10948_v55 = vpop.f32.mrf.mxu0  ;;  %9258 = vmatprep.mubr.msk.bf16.mxu1 %vm402_vm1, %v10261_v9  ;;  %v2453_v39 = vrot.slane %v2451_v5, 5  ;;  %v2465_v9 = vshll.u32 %v10290_v19, 16  ;;  %v3120_v19 = vshrl.u32 %v10314_v26, 16  ;;  %v10985_v5 = vsel %vm10957_vm7, %v2399_v63, %v2403_v43  ;;  %v8146_v43 = vld [vmem:[%s14181_s1 + $0xe] sm:$0x3] }
  0xf0   : > { %v10961_v11 = vpop.f32.mrf.mxu1  ;;  %v2427_v25 = vrot.slane %v2426_v31, 4  ;;  %v10994_v34 = vsel %vm10957_vm7, %v2413_v51, %v2417_v49  ;;  %v2445_v63 = vrot.slane %v2443_v17, 5  ;;  %v2478_v31 = vrot.slane %v2476_v44, 4  ;;  %v8167_v17 = vld [vmem:[%s14181_s1 + $0x14] sm:$0x3] }
  0xf1   : > { %14398 = vst [vmem:[#allocation58_spill] sm:$0xff] %v10961_v11  ;;  %v10965_v52 = vpop.f32.mrf.mxu0  ;;  %v2454_v50 = vor.u32 %v2453_v39, %v2450_v41  ;;  %v2467_v61 = vrot.slane %v2465_v9, 5  ;;  %v2481_v39 = vrot.slane %v2479_v56, 5  ;;  %v11005_v49 = vcombine.low %v2390_v20, %v10985_v5 }
  0xf2   : > { %v10970_v1 = vpop.f32.mrf.mxu1  ;;  %v3122_v44 = vrot.slane %v3120_v19, 4  ;;  %v3125_v51 = vrot.slane %v3123_v7, 5  ;;  %v2471_v41 = vshll.u32 %v212_v21, 16  ;;  %v2459_v56 = vrot.slane %v2457_v45, 5 }
  0xf3   : > { %14399 = vst [vmem:[#allocation59_spill] sm:$0xff] %v10970_v1  ;;  %v10978_v15 = vpop.f32.mrf.mxu0  ;;  %v2440_v1 = vor.u32 %v2439_v58, %v2436_v14  ;;  %v216_v58 = vld [vmem:[%s10243_s26 + $0x44] sm:$0x1]  ;;  %v2468_v20 = vor.u32 %v2467_v61, %v2464_v18  ;;  %v11034_v21 = vsel %vm451_vm0, %v8146_v43, 0 }
  0xf4   : > { %v10987_v11 = vpop.f32.mrf.mxu1  ;;  %v3129_v45 = vshll.u32 %v216_v58, 16 }
  0xf5   : > { %v9090_v26 = vpop.f32.mrf.mxu0  ;;  %9293 = vmatmul.mubr.msk.bf16.vlgmr.msra.gmra.mxu0 %vm402_vm1, %v10510_v8  ;;  %v2441_v14 = vrot.slane %v2440_v1, 4  ;;  %v2482_v1 = vor.u32 %v2481_v39, %v2478_v31  ;;  %v2473_v31 = vrot.slane %v2471_v41, 5  ;;  %v220_v41 = vld [vmem:[%s10243_s26 + $0x54] sm:$0x1] }
  0xf6   : > { %v9056_v46 = vpop.f32.mrf.mxu1  ;;  %9259 = vmatmul.mubr.msk.bf16.vlgmr.msra.gmra.mxu1 %vm402_vm1, %v10283_v16  ;;  %9359 = vmatpush3.bf16.msra.mxu0 %v10913_v10  ;;  %v11017_v10 = vsel %vm10957_vm7, %v2427_v25, %v2431_v38  ;;  %v2485_v25 = vshll.u32 %v214_v62, 16  ;;  %v14400_v62 = vshrl.u32 %v10453_v2, 16 }
  0xf7   : > { %v734_v12 = vadd.f32 %v9056_v46, %v10747_v27  ;;  %9325 = vmatpush3.bf16.msra.mxu1 %v10909_v3  ;;  %v915_v16 = vpop.f32.mrf.mxu0  ;;  %9262 = vmatprep.mubr.msk.bf16.mxu1 %vm402_vm1, %v10308_v24  ;;  %v2455_v3 = vrot.slane %v2454_v50, 4  ;;  %v3126_v50 = vor.u32 %v3125_v51, %v3122_v44  ;;  %v14401_v51 = vshll.u32 %v10453_v2, 16  ;;  %v236_v2 = vld [vmem:[%s10243_s26 + $0x94] sm:$0x1] }
  0xf8   : > { %v725_v9 = vpop.f32.mrf.mxu1  ;;  %9296 = vmatprep.mubr.msk.bf16.mxu0 %vm402_vm1, %v10514_v6  ;;  %9950 = vmatprep.subr.msk.bf16.mxu1 %vm451_vm0, %v8146_v43  ;;  %v11031_v6 = vcombine.low %v10994_v34, %v11017_v10  ;;  %v2469_v43 = vrot.slane %v2468_v20, 4  ;;  %v2492_v44 = vrot.slane %v14400_v62, 4  ;;  %v2487_v58 = vrot.slane %v2485_v25, 5  ;;  %v222_v20 = vld [vmem:[%s10243_s26 + $0x5c] sm:$0x1] }
  0xf9   : > { %v11025_v24 = vadd.f32 %v9090_v26, %v734_v12  ;;  %v726_v19 = vadd.f32 %v725_v9, %v10757_v36  ;;  %v9091_v7 = vpop.f32.mrf.mxu0  ;;  %9951 = vmatprep.subr.msk.bf16.mxu0 %vm451_vm0, %v8167_v17  ;;  %v11041_v26 = vsel %vm10957_vm7, %v2441_v14, %v2445_v63  ;;  %v11045_v46 = vsel %vm10957_vm7, %v2455_v3, %v2459_v56 }
  0xfa   : > { %v9057_v38 = vpop.f32.mrf.mxu1  ;;  %v2495_v12 = vrot.slane %v14401_v51, 5  ;;  %v2483_v14 = vrot.slane %v2482_v1, 4  ;;  %v11064_v3 = vsel %vm451_vm0, %v8167_v17, 0  ;;  %v3131_v56 = vrot.slane %v3129_v45, 5 }
  0xfb   : > { %v11036_v61 = vadd.f32 %v915_v16, %v726_v19  ;;  %v737_v36 = vadd.f32 %v9057_v38, %v10769_v60  ;;  %v918_v18 = vpop.f32.mrf.mxu0  ;;  %v11076_v17 = vcombine.low %v11041_v26, %v11045_v46  ;;  %v11080_v25 = vsel %vm10957_vm7, %v2469_v43, %v2473_v31  ;;  %v14402_v43 = vld [vmem:[#allocation7_spill] sm:$0xff] }
  0xfc   : > { %v728_v39 = vpop.f32.mrf.mxu1  ;;  %v2496_v38 = vor.u32 %v2495_v12, %v2492_v44  ;;  %v2518_v31 = vshrl.u32 %v10335_v32, 16  ;;  %v3134_v62 = vshrl.u32 %v14402_v43, 16  ;;  %v3137_v44 = vshll.u32 %v14402_v43, 16 }
  0xfd   : > { %v11051_v60 = vadd.f32 %v9091_v7, %v737_v36  ;;  %v729_v16 = vadd.f32 %v728_v39, %v10777_v0  ;;  %v9094_v63 = vpop.f32.mrf.mxu0  ;;  %9297 = vmatmul.mubr.msk.bf16.gmra.mxu0 %vm402_vm1, %v10532_v22  ;;  %v3127_v0 = vrot.slane %v3126_v50, 4  ;;  %v2499_v50 = vshll.u32 %v220_v41, 16 }
  0xfe   : > { %v9060_v9 = vpop.f32.mrf.mxu1  ;;  %9263 = vmatmul.mubr.msk.bf16.gmra.mxu1 %vm402_vm1, %v10346_v35  ;;  %9300 = vmatprep.mubr.msk.bf16.mxu0 %vm402_vm1, %v10536_v28  ;;  %v2504_v35 = vshrl.u32 %v10329_v30, 16  ;;  %v2507_v28 = vshll.u32 %v10329_v30, 16  ;;  %v11087_v36 = vsel %vm10957_vm7, %v2483_v14, %v2487_v58  ;;  %v2513_v30 = vshll.u32 %v222_v20, 16 }
  0xff   : > { %v11067_v22 = vadd.f32 %v918_v18, %v729_v16  ;;  %v750_v19 = vadd.f32 %v9060_v9, %v10788_v57  ;;  %v931_v7 = vpop.f32.mrf.mxu0  ;;  %9266 = vmatprep.mubr.msk.bf16.mxu1 %vm402_vm1, %v10354_v37  ;;  %v11091_v39 = vsel %vm10957_vm7, %v3127_v0, %v3131_v56  ;;  %v11101_v9 = vrot.slane %v2496_v38, 4  ;;  %v224_v56 = vld [vmem:[%s10243_s26 + $0x64] sm:$0x1] }
 0x100   : > { %v741_v1 = vpop.f32.mrf.mxu1  ;;  %v2509_v14 = vrot.slane %v2507_v28, 5  ;;  %v11103_v0 = vrot.slane %v2499_v50, 5  ;;  %v2521_v20 = vshll.u32 %v10335_v32, 16  ;;  %v14407_v50 = vld [vmem:[#allocation5_spill] sm:$0xff]  ;;  %v14408_v32 = vld [vmem:[#allocation12_spill] sm:$0xff]  ;;  %v3136_v43 = vrot.slane %v3134_v62, 4 }
 0x101   : > { %v11082_v57 = vadd.f32 %v9094_v63, %v750_v19  ;;  %v742_v45 = vadd.f32 %v741_v1, %v10810_v29  ;;  %v9095_v37 = vpop.f32.mrf.mxu0  ;;  %v14404_v29 = vld [vmem:[#allocation40_spill] sm:$0xff]  ;;  %v2506_v63 = vrot.slane %v2504_v35, 4  ;;  %v11114_v35 = vcombine.low %v11080_v25, %v11087_v36  ;;  %v14410_v28 = vld [vmem:[#allocation6_spill] sm:$0xff]  ;;  %v14411_v62 = vld [vmem:[#allocation3_spill] sm:$0xff] }
 0x102   : > { %v9061_v18 = vpop.f32.mrf.mxu1  ;;  %v3143_v8 = vshll.u32 %v236_v2, 16 }
 0x103   : > { %v11096_v51 = vadd.f32 %v931_v7, %v742_v45  ;;  %v753_v12 = vadd.f32 %v9061_v18, %v14404_v29  ;;  %v934_v16 = vpop.f32.mrf.mxu0  ;;  %v14406_v45 = vld [vmem:[#allocation11_spill] sm:$0xff]  ;;  %v11125_v18 = vrot.slane %v2518_v31, 4  ;;  %v3139_v29 = vrot.slane %v3137_v44, 5 }
 0x104   : > { %v744_v58 = vpop.f32.mrf.mxu1  ;;  %v2510_v41 = vor.u32 %v2509_v14, %v2506_v63  ;;  %v11137_v31 = vrot.slane %v2521_v20, 5  ;;  %v2532_v44 = vshrl.u32 %v14411_v62, 16 }
 0x105   : > { %14403 = vst [vmem:[#allocation7_spill] sm:$0xff] %v11096_v51  ;;  %v11107_v19 = vadd.f32 %v9095_v37, %v753_v12  ;;  %v745_v7 = vadd.f32 %v744_v58, %v10852_v33  ;;  %v9098_v1 = vpop.f32.mrf.mxu0  ;;  %9301 = vmatmul.mubr.msk.bf16.gmra.mxu0 %vm402_vm1, %v14406_v45  ;;  %v11122_v33 = vrot.slane %v2513_v30, 5  ;;  %v226_v37 = vld [vmem:[%s10243_s26 + $0x6c] sm:$0x1]  ;;  %v3140_v27 = vor.u32 %v3139_v29, %v3136_v43  ;;  %v238_v30 = vld [vmem:[%s10243_s26 + $0x9c] sm:$0x1] }
 0x106   : > { %v9064_v38 = vpop.f32.mrf.mxu1  ;;  %9267 = vmatmul.mubr.msk.bf16.gmra.mxu1 %vm402_vm1, %v14407_v50  ;;  %9304 = vmatprep.mubr.msk.bf16.mxu0 %vm402_vm1, %v14408_v32  ;;  %v2527_v50 = vshll.u32 %v224_v56, 16  ;;  %v2541_v14 = vshll.u32 %v226_v37, 16  ;;  %v14413_v56 = vld [vmem:[#allocation4_spill] sm:$0xff]  ;;  %v11155_v43 = vrot.slane %v2532_v44, 4 }
 0x107   : > { %14405 = vst [vmem:[#allocation40_spill] sm:$0xff] %v11107_v19  ;;  %v11127_v12 = vadd.f32 %v934_v16, %v745_v7  ;;  %v766_v58 = vadd.f32 %v9064_v38, %v10862_v59  ;;  %v947_v45 = vpop.f32.mrf.mxu0  ;;  %9270 = vmatprep.mubr.msk.bf16.mxu1 %vm402_vm1, %v14410_v28  ;;  %v2535_v59 = vshll.u32 %v14411_v62, 16  ;;  %v2546_v28 = vshrl.u32 %v14413_v56, 16  ;;  %v14418_v44 = vld [vmem:[#allocation8_spill] sm:$0xff] }
 0x108   : > { %v757_v32 = vpop.f32.mrf.mxu1  ;;  %v2511_v62 = vrot.slane %v2510_v41, 4  ;;  %v2549_v29 = vshll.u32 %v14413_v56, 16  ;;  %v228_v41 = vld [vmem:[%s10243_s26 + $0x74] sm:$0x1]  ;;  %v3145_v56 = vrot.slane %v3143_v8, 5 }
 0x109   : > { %14409 = vst [vmem:[#allocation11_spill] sm:$0xff] %v11127_v12  ;;  %v11141_v16 = vadd.f32 %v9098_v1, %v766_v58  ;;  %v758_v7 = vadd.f32 %v757_v32, %v10886_v23  ;;  %v9099_v63 = vpop.f32.mrf.mxu0  ;;  %v14414_v12 = vld [vmem:[#allocation2_spill] sm:$0xff]  ;;  %v11151_v23 = vrot.slane %v2527_v50, 5  ;;  %v2524_v32 = vor.u32 %v11137_v31, %v11125_v18 }
 0x10a   : > { %v9065_v38 = vpop.f32.mrf.mxu1  ;;  %v3148_v19 = vshrl.u32 %v14414_v12, 16  ;;  %v3151_v20 = vshll.u32 %v14414_v12, 16  ;;  %v11157_v2 = vrot.slane %v2535_v59, 5  ;;  %v3462_v50 = vor.u32 %v10854_v47, %v10849_v48  ;;  %v14419_v59 = vld [vmem:[#allocation18_spill] sm:$0xff] }
 0x10b   : > { %14412 = vst [vmem:[#allocation5_spill] sm:$0xff] %v11141_v16  ;;  %v11148_v51 = vadd.f32 %v947_v45, %v758_v7  ;;  %v769_v1 = vadd.f32 %v9065_v38, %v10905_v54  ;;  %v950_v58 = vpop.f32.mrf.mxu0  ;;  %v14417_v54 = vld [vmem:[#allocation13_spill] sm:$0xff]  ;;  %v3465_v18 = vshll.u32 %v238_v30, 16  ;;  %v11177_v47 = vrot.slane %v2541_v14, 5  ;;  %v256_v48 = vld [vmem:[%s10243_s26 + $0xe4] sm:$0x1] }
 0x10c   : > { %v760_v37 = vpop.f32.mrf.mxu1  ;;  %v3153_v38 = vrot.slane %v3151_v20, 5  ;;  %v3463_v30 = vrot.slane %v3462_v50, 4  ;;  %v3157_v50 = vshll.u32 %v256_v48, 16 }
 0x10d   : > { %14415 = vst [vmem:[#allocation12_spill] sm:$0xff] %v11148_v51  ;;  %v11160_v12 = vadd.f32 %v9099_v63, %v769_v1  ;;  %v761_v45 = vadd.f32 %v760_v37, %v10923_v53  ;;  %v9102_v7 = vpop.f32.mrf.mxu0  ;;  %9305 = vmatmul.mubr.msk.bf16.gmra.mxu0 %vm402_vm1, %v14417_v54  ;;  %v3141_v63 = vrot.slane %v3140_v27, 4  ;;  %v3150_v53 = vrot.slane %v3148_v19, 4 }
 0x10e   : > { %v9068_v31 = vpop.f32.mrf.mxu1  ;;  %9271 = vmatmul.mubr.msk.bf16.gmra.mxu1 %vm402_vm1, %v14418_v44  ;;  %9308 = vmatprep.mubr.msk.bf16.mxu0 %vm402_vm1, %v14419_v59  ;;  %v2548_v51 = vrot.slane %v2546_v28, 4  ;;  %v2551_v59 = vrot.slane %v2549_v29, 5  ;;  %v2555_v27 = vshll.u32 %v228_v41, 16  ;;  %v3467_v8 = vrot.slane %v3465_v18, 5 }
 0x10f   : > { %14416 = vst [vmem:[#allocation6_spill] sm:$0xff] %v11160_v12  ;;  %v11172_v1 = vadd.f32 %v950_v58, %v761_v45  ;;  %v782_v37 = vadd.f32 %v9068_v31, %v10932_v40  ;;  %v963_v54 = vpop.f32.mrf.mxu0  ;;  %v14421_v12 = vld [vmem:[#allocation14_spill] sm:$0xff]  ;;  %v10029_v45 = vld [vmem:[%s10243_s26 + $0x78] sm:$0xf]  ;;  %v11186_v14 = vsel %vm10957_vm7, %v3141_v63, %v3145_v56  ;;  %v11196_v41 = vsel %vm10957_vm7, %v2511_v62, %v11122_v33  ;;  %v230_v62 = vld [vmem:[%s10243_s26 + $0x7c] sm:$0x1] }
 0x110   : > { %9274 = vmatprep.mubr.msk.bf16.mxu1 %vm402_vm1, %v14421_v12  ;;  %v773_v44 = vpop.f32.mrf.mxu1  ;;  %v2560_v40 = vshrl.u32 %v10029_v45, 16  ;;  %v2563_v31 = vshll.u32 %v10029_v45, 16  ;;  %14423 = vst [vmem:[#allocation2_spill] sm:$0xff] %v11186_v14  ;;  %v3154_v12 = vor.u32 %v3153_v38, %v3150_v53  ;;  %v3468_v28 = vsel %vm10957_vm7, %v3463_v30, %v3467_v8  ;;  %v14427_v30 = vld [vmem:[#allocation20_spill] sm:$0xff]  ;;  %v14431_v45 = vld [vmem:[#allocation25_spill] sm:$0xff] }
 0x111   : > { %14420 = vst [vmem:[#allocation3_spill] sm:$0xff] %v11172_v1  ;;  %v11180_v19 = vadd.f32 %v9102_v7, %v782_v37  ;;  %v774_v20 = vadd.f32 %v773_v44, %v10948_v55  ;;  %v9103_v58 = vpop.f32.mrf.mxu0  ;;  %v11199_v18 = vcombine.low %v11186_v14, %v3468_v28  ;;  %v2525_v56 = vrot.slane %v2524_v32, 4  ;;  %v10030_v37 = vld [vmem:[%s10243_s26 + $0x80] sm:$0xf]  ;;  %v14428_v32 = vld [vmem:[#allocation17_spill] sm:$0xff] }
 0x112   : > { %v9069_v1 = vpop.f32.mrf.mxu1  ;;  %v2538_v53 = vor.u32 %v11157_v2, %v11155_v43  ;;  %v2552_v38 = vor.u32 %v2551_v59, %v2548_v51  ;;  %v2557_v33 = vrot.slane %v2555_v27, 5  ;;  %v2562_v44 = vrot.slane %v2560_v40, 4  ;;  %v14429_v43 = vld [vmem:[#allocation22_spill] sm:$0xff]  ;;  %v14432_v27 = vld [vmem:[#allocation19_spill] sm:$0xff] }
 0x113   : > { %14422 = vst [vmem:[#allocation4_spill] sm:$0xff] %v11180_v19  ;;  %v11190_v29 = vadd.f32 %v963_v54, %v774_v20  ;;  %v785_v55 = vadd.f32 %v9069_v1, %v10965_v52  ;;  %v966_v7 = vpop.f32.mrf.mxu0  ;;  %14425 = vst [vmem:[#allocation8_spill] sm:$0xff] %v11199_v18  ;;  %v2574_v54 = vshrl.u32 %v10030_v37, 16  ;;  %v2565_v51 = vrot.slane %v2563_v31, 5  ;;  %v14433_v40 = vld [vmem:[#allocation47_spill] sm:$0xff] }
 0x114   : > { %v776_v63 = vpop.f32.mrf.mxu1  ;;  %v2577_v2 = vshll.u32 %v10030_v37, 16  ;;  %v3155_v59 = vrot.slane %v3154_v12, 4  ;;  %v3159_v20 = vrot.slane %v3157_v50, 5  ;;  %v2539_v31 = vrot.slane %v2538_v53, 4  ;;  %v14438_v53 = vld [vmem:[#allocation28_spill] sm:$0xff] }
 0x115   : > { %14424 = vst [vmem:[#allocation13_spill] sm:$0xff] %v11190_v29  ;;  %v11204_v48 = vadd.f32 %v9103_v58, %v785_v55  ;;  %v777_v52 = vadd.f32 %v776_v63, %v10978_v15  ;;  %v9106_v1 = vpop.f32.mrf.mxu0  ;;  %9309 = vmatmul.mubr.msk.bf16.gmra.mxu0 %vm402_vm1, %v14427_v30  ;;  %v258_v58 = vld [vmem:[%s10243_s26 + $0xec] sm:$0x1]  ;;  %v14434_v63 = vld [vmem:[#allocation48_spill] sm:$0xff]  ;;  %v2553_v37 = vrot.slane %v2552_v38, 4  ;;  %v2569_v12 = vshll.u32 %v230_v62, 16 }
 0x116   : > { %v9072_v8 = vpop.f32.mrf.mxu1  ;;  %9275 = vmatmul.mubr.msk.bf16.gmra.mxu1 %vm402_vm1, %v14428_v32  ;;  %9312 = vmatprep.mubr.msk.bf16.mxu0 %vm402_vm1, %v14429_v43  ;;  %v3476_v30 = vor.u32 %v14434_v63, %v14433_v40  ;;  %v3479_v32 = vshll.u32 %v258_v58, 16  ;;  %v2576_v50 = vrot.slane %v2574_v54, 4  ;;  %v232_v29 = vld [vmem:[%s10243_s26 + $0x84] sm:$0x1]  ;;  %v2579_v19 = vrot.slane %v2577_v2, 5 }
 0x117   : > { %14426 = vst [vmem:[#allocation18_spill] sm:$0xff] %v11204_v48  ;;  %v11215_v15 = vadd.f32 %v966_v7, %v777_v52  ;;  %v798_v28 = vadd.f32 %v9072_v8, %v14431_v45  ;;  %v979_v55 = vpop.f32.mrf.mxu0  ;;  %9278 = vmatprep.mubr.msk.bf16.mxu1 %vm402_vm1, %v14432_v27  ;;  %v14436_v52 = vld [vmem:[#allocation27_spill] sm:$0xff]  ;;  %v2566_v27 = vor.u32 %v2565_v51, %v2562_v44  ;;  %v2571_v2 = vrot.slane %v2569_v12, 5 }
 0x118   : > { %v789_v43 = vpop.f32.mrf.mxu1  ;;  %v3477_v18 = vrot.slane %v3476_v30, 4  ;;  %v10031_v40 = vld [vmem:[%s10243_s26 + $0x88] sm:$0xf]  ;;  %v234_v62 = vld [vmem:[%s10243_s26 + $0x8c] sm:$0x1]  ;;  %v14440_v44 = vsel %vm10957_vm7, %v11101_v9, %v11103_v0  ;;  %v2544_v9 = vsel %vm10957_vm7, %v2539_v31, %v11177_v47  ;;  %v2583_v0 = vshll.u32 %v232_v29, 16 }
 0x119   : > { %14430 = vst [vmem:[#allocation14_spill] sm:$0xff] %v11215_v15  ;;  %v11222_v7 = vadd.f32 %v9106_v1, %v798_v28  ;;  %v790_v8 = vadd.f32 %v789_v43, %v14436_v52  ;;  %v9107_v45 = vpop.f32.mrf.mxu0  ;;  %v3481_v15 = vrot.slane %v3479_v32, 5  ;;  %v2588_v63 = vshrl.u32 %v10031_v40, 16  ;;  %v14444_v32 = vld [vmem:[#allocation53_spill] sm:$0xff]  ;;  %v14449_v31 = vld [vmem:[#allocation26_spill] sm:$0xff] }
 0x11a   : > { %v9073_v48 = vpop.f32.mrf.mxu1  ;;  %v2591_v58 = vshll.u32 %v10031_v40, 16  ;;  %v11233_v1 = vsel %vm10957_vm7, %v3155_v59, %v3159_v20  ;;  %v11243_v51 = vcombine.low %v14440_v44, %v11196_v41  ;;  %v14445_v52 = vld [vmem:[#allocation21_spill] sm:$0xff]  ;;  %v2567_v12 = vrot.slane %v2566_v27, 4 }
 0x11b   : > { %14435 = vst [vmem:[#allocation20_spill] sm:$0xff] %v11222_v7  ;;  %v11227_v16 = vadd.f32 %v979_v55, %v790_v8  ;;  %v801_v38 = vadd.f32 %v9073_v48, %v14438_v53  ;;  %v982_v54 = vpop.f32.mrf.mxu0  ;;  %14439 = vst [vmem:[#allocation22_spill] sm:$0xff] %v11233_v1  ;;  %v3482_v28 = vsel %vm10957_vm7, %v3477_v18, %v3481_v15  ;;  %v14443_v18 = vld [vmem:[#allocation29_spill] sm:$0xff]  ;;  %v2590_v8 = vrot.slane %v2588_v63, 4  ;;  %v14448_v53 = vld [vmem:[#allocation30_spill] sm:$0xff] }
 0x11c   : > { %v792_v30 = vpop.f32.mrf.mxu1  ;;  %v2530_v48 = vsel %vm10957_vm7, %v2525_v56, %v11151_v23  ;;  %v11249_v59 = vcombine.low %v11233_v1, %v3482_v28  ;;  %v14446_v23 = vld [vmem:[#allocation41_spill] sm:$0xff]  ;;  %v11265_v56 = vsel %vm10957_vm7, %v2553_v37, %v2557_v33  ;;  %v2593_v44 = vrot.slane %v2591_v58, 5  ;;  %v10032_v37 = vld [vmem:[%s10243_s26 + $0x130] sm:$0xf]  ;;  %v14475_v7 = vld [vmem:[#allocation35_spill] sm:$0xff] }
 0x11d   : > { %14437 = vst [vmem:[#allocation17_spill] sm:$0xff] %v11227_v16  ;;  %v11251_v20 = vadd.f32 %v9107_v45, %v801_v38  ;;  %v793_v15 = vadd.f32 %v792_v30, %v14443_v18  ;;  %v9110_v55 = vpop.f32.mrf.mxu0  ;;  %9313 = vmatmul.mubr.msk.bf16.gmra.mxu0 %vm402_vm1, %v14444_v32  ;;  %v2597_v45 = vshll.u32 %v234_v62, 16  ;;  %v14450_v38 = vld [vmem:[#allocation31_spill] sm:$0xff]  ;;  %v2580_v30 = vor.u32 %v2579_v19, %v2576_v50  ;;  %v14476_v1 = vld [vmem:[#allocation45_spill] sm:$0xff] }
 0x11e   : > { %14441 = vst [vmem:[#allocation25_spill] sm:$0xff] %v11249_v59  ;;  %v9076_v43 = vpop.f32.mrf.mxu1  ;;  %9279 = vmatmul.mubr.msk.bf16.gmra.mxu1 %vm402_vm1, %v14445_v52  ;;  %9316 = vmatprep.mubr.msk.bf16.mxu0 %vm402_vm1, %v14446_v23  ;;  %v14451_v28 = vcombine.low %v14449_v31, %v14450_v38  ;;  %v11274_v32 = vcombine.low %v2530_v48, %v2544_v9  ;;  %v3162_v27 = vshrl.u32 %v10032_v37, 16  ;;  %v3165_v63 = vshll.u32 %v10032_v37, 16  ;;  %v14455_v62 = vld [vmem:[#allocation39_spill] sm:$0xff]  ;;  %v14461_v38 = vld [vmem:[#allocation42_spill] sm:$0xff] }
 0x11f   : > { %14442 = vst [vmem:[#allocation19_spill] sm:$0xff] %v11251_v20  ;;  %v11267_v40 = vadd.f32 %v982_v54, %v793_v15  ;;  %v814_v47 = vadd.f32 %v9076_v43, %v14448_v53  ;;  %v995_v29 = vpop.f32.mrf.mxu0  ;;  %v11277_v33 = vcombine.low %v11196_v41, %v2530_v48  ;;  %v11284_v52 = vcombine.low %v2544_v9, %v11265_v56  ;;  %v14457_v48 = vld [vmem:[#allocation15_spill] sm:$0xff]  ;;  %v286_v37 = vld [vmem:[%s10243_s26 + $0x15c] sm:$0x1]  ;;  %v14470_v20 = vld [vmem:[#allocation34_spill] sm:$0xff] }
 0x120   : > { %9282 = vmatprep.mubr.msk.bf16.mxu1 %vm402_vm1, %v14451_v28  ;;  %v805_v18 = vpop.f32.mrf.mxu1  ;;  %14452 = vst [vmem:[#allocation48_spill] sm:$0xff] %v11274_v32  ;;  %v2585_v19 = vrot.slane %v2583_v0, 5  ;;  %v11288_v58 = vsel %vm10957_vm7, %v2567_v12, %v2571_v2  ;;  %v11290_v41 = vrot.slane %v2597_v45, 5  ;;  %v14458_v23 = vshrl.u32 %v14457_v48, 16  ;;  %v11301_v12 = vld [vmem:[%s10243_s26 + $0xa4] sm:$0x1] }
 0x121   : > { %14447 = vst [vmem:[#allocation47_spill] sm:$0xff] %v11267_v40  ;;  %14453 = vst [vmem:[#allocation27_spill] sm:$0xff] %v11277_v33  ;;  %v11280_v54 = vadd.f32 %v9110_v55, %v814_v47  ;;  %v806_v15 = vadd.f32 %v805_v18, %v14455_v62  ;;  %v9111_v43 = vpop.f32.mrf.mxu0  ;;  %v14459_v55 = vshll.u32 %v14457_v48, 16  ;;  %v2581_v0 = vrot.slane %v2580_v30, 4  ;;  %v14462_v45 = vld [vmem:[#allocation9_spill] sm:$0xff] }
 0x122   : > { %14456 = vst [vmem:[#allocation29_spill] sm:$0xff] %v11284_v52  ;;  %v9077_v50 = vpop.f32.mrf.mxu1  ;;  %v3760_v53 = vrot.slane %v14458_v23, 4  ;;  %v2594_v18 = vor.u32 %v2593_v44, %v2590_v8  ;;  %v14463_v62 = vshrl.u32 %v14462_v45, 16  ;;  %v3164_v23 = vrot.slane %v3162_v27, 4  ;;  %v276_v44 = vld [vmem:[%s10243_s26 + $0x134] sm:$0x1] }
 0x123   : > { %14454 = vst [vmem:[#allocation28_spill] sm:$0xff] %v11280_v54  ;;  %v3763_v47 = vrot.slane %v14459_v55, 5  ;;  %v11296_v31 = vadd.f32 %v995_v29, %v806_v15  ;;  %v817_v28 = vadd.f32 %v9077_v50, %v14461_v38  ;;  %v998_v9 = vpop.f32.mrf.mxu0  ;;  %v3167_v48 = vrot.slane %v3165_v63, 5  ;;  %v14464_v55 = vld [vmem:[#allocation16_spill] sm:$0xff]  ;;  %v14467_v54 = vld [vmem:[#allocation43_spill] sm:$0xff]  ;;  %v14480_v52 = vld [vmem:[#allocation49_spill] sm:$0xff] }
 0x124   : > { %v808_v2 = vpop.f32.mrf.mxu1  ;;  %v11305_v59 = vrot.slane %v14463_v62, 4  ;;  %v3772_v29 = vshrl.u32 %v14464_v55, 16  ;;  %v14466_v50 = vld [vmem:[#allocation44_spill] sm:$0xff]  ;;  %v14468_v8 = vshll.u32 %v14462_v45, 16  ;;  %v288_v40 = vld [vmem:[%s10243_s26 + $0x164] sm:$0x1]  ;;  %v14477_v32 = vcombine.low %v14475_v7, %v14476_v1 }
 0x125   : > { %14460 = vst [vmem:[#allocation53_spill] sm:$0xff] %v11296_v31  ;;  %v11308_v15 = vadd.f32 %v9111_v43, %v817_v28  ;;  %v809_v38 = vadd.f32 %v808_v2, %v14466_v50  ;;  %v9114_v31 = vpop.f32.mrf.mxu0  ;;  %9317 = vmatmul.mubr.msk.bf16.gmra.mxu0 %vm402_vm1, %v14467_v54  ;;  %v3775_v62 = vshll.u32 %v14464_v55, 16  ;;  %v14469_v63 = vld [vmem:[#allocation32_spill] sm:$0xff]  ;;  %v14472_v43 = vld [vmem:[#allocation54_spill] sm:$0xff]  ;;  %v3764_v28 = vor.u32 %v3763_v47, %v3760_v53  ;;  %v10033_v1 = vld [vmem:[%s10243_s26 + $0xa8] sm:$0xf] }
 0x126   : > { %v11315_v30 = vrot.slane %v14468_v8, 5  ;;  %v9080_v27 = vpop.f32.mrf.mxu1  ;;  %v14471_v16 = vcombine.low %v14469_v63, %v14470_v20  ;;  %9320 = vmatprep.mubr.msk.bf16.mxu0 %vm402_vm1, %v14472_v43  ;;  %v3767_v54 = vshll.u32 %v286_v37, 16  ;;  %v3774_v2 = vrot.slane %v3772_v29, 4  ;;  %v14474_v8 = vld [vmem:[#allocation51_spill] sm:$0xff]  ;;  %v278_v37 = vld [vmem:[%s10243_s26 + $0x13c] sm:$0x1] }
 0x127   : > { %14465 = vst [vmem:[#allocation21_spill] sm:$0xff] %v11308_v15  ;;  %v3781_v45 = vshll.u32 %v288_v40, 16  ;;  %v11326_v50 = vadd.f32 %v998_v9, %v809_v38  ;;  %v830_v15 = vadd.f32 %v9080_v27, %v14474_v8  ;;  %v1011_v55 = vpop.f32.mrf.mxu0  ;;  %v3777_v20 = vrot.slane %v3775_v62, 5  ;;  %v14479_v38 = vld [vmem:[#allocation52_spill] sm:$0xff] }
 0x128   : > { %9283 = vmatmul.mubr.msk.bf16.gmra.mxu1 %vm402_vm1, %v14471_v16  ;;  %v2611_v16 = vshll.u32 %v11301_v12, 16  ;;  %v821_v63 = vpop.f32.mrf.mxu1  ;;  %v11336_v53 = vsel %vm10957_vm7, %v2581_v0, %v2585_v19  ;;  %v11338_v40 = vrot.slane %v2594_v18, 4  ;;  %v3168_v47 = vor.u32 %v3167_v48, %v3164_v23  ;;  %v14481_v19 = vld [vmem:[#allocation50_spill] sm:$0xff]  ;;  %v14482_v23 = vld [vmem:[#allocation55_spill] sm:$0xff] }
 0x129   : > { %14473 = vst [vmem:[#allocation41_spill] sm:$0xff] %v11326_v50  ;;  %9286 = vmatprep.mubr.msk.bf16.mxu1 %vm402_vm1, %v14477_v32  ;;  %v3171_v9 = vshll.u32 %v276_v44, 16  ;;  %v11341_v29 = vadd.f32 %v9114_v31, %v830_v15  ;;  %v822_v27 = vadd.f32 %v821_v63, %v14479_v38  ;;  %v9115_v7 = vpop.f32.mrf.mxu0  ;;  %v2616_v32 = vshrl.u32 %v10033_v1, 16 }
 0x12a   : > { %v3778_v43 = vor.u32 %v3777_v20, %v3774_v2  ;;  %v9081_v12 = vpop.f32.mrf.mxu1  ;;  %v3765_v62 = vrot.slane %v3764_v28, 4  ;;  %v3769_v8 = vrot.slane %v3767_v54, 5  ;;  %v3783_v50 = vrot.slane %v3781_v45, 5  ;;  %v14483_v54 = vld [vmem:[#allocation56_spill] sm:$0xff] }
 0x12b   : > { %14478 = vst [vmem:[#allocation30_spill] sm:$0xff] %v11341_v29  ;;  %v3490_v0 = vor.u32 %v14481_v19, %v14480_v52  ;;  %v11347_v18 = vadd.f32 %v1011_v55, %v822_v27  ;;  %v833_v48 = vadd.f32 %v9081_v12, %v14482_v23  ;;  %v1014_v44 = vpop.f32.mrf.mxu0  ;;  %v3493_v15 = vshll.u32 %v278_v37, 16  ;;  %v14490_v19 = vld [vmem:[#allocation57_spill] sm:$0xff] }
 0x12c   : > { %v3779_v31 = vrot.slane %v3778_v43, 4  ;;  %v824_v63 = vpop.f32.mrf.mxu1  ;;  %v2619_v38 = vshll.u32 %v10033_v1, 16  ;;  %v3169_v29 = vrot.slane %v3168_v47, 4  ;;  %v3173_v2 = vrot.slane %v3171_v9, 5  ;;  %v14485_v43 = vld [vmem:[#allocation46_spill] sm:$0xff] }
 0x12d   : > { %v3491_v20 = vrot.slane %v3490_v0, 4  ;;  %v11350_v28 = vadd.f32 %v9115_v7, %v833_v48  ;;  %v825_v45 = vadd.f32 %v824_v63, %v14483_v54  ;;  %v9118_v14 = vpop.f32.mrf.mxu0  ;;  %v14484_v52 = vcombine.low %v10953_v42, %v10981_v13  ;;  %v242_v7 = vld [vmem:[%s10243_s26 + $0xac] sm:$0x1]  ;;  %v10034_v13 = vld [vmem:[%s10243_s26 + $0xb0] sm:$0xf] }
 0x12e   : > { %v2608_v55 = vor.u32 %v11315_v30, %v11305_v59  ;;  %v3495_v37 = vrot.slane %v3493_v15, 5  ;;  %v9084_v27 = vpop.f32.mrf.mxu1  ;;  %v14486_v47 = vcombine.low %v14485_v43, %v10953_v42  ;;  %v14487_v9 = vcombine.low %v10985_v5, %v10994_v34 }
 0x12f   : > { %9321 = vmatmul.mubr.msk.bf16.gmra.mxu0 %vm402_vm1, %v14484_v52  ;;  %v2630_v1 = vshrl.u32 %v10034_v13, 16  ;;  %v2633_v12 = vshll.u32 %v10034_v13, 16  ;;  %v11371_v59 = vsel %vm10957_vm7, %v3765_v62, %v3769_v8  ;;  %v11375_v30 = vsel %vm10957_vm7, %v3779_v31, %v3783_v50  ;;  %v1027_v34 = vpop.f32.mrf.mxu0  ;;  %v244_v50 = vld [vmem:[%s10243_s26 + $0xb4] sm:$0x1] }
 0x130   : > { %9287 = vmatmul.mubr.msk.bf16.gmra.mxu1 %vm402_vm1, %v14486_v47  ;;  %9360 = vmatprep.mubr.msk.bf16.mxu0 %vm402_vm1, %v14487_v9  ;;  %14488 = vst [vmem:[#allocation26_spill] sm:$0xff] %v11371_v59  ;;  %14489 = vst [vmem:[#allocation31_spill] sm:$0xff] %v11375_v30  ;;  %v11377_v42 = vadd.f32 %v1014_v44, %v825_v45  ;;  %v846_v0 = vadd.f32 %v9084_v27, %v14490_v19  ;;  %v11382_v5 = vrot.slane %v2611_v16, 5  ;;  %v837_v62 = vpop.f32.mrf.mxu1  ;;  %v10035_v27 = vld [vmem:[%s10243_s26 + $0xb8] sm:$0xf] }
 0x131   : > { %9326 = vmatprep.mubr.msk.bf16.mxu1 %vm402_vm1, %v11005_v49  ;;  %v11386_v23 = vcombine.low %v11371_v59, %v11375_v30  ;;  %v2618_v8 = vrot.slane %v2616_v32, 4  ;;  %v2621_v48 = vrot.slane %v2619_v38, 5  ;;  %v11391_v44 = vsel %vm10957_vm7, %v3169_v29, %v3173_v2  ;;  %v14492_v49 = vld [vmem:[#allocation58_spill] sm:$0xff]  ;;  %v9119_v63 = vpop.f32.mrf.mxu0 }
 0x132   : > { %v3496_v31 = vsel %vm10957_vm7, %v3491_v20, %v3495_v37  ;;  %v11395_v15 = vadd.f32 %v9118_v14, %v846_v0  ;;  %v838_v16 = vadd.f32 %v837_v62, %v14492_v49  ;;  %v2625_v54 = vshll.u32 %v242_v7, 16  ;;  %v9085_v52 = vpop.f32.mrf.mxu1  ;;  %v14494_v20 = vld [vmem:[#allocation59_spill] sm:$0xff]  ;;  %v246_v62 = vld [vmem:[%s10243_s26 + $0xbc] sm:$0x1]  ;;  %v264_v30 = vld [vmem:[%s10243_s26 + $0x104] sm:$0x1] }
 0x133   : > { %14491 = vst [vmem:[#allocation39_spill] sm:$0xff] %v11386_v23  ;;  %v11399_v45 = vcombine.low %v11391_v44, %v3496_v31  ;;  %v2632_v32 = vrot.slane %v2630_v1, 4  ;;  %v2635_v38 = vrot.slane %v2633_v12, 5  ;;  %v2644_v43 = vshrl.u32 %v10035_v27, 16  ;;  %v1030_v37 = vpop.f32.mrf.mxu0 }
 0x134   : > { %v2647_v29 = vshll.u32 %v10035_v27, 16  ;;  %v11402_v2 = vadd.f32 %v1027_v34, %v838_v16  ;;  %v849_v14 = vadd.f32 %v9085_v52, %v14494_v20  ;;  %v11405_v47 = vrot.slane %v2608_v55, 4  ;;  %v840_v7 = vpop.f32.mrf.mxu1  ;;  %v10037_v27 = vld [vmem:[%s10243_s26 + $0xd0] sm:$0xf] }
 0x135   : > { %14493 = vst [vmem:[#allocation15_spill] sm:$0xff] %v11399_v45  ;;  %v2639_v9 = vshll.u32 %v244_v50, 16  ;;  %v11409_v13 = vcombine.low %v11265_v56, %v11288_v58  ;;  %v11415_v1 = vsel %vm10957_vm7, %v11338_v40, %v11290_v41  ;;  %v11419_v12 = vcombine.low %v11288_v58, %v11336_v53  ;;  %v9158_v34 = vpop.f32.mrf.mxu0  ;;  %v10036_v50 = vld [vmem:[%s10243_s26 + $0xc0] sm:$0xf]  ;;  %v11433_v58 = vld [vmem:[%s14181_s1 + $0x1a] sm:$0x3] }
 0x136   : > { %v2622_v19 = vor.u32 %v2621_v48, %v2618_v8  ;;  %v11421_v0 = vadd.f32 %v9119_v63, %v849_v14  ;;  %v841_v55 = vadd.f32 %v840_v7, %v10987_v11  ;;  %v14496_v56 = vcombine.low %v11017_v10, %v11041_v26  ;;  %v9124_v40 = vpop.f32.mrf.mxu1  ;;  %v11441_v48 = vld [vmem:[%s14181_s1 + $0x20] sm:$0x3]  ;;  %v262_v45 = vld [vmem:[%s10243_s26 + $0xfc] sm:$0x1] }
 0x137   : > { %14495 = vst [vmem:[#allocation42_spill] sm:$0xff] %v11419_v12  ;;  %v2658_v31 = vshrl.u32 %v10036_v50, 16  ;;  %v2661_v41 = vshll.u32 %v10036_v50, 16  ;;  %v2627_v11 = vrot.slane %v2625_v54, 5  ;;  %v2636_v10 = vor.u32 %v2635_v38, %v2632_v32  ;;  %v1361_v63 = vpop.f32.mrf.mxu0  ;;  %v250_v38 = vld [vmem:[%s10243_s26 + $0xcc] sm:$0x1] }
 0x138   : > { %9361 = vmatmul.mubr.msk.bf16.vlgmr.msra.gmra.mxu0 %vm402_vm1, %v14496_v56  ;;  %9327 = vmatmul.mubr.msk.bf16.vlgmr.msra.gmra.mxu1 %vm402_vm1, %v11031_v6  ;;  %v2646_v26 = vrot.slane %v2644_v43, 4  ;;  %v2649_v8 = vrot.slane %v2647_v29, 5  ;;  %v11443_v49 = vadd.f32 %v1030_v37, %v841_v55  ;;  %v1274_v16 = vadd.f32 %v9124_v40, %v11025_v24  ;;  %v1145_v52 = vpop.f32.mrf.mxu1  ;;  %v10038_v56 = vld [vmem:[%s10243_s26 + $0xd8] sm:$0xf] }
 0x139   : > { %9427 = vmatpush3.bf16.msra.mxu0 %v11064_v3  ;;  %9393 = vmatpush3.bf16.msra.mxu1 %v11034_v21  ;;  %v2641_v54 = vrot.slane %v2639_v9, 5  ;;  %v14497_v32 = vcombine.low %v11045_v46, %v11080_v25  ;;  %v2623_v24 = vrot.slane %v2622_v19, 4  ;;  %v2653_v21 = vshll.u32 %v246_v62, 16  ;;  %v9159_v37 = vpop.f32.mrf.mxu0  ;;  %v248_v9 = vld [vmem:[%s10243_s26 + $0xc4] sm:$0x1] }
 0x13a   : > { %9330 = vmatprep.mubr.msk.bf16.mxu1 %vm402_vm1, %v11076_v17  ;;  %v2686_v43 = vshrl.u32 %v10037_v27, 16  ;;  %v2689_v29 = vshll.u32 %v10037_v27, 16  ;;  %9952 = vmatprep.subr.msk.bf16.mxu1 %vm451_vm0, %v11433_v58  ;;  %v11461_v20 = vadd.f32 %v9158_v34, %v1274_v16  ;;  %v1272_v14 = vadd.f32 %v1145_v52, %v11036_v61  ;;  %v9125_v25 = vpop.f32.mrf.mxu1  ;;  %v14498_v61 = vld [vmem:[#allocation33_spill] sm:$0xff]  ;;  %v14499_v52 = vld [vmem:[#allocation36_spill] sm:$0xff] }
 0x13b   : > { %9364 = vmatprep.mubr.msk.bf16.mxu0 %vm402_vm1, %v14497_v32  ;;  %v2660_v7 = vrot.slane %v2658_v31, 4  ;;  %v2663_v46 = vrot.slane %v2661_v41, 5  ;;  %9953 = vmatprep.subr.msk.bf16.mxu0 %vm451_vm0, %v11441_v48  ;;  %v2637_v19 = vrot.slane %v2636_v10, 4  ;;  %v2650_v55 = vor.u32 %v2649_v8, %v2646_v26  ;;  %v1364_v16 = vpop.f32.mrf.mxu0 }
 0x13c   : > { %v2700_v62 = vshrl.u32 %v10038_v56, 16  ;;  %v2703_v50 = vshll.u32 %v10038_v56, 16  ;;  %v11468_v40 = vadd.f32 %v1361_v63, %v1272_v14  ;;  %v1275_v34 = vadd.f32 %v9125_v25, %v11051_v60  ;;  %v1148_v41 = vpop.f32.mrf.mxu1  ;;  %v252_v56 = vld [vmem:[%s10243_s26 + $0xd4] sm:$0x1] }
 0x13d   : > { %v2678_v32 = vor.u32 %v14499_v52, %v14498_v61  ;;  %v2681_v31 = vshll.u32 %v250_v38, 16  ;;  %v2628_v27 = vsel %vm10957_vm7, %v2623_v24, %v2627_v11  ;;  %v2667_v3 = vshll.u32 %v248_v9, 16  ;;  %v9162_v14 = vpop.f32.mrf.mxu0 }
 0x13e   : > { %v2688_v10 = vrot.slane %v2686_v43, 4  ;;  %v2691_v26 = vrot.slane %v2689_v29, 5  ;;  %v11475_v8 = vadd.f32 %v9159_v37, %v1275_v34  ;;  %v1273_v63 = vadd.f32 %v1148_v41, %v11067_v22  ;;  %v9128_v61 = vpop.f32.mrf.mxu1 }
 0x13f   : > { %v14500_v60 = vcombine.low %v11087_v36, %v11091_v39  ;;  %v2655_v25 = vrot.slane %v2653_v21, 5  ;;  %v2664_v38 = vor.u32 %v2663_v46, %v2660_v7  ;;  %v2642_v22 = vsel %vm10957_vm7, %v2637_v19, %v2641_v54  ;;  %v1377_v29 = vpop.f32.mrf.mxu0  ;;  %v254_v7 = vld [vmem:[%s10243_s26 + $0xdc] sm:$0x1]  ;;  %v14501_v54 = vld [vmem:[#allocation2_spill] sm:$0xff] }
 0x140   : > { %9331 = vmatmul.mubr.msk.bf16.gmra.mxu1 %vm402_vm1, %v11114_v35  ;;  %v2651_v11 = vrot.slane %v2650_v55, 4  ;;  %v2702_v24 = vrot.slane %v2700_v62, 4  ;;  %v2705_v43 = vrot.slane %v2703_v50, 5  ;;  %v11489_v36 = vadd.f32 %v1364_v16, %v1273_v63  ;;  %v1161_v46 = vpop.f32.mrf.mxu1 }
 0x141   : > { %9365 = vmatmul.mubr.msk.bf16.gmra.mxu0 %vm402_vm1, %v14500_v60  ;;  %v1278_v21 = vadd.f32 %v9128_v61, %v11082_v57  ;;  %9334 = vmatprep.mubr.msk.bf16.mxu1 %vm402_vm1, %v11243_v51  ;;  %v2679_v37 = vrot.slane %v2678_v32, 4  ;;  %v2683_v9 = vrot.slane %v2681_v31, 5  ;;  %v11497_v34 = vcombine.low %v11336_v53, %v11415_v1  ;;  %v14504_v57 = vld [vmem:[#allocation7_spill] sm:$0xff]  ;;  %v9163_v52 = vpop.f32.mrf.mxu0  ;;  %v14509_v60 = vld [vmem:[#allocation40_spill] sm:$0xff] }
 0x142   : > { %9368 = vmatprep.mubr.msk.bf16.mxu0 %vm402_vm1, %v11277_v33  ;;  %v11501_v19 = vcombine.low %v11415_v1, %v14501_v54  ;;  %v2692_v55 = vor.u32 %v2691_v26, %v2688_v10  ;;  %v2695_v62 = vshll.u32 %v252_v56, 16  ;;  %v1276_v16 = vadd.f32 %v1161_v46, %v14504_v57  ;;  %v9129_v41 = vpop.f32.mrf.mxu1 }
 0x143   : > { %v11503_v50 = vadd.f32 %v9162_v14, %v1278_v21  ;;  %v14505_v32 = vsel %vm10957_vm7, %v11405_v47, %v11382_v5  ;;  %v2669_v53 = vrot.slane %v2667_v3, 5  ;;  %v2665_v1 = vrot.slane %v2664_v38, 4  ;;  %v1380_v61 = vpop.f32.mrf.mxu0  ;;  %v260_v38 = vld [vmem:[%s10243_s26 + $0xf4] sm:$0x1] }
 0x144   : > { %14502 = vst [vmem:[#allocation9_spill] sm:$0xff] %v11501_v19  ;;  %v11511_v31 = vcombine.low %v14505_v32, %v2628_v27  ;;  %v11513_v63 = vcombine.low %v2628_v27, %v2642_v22  ;;  %v2706_v10 = vor.u32 %v2705_v43, %v2702_v24  ;;  %v2709_v26 = vshll.u32 %v254_v7, 16  ;;  %v1164_v47 = vpop.f32.mrf.mxu1  ;;  %v10039_v27 = vld [vmem:[%s10243_s26 + $0xf8] sm:$0xf] }
 0x145   : > { %14503 = vst [vmem:[#allocation16_spill] sm:$0xff] %v11503_v50  ;;  %v11515_v14 = vadd.f32 %v1377_v29, %v1276_v16  ;;  %v1279_v56 = vadd.f32 %v9129_v41, %v14509_v60  ;;  %v2656_v21 = vsel %vm10957_vm7, %v2651_v11, %v2655_v25  ;;  %v2684_v5 = vsel %vm10957_vm7, %v2679_v37, %v2683_v9  ;;  %v14511_v29 = vld [vmem:[#allocation11_spill] sm:$0xff]  ;;  %v9166_v57 = vpop.f32.mrf.mxu0  ;;  %v14512_v16 = vld [vmem:[#allocation29_spill] sm:$0xff]  ;;  %v14513_v25 = vld [vmem:[#allocation10_spill] sm:$0xff] }
 0x146   : > { %14506 = vst [vmem:[#allocation44_spill] sm:$0xff] %v11511_v31  ;;  %14507 = vst [vmem:[#allocation43_spill] sm:$0xff] %v11513_v63  ;;  %v2693_v46 = vrot.slane %v2692_v55, 4  ;;  %v2697_v3 = vrot.slane %v2695_v62, 5  ;;  %v2728_v54 = vshrl.u32 %v10039_v27, 16  ;;  %v2731_v24 = vshll.u32 %v10039_v27, 16  ;;  %v9132_v55 = vpop.f32.mrf.mxu1 }
 0x147   : > { %14508 = vst [vmem:[#allocation32_spill] sm:$0xff] %v11515_v14  ;;  %v11524_v43 = vadd.f32 %v9163_v52, %v1279_v56  ;;  %v1277_v7 = vadd.f32 %v1164_v47, %v14511_v29  ;;  %v14514_v11 = vshrl.u32 %v14513_v25, 16  ;;  %v14515_v37 = vshll.u32 %v14513_v25, 16  ;;  %v14516_v62 = vld [vmem:[#allocation48_spill] sm:$0xff]  ;;  %v10040_v60 = vld [vmem:[%s10243_s26 + $0x100] sm:$0xf]  ;;  %v1393_v23 = vpop.f32.mrf.mxu0 }
 0x148   : > { %9335 = vmatmul.mubr.msk.bf16.gmra.mxu1 %vm402_vm1, %v14516_v62  ;;  %v2707_v52 = vrot.slane %v2706_v10, 4  ;;  %v2711_v41 = vrot.slane %v2709_v26, 5  ;;  %v2742_v56 = vshrl.u32 %v10040_v60, 16  ;;  %v2745_v47 = vshll.u32 %v10040_v60, 16  ;;  %v14518_v29 = vld [vmem:[#allocation5_spill] sm:$0xff] }
 0x149   : > { %14510 = vst [vmem:[#allocation34_spill] sm:$0xff] %v11524_v43  ;;  %9369 = vmatmul.mubr.msk.bf16.gmra.mxu0 %vm402_vm1, %v14512_v16  ;;  %v2716_v32 = vrot.slane %v14514_v11, 4  ;;  %v2719_v9 = vrot.slane %v14515_v37, 5  ;;  %v11538_v27 = vadd.f32 %v1380_v61, %v1277_v7  ;;  %v1282_v11 = vadd.f32 %v9132_v55, %v14518_v29  ;;  %9338 = vmatprep.mubr.msk.bf16.mxu1 %vm402_vm1, %v11409_v13  ;;  %v1177_v16 = vpop.f32.mrf.mxu1  ;;  %v14521_v7 = vld [vmem:[#allocation12_spill] sm:$0xff]  ;;  %v9167_v29 = vpop.f32.mrf.mxu0  ;;  %v272_v50 = vld [vmem:[%s10243_s26 + $0x124] sm:$0x1] }
 0x14a   : > { %9372 = vmatprep.mubr.msk.bf16.mxu0 %vm402_vm1, %v11419_v12  ;;  %v2670_v25 = vsel %vm10957_vm7, %v2665_v1, %v2669_v53  ;;  %v2723_v37 = vshll.u32 %v260_v38, 16  ;;  %v11545_v12 = vcombine.low %v2642_v22, %v2656_v21  ;;  %v2698_v10 = vsel %vm10957_vm7, %v2693_v46, %v2697_v3 }
 0x14b   : > { %14517 = vst [vmem:[#allocation54_spill] sm:$0xff] %v11538_v27  ;;  %v2730_v26 = vrot.slane %v2728_v54, 4  ;;  %v2733_v60 = vrot.slane %v2731_v24, 5  ;;  %v11549_v61 = vadd.f32 %v9166_v57, %v1282_v11  ;;  %v1280_v55 = vadd.f32 %v1177_v16, %v14521_v7  ;;  %v9133_v1 = vpop.f32.mrf.mxu1  ;;  %v14525_v24 = vld [vmem:[#allocation6_spill] sm:$0xff]  ;;  %v1396_v11 = vpop.f32.mrf.mxu0 }
 0x14c   : > { %14519 = vst [vmem:[#allocation51_spill] sm:$0xff] %v11545_v12  ;;  %v11552_v33 = vcombine.low %v2670_v25, %v2684_v5  ;;  %v2720_v53 = vor.u32 %v2719_v9, %v2716_v32  ;;  %v11555_v38 = vcombine.low %v2656_v21, %v2670_v25  ;;  %v2712_v22 = vsel %vm10957_vm7, %v2707_v52, %v2711_v41  ;;  %v10041_v9 = vld [vmem:[%s10243_s26 + $0x108] sm:$0xf] }
 0x14d   : > { %14520 = vst [vmem:[#allocation35_spill] sm:$0xff] %v11549_v61  ;;  %v2744_v46 = vrot.slane %v2742_v56, 4  ;;  %v2747_v3 = vrot.slane %v2745_v47, 5  ;;  %v11559_v54 = vadd.f32 %v1393_v23, %v1280_v55  ;;  %v1283_v57 = vadd.f32 %v9133_v1, %v14525_v24  ;;  %v1180_v59 = vpop.f32.mrf.mxu1  ;;  %v14528_v41 = vld [vmem:[#allocation3_spill] sm:$0xff]  ;;  %v9170_v56 = vpop.f32.mrf.mxu0  ;;  %v14531_v1 = vld [vmem:[#allocation4_spill] sm:$0xff] }
 0x14e   : > { %14522 = vst [vmem:[#allocation45_spill] sm:$0xff] %v11552_v33  ;;  %14523 = vst [vmem:[#allocation52_spill] sm:$0xff] %v11555_v38  ;;  %v11562_v16 = vcombine.low %v2684_v5, %v2698_v10  ;;  %v11564_v7 = vrot.slane %v2723_v37, 5  ;;  %v2734_v32 = vor.u32 %v2733_v60, %v2730_v26  ;;  %v2737_v21 = vshll.u32 %v262_v45, 16  ;;  %v10042_v60 = vld [vmem:[%s10243_s26 + $0x110] sm:$0xf] }
 0x14f   : > { %14524 = vst [vmem:[#allocation49_spill] sm:$0xff] %v11559_v54  ;;  %v2756_v25 = vshrl.u32 %v10041_v9, 16  ;;  %v2759_v61 = vshll.u32 %v10041_v9, 16  ;;  %v11568_v52 = vadd.f32 %v9167_v29, %v1283_v57  ;;  %v1281_v23 = vadd.f32 %v1180_v59, %v14528_v41  ;;  %v9136_v37 = vpop.f32.mrf.mxu1 }
 0x150   : > { %14526 = vst [vmem:[#allocation50_spill] sm:$0xff] %v11562_v16  ;;  %v11573_v5 = vcombine.low %v2698_v10, %v2712_v22  ;;  %v11575_v47 = vrot.slane %v2720_v53, 4  ;;  %9339 = vmatmul.mubr.msk.bf16.gmra.mxu1 %vm402_vm1, %v11497_v34  ;;  %v2748_v45 = vor.u32 %v2747_v3, %v2744_v46  ;;  %v2751_v26 = vshll.u32 %v264_v30, 16  ;;  %v1409_v10 = vpop.f32.mrf.mxu0  ;;  %v10043_v53 = vld [vmem:[%s10243_s26 + $0x120] sm:$0xf] }
 0x151   : > { %14527 = vst [vmem:[#allocation55_spill] sm:$0xff] %v11568_v52  ;;  %9373 = vmatmul.mubr.msk.bf16.gmra.mxu0 %vm402_vm1, %v11501_v19  ;;  %v2770_v59 = vshrl.u32 %v10042_v60, 16  ;;  %v2773_v55 = vshll.u32 %v10042_v60, 16  ;;  %v11582_v29 = vadd.f32 %v1396_v11, %v1281_v23  ;;  %v1286_v24 = vadd.f32 %v9136_v37, %v14531_v1  ;;  %9342 = vmatprep.mubr.msk.bf16.mxu1 %vm402_vm1, %v11511_v31  ;;  %v1193_v41 = vpop.f32.mrf.mxu1  ;;  %v14533_v11 = vld [vmem:[#allocation13_spill] sm:$0xff]  ;;  %v14534_v1 = vld [vmem:[#allocation22_spill] sm:$0xff] }
 0x152   : > { %14529 = vst [vmem:[#allocation56_spill] sm:$0xff] %v11573_v5  ;;  %9376 = vmatprep.mubr.msk.bf16.mxu0 %vm402_vm1, %v11513_v63  ;;  %v2798_v57 = vshrl.u32 %v10043_v53, 16  ;;  %v2801_v9 = vshll.u32 %v10043_v53, 16  ;;  %v2735_v46 = vrot.slane %v2734_v32, 4  ;;  %v2739_v30 = vrot.slane %v2737_v21, 5  ;;  %v9171_v37 = vpop.f32.mrf.mxu0 }
 0x153   : > { %14530 = vst [vmem:[#allocation46_spill] sm:$0xff] %v11582_v29  ;;  %v2758_v3 = vrot.slane %v2756_v25, 4  ;;  %v2761_v63 = vrot.slane %v2759_v61, 5  ;;  %v11588_v60 = vadd.f32 %v9170_v56, %v1286_v24  ;;  %v1284_v23 = vadd.f32 %v1193_v41, %v14533_v11  ;;  %v266_v52 = vld [vmem:[%s10243_s26 + $0x10c] sm:$0x1]  ;;  %v9137_v54 = vpop.f32.mrf.mxu1  ;;  %v14536_v41 = vld [vmem:[#allocation18_spill] sm:$0xff] }
 0x154   : > { %v11592_v19 = vcombine.low %v2712_v22, %v14534_v1  ;;  %v2726_v29 = vsel %vm10957_vm7, %v11575_v47, %v11564_v7  ;;  %v268_v53 = vld [vmem:[%s10243_s26 + $0x114] sm:$0x1]  ;;  %v270_v32 = vld [vmem:[%s10243_s26 + $0x11c] sm:$0x1]  ;;  %v2749_v21 = vrot.slane %v2748_v45, 4  ;;  %v2753_v61 = vrot.slane %v2751_v26, 5  ;;  %v1412_v22 = vpop.f32.mrf.mxu0 }
 0x155   : > { %14532 = vst [vmem:[#allocation57_spill] sm:$0xff] %v11588_v60  ;;  %v2772_v25 = vrot.slane %v2770_v59, 4  ;;  %v2775_v56 = vrot.slane %v2773_v55, 5  ;;  %v11601_v24 = vadd.f32 %v1409_v10, %v1284_v23  ;;  %v1287_v11 = vadd.f32 %v9137_v54, %v14536_v41  ;;  %v1196_v27 = vpop.f32.mrf.mxu1  ;;  %v14537_v26 = vld [vmem:[#allocation14_spill] sm:$0xff]  ;;  %v14538_v54 = vld [vmem:[#allocation37_spill] sm:$0xff] }
 0x156   : > { %14535 = vst [vmem:[#allocation58_spill] sm:$0xff] %v11592_v19  ;;  %v2800_v1 = vrot.slane %v2798_v57, 4  ;;  %v2803_v60 = vrot.slane %v2801_v9, 5  ;;  %v2740_v7 = vsel %vm10957_vm7, %v2735_v46, %v2739_v30  ;;  %v2762_v47 = vor.u32 %v2761_v63, %v2758_v3  ;;  %v9174_v55 = vpop.f32.mrf.mxu0  ;;  %v14539_v10 = vld [vmem:[#allocation38_spill] sm:$0xff] }
 0x157   : > { %v2765_v43 = vshll.u32 %v266_v52, 16  ;;  %v2779_v14 = vshll.u32 %v268_v53, 16  ;;  %v11607_v45 = vadd.f32 %v9171_v37, %v1287_v11  ;;  %v1285_v59 = vadd.f32 %v1196_v27, %v14537_v26  ;;  %v9140_v23 = vpop.f32.mrf.mxu1  ;;  %v10044_v27 = vld [vmem:[%s10243_s26 + $0x128] sm:$0xf]  ;;  %v14541_v37 = vld [vmem:[#allocation20_spill] sm:$0xff] }
 0x158   : > { %v2790_v57 = vor.u32 %v14539_v10, %v14538_v54  ;;  %v2793_v9 = vshll.u32 %v270_v32, 16  ;;  %9343 = vmatmul.mubr.msk.bf16.gmra.mxu1 %vm402_vm1, %v11545_v12  ;;  %v2754_v63 = vsel %vm10957_vm7, %v2749_v21, %v2753_v61  ;;  %v2776_v52 = vor.u32 %v2775_v56, %v2772_v25  ;;  %v1425_v41 = vpop.f32.mrf.mxu0  ;;  %v14544_v56 = vld [vmem:[#allocation17_spill] sm:$0xff] }
 0x159   : > { %9377 = vmatmul.mubr.msk.bf16.gmra.mxu0 %vm402_vm1, %v11555_v38  ;;  %v2812_v46 = vshrl.u32 %v10044_v27, 16  ;;  %v2815_v30 = vshll.u32 %v10044_v27, 16  ;;  %v11621_v3 = vadd.f32 %v1412_v22, %v1285_v59  ;;  %v1290_v53 = vadd.f32 %v9140_v23, %v14541_v37  ;;  %9346 = vmatprep.mubr.msk.bf16.mxu1 %vm402_vm1, %v11552_v33  ;;  %v1209_v26 = vpop.f32.mrf.mxu1 }
 0x15a   : > { %9380 = vmatprep.mubr.msk.bf16.mxu0 %vm402_vm1, %v11562_v16  ;;  %v2804_v32 = vor.u32 %v2803_v60, %v2800_v1  ;;  %v2807_v11 = vshll.u32 %v272_v50, 16  ;;  %v11626_v54 = vcombine.low %v2726_v29, %v2740_v7  ;;  %v2763_v10 = vrot.slane %v2762_v47, 4  ;;  %v9175_v59 = vpop.f32.mrf.mxu0  ;;  %v14546_v29 = vld [vmem:[#allocation19_spill] sm:$0xff] }
 0x15b   : > { %14540 = vst [vmem:[#allocation59_spill] sm:$0xff] %v11621_v3  ;;  %v2767_v21 = vrot.slane %v2765_v43, 5  ;;  %v2781_v61 = vrot.slane %v2779_v14, 5  ;;  %v11628_v25 = vadd.f32 %v9174_v55, %v1290_v53  ;;  %v1288_v22 = vadd.f32 %v1209_v26, %v14544_v56  ;;  %v9141_v37 = vpop.f32.mrf.mxu1  ;;  %v274_v43 = vld [vmem:[%s10243_s26 + $0x12c] sm:$0x1] }
 0x15c   : > { %14542 = vst [vmem:[#allocation33_spill] sm:$0xff] %v11626_v54  ;;  %v2791_v27 = vrot.slane %v2790_v57, 4  ;;  %v2795_v23 = vrot.slane %v2793_v9, 5  ;;  %v2777_v16 = vrot.slane %v2776_v52, 4  ;;  %v11631_v38 = vcombine.low %v2740_v7, %v2754_v63  ;;  %v1428_v3 = vpop.f32.mrf.mxu0  ;;  %v14547_v26 = vld [vmem:[#allocation47_spill] sm:$0xff] }
 0x15d   : > { %14543 = vst [vmem:[#allocation36_spill] sm:$0xff] %v11628_v25  ;;  %v2814_v60 = vrot.slane %v2812_v46, 4  ;;  %v2817_v50 = vrot.slane %v2815_v30, 5  ;;  %v11633_v1 = vadd.f32 %v1425_v41, %v1288_v22  ;;  %v1291_v47 = vadd.f32 %v9141_v37, %v14546_v29  ;;  %v1212_v53 = vpop.f32.mrf.mxu1 }
 0x15e   : > { %14545 = vst [vmem:[#allocation2_spill] sm:$0xff] %v11631_v38  ;;  %v2805_v14 = vrot.slane %v2804_v32, 4  ;;  %v2809_v55 = vrot.slane %v2807_v11, 5  ;;  %v1289_v57 = vadd.f32 %v1212_v53, %v14547_v26  ;;  %v9178_v9 = vpop.f32.mrf.mxu0  ;;  %v2768_v52 = vsel %vm10957_vm7, %v2763_v10, %v2767_v21  ;;  %v14548_v11 = vld [vmem:[#allocation28_spill] sm:$0xff] }
 0x15f   : > { %v11637_v25 = vadd.f32 %v9175_v59, %v1291_v47  ;;  %v9144_v7 = vpop.f32.mrf.mxu1  ;;  %v2782_v46 = vsel %vm10957_vm7, %v2777_v16, %v2781_v61  ;;  %v2818_v30 = vor.u32 %v2817_v50, %v2814_v60  ;;  %v2821_v41 = vshll.u32 %v274_v43, 16  ;;  %v14549_v61 = vld [vmem:[#allocation53_spill] sm:$0xff] }
 0x160   : > { %9347 = vmatmul.mubr.msk.bf16.gmra.mxu1 %vm402_vm1, %v11573_v5  ;;  %v11650_v32 = vadd.f32 %v1428_v3, %v1289_v57  ;;  %v1294_v56 = vadd.f32 %v9144_v7, %v14548_v11  ;;  %v1441_v22 = vpop.f32.mrf.mxu0  ;;  %v2796_v59 = vsel %vm10957_vm7, %v2791_v27, %v2795_v23  ;;  %v2810_v10 = vsel %vm10957_vm7, %v2805_v14, %v2809_v55  ;;  %v14553_v23 = vld [vmem:[#allocation21_spill] sm:$0xff] }
 0x161   : > { %9381 = vmatmul.mubr.msk.bf16.gmra.mxu0 %vm402_vm1, %v11592_v19  ;;  %9350 = vmatprep.mubr.msk.bf16.mxu1 %vm402_vm1, %v11626_v54  ;;  %v1225_v16 = vpop.f32.mrf.mxu1  ;;  %v11662_v3 = vcombine.low %v2768_v52, %v2782_v46  ;;  %v11664_v29 = vcombine.low %v2754_v63, %v2768_v52  ;;  %v2819_v47 = vrot.slane %v2818_v30, 4  ;;  %v2823_v43 = vrot.slane %v2821_v41, 5  ;;  %v14555_v7 = vld [vmem:[#allocation41_spill] sm:$0xff] }
 0x162   : > { %9384 = vmatprep.mubr.msk.bf16.mxu0 %vm402_vm1, %v11631_v38  ;;  %v11659_v21 = vadd.f32 %v9178_v9, %v1294_v56  ;;  %v1292_v37 = vadd.f32 %v1225_v16, %v14549_v61  ;;  %v9179_v60 = vpop.f32.mrf.mxu0  ;;  %v11666_v53 = vcombine.low %v2796_v59, %v2810_v10  ;;  %v11671_v26 = vcombine.low %v2782_v46, %v2796_v59  ;;  %v10045_v46 = vld [vmem:[%s10243_s26 + $0x48] sm:$0xf]  ;;  %v14556_v59 = vld [vmem:[#allocation30_spill] sm:$0xff]  ;;  %v10048_v38 = vld [vmem:[%s10243_s26 + $0x150] sm:$0xf] }
 0x163   : > { %14550 = vst [vmem:[#allocation7_spill] sm:$0xff] %v11662_v3  ;;  %v9145_v50 = vpop.f32.mrf.mxu1  ;;  %14551 = vst [vmem:[#allocation40_spill] sm:$0xff] %v11664_v29  ;;  %v2824_v52 = vsel %vm10957_vm7, %v2819_v47, %v2823_v43  ;;  %v3442_v30 = vshrl.u32 %v10045_v46, 16  ;;  %v3445_v41 = vshll.u32 %v10045_v46, 16  ;;  %v3744_v19 = vshrl.u32 %v10048_v38, 16 }
 0x164   : > { %14552 = vst [vmem:[#allocation11_spill] sm:$0xff] %v11666_v53  ;;  %v11668_v27 = vadd.f32 %v1441_v22, %v1292_v37  ;;  %v1295_v14 = vadd.f32 %v9145_v50, %v14553_v23  ;;  %v1444_v55 = vpop.f32.mrf.mxu0  ;;  %14554 = vst [vmem:[#allocation10_spill] sm:$0xff] %v11671_v26  ;;  %v11694_v43 = vcombine.low %v2824_v52, %v11391_v44 }
 0x165   : > { %v1228_v57 = vpop.f32.mrf.mxu1 }
 0x166   : > { %v11673_v9 = vadd.f32 %v9179_v60, %v1295_v14  ;;  %v1293_v11 = vadd.f32 %v1228_v57, %v14555_v7  ;;  %v9182_v56 = vpop.f32.mrf.mxu0  ;;  %14557 = vst [vmem:[#allocation48_spill] sm:$0xff] %v11694_v43  ;;  %v11696_v14 = vcombine.low %v2810_v10, %v2824_v52  ;;  %v3447_v57 = vrot.slane %v3445_v41, 5 }
 0x167   : > { %v9148_v63 = vpop.f32.mrf.mxu1 }
 0x168   : > { %9351 = vmatmul.mubr.msk.bf16.gmra.mxu1 %vm402_vm1, %v11664_v29  ;;  %v11685_v22 = vadd.f32 %v1444_v55, %v1293_v11  ;;  %v1298_v16 = vadd.f32 %v9148_v63, %v14556_v59  ;;  %v1457_v61 = vpop.f32.mrf.mxu0  ;;  %14558 = vst [vmem:[#allocation5_spill] sm:$0xff] %v11696_v14  ;;  %v3444_v55 = vrot.slane %v3442_v30, 4  ;;  %v218_v59 = vld [vmem:[%s10243_s26 + $0x4c] sm:$0x1] }
 0x169   : > { %9385 = vmatmul.mubr.msk.bf16.gmra.mxu0 %vm402_vm1, %v11662_v3  ;;  %9354 = vmatprep.mubr.msk.bf16.mxu1 %vm402_vm1, %v11671_v26  ;;  %v1241_v37 = vpop.f32.mrf.mxu1  ;;  %v3451_v30 = vshll.u32 %v218_v59, 16 }
 0x16a   : > { %9388 = vmatprep.mubr.msk.bf16.mxu0 %vm402_vm1, %v11666_v53  ;;  %v11690_v60 = vadd.f32 %v9182_v56, %v1298_v16  ;;  %v1296_v50 = vadd.f32 %v1241_v37, %v11347_v18  ;;  %v9183_v47 = vpop.f32.mrf.mxu0  ;;  %v282_v53 = vld [vmem:[%s10243_s26 + $0x14c] sm:$0x1] }
 0x16b   : > { %v9149_v23 = vpop.f32.mrf.mxu1 }
 0x16c   : > { %v11698_v7 = vadd.f32 %v1457_v61, %v1296_v50  ;;  %v1299_v11 = vadd.f32 %v9149_v23, %v11350_v28  ;;  %v1460_v63 = vpop.f32.mrf.mxu0 }
 0x16d   : > { %v1244_v46 = vpop.f32.mrf.mxu1 }
 0x16e   : > { %v11702_v56 = vadd.f32 %v9183_v47, %v1299_v11  ;;  %v1297_v18 = vadd.f32 %v1244_v46, %v11377_v42  ;;  %v9186_v16 = vpop.f32.mrf.mxu0  ;;  %v3448_v42 = vor.u32 %v3447_v57, %v3444_v55  ;;  %v3453_v46 = vrot.slane %v3451_v30, 5 }
 0x16f   : > { %v9152_v44 = vpop.f32.mrf.mxu1  ;;  %v4083_v55 = vsel %vm451_vm0, %v11433_v58, 0  ;;  %v11741_v58 = vld [vmem:[%s14181_s1 + $0x2c] sm:$0x3] }
 0x170   : > { %9355 = vmatmul.mubr.msk.bf16.gmra.mxu1 %vm402_vm1, %v11696_v14  ;;  %v11711_v10 = vadd.f32 %v1460_v63, %v1297_v18  ;;  %v1302_v28 = vadd.f32 %v9152_v44, %v11395_v15  ;;  %v1473_v52 = vpop.f32.mrf.mxu0  ;;  %v3449_v63 = vrot.slane %v3448_v42, 4 }
 0x171   : > { %9389 = vmatmul.mubr.msk.bf16.gmra.mxu0 %vm402_vm1, %v11694_v43  ;;  %9394 = vmatprep.mubr.msk.bf16.mxu1 %vm402_vm1, %v11031_v6  ;;  %v1257_v41 = vpop.f32.mrf.mxu1  ;;  %v280_v43 = vld [vmem:[%s10243_s26 + $0x144] sm:$0x1] }
 0x172   : > { %9428 = vmatprep.mubr.msk.bf16.mxu0 %vm402_vm1, %v11243_v51  ;;  %v11716_v61 = vadd.f32 %v9186_v16, %v1302_v28  ;;  %v1300_v37 = vadd.f32 %v1257_v41, %v11402_v2  ;;  %v9187_v50 = vpop.f32.mrf.mxu0  ;;  %v4300_v51 = vsel %vm451_vm0, %v11441_v48, 0  ;;  %v11734_v48 = vld [vmem:[%s14181_s1 + $0x26] sm:$0x3]  ;;  %v3454_v44 = vsel %vm10957_vm7, %v3449_v63, %v3453_v46 }
 0x173   : > { %v9153_v47 = vpop.f32.mrf.mxu1 }
 0x174   : > { %v11721_v23 = vadd.f32 %v1473_v52, %v1300_v37  ;;  %v1303_v15 = vadd.f32 %v9153_v47, %v11421_v0  ;;  %v1476_v11 = vpop.f32.mrf.mxu0 }
 0x175   : > { %v1260_v6 = vpop.f32.mrf.mxu1 }
 0x176   : > { %v11726_v57 = vadd.f32 %v9187_v50, %v1303_v15  ;;  %v1301_v2 = vadd.f32 %v1260_v6, %v11443_v49  ;;  %v9226_v59 = vpop.f32.mrf.mxu0  ;;  %v14561_v6 = vld [vmem:[#allocation32_spill] sm:$0xff] }
 0x177   : > { %v9192_v0 = vpop.f32.mrf.mxu1 }
 0x178   : > { %9395 = vmatmul.mubr.msk.bf16.vlgmr.msra.gmra.mxu1 %vm402_vm1, %v11076_v17  ;;  %v11743_v49 = vadd.f32 %v1476_v11, %v1301_v2  ;;  %v1694_v18 = vadd.f32 %v9192_v0, %v11461_v20  ;;  %v1795_v16 = vpop.f32.mrf.mxu0  ;;  %v14559_v11 = vld [vmem:[#allocation16_spill] sm:$0xff] }
 0x179   : > { %9429 = vmatmul.mubr.msk.bf16.vlgmr.msra.gmra.mxu0 %vm402_vm1, %v14516_v62  ;;  %9461 = vmatpush3.bf16.msra.mxu1 %v4083_v55  ;;  %v1565_v28 = vpop.f32.mrf.mxu1 }
 0x17a   : > { %9495 = vmatpush3.bf16.msra.mxu0 %v4300_v51  ;;  %9398 = vmatprep.mubr.msk.bf16.mxu1 %vm402_vm1, %v11114_v35  ;;  %v11754_v17 = vadd.f32 %v9226_v59, %v1694_v18  ;;  %v1692_v52 = vadd.f32 %v1565_v28, %v11468_v40  ;;  %v9227_v20 = vpop.f32.mrf.mxu0  ;;  %v8147_v35 = vcombine.low %v11091_v39, %v3454_v44  ;;  %v14563_v18 = vld [vmem:[#allocation34_spill] sm:$0xff] }
 0x17b   : > { %9432 = vmatprep.mubr.msk.bf16.mxu0 %vm402_vm1, %v11409_v13  ;;  %9954 = vmatprep.subr.msk.bf16.mxu1 %vm451_vm0, %v11734_v48  ;;  %v9193_v42 = vpop.f32.mrf.mxu1 }
 0x17c   : > { %9955 = vmatprep.subr.msk.bf16.mxu0 %vm451_vm0, %v11741_v58  ;;  %v11760_v30 = vadd.f32 %v1795_v16, %v1692_v52  ;;  %v1695_v41 = vadd.f32 %v9193_v42, %v11475_v8  ;;  %v1798_v37 = vpop.f32.mrf.mxu0 }
 0x17d   : > { %v1568_v50 = vpop.f32.mrf.mxu1 }
 0x17e   : > { %v11763_v47 = vadd.f32 %v9227_v20, %v1695_v41  ;;  %v1693_v51 = vadd.f32 %v1568_v50, %v11489_v36  ;;  %v9230_v15 = vpop.f32.mrf.mxu0  ;;  %v14565_v20 = vld [vmem:[#allocation54_spill] sm:$0xff] }
 0x17f   : > { %v9196_v40 = vpop.f32.mrf.mxu1  ;;  %v10046_v41 = vld [vmem:[%s10243_s26 + $0x140] sm:$0xf] }
 0x180   : > { %9399 = vmatmul.mubr.msk.bf16.gmra.mxu1 %vm402_vm1, %v8147_v35  ;;  %v11771_v39 = vadd.f32 %v1798_v37, %v1693_v51  ;;  %v1698_v8 = vadd.f32 %v9196_v40, %v14559_v11  ;;  %v1811_v63 = vpop.f32.mrf.mxu0  ;;  %v3716_v37 = vshrl.u32 %v10046_v41, 16  ;;  %v3719_v50 = vshll.u32 %v10046_v41, 16 }
 0x181   : > { %9433 = vmatmul.mubr.msk.bf16.gmra.mxu0 %vm402_vm1, %v11497_v34  ;;  %9402 = vmatprep.mubr.msk.bf16.mxu1 %vm402_vm1, %v14516_v62  ;;  %v1581_v36 = vpop.f32.mrf.mxu1 }
 0x182   : > { %9436 = vmatprep.mubr.msk.bf16.mxu0 %vm402_vm1, %v11511_v31  ;;  %v11776_v46 = vadd.f32 %v9230_v15, %v1698_v8  ;;  %v1696_v55 = vadd.f32 %v1581_v36, %v14561_v6  ;;  %v9231_v2 = vpop.f32.mrf.mxu0  ;;  %v10047_v15 = vld [vmem:[%s10243_s26 + $0x148] sm:$0xf]  ;;  %v3721_v41 = vrot.slane %v3719_v50, 5 }
 0x183   : > { %v9197_v59 = vpop.f32.mrf.mxu1  ;;  %v3730_v40 = vshrl.u32 %v10047_v15, 16  ;;  %v3733_v11 = vshll.u32 %v10047_v15, 16 }
 0x184   : > { %14560 = vst [vmem:[#allocation12_spill] sm:$0xff] %v11776_v46  ;;  %v11779_v0 = vadd.f32 %v1811_v63, %v1696_v55  ;;  %v1699_v16 = vadd.f32 %v9197_v59, %v14563_v18  ;;  %v1814_v44 = vpop.f32.mrf.mxu0  ;;  %v14567_v63 = vld [vmem:[#allocation35_spill] sm:$0xff]  ;;  %v14569_v59 = vld [vmem:[#allocation49_spill] sm:$0xff] }
 0x185   : > { %v1584_v28 = vpop.f32.mrf.mxu1 }
 0x186   : > { %14562 = vst [vmem:[#allocation6_spill] sm:$0xff] %v11779_v0  ;;  %v11782_v52 = vadd.f32 %v9231_v2, %v1699_v16  ;;  %v1697_v42 = vadd.f32 %v1584_v28, %v14565_v20  ;;  %v9234_v35 = vpop.f32.mrf.mxu0  ;;  %v3718_v20 = vrot.slane %v3716_v37, 4 }
 0x187   : > { %v9200_v51 = vpop.f32.mrf.mxu1 }
 0x188   : > { %14564 = vst [vmem:[#allocation3_spill] sm:$0xff] %v11782_v52  ;;  %9403 = vmatmul.mubr.msk.bf16.gmra.mxu1 %vm402_vm1, %v11409_v13  ;;  %v11793_v8 = vadd.f32 %v1814_v44, %v1697_v42  ;;  %v1702_v36 = vadd.f32 %v9200_v51, %v14567_v63  ;;  %v1827_v6 = vpop.f32.mrf.mxu0  ;;  %v3732_v44 = vrot.slane %v3730_v40, 4  ;;  %v3735_v42 = vrot.slane %v3733_v11, 5  ;;  %v14571_v51 = vld [vmem:[#allocation55_spill] sm:$0xff]  ;;  %v14574_v40 = vld [vmem:[#allocation8_spill] sm:$0xff] }
 0x189   : > { %9437 = vmatmul.mubr.msk.bf16.gmra.mxu0 %vm402_vm1, %v11545_v12  ;;  %9406 = vmatprep.mubr.msk.bf16.mxu1 %vm402_vm1, %v11497_v34  ;;  %v1597_v55 = vpop.f32.mrf.mxu1  ;;  %v3722_v11 = vor.u32 %v3721_v41, %v3718_v20  ;;  %v284_v41 = vld [vmem:[%s10243_s26 + $0x154] sm:$0x1] }
 0x18a   : > { %9440 = vmatprep.mubr.msk.bf16.mxu0 %vm402_vm1, %v11552_v33  ;;  %14566 = vst [vmem:[#allocation4_spill] sm:$0xff] %v11793_v8  ;;  %v11798_v2 = vadd.f32 %v9234_v35, %v1702_v36  ;;  %v1700_v18 = vadd.f32 %v1597_v55, %v14569_v59  ;;  %v9235_v16 = vpop.f32.mrf.mxu0  ;;  %v3747_v35 = vshll.u32 %v10048_v38, 16  ;;  %v14573_v55 = vld [vmem:[#allocation46_spill] sm:$0xff]  ;;  %v3736_v38 = vor.u32 %v3735_v42, %v3732_v44 }
 0x18b   : > { %v9201_v28 = vpop.f32.mrf.mxu1  ;;  %v3723_v42 = vrot.slane %v3722_v11, 4  ;;  %v3753_v8 = vshll.u32 %v284_v41, 16  ;;  %v14578_v11 = vld [vmem:[#allocation59_spill] sm:$0xff] }
 0x18c   : > { %14568 = vst [vmem:[#allocation13_spill] sm:$0xff] %v11798_v2  ;;  %v11801_v15 = vadd.f32 %v1827_v6, %v1700_v18  ;;  %v1703_v63 = vadd.f32 %v9201_v28, %v14571_v51  ;;  %v1830_v31 = vpop.f32.mrf.mxu0  ;;  %v3725_v6 = vshll.u32 %v280_v43, 16  ;;  %v3739_v18 = vshll.u32 %v282_v53, 16  ;;  %v14576_v28 = vld [vmem:[#allocation57_spill] sm:$0xff] }
 0x18d   : > { %v1600_v3 = vpop.f32.mrf.mxu1  ;;  %v3746_v53 = vrot.slane %v3744_v19, 4  ;;  %v290_v19 = vld [vmem:[%s10243_s26 + $0x16c] sm:$0x1] }
 0x18e   : > { %14570 = vst [vmem:[#allocation22_spill] sm:$0xff] %v11801_v15  ;;  %v11807_v36 = vadd.f32 %v9235_v16, %v1703_v63  ;;  %v1701_v59 = vadd.f32 %v1600_v3, %v14573_v55  ;;  %v9238_v37 = vpop.f32.mrf.mxu0  ;;  %v10049_v63 = vld [vmem:[%s10243_s26 + $0x168] sm:$0xf] }
 0x18f   : > { %v9204_v50 = vpop.f32.mrf.mxu1  ;;  %v3786_v55 = vshrl.u32 %v10049_v63, 16 }
 0x190   : > { %14572 = vst [vmem:[#allocation18_spill] sm:$0xff] %v11807_v36  ;;  %9407 = vmatmul.mubr.msk.bf16.gmra.mxu1 %vm402_vm1, %v14574_v40  ;;  %v11816_v16 = vadd.f32 %v1830_v31, %v1701_v59  ;;  %v1706_v3 = vadd.f32 %v9204_v50, %v14576_v28  ;;  %v1843_v51 = vpop.f32.mrf.mxu0  ;;  %v3789_v36 = vshll.u32 %v10049_v63, 16  ;;  %v3749_v31 = vrot.slane %v3747_v35, 5  ;;  %v10051_v35 = vld [vmem:[%s10243_s26 + $0x178] sm:$0xf] }
 0x191   : > { %9441 = vmatmul.mubr.msk.bf16.gmra.mxu0 %vm402_vm1, %v11573_v5  ;;  %9410 = vmatprep.mubr.msk.bf16.mxu1 %vm402_vm1, %v11545_v12  ;;  %v1613_v15 = vpop.f32.mrf.mxu1  ;;  %v3727_v59 = vrot.slane %v3725_v6, 5  ;;  %v3737_v50 = vrot.slane %v3736_v38, 4  ;;  %v3741_v28 = vrot.slane %v3739_v18, 5  ;;  %v3814_v0 = vshrl.u32 %v10051_v35, 16 }
 0x192   : > { %9444 = vmatprep.mubr.msk.bf16.mxu0 %vm402_vm1, %v11626_v54  ;;  %14575 = vst [vmem:[#allocation14_spill] sm:$0xff] %v11816_v16  ;;  %v11822_v2 = vadd.f32 %v9238_v37, %v1706_v3  ;;  %v1704_v20 = vadd.f32 %v1613_v15, %v11601_v24  ;;  %v9239_v43 = vpop.f32.mrf.mxu0  ;;  %v3788_v3 = vrot.slane %v3786_v55, 4  ;;  %v10050_v16 = vld [vmem:[%s10243_s26 + $0x170] sm:$0xf] }
 0x193   : > { %v9205_v44 = vpop.f32.mrf.mxu1  ;;  %v3800_v24 = vshrl.u32 %v10050_v16, 16  ;;  %v3803_v52 = vshll.u32 %v10050_v16, 16  ;;  %v11845_v16 = vsel %vm10957_vm7, %v3737_v50, %v3741_v28 }
 0x194   : > { %14577 = vst [vmem:[#allocation37_spill] sm:$0xff] %v11822_v2  ;;  %v11826_v54 = vadd.f32 %v1843_v51, %v1704_v20  ;;  %v1707_v63 = vadd.f32 %v9205_v44, %v11607_v45  ;;  %v1846_v37 = vpop.f32.mrf.mxu0  ;;  %v3791_v2 = vrot.slane %v3789_v36, 5  ;;  %v3817_v45 = vshll.u32 %v10051_v35, 16  ;;  %v14579_v20 = vld [vmem:[#allocation36_spill] sm:$0xff] }
 0x195   : > { %v1616_v15 = vpop.f32.mrf.mxu1  ;;  %v3728_v36 = vsel %vm10957_vm7, %v3723_v42, %v3727_v59  ;;  %v3750_v51 = vor.u32 %v3749_v31, %v3746_v53  ;;  %v3755_v35 = vrot.slane %v3753_v8, 5  ;;  %v3802_v53 = vrot.slane %v3800_v24, 4 }
 0x196   : > { %v11832_v46 = vadd.f32 %v9239_v43, %v1707_v63  ;;  %v1705_v6 = vadd.f32 %v1616_v15, %v14578_v11  ;;  %v9242_v38 = vpop.f32.mrf.mxu0  ;;  %v3792_v44 = vor.u32 %v3791_v2, %v3788_v3  ;;  %v3795_v63 = vshll.u32 %v290_v19, 16 }
 0x197   : > { %v9208_v18 = vpop.f32.mrf.mxu1  ;;  %v3805_v31 = vrot.slane %v3803_v52, 5  ;;  %v11856_v28 = vcombine.low %v3728_v36, %v11845_v16  ;;  %v14581_v36 = vld [vmem:[#allocation25_spill] sm:$0xff] }
 0x198   : > { %9411 = vmatmul.mubr.msk.bf16.gmra.mxu1 %vm402_vm1, %v11552_v33  ;;  %v11847_v55 = vadd.f32 %v1846_v37, %v1705_v6  ;;  %v1710_v43 = vadd.f32 %v9208_v18, %v14579_v20  ;;  %v1859_v41 = vpop.f32.mrf.mxu0  ;;  %v3751_v37 = vrot.slane %v3750_v51, 4  ;;  %v3816_v6 = vrot.slane %v3814_v0, 4  ;;  %v292_v20 = vld [vmem:[%s10243_s26 + $0x174] sm:$0x1] }
 0x199   : > { %9445 = vmatmul.mubr.msk.bf16.gmra.mxu0 %vm402_vm1, %v11664_v29  ;;  %9414 = vmatprep.mubr.msk.bf16.mxu1 %vm402_vm1, %v11573_v5  ;;  %v1629_v15 = vpop.f32.mrf.mxu1  ;;  %14580 = vst [vmem:[#allocation38_spill] sm:$0xff] %v11856_v28  ;;  %v3819_v18 = vrot.slane %v3817_v45, 5  ;;  %v3793_v19 = vrot.slane %v3792_v44, 4  ;;  %v3806_v0 = vor.u32 %v3805_v31, %v3802_v53  ;;  %v3809_v51 = vshll.u32 %v292_v20, 16 }
 0x19a   : > { %9448 = vmatprep.mubr.msk.bf16.mxu0 %vm402_vm1, %v11671_v26  ;;  %v11852_v11 = vadd.f32 %v9242_v38, %v1710_v43  ;;  %v1708_v42 = vadd.f32 %v1629_v15, %v11633_v1  ;;  %v9243_v59 = vpop.f32.mrf.mxu0  ;;  %v3797_v38 = vrot.slane %v3795_v63, 5  ;;  %v294_v43 = vld [vmem:[%s10243_s26 + $0x17c] sm:$0x1] }
 0x19b   : > { %v9209_v50 = vpop.f32.mrf.mxu1  ;;  %v3823_v44 = vshll.u32 %v294_v43, 16  ;;  %v3811_v20 = vrot.slane %v3809_v51, 5 }
 0x19c   : > { %v11858_v2 = vadd.f32 %v1859_v41, %v1708_v42  ;;  %v1711_v8 = vadd.f32 %v9209_v50, %v11637_v25  ;;  %v1862_v3 = vpop.f32.mrf.mxu0  ;;  %v11874_v25 = vsel %vm10957_vm7, %v3751_v37, %v3755_v35  ;;  %v3820_v41 = vor.u32 %v3819_v18, %v3816_v6  ;;  %v14582_v37 = vld [vmem:[#allocation26_spill] sm:$0xff] }
 0x19d   : > { %v1632_v1 = vpop.f32.mrf.mxu1  ;;  %v11890_v6 = vcombine.low %v11874_v25, %v14582_v37  ;;  %v3807_v18 = vrot.slane %v3806_v0, 4 }
 0x19e   : > { %v11863_v15 = vadd.f32 %v9243_v59, %v1711_v8  ;;  %v1709_v52 = vadd.f32 %v1632_v1, %v11650_v32  ;;  %v9246_v24 = vpop.f32.mrf.mxu0  ;;  %v11883_v59 = vsel %vm10957_vm7, %v3793_v19, %v3797_v38  ;;  %v14583_v8 = vld [vmem:[#allocation31_spill] sm:$0xff]  ;;  %v3821_v43 = vrot.slane %v3820_v41, 4 }
 0x19f   : > { %v9212_v45 = vpop.f32.mrf.mxu1  ;;  %v3825_v19 = vrot.slane %v3823_v44, 5 }
 0x1a0   : > { %9415 = vmatmul.mubr.msk.bf16.gmra.mxu1 %vm402_vm1, %v14581_v36  ;;  %v11876_v32 = vadd.f32 %v1862_v3, %v1709_v52  ;;  %v1714_v63 = vadd.f32 %v9212_v45, %v11659_v21  ;;  %v1875_v42 = vpop.f32.mrf.mxu0  ;;  %v11894_v3 = vcombine.low %v14583_v8, %v11883_v59 }
 0x1a1   : > { %9449 = vmatmul.mubr.msk.bf16.gmra.mxu0 %vm402_vm1, %v11696_v14  ;;  %9418 = vmatprep.mubr.msk.bf16.mxu1 %vm402_vm1, %v11664_v29  ;;  %v1645_v53 = vpop.f32.mrf.mxu1  ;;  %v11914_v51 = vsel %vm10957_vm7, %v3821_v43, %v3825_v19 }
 0x1a2   : > { %9452 = vmatprep.mubr.msk.bf16.mxu0 %vm402_vm1, %v11856_v28  ;;  %v11885_v31 = vadd.f32 %v9246_v24, %v1714_v63  ;;  %v1712_v35 = vadd.f32 %v1645_v53, %v11668_v27  ;;  %v9247_v50 = vpop.f32.mrf.mxu0 }
 0x1a3   : > { %v9213_v21 = vpop.f32.mrf.mxu1 }
 0x1a4   : > { %v11896_v38 = vadd.f32 %v1875_v42, %v1712_v35  ;;  %v1715_v1 = vadd.f32 %v9213_v21, %v11673_v9  ;;  %v1878_v52 = vpop.f32.mrf.mxu0  ;;  %v11910_v9 = vsel %vm10957_vm7, %v3807_v18, %v3811_v20 }
 0x1a5   : > { %v1648_v27 = vpop.f32.mrf.mxu1  ;;  %v11926_v37 = vcombine.low %v11910_v9, %v11914_v51 }
 0x1a6   : > { %v11899_v24 = vadd.f32 %v9247_v50, %v1715_v1  ;;  %v1713_v45 = vadd.f32 %v1648_v27, %v11685_v22  ;;  %v9250_v63 = vpop.f32.mrf.mxu0 }
 0x1a7   : > { %v9216_v0 = vpop.f32.mrf.mxu1 }
 0x1a8   : > { %9419 = vmatmul.mubr.msk.bf16.gmra.mxu1 %vm402_vm1, %v11671_v26  ;;  %v11916_v22 = vadd.f32 %v1878_v52, %v1713_v45  ;;  %v1718_v41 = vadd.f32 %v9216_v0, %v11690_v60  ;;  %v1891_v44 = vpop.f32.mrf.mxu0  ;;  %v14584_v52 = vld [vmem:[#allocation15_spill] sm:$0xff] }
 0x1a9   : > { %9453 = vmatmul.mubr.msk.bf16.gmra.mxu0 %vm402_vm1, %v11890_v6  ;;  %9422 = vmatprep.mubr.msk.bf16.mxu1 %vm402_vm1, %v11696_v14  ;;  %v1661_v42 = vpop.f32.mrf.mxu1 }
 0x1aa   : > { %9456 = vmatprep.mubr.msk.bf16.mxu0 %vm402_vm1, %v11894_v3  ;;  %v11921_v53 = vadd.f32 %v9250_v63, %v1718_v41  ;;  %v1716_v35 = vadd.f32 %v1661_v42, %v11698_v7  ;;  %v9251_v50 = vpop.f32.mrf.mxu0  ;;  %v14585_v63 = vld [vmem:[#allocation27_spill] sm:$0xff] }
 0x1ab   : > { %v9217_v18 = vpop.f32.mrf.mxu1 }
 0x1ac   : > { %v11928_v21 = vadd.f32 %v1891_v44, %v1716_v35  ;;  %v1719_v8 = vadd.f32 %v9217_v18, %v11702_v56  ;;  %v1894_v60 = vpop.f32.mrf.mxu0  ;;  %v4863_v18 = vsel %vm451_vm0, %v11741_v58, 0 }
 0x1ad   : > { %v1664_v20 = vpop.f32.mrf.mxu1 }
 0x1ae   : > { %v11931_v43 = vadd.f32 %v9251_v50, %v1719_v8  ;;  %v1717_v19 = vadd.f32 %v1664_v20, %v11711_v10  ;;  %v9254_v1 = vpop.f32.mrf.mxu0  ;;  %v4634_v8 = vsel %vm451_vm0, %v11734_v48, 0  ;;  %v11970_v48 = vld [vmem:[%s14181_s1 + $0x4] sm:$0x3] }
 0x1af   : > { %v9220_v7 = vpop.f32.mrf.mxu1 }
 0x1b0   : > { %9423 = vmatmul.mubr.msk.bf16.gmra.mxu1 %vm402_vm1, %v14584_v52  ;;  %v11940_v27 = vadd.f32 %v1894_v60, %v1717_v19  ;;  %v1722_v56 = vadd.f32 %v9220_v7, %v11716_v61  ;;  %v1907_v45 = vpop.f32.mrf.mxu0  ;;  %v14587_v7 = vld [vmem:[#allocation42_spill] sm:$0xff] }
 0x1b1   : > { %9457 = vmatmul.mubr.msk.bf16.gmra.mxu0 %vm402_vm1, %v11926_v37  ;;  %9462 = vmatprep.mubr.msk.bf16.mxu1 %vm402_vm1, %v14585_v63  ;;  %v1677_v10 = vpop.f32.mrf.mxu1 }
 0x1b2   : > { %9496 = vmatprep.mubr.msk.bf16.mxu0 %vm402_vm1, %v14516_v62  ;;  %v11945_v0 = vadd.f32 %v9254_v1, %v1722_v56  ;;  %v1720_v41 = vadd.f32 %v1677_v10, %v11721_v23  ;;  %v9255_v44 = vpop.f32.mrf.mxu0  ;;  %v11963_v23 = vld [vmem:[%s14181_s1 + $0x32] sm:$0x3]  ;;  %v14586_v1 = vld [vmem:[#allocation29_spill] sm:$0xff] }
 0x1b3   : > { %v9221_v42 = vpop.f32.mrf.mxu1 }
 0x1b4   : > { %v11948_v35 = vadd.f32 %v1907_v45, %v1720_v41  ;;  %v1723_v50 = vadd.f32 %v9221_v42, %v11726_v57  ;;  %v1910_v62 = vpop.f32.mrf.mxu0 }
 0x1b5   : > { %v1680_v61 = vpop.f32.mrf.mxu1 }
 0x1b6   : > { %v11955_v60 = vadd.f32 %v9255_v44, %v1723_v50  ;;  %v1721_v20 = vadd.f32 %v1680_v61, %v11743_v49  ;;  %v9294_v19 = vpop.f32.mrf.mxu0  ;;  %v14588_v61 = vld [vmem:[#allocation9_spill] sm:$0xff] }
 0x1b7   : > { %v9260_v57 = vpop.f32.mrf.mxu1 }
 0x1b8   : > { %9463 = vmatmul.mubr.msk.bf16.vlgmr.msra.gmra.mxu1 %vm402_vm1, %v14586_v1  ;;  %v11972_v58 = vadd.f32 %v1910_v62, %v1721_v20  ;;  %v2140_v49 = vadd.f32 %v9260_v57, %v11754_v17  ;;  %v14591_v57 = vld [vmem:[#allocation43_spill] sm:$0xff] }
 0x1b9   : > { %9497 = vmatmul.mubr.msk.bf16.vlgmr.msra.gmra.mxu0 %vm402_vm1, %v11409_v13  ;;  %9529 = vmatpush3.bf16.msra.mxu1 %v4634_v8  ;;  %v2215_v13 = vpop.f32.mrf.mxu0  ;;  %v2011_v56 = vpop.f32.mrf.mxu1 }
 0x1ba   : > { %9563 = vmatpush3.bf16.msra.mxu0 %v4863_v18  ;;  %9466 = vmatprep.mubr.msk.bf16.mxu1 %vm402_vm1, %v14587_v7  ;;  %v11981_v45 = vadd.f32 %v9294_v19, %v2140_v49  ;;  %v2138_v63 = vadd.f32 %v2011_v56, %v11760_v30  ;;  %v14593_v49 = vld [vmem:[#allocation6_spill] sm:$0xff] }
 0x1bb   : > { %9500 = vmatprep.mubr.msk.bf16.mxu0 %vm402_vm1, %v11497_v34  ;;  %9956 = vmatprep.subr.msk.bf16.mxu1 %vm451_vm0, %v11963_v23  ;;  %v9295_v10 = vpop.f32.mrf.mxu0  ;;  %v9261_v17 = vpop.f32.mrf.mxu1 }
 0x1bc   : > { %9957 = vmatprep.subr.msk.bf16.mxu0 %vm451_vm0, %v11970_v48  ;;  %v11986_v41 = vadd.f32 %v2215_v13, %v2138_v63  ;;  %v2141_v44 = vadd.f32 %v9261_v17, %v11763_v47  ;;  %v14590_v47 = vld [vmem:[#allocation12_spill] sm:$0xff]  ;;  %v14595_v63 = vld [vmem:[#allocation3_spill] sm:$0xff] }
 0x1bd   : > { %v2218_v42 = vpop.f32.mrf.mxu0  ;;  %v2014_v50 = vpop.f32.mrf.mxu1 }
 0x1be   : > { %v11989_v62 = vadd.f32 %v9295_v10, %v2141_v44  ;;  %v2139_v34 = vadd.f32 %v2014_v50, %v11771_v39  ;;  %v14597_v50 = vld [vmem:[#allocation4_spill] sm:$0xff] }
 0x1bf   : > { %v9298_v18 = vpop.f32.mrf.mxu0  ;;  %v9264_v30 = vpop.f32.mrf.mxu1 }
 0x1c0   : > { %9467 = vmatmul.mubr.msk.bf16.gmra.mxu1 %vm402_vm1, %v14588_v61  ;;  %v11998_v8 = vadd.f32 %v2218_v42, %v2139_v34  ;;  %v2144_v20 = vadd.f32 %v9264_v30, %v14590_v47  ;;  %v14598_v61 = vld [vmem:[#allocation52_spill] sm:$0xff] }
 0x1c1   : > { %9501 = vmatmul.mubr.msk.bf16.gmra.mxu0 %vm402_vm1, %v14574_v40  ;;  %v2231_v19 = vpop.f32.mrf.mxu0  ;;  %9470 = vmatprep.mubr.msk.bf16.mxu1 %vm402_vm1, %v14591_v57  ;;  %v2027_v39 = vpop.f32.mrf.mxu1 }
 0x1c2   : > { %9504 = vmatprep.mubr.msk.bf16.mxu0 %vm402_vm1, %v11545_v12  ;;  %14589 = vst [vmem:[#allocation20_spill] sm:$0xff] %v11998_v8  ;;  %v12003_v1 = vadd.f32 %v9298_v18, %v2144_v20  ;;  %v2142_v40 = vadd.f32 %v2027_v39, %v14593_v49  ;;  %v14600_v20 = vld [vmem:[#allocation13_spill] sm:$0xff]  ;;  %v14601_v49 = vld [vmem:[#allocation50_spill] sm:$0xff] }
 0x1c3   : > { %v9299_v13 = vpop.f32.mrf.mxu0  ;;  %v9265_v7 = vpop.f32.mrf.mxu1 }
 0x1c4   : > { %14592 = vst [vmem:[#allocation17_spill] sm:$0xff] %v12003_v1  ;;  %v12006_v56 = vadd.f32 %v2231_v19, %v2142_v40  ;;  %v2145_v10 = vadd.f32 %v9265_v7, %v14595_v63  ;;  %v14603_v7 = vld [vmem:[#allocation22_spill] sm:$0xff] }
 0x1c5   : > { %v2234_v17 = vpop.f32.mrf.mxu0  ;;  %v2030_v44 = vpop.f32.mrf.mxu1  ;;  %v14605_v1 = vld [vmem:[#allocation18_spill] sm:$0xff] }
 0x1c6   : > { %14594 = vst [vmem:[#allocation19_spill] sm:$0xff] %v12006_v56  ;;  %v12009_v42 = vadd.f32 %v9299_v13, %v2145_v10  ;;  %v2143_v34 = vadd.f32 %v2030_v44, %v14597_v50  ;;  %v10052_v50 = vld [vmem:[%s10243_s26 + $0x68] sm:$0xf] }
 0x1c7   : > { %v9302_v30 = vpop.f32.mrf.mxu0  ;;  %v9268_v18 = vpop.f32.mrf.mxu1  ;;  %v8298_v28 = vrot.slane %v10052_v50, 9 }
 0x1c8   : > { %14596 = vst [vmem:[#allocation47_spill] sm:$0xff] %v12009_v42  ;;  %9471 = vmatmul.mubr.msk.bf16.gmra.mxu1 %vm402_vm1, %v14598_v61  ;;  %v12018_v47 = vadd.f32 %v2234_v17, %v2143_v34  ;;  %v2148_v19 = vadd.f32 %v9268_v18, %v14600_v20  ;;  %v10053_v42 = vld [vmem:[%s10243_s26 + $0x6c] sm:$0x1]  ;;  %v10054_v17 = vld [vmem:[%s10243_s26 + $0x70] sm:$0xf] }
 0x1c9   : > { %9505 = vmatmul.mubr.msk.bf16.gmra.mxu0 %vm402_vm1, %v11552_v33  ;;  %v2247_v39 = vpop.f32.mrf.mxu0  ;;  %9474 = vmatprep.mubr.msk.bf16.mxu1 %vm402_vm1, %v14601_v49  ;;  %v2043_v40 = vpop.f32.mrf.mxu1  ;;  %v5356_v56 = vrot.slane %v10053_v42, 5  ;;  %v8299_v34 = vrot.slane %v10054_v17, 9  ;;  %v10056_v42 = vld [vmem:[%s10243_s26 + $0xb0] sm:$0xf]  ;;  %v14608_v17 = vld [vmem:[#allocation58_spill] sm:$0xff] }
 0x1ca   : > { %9508 = vmatprep.mubr.msk.bf16.mxu0 %vm402_vm1, %v11573_v5  ;;  %14599 = vst [vmem:[#allocation28_spill] sm:$0xff] %v12018_v47  ;;  %v12023_v13 = vadd.f32 %v9302_v30, %v2148_v19  ;;  %v2146_v63 = vadd.f32 %v2043_v40, %v14603_v7  ;;  %v10055_v47 = vld [vmem:[%s10243_s26 + $0x74] sm:$0x1]  ;;  %v14607_v40 = vld [vmem:[#allocation14_spill] sm:$0xff]  ;;  %v8305_v50 = vrot.slane %v10056_v42, 9 }
 0x1cb   : > { %v9303_v10 = vpop.f32.mrf.mxu0  ;;  %v9269_v44 = vpop.f32.mrf.mxu1  ;;  %v5360_v18 = vrot.slane %v10055_v47, 5 }
 0x1cc   : > { %14602 = vst [vmem:[#allocation53_spill] sm:$0xff] %v12023_v13  ;;  %v12030_v20 = vadd.f32 %v2247_v39, %v2146_v63  ;;  %v2149_v5 = vadd.f32 %v9269_v44, %v14605_v1  ;;  %v10057_v63 = vld [vmem:[%s10243_s26 + $0xb4] sm:$0x1] }
 0x1cd   : > { %v2250_v30 = vpop.f32.mrf.mxu0  ;;  %v2046_v19 = vpop.f32.mrf.mxu1  ;;  %v12049_v39 = vsel %vm10713_vm4, %v8299_v34, %v5360_v18  ;;  %v10059_v34 = vld [vmem:[%s10243_s26 + $0xbc] sm:$0x1] }
 0x1ce   : > { %14604 = vst [vmem:[#allocation21_spill] sm:$0xff] %v12030_v20  ;;  %v12033_v13 = vadd.f32 %v9303_v10, %v2149_v5  ;;  %v2147_v7 = vadd.f32 %v2046_v19, %v14607_v40  ;;  %v12045_v5 = vsel %vm10713_vm4, %v8298_v28, %v5356_v56  ;;  %14611 = vst [vmem:[#allocation16_spill] sm:$0xff] %v12049_v39  ;;  %v5384_v10 = vrot.slane %v10057_v63, 5  ;;  %v14613_v19 = vld [vmem:[#allocation37_spill] sm:$0xff] }
 0x1cf   : > { %v9306_v8 = vpop.f32.mrf.mxu0  ;;  %v9272_v47 = vpop.f32.mrf.mxu1  ;;  %14610 = vst [vmem:[#allocation30_spill] sm:$0xff] %v12045_v5  ;;  %v10058_v28 = vld [vmem:[%s10243_s26 + $0xb8] sm:$0xf]  ;;  %v5388_v18 = vrot.slane %v10059_v34, 5  ;;  %v10061_v34 = vld [vmem:[%s10243_s26 + $0xc8] sm:$0xf] }
 0x1d0   : > { %14606 = vst [vmem:[#allocation41_spill] sm:$0xff] %v12033_v13  ;;  %9475 = vmatmul.mubr.msk.bf16.gmra.mxu1 %vm402_vm1, %v14608_v17  ;;  %v12052_v44 = vadd.f32 %v2250_v30, %v2147_v7  ;;  %v2152_v40 = vadd.f32 %v9272_v47, %v14613_v19  ;;  %v12059_v13 = vcombine.low %v12045_v5, %v12049_v39  ;;  %v8306_v56 = vrot.slane %v10058_v28, 9  ;;  %v10060_v28 = vld [vmem:[%s10243_s26 + $0xc0] sm:$0xf] }
 0x1d1   : > { %9509 = vmatmul.mubr.msk.bf16.gmra.mxu0 %vm402_vm1, %v14581_v36  ;;  %v2263_v42 = vpop.f32.mrf.mxu0  ;;  %v14614_v36 = vld [vmem:[#allocation2_spill] sm:$0xff]  ;;  %v2059_v63 = vpop.f32.mrf.mxu1  ;;  %v8307_v39 = vrot.slane %v10060_v28, 9 }
 0x1d2   : > { %9512 = vmatprep.mubr.msk.bf16.mxu0 %vm402_vm1, %v11664_v29  ;;  %14612 = vst [vmem:[#allocation32_spill] sm:$0xff] %v12052_v44  ;;  %9478 = vmatprep.mubr.msk.bf16.mxu1 %vm402_vm1, %v14614_v36  ;;  %14615 = vst [vmem:[#allocation34_spill] sm:$0xff] %v12059_v13  ;;  %v12063_v30 = vadd.f32 %v9306_v8, %v2152_v40  ;;  %v2150_v7 = vadd.f32 %v2059_v63, %v11826_v54  ;;  %v8308_v8 = vrot.slane %v10061_v34, 9  ;;  %v10062_v40 = vld [vmem:[%s10243_s26 + $0x188] sm:$0xf] }
 0x1d3   : > { %v9307_v47 = vpop.f32.mrf.mxu0  ;;  %v9273_v19 = vpop.f32.mrf.mxu1  ;;  %v12071_v13 = vsel %vm10713_vm4, %v8305_v50, %v5384_v10  ;;  %v4279_v54 = vshrl.u32 %v10062_v40, 16  ;;  %v10063_v28 = vld [vmem:[%s10243_s26 + $0x180] sm:$0xf]  ;;  %v10069_v36 = vld [vmem:[%s10243_s26 + $0xdc] sm:$0x1] }
 0x1d4   : > { %14616 = vst [vmem:[#allocation54_spill] sm:$0xff] %v12063_v30  ;;  %v12066_v44 = vadd.f32 %v2263_v42, %v2150_v7  ;;  %v2153_v20 = vadd.f32 %v9273_v19, %v11832_v46  ;;  %14618 = vst [vmem:[#allocation49_spill] sm:$0xff] %v12071_v13  ;;  %v12078_v42 = vsel %vm10713_vm4, %v8306_v56, %v5388_v18  ;;  %v4282_v46 = vshll.u32 %v10062_v40, 16  ;;  %v10064_v56 = vld [vmem:[%s10243_s26 + $0xc4] sm:$0x1] }
 0x1d5   : > { %v2266_v29 = vpop.f32.mrf.mxu0  ;;  %v2062_v63 = vpop.f32.mrf.mxu1  ;;  %14619 = vst [vmem:[#allocation55_spill] sm:$0xff] %v12078_v42  ;;  %v12087_v19 = vcombine.low %v12071_v13, %v12078_v42  ;;  %v4050_v34 = vshrl.u32 %v10063_v28, 16  ;;  %v4053_v5 = vshll.u32 %v10063_v28, 16  ;;  %v5392_v18 = vrot.slane %v10064_v56, 5  ;;  %v10065_v40 = vld [vmem:[%s10243_s26 + $0xcc] sm:$0x1] }
 0x1d6   : > { %14617 = vst [vmem:[#allocation35_spill] sm:$0xff] %v12066_v44  ;;  %v12080_v7 = vadd.f32 %v9307_v47, %v2153_v20  ;;  %v2151_v50 = vadd.f32 %v2062_v63, %v11847_v55  ;;  %v5396_v20 = vrot.slane %v10065_v40, 5  ;;  %v14622_v55 = vld [vmem:[#allocation7_spill] sm:$0xff]  ;;  %v10066_v63 = vld [vmem:[%s10243_s26 + $0xd0] sm:$0xf]  ;;  %v4284_v17 = vrot.slane %v4282_v46, 5 }
 0x1d7   : > { %v9310_v10 = vpop.f32.mrf.mxu0  ;;  %14621 = vst [vmem:[#allocation8_spill] sm:$0xff] %v12087_v19  ;;  %v9276_v47 = vpop.f32.mrf.mxu1  ;;  %v10067_v42 = vld [vmem:[%s10243_s26 + $0xd4] sm:$0x1]  ;;  %v14624_v56 = vld [vmem:[#allocation11_spill] sm:$0xff]  ;;  %v10068_v40 = vld [vmem:[%s10243_s26 + $0xd8] sm:$0xf] }
 0x1d8   : > { %14620 = vst [vmem:[#allocation46_spill] sm:$0xff] %v12080_v7  ;;  %9479 = vmatmul.mubr.msk.bf16.gmra.mxu1 %vm402_vm1, %v14622_v55  ;;  %v8309_v7 = vrot.slane %v10066_v63, 9  ;;  %v5400_v19 = vrot.slane %v10067_v42, 5  ;;  %v12098_v13 = vadd.f32 %v2266_v29, %v2151_v50  ;;  %v2156_v28 = vadd.f32 %v9276_v47, %v11852_v11 }
 0x1d9   : > { %9513 = vmatmul.mubr.msk.bf16.gmra.mxu0 %vm402_vm1, %v11671_v26  ;;  %v2279_v44 = vpop.f32.mrf.mxu0  ;;  %9482 = vmatprep.mubr.msk.bf16.mxu1 %vm402_vm1, %v14624_v56  ;;  %v8310_v30 = vrot.slane %v10068_v40, 9  ;;  %v4281_v26 = vrot.slane %v4279_v54, 4  ;;  %v5404_v55 = vrot.slane %v10069_v36, 5  ;;  %v12110_v11 = vcombine.low %v11845_v16, %v11874_v25 }
 0x1da   : > { %9516 = vmatprep.mubr.msk.bf16.mxu0 %vm402_vm1, %v11696_v14  ;;  %14623 = vst [vmem:[#allocation57_spill] sm:$0xff] %v12098_v13  ;;  %v2075_v14 = vpop.f32.mrf.mxu1  ;;  %v12105_v63 = vadd.f32 %v9310_v10, %v2156_v28  ;;  %v4052_v47 = vrot.slane %v4050_v34, 4  ;;  %v4055_v13 = vrot.slane %v4053_v5, 5  ;;  %v12114_v54 = vsel %vm10713_vm4, %v8307_v39, %v5392_v18  ;;  %v296_v10 = vld [vmem:[%s10243_s26 + $0x184] sm:$0x1] }
 0x1db   : > { %v2154_v29 = vadd.f32 %v2075_v14, %v11858_v2  ;;  %v9311_v42 = vpop.f32.mrf.mxu0  ;;  %v12118_v36 = vsel %vm10713_vm4, %v8308_v8, %v5396_v20  ;;  %v298_v28 = vld [vmem:[%s10243_s26 + $0x18c] sm:$0x1]  ;;  %v12131_v25 = vsel %vm10713_vm4, %v8309_v7, %v5400_v19  ;;  %v12135_v39 = vsel %vm10713_vm4, %v8310_v30, %v5404_v55  ;;  %v14628_v19 = vld [vmem:[#allocation48_spill] sm:$0xff]  ;;  %v10070_v55 = vld [vmem:[%s10243_s26 + $0x100] sm:$0xf] }
 0x1dc   : > { %v9277_v50 = vpop.f32.mrf.mxu1  ;;  %v12127_v16 = vcombine.low %v12114_v54, %v12118_v36  ;;  %14626 = vst [vmem:[#allocation36_spill] sm:$0xff] %v12135_v39  ;;  %v12144_v34 = vcombine.low %v12131_v25, %v12135_v39  ;;  %v4056_v30 = vor.u32 %v4055_v13, %v4052_v47  ;;  %v4059_v18 = vshll.u32 %v296_v10, 16  ;;  %v10072_v39 = vld [vmem:[%s10243_s26 + $0x108] sm:$0xf] }
 0x1dd   : > { %v12120_v46 = vadd.f32 %v2279_v44, %v2154_v29  ;;  %v2157_v14 = vadd.f32 %v9277_v50, %v11863_v15  ;;  %v2282_v2 = vpop.f32.mrf.mxu0  ;;  %v4288_v20 = vshll.u32 %v298_v28, 16  ;;  %v8313_v40 = vrot.slane %v10070_v55, 9  ;;  %v10071_v29 = vld [vmem:[%s10243_s26 + $0x104] sm:$0x1] }
 0x1de   : > { %14625 = vst [vmem:[#allocation59_spill] sm:$0xff] %v12127_v16  ;;  %v2078_v5 = vpop.f32.mrf.mxu1  ;;  %14627 = vst [vmem:[#allocation26_spill] sm:$0xff] %v12144_v34  ;;  %v8314_v34 = vrot.slane %v10072_v39, 9  ;;  %v10073_v16 = vld [vmem:[%s10243_s26 + $0x10c] sm:$0x1]  ;;  %v4057_v28 = vrot.slane %v4056_v30, 4 }
 0x1df   : > { %v12137_v44 = vadd.f32 %v9311_v42, %v2157_v14  ;;  %v2155_v15 = vadd.f32 %v2078_v5, %v11876_v32  ;;  %v9314_v8 = vpop.f32.mrf.mxu0  ;;  %v4285_v32 = vor.u32 %v4284_v17, %v4281_v26  ;;  %v5416_v42 = vrot.slane %v10071_v29, 5 }
 0x1e0   : > { %v9280_v7 = vpop.f32.mrf.mxu1  ;;  %9483 = vmatmul.mubr.msk.bf16.gmra.mxu1 %vm402_vm1, %v14628_v19  ;;  %v5420_v13 = vrot.slane %v10073_v16, 5  ;;  %v12167_v16 = vcombine.low %v11883_v59, %v11910_v9 }
 0x1e1   : > { %9517 = vmatmul.mubr.msk.bf16.gmra.mxu0 %vm402_vm1, %v14584_v52  ;;  %v12152_v50 = vadd.f32 %v2282_v2, %v2155_v15  ;;  %v2160_v14 = vadd.f32 %v9280_v7, %v11885_v31  ;;  %v2295_v5 = vpop.f32.mrf.mxu0  ;;  %9486 = vmatprep.mubr.msk.bf16.mxu1 %vm402_vm1, %v12110_v11  ;;  %v4061_v15 = vrot.slane %v4059_v18, 5  ;;  %v4286_v31 = vrot.slane %v4285_v32, 4 }
 0x1e2   : > { %9520 = vmatprep.mubr.msk.bf16.mxu0 %vm402_vm1, %v11890_v6  ;;  %v2091_v47 = vpop.f32.mrf.mxu1  ;;  %v4290_v7 = vrot.slane %v4288_v20, 5  ;;  %v12176_v32 = vsel %vm10713_vm4, %v8314_v34, %v5420_v13  ;;  %v10075_v20 = vld [vmem:[%s10243_s26 + $0x118] sm:$0xf]  ;;  %v10077_v34 = vld [vmem:[%s10243_s26 + $0x11c] sm:$0x1] }
 0x1e3   : > { %v12159_v26 = vadd.f32 %v9314_v8, %v2160_v14  ;;  %v2158_v17 = vadd.f32 %v2091_v47, %v11896_v38  ;;  %v9315_v10 = vpop.f32.mrf.mxu0  ;;  %v12171_v38 = vsel %vm10713_vm4, %v8313_v40, %v5416_v42  ;;  %v10074_v8 = vld [vmem:[%s10243_s26 + $0x110] sm:$0xf]  ;;  %14630 = vst [vmem:[#allocation27_spill] sm:$0xff] %v12176_v32  ;;  %v10076_v42 = vld [vmem:[%s10243_s26 + $0x114] sm:$0x1]  ;;  %v5428_v13 = vrot.slane %v10077_v34, 5 }
 0x1e4   : > { %v9281_v2 = vpop.f32.mrf.mxu1  ;;  %14629 = vst [vmem:[#allocation31_spill] sm:$0xff] %v12171_v38  ;;  %v8315_v30 = vrot.slane %v10074_v8, 9  ;;  %v12186_v40 = vcombine.low %v12171_v38, %v12176_v32  ;;  %v10079_v8 = vld [vmem:[%s10243_s26 + $0x124] sm:$0x1]  ;;  %v10081_v32 = vld [vmem:[%s10243_s26 + $0x12c] sm:$0x1] }
 0x1e5   : > { %v12162_v55 = vadd.f32 %v2295_v5, %v2158_v17  ;;  %v2161_v39 = vadd.f32 %v9281_v2, %v11899_v24  ;;  %v2298_v29 = vpop.f32.mrf.mxu0  ;;  %v8316_v24 = vrot.slane %v10075_v20, 9  ;;  %v5424_v5 = vrot.slane %v10076_v42, 5  ;;  %v14632_v17 = vld [vmem:[#allocation39_spill] sm:$0xff]  ;;  %v10078_v2 = vld [vmem:[%s10243_s26 + $0x120] sm:$0xf] }
 0x1e6   : > { %v2094_v18 = vpop.f32.mrf.mxu1  ;;  %14631 = vst [vmem:[#allocation29_spill] sm:$0xff] %v12186_v40  ;;  %v10080_v40 = vld [vmem:[%s10243_s26 + $0x128] sm:$0xf]  ;;  %v5436_v38 = vrot.slane %v10081_v32, 5 }
 0x1e7   : > { %v12179_v14 = vadd.f32 %v9315_v10, %v2161_v39  ;;  %v2159_v59 = vadd.f32 %v2094_v18, %v11916_v22  ;;  %v9318_v9 = vpop.f32.mrf.mxu0  ;;  %v4062_v22 = vsel %vm10957_vm7, %v4057_v28, %v4061_v15  ;;  %v4291_v10 = vsel %vm10957_vm7, %v4286_v31, %v4290_v7 }
 0x1e8   : > { %v9284_v47 = vpop.f32.mrf.mxu1  ;;  %9487 = vmatmul.mubr.msk.bf16.gmra.mxu1 %vm402_vm1, %v14632_v17  ;;  %v8317_v39 = vrot.slane %v10078_v2, 9  ;;  %v5432_v18 = vrot.slane %v10079_v8, 5  ;;  %v8318_v52 = vrot.slane %v10080_v40, 9  ;;  %v12210_v2 = vcombine.low %v4062_v22, %v4291_v10 }
 0x1e9   : > { %9521 = vmatmul.mubr.msk.bf16.gmra.mxu0 %vm402_vm1, %v11894_v3  ;;  %v12200_v20 = vadd.f32 %v2298_v29, %v2159_v59  ;;  %v2164_v42 = vadd.f32 %v9284_v47, %v11921_v53  ;;  %v2311_v34 = vpop.f32.mrf.mxu0  ;;  %9490 = vmatprep.mubr.msk.bf16.mxu1 %vm402_vm1, %v12167_v16  ;;  %v12213_v59 = vcombine.low %v11914_v51, %v4062_v22 }
 0x1ea   : > { %9524 = vmatprep.mubr.msk.bf16.mxu0 %vm402_vm1, %v11926_v37  ;;  %v2107_v28 = vpop.f32.mrf.mxu1  ;;  %14633 = vst [vmem:[#allocation42_spill] sm:$0xff] %v12210_v2  ;;  %v12217_v53 = vsel %vm10713_vm4, %v8315_v30, %v5424_v5  ;;  %v12221_v40 = vsel %vm10713_vm4, %v8316_v24, %v5428_v13  ;;  %v12232_v51 = vsel %vm10713_vm4, %v8317_v39, %v5432_v18  ;;  %v10083_v39 = vld [vmem:[%s10243_s26 + $0xc] sm:$0x1] }
 0x1eb   : > { %v12207_v15 = vadd.f32 %v9318_v9, %v2164_v42  ;;  %v2162_v31 = vadd.f32 %v2107_v28, %v11928_v21  ;;  %v9319_v7 = vpop.f32.mrf.mxu0  ;;  %v12228_v47 = vcombine.low %v12217_v53, %v12221_v40  ;;  %v12236_v24 = vsel %vm10713_vm4, %v8318_v52, %v5436_v38  ;;  %v10082_v52 = vld [vmem:[%s10243_s26 + $0x8] sm:$0xf] }
 0x1ec   : > { %v9285_v29 = vpop.f32.mrf.mxu1  ;;  %14635 = vst [vmem:[#allocation12_spill] sm:$0xff] %v12236_v24  ;;  %v12245_v22 = vcombine.low %v12232_v51, %v12236_v24  ;;  %v8288_v38 = vrot.slane %v10082_v52, 9  ;;  %v5316_v8 = vrot.slane %v10083_v39, 5  ;;  %v14649_v24 = vld [vmem:[#allocation56_spill] sm:$0xff] }
 0x1ed   : > { %v12223_v32 = vadd.f32 %v2311_v34, %v2162_v31  ;;  %v2165_v21 = vadd.f32 %v9285_v29, %v11931_v43  ;;  %v2314_v9 = vpop.f32.mrf.mxu0  ;;  %14634 = vst [vmem:[#allocation9_spill] sm:$0xff] %v12228_v47  ;;  %v14637_v34 = vld [vmem:[#allocation44_spill] sm:$0xff] }
 0x1ee   : > { %v2110_v30 = vpop.f32.mrf.mxu1  ;;  %14636 = vst [vmem:[#allocation43_spill] sm:$0xff] %v12245_v22  ;;  %v10089_v22 = vld [vmem:[%s10243_s26 + $0x60] sm:$0xf] }
 0x1ef   : > { %v12238_v5 = vadd.f32 %v9319_v7, %v2165_v21  ;;  %v2163_v13 = vadd.f32 %v2110_v30, %v11940_v27  ;;  %v9322_v43 = vpop.f32.mrf.mxu0 }
 0x1f0   : > { %v9288_v10 = vpop.f32.mrf.mxu1  ;;  %9491 = vmatmul.mubr.msk.bf16.gmra.mxu1 %vm402_vm1, %v12213_v59 }
 0x1f1   : > { %9525 = vmatmul.mubr.msk.bf16.gmra.mxu0 %vm402_vm1, %v12210_v2  ;;  %v12253_v27 = vadd.f32 %v2314_v9, %v2163_v13  ;;  %v2168_v18 = vadd.f32 %v9288_v10, %v11945_v0  ;;  %v2327_v42 = vpop.f32.mrf.mxu0  ;;  %9530 = vmatprep.mubr.msk.bf16.mxu1 %vm402_vm1, %v14637_v34  ;;  %v5537_v13 = vsel %vm451_vm0, %v11970_v48, 0  ;;  %v14653_v2 = vld [vmem:[#allocation33_spill] sm:$0xff] }
 0x1f2   : > { %9564 = vmatprep.mubr.msk.bf16.mxu0 %vm402_vm1, %v14591_v57  ;;  %v2123_v28 = vpop.f32.mrf.mxu1  ;;  %v12263_v57 = vsel %vm10713_vm4, %v8288_v38, %v5316_v8 }
 0x1f3   : > { %v12258_v31 = vadd.f32 %v9322_v43, %v2168_v18  ;;  %v2166_v7 = vadd.f32 %v2123_v28, %v11948_v35  ;;  %v9323_v29 = vpop.f32.mrf.mxu0  ;;  %v5080_v35 = vsel %vm451_vm0, %v11963_v23, 0  ;;  %v12289_v23 = vld [vmem:[%s14181_s1 + $0x10] sm:$0x3]  ;;  %v14648_v43 = vld [vmem:[#allocation58_spill] sm:$0xff] }
 0x1f4   : > { %v9289_v21 = vpop.f32.mrf.mxu1  ;;  %14642 = vst [vmem:[#allocation52_spill] sm:$0xff] %v12289_v23 }
 0x1f5   : > { %v12265_v30 = vadd.f32 %v2327_v42, %v2166_v7  ;;  %v2169_v9 = vadd.f32 %v9289_v21, %v11955_v60  ;;  %v2330_v0 = vpop.f32.mrf.mxu0  ;;  %v12282_v60 = vld [vmem:[%s14181_s1 + $0xa] sm:$0x3] }
 0x1f6   : > { %v2126_v52 = vpop.f32.mrf.mxu1  ;;  %14641 = vst [vmem:[#allocation4_spill] sm:$0xff] %v12282_v60 }
 0x1f7   : > { %14638 = vst [vmem:[#allocation6_spill] sm:$0xff] %v12265_v30  ;;  %v12274_v39 = vadd.f32 %v9323_v29, %v2169_v9  ;;  %v2167_v38 = vadd.f32 %v2126_v52, %v11972_v58  ;;  %v10084_v29 = vld [vmem:[%s10243_s26 + $0x190] sm:$0xf] }
 0x1f8   : > { %v9362_v8 = vpop.f32.mrf.mxu0  ;;  %v9328_v48 = vpop.f32.mrf.mxu1  ;;  %9531 = vmatmul.mubr.msk.bf16.vlgmr.msra.gmra.mxu1 %vm402_vm1, %v11545_v12  ;;  %v4496_v21 = vshrl.u32 %v10084_v29, 16  ;;  %v4499_v9 = vshll.u32 %v10084_v29, 16 }
 0x1f9   : > { %14640 = vst [vmem:[#allocation3_spill] sm:$0xff] %v12274_v39  ;;  %9565 = vmatmul.mubr.msk.bf16.vlgmr.msra.gmra.mxu0 %vm402_vm1, %v14598_v61  ;;  %v12291_v58 = vadd.f32 %v2330_v0, %v2167_v38  ;;  %v3089_v61 = vadd.f32 %v9328_v48, %v11981_v45  ;;  %9597 = vmatpush3.bf16.msra.mxu1 %v5080_v35  ;;  %v10085_v35 = vld [vmem:[%s10243_s26 + $0x198] sm:$0xf]  ;;  %v14647_v48 = vld [vmem:[#allocation20_spill] sm:$0xff] }
 0x1fa   : > { %9631 = vmatpush3.bf16.msra.mxu0 %v5537_v13  ;;  %v3282_v18 = vpop.f32.mrf.mxu0  ;;  %9534 = vmatprep.mubr.msk.bf16.mxu1 %vm402_vm1, %v11552_v33  ;;  %v2960_v42 = vpop.f32.mrf.mxu1  ;;  %v4513_v38 = vshll.u32 %v10085_v35, 16 }
 0x1fb   : > { %14643 = vst [vmem:[#allocation13_spill] sm:$0xff] %v12291_v58  ;;  %9568 = vmatprep.mubr.msk.bf16.mxu0 %vm402_vm1, %v14601_v49  ;;  %9958 = vmatprep.subr.msk.bf16.mxu1 %vm451_vm0, %v12282_v60  ;;  %v12300_v34 = vadd.f32 %v9362_v8, %v3089_v61  ;;  %v3087_v28 = vadd.f32 %v2960_v42, %v11986_v41  ;;  %v4510_v41 = vshrl.u32 %v10085_v35, 16 }
 0x1fc   : > { %v9363_v7 = vpop.f32.mrf.mxu0  ;;  %9959 = vmatprep.subr.msk.bf16.mxu0 %vm451_vm0, %v12289_v23  ;;  %v9329_v45 = vpop.f32.mrf.mxu1 }
 0x1fd   : > { %14644 = vst [vmem:[#allocation50_spill] sm:$0xff] %v12300_v34  ;;  %v12306_v0 = vadd.f32 %v3282_v18, %v3087_v28  ;;  %v3090_v49 = vadd.f32 %v9329_v45, %v11989_v62  ;;  %v10086_v18 = vld [vmem:[%s10243_s26 + $0x64] sm:$0x1]  ;;  %v10087_v45 = vld [vmem:[%s10243_s26 + $0x58] sm:$0xf]  ;;  %v4515_v34 = vrot.slane %v4513_v38, 5 }
 0x1fe   : > { %v3285_v13 = vpop.f32.mrf.mxu0  ;;  %v2963_v52 = vpop.f32.mrf.mxu1  ;;  %v5352_v28 = vrot.slane %v10086_v18, 5  ;;  %v14650_v62 = vld [vmem:[#allocation2_spill] sm:$0xff]  ;;  %v8296_v35 = vrot.slane %v10087_v45, 9 }
 0x1ff   : > { %14645 = vst [vmem:[#allocation22_spill] sm:$0xff] %v12306_v0  ;;  %v12310_v8 = vadd.f32 %v9363_v7, %v3090_v49  ;;  %v3088_v61 = vadd.f32 %v2963_v52, %v14647_v48  ;;  %v10088_v7 = vld [vmem:[%s10243_s26 + $0x5c] sm:$0x1]  ;;  %v8297_v52 = vrot.slane %v10089_v22, 9  ;;  %v4501_v0 = vrot.slane %v4499_v9, 5  ;;  %v14655_v22 = vld [vmem:[#allocation19_spill] sm:$0xff] }
 0x200   : > { %v9332_v29 = vpop.f32.mrf.mxu1  ;;  %9535 = vmatmul.mubr.msk.bf16.gmra.mxu1 %vm402_vm1, %v14649_v24  ;;  %v5348_v49 = vrot.slane %v10088_v7, 5  ;;  %v4512_v24 = vrot.slane %v4510_v41, 4  ;;  %v10090_v45 = vld [vmem:[%s10243_s26 + $0x1a0] sm:$0xf]  ;;  %v14659_v9 = vld [vmem:[#allocation47_spill] sm:$0xff] }
 0x201   : > { %14646 = vst [vmem:[#allocation18_spill] sm:$0xff] %v12310_v8  ;;  %v9366_v42 = vpop.f32.mrf.mxu0  ;;  %9569 = vmatmul.mubr.msk.bf16.gmra.mxu0 %vm402_vm1, %v14648_v43  ;;  %v12323_v48 = vadd.f32 %v3285_v13, %v3088_v61  ;;  %v14652_v43 = vld [vmem:[#allocation17_spill] sm:$0xff]  ;;  %9538 = vmatprep.mubr.msk.bf16.mxu1 %vm402_vm1, %v14653_v2  ;;  %v4498_v8 = vrot.slane %v4496_v21, 4  ;;  %v4524_v33 = vshrl.u32 %v10090_v45, 16  ;;  %v4527_v7 = vshll.u32 %v10090_v45, 16 }
 0x202   : > { %9572 = vmatprep.mubr.msk.bf16.mxu0 %vm402_vm1, %v14650_v62  ;;  %v3093_v47 = vadd.f32 %v9332_v29, %v14652_v43  ;;  %v2976_v62 = vpop.f32.mrf.mxu1  ;;  %v302_v43 = vld [vmem:[%s10243_s26 + $0x19c] sm:$0x1]  ;;  %v12336_v60 = vsel %vm10713_vm4, %v8296_v35, %v5348_v49  ;;  %v12340_v2 = vsel %vm10713_vm4, %v8297_v52, %v5352_v28  ;;  %v4516_v49 = vor.u32 %v4515_v34, %v4512_v24  ;;  %v14664_v34 = vld [vmem:[#allocation40_spill] sm:$0xff] }
 0x203   : > { %14651 = vst [vmem:[#allocation14_spill] sm:$0xff] %v12323_v48  ;;  %v3298_v18 = vpop.f32.mrf.mxu0  ;;  %v3091_v13 = vadd.f32 %v2976_v62, %v14655_v22  ;;  %v300_v48 = vld [vmem:[%s10243_s26 + $0x194] sm:$0x1]  ;;  %14656 = vst [vmem:[#allocation37_spill] sm:$0xff] %v12336_v60  ;;  %v4502_v38 = vor.u32 %v4501_v0, %v4498_v8  ;;  %v4526_v45 = vrot.slane %v4524_v33, 4  ;;  %v4529_v28 = vrot.slane %v4527_v7, 5 }
 0x204   : > { %v12329_v58 = vadd.f32 %v9366_v42, %v3093_v47  ;;  %v9333_v29 = vpop.f32.mrf.mxu1  ;;  %14657 = vst [vmem:[#allocation11_spill] sm:$0xff] %v12340_v2  ;;  %v12347_v42 = vcombine.low %v12336_v60, %v12340_v2  ;;  %v4505_v35 = vshll.u32 %v300_v48, 16  ;;  %v4519_v0 = vshll.u32 %v302_v43, 16  ;;  %v304_v8 = vld [vmem:[%s10243_s26 + $0x1a4] sm:$0x1]  ;;  %v14666_v43 = vld [vmem:[#allocation53_spill] sm:$0xff] }
 0x205   : > { %v9367_v61 = vpop.f32.mrf.mxu0  ;;  %v12342_v21 = vadd.f32 %v3298_v18, %v3091_v13  ;;  %v3094_v47 = vadd.f32 %v9333_v29, %v14659_v9  ;;  %v14662_v18 = vld [vmem:[#allocation28_spill] sm:$0xff]  ;;  %v14663_v29 = vld [vmem:[#allocation7_spill] sm:$0xff]  ;;  %v10092_v2 = vld [vmem:[%s10243_s26 + $0x84] sm:$0x1]  ;;  %v4530_v39 = vor.u32 %v4529_v28, %v4526_v45 }
 0x206   : > { %14654 = vst [vmem:[#allocation23_spill] sm:$0xff] %v12329_v58  ;;  %14660 = vst [vmem:[#allocation39_spill] sm:$0xff] %v12347_v42  ;;  %v2979_v62 = vpop.f32.mrf.mxu1  ;;  %v10091_v9 = vld [vmem:[%s10243_s26 + $0x1a8] sm:$0xf]  ;;  %v5368_v48 = vrot.slane %v10092_v2, 5  ;;  %v14667_v2 = vld [vmem:[#allocation10_spill] sm:$0xff] }
 0x207   : > { %14658 = vst [vmem:[#allocation48_spill] sm:$0xff] %v12342_v21  ;;  %v3301_v41 = vpop.f32.mrf.mxu0  ;;  %v12349_v52 = vadd.f32 %v9367_v61, %v3094_v47  ;;  %v3092_v22 = vadd.f32 %v2979_v62, %v14662_v18  ;;  %v4538_v42 = vshrl.u32 %v10091_v9, 16  ;;  %v10093_v33 = vld [vmem:[%s10243_s26 + $0x78] sm:$0xf]  ;;  %v10094_v61 = vld [vmem:[%s10243_s26 + $0x7c] sm:$0x1] }
 0x208   : > { %v9336_v24 = vpop.f32.mrf.mxu1  ;;  %9539 = vmatmul.mubr.msk.bf16.gmra.mxu1 %vm402_vm1, %v14664_v34  ;;  %v8300_v7 = vrot.slane %v10093_v33, 9  ;;  %v5364_v47 = vrot.slane %v10094_v61, 5  ;;  %v10095_v62 = vld [vmem:[%s10243_s26 + $0x80] sm:$0xf]  ;;  %v12369_v58 = vrot.slane %v4502_v38, 4  ;;  %v4541_v34 = vshll.u32 %v10091_v9, 16 }
 0x209   : > { %14661 = vst [vmem:[#allocation44_spill] sm:$0xff] %v12349_v52  ;;  %v9370_v13 = vpop.f32.mrf.mxu0  ;;  %9573 = vmatmul.mubr.msk.bf16.gmra.mxu0 %vm402_vm1, %v14663_v29  ;;  %v8301_v18 = vrot.slane %v10095_v62, 9  ;;  %v12364_v29 = vadd.f32 %v3301_v41, %v3092_v22  ;;  %v3097_v52 = vadd.f32 %v9336_v24, %v14666_v43  ;;  %9542 = vmatprep.mubr.msk.bf16.mxu1 %vm402_vm1, %v14667_v2  ;;  %v4517_v33 = vrot.slane %v4516_v49, 4  ;;  %v14669_v41 = vld [vmem:[#allocation21_spill] sm:$0xff]  ;;  %v10096_v2 = vld [vmem:[%s10243_s26 + $0x1b0] sm:$0xf] }
 0x20a   : > { %9576 = vmatprep.mubr.msk.bf16.mxu0 %vm402_vm1, %v14624_v56  ;;  %v2992_v60 = vpop.f32.mrf.mxu1  ;;  %v12371_v56 = vrot.slane %v4505_v35, 5  ;;  %v4533_v61 = vshll.u32 %v304_v8, 16  ;;  %v4521_v24 = vrot.slane %v4519_v0, 5  ;;  %v12376_v43 = vrot.slane %v4538_v42, 4 }
 0x20b   : > { %14665 = vst [vmem:[#allocation20_spill] sm:$0xff] %v12364_v29  ;;  %v3314_v21 = vpop.f32.mrf.mxu0  ;;  %v12373_v23 = vadd.f32 %v9370_v13, %v3097_v52  ;;  %v3095_v22 = vadd.f32 %v2992_v60, %v14669_v41  ;;  %v4552_v38 = vshrl.u32 %v10096_v2, 16  ;;  %v4555_v30 = vshll.u32 %v10096_v2, 16  ;;  %v14673_v60 = vld [vmem:[#allocation41_spill] sm:$0xff]  ;;  %v10098_v41 = vld [vmem:[%s10243_s26 + $0x1c0] sm:$0xf] }
 0x20c   : > { %v9337_v29 = vpop.f32.mrf.mxu1  ;;  %v12381_v35 = vsel %vm10713_vm4, %v8300_v7, %v5364_v47  ;;  %v12385_v49 = vsel %vm10713_vm4, %v8301_v18, %v5368_v48  ;;  %v12390_v52 = vrot.slane %v4541_v34, 5  ;;  %v4531_v8 = vrot.slane %v4530_v39, 4  ;;  %v10097_v7 = vld [vmem:[%s10243_s26 + $0x1b8] sm:$0xf]  ;;  %v14676_v18 = vld [vmem:[#allocation32_spill] sm:$0xff] }
 0x20d   : > { %14668 = vst [vmem:[#allocation58_spill] sm:$0xff] %v12373_v23  ;;  %v9371_v62 = vpop.f32.mrf.mxu0  ;;  %14670 = vst [vmem:[#allocation2_spill] sm:$0xff] %v12381_v35  ;;  %v12387_v45 = vadd.f32 %v3314_v21, %v3095_v22  ;;  %v3098_v28 = vadd.f32 %v9337_v29, %v14673_v60  ;;  %v12394_v13 = vcombine.low %v12381_v35, %v12385_v49  ;;  %v4535_v9 = vrot.slane %v4533_v61, 5  ;;  %v306_v34 = vld [vmem:[%s10243_s26 + $0x1ac] sm:$0x1]  ;;  %v14677_v61 = vld [vmem:[#allocation5_spill] sm:$0xff] }
 0x20e   : > { %14671 = vst [vmem:[#allocation17_spill] sm:$0xff] %v12385_v49  ;;  %v2995_v0 = vpop.f32.mrf.mxu1  ;;  %v4566_v48 = vshrl.u32 %v10097_v7, 16  ;;  %v4569_v47 = vshll.u32 %v10097_v7, 16  ;;  %v4580_v22 = vshrl.u32 %v10098_v41, 16  ;;  %v4583_v60 = vshll.u32 %v10098_v41, 16 }
 0x20f   : > { %14672 = vst [vmem:[#allocation33_spill] sm:$0xff] %v12387_v45  ;;  %v3317_v42 = vpop.f32.mrf.mxu0  ;;  %14674 = vst [vmem:[#allocation19_spill] sm:$0xff] %v12394_v13  ;;  %v12397_v21 = vadd.f32 %v9371_v62, %v3098_v28  ;;  %v3096_v2 = vadd.f32 %v2995_v0, %v14676_v18  ;;  %v4554_v62 = vrot.slane %v4552_v38, 4  ;;  %v4557_v28 = vrot.slane %v4555_v30, 5  ;;  %v10099_v0 = vld [vmem:[%s10243_s26 + $0xa8] sm:$0xf] }
 0x210   : > { %v9340_v39 = vpop.f32.mrf.mxu1  ;;  %9543 = vmatmul.mubr.msk.bf16.gmra.mxu1 %vm402_vm1, %v14677_v61  ;;  %v8304_v7 = vrot.slane %v10099_v0, 9  ;;  %v10100_v18 = vld [vmem:[%s10243_s26 + $0xac] sm:$0x1]  ;;  %v14680_v45 = vld [vmem:[#allocation38_spill] sm:$0xff]  ;;  %v12421_v30 = vsel %vm10957_vm7, %v4517_v33, %v4521_v24  ;;  %v308_v38 = vld [vmem:[%s10243_s26 + $0x1b4] sm:$0x1]  ;;  %v12433_v24 = vsel %vm10957_vm7, %v4531_v8, %v4535_v9 }
 0x211   : > { %14675 = vst [vmem:[#allocation47_spill] sm:$0xff] %v12397_v21  ;;  %v9374_v29 = vpop.f32.mrf.mxu0  ;;  %9577 = vmatmul.mubr.msk.bf16.gmra.mxu0 %vm402_vm1, %v14628_v19  ;;  %v5380_v13 = vrot.slane %v10100_v18, 5  ;;  %v12410_v19 = vadd.f32 %v3317_v42, %v3096_v2  ;;  %v14679_v21 = vld [vmem:[#allocation54_spill] sm:$0xff]  ;;  %9546 = vmatprep.mubr.msk.bf16.mxu1 %vm402_vm1, %v14680_v45  ;;  %v4544_v42 = vor.u32 %v12390_v52, %v12376_v43  ;;  %v4547_v2 = vshll.u32 %v306_v34, 16  ;;  %v14681_v45 = vld [vmem:[#allocation35_spill] sm:$0xff] }
 0x212   : > { %9580 = vmatprep.mubr.msk.bf16.mxu0 %vm402_vm1, %v12110_v11  ;;  %v3101_v41 = vadd.f32 %v9340_v39, %v14679_v21  ;;  %v3008_v0 = vpop.f32.mrf.mxu1  ;;  %v310_v21 = vld [vmem:[%s10243_s26 + $0x1bc] sm:$0x1]  ;;  %v4568_v39 = vrot.slane %v4566_v48, 4  ;;  %v4571_v18 = vrot.slane %v4569_v47, 5  ;;  %v312_v35 = vld [vmem:[%s10243_s26 + $0x1c4] sm:$0x1]  ;;  %v4558_v12 = vor.u32 %v4557_v28, %v4554_v62 }
 0x213   : > { %14678 = vst [vmem:[#allocation28_spill] sm:$0xff] %v12410_v19  ;;  %v3330_v49 = vpop.f32.mrf.mxu0  ;;  %v3099_v61 = vadd.f32 %v3008_v0, %v14681_v45  ;;  %v4582_v11 = vrot.slane %v4580_v22, 4  ;;  %v4585_v10 = vrot.slane %v4583_v60, 5  ;;  %v4561_v43 = vshll.u32 %v308_v38, 16  ;;  %v14682_v47 = vld [vmem:[#allocation46_spill] sm:$0xff]  ;;  %v14683_v0 = vld [vmem:[#allocation49_spill] sm:$0xff] }
 0x214   : > { %v12427_v19 = vadd.f32 %v9374_v29, %v3101_v41  ;;  %v9341_v33 = vpop.f32.mrf.mxu1  ;;  %v12437_v52 = vsel %vm10713_vm4, %v8304_v7, %v5380_v13  ;;  %v4575_v41 = vshll.u32 %v310_v21, 16  ;;  %v4572_v45 = vor.u32 %v4571_v18, %v4568_v39  ;;  %v10101_v9 = vld [vmem:[%s10243_s26 + $0x1c8] sm:$0xf]  ;;  %v10102_v39 = vld [vmem:[%s10243_s26 + $0x1d0] sm:$0xf] }
 0x215   : > { %v9375_v23 = vpop.f32.mrf.mxu0  ;;  %v12439_v48 = vadd.f32 %v3330_v49, %v3099_v61  ;;  %v3102_v29 = vadd.f32 %v9341_v33, %v14682_v47  ;;  %v12444_v22 = vcombine.low %v12437_v52, %v14683_v0  ;;  %v4589_v8 = vshll.u32 %v312_v35, 16  ;;  %v14685_v28 = vld [vmem:[#allocation55_spill] sm:$0xff]  ;;  %v14687_v61 = vld [vmem:[#allocation57_spill] sm:$0xff] }
 0x216   : > { %v3011_v60 = vpop.f32.mrf.mxu1  ;;  %v4594_v62 = vshrl.u32 %v10101_v9, 16  ;;  %v12449_v13 = vcombine.low %v14685_v28, %v12114_v54  ;;  %v4586_v21 = vor.u32 %v4585_v10, %v4582_v11  ;;  %v4597_v33 = vshll.u32 %v10101_v9, 16 }
 0x217   : > { %v3333_v34 = vpop.f32.mrf.mxu0  ;;  %14684 = vst [vmem:[#allocation7_spill] sm:$0xff] %v12444_v22  ;;  %v12451_v49 = vadd.f32 %v9375_v23, %v3102_v29  ;;  %v3100_v7 = vadd.f32 %v3011_v60, %v14687_v61  ;;  %v4545_v35 = vrot.slane %v4544_v42, 4  ;;  %v4549_v54 = vrot.slane %v4547_v2, 5 }
 0x218   : > { %14686 = vst [vmem:[#allocation53_spill] sm:$0xff] %v12449_v13  ;;  %v9344_v47 = vpop.f32.mrf.mxu1  ;;  %9547 = vmatmul.mubr.msk.bf16.gmra.mxu1 %vm402_vm1, %v11890_v6  ;;  %v4830_v23 = vshrl.u32 %v10102_v39, 16  ;;  %v4833_v18 = vshll.u32 %v10102_v39, 16  ;;  %v4559_v10 = vrot.slane %v4558_v12, 4  ;;  %v4563_v11 = vrot.slane %v4561_v43, 5 }
 0x219   : > { %v9378_v38 = vpop.f32.mrf.mxu0  ;;  %9581 = vmatmul.mubr.msk.bf16.gmra.mxu0 %vm402_vm1, %v14632_v17  ;;  %v12461_v29 = vadd.f32 %v3333_v34, %v3100_v7  ;;  %v3105_v0 = vadd.f32 %v9344_v47, %v12105_v63  ;;  %9550 = vmatprep.mubr.msk.bf16.mxu1 %vm402_vm1, %v11894_v3  ;;  %v4573_v9 = vrot.slane %v4572_v45, 4  ;;  %v4577_v28 = vrot.slane %v4575_v41, 5  ;;  %v314_v7 = vld [vmem:[%s10243_s26 + $0x1cc] sm:$0x1] }
 0x21a   : > { %9584 = vmatprep.mubr.msk.bf16.mxu0 %vm402_vm1, %v12167_v16  ;;  %v3024_v60 = vpop.f32.mrf.mxu1  ;;  %v4591_v16 = vrot.slane %v4589_v8, 5  ;;  %v4596_v42 = vrot.slane %v4594_v62, 4  ;;  %v4587_v39 = vrot.slane %v4586_v21, 4  ;;  %v4599_v63 = vrot.slane %v4597_v33, 5  ;;  %v316_v62 = vld [vmem:[%s10243_s26 + $0x1d4] sm:$0x1] }
 0x21b   : > { %v3346_v17 = vpop.f32.mrf.mxu0  ;;  %v12466_v2 = vadd.f32 %v9378_v38, %v3105_v0  ;;  %v3103_v61 = vadd.f32 %v3024_v60, %v12120_v46  ;;  %v8249_v13 = vcombine.low %v12421_v30, %v12433_v24  ;;  %v4832_v12 = vrot.slane %v4830_v23, 4 }
 0x21c   : > { %v9345_v47 = vpop.f32.mrf.mxu1  ;;  %v4835_v43 = vrot.slane %v4833_v18, 5  ;;  %v14688_v46 = vsel %vm10957_vm7, %v12369_v58, %v12371_v56  ;;  %v12484_v38 = vcombine.low %v12118_v36, %v12131_v25  ;;  %v4550_v33 = vsel %vm10957_vm7, %v4545_v35, %v4549_v54 }
 0x21d   : > { %v9379_v34 = vpop.f32.mrf.mxu0  ;;  %v12472_v22 = vadd.f32 %v3346_v17, %v3103_v61  ;;  %v3106_v41 = vadd.f32 %v9345_v47, %v12137_v44  ;;  %v8228_v8 = vcombine.low %v14688_v46, %v12421_v30  ;;  %v4564_v44 = vsel %vm10957_vm7, %v4559_v10, %v4563_v11  ;;  %v10103_v17 = vld [vmem:[%s10243_s26 + $0xf8] sm:$0xf] }
 0x21e   : > { %14689 = vst [vmem:[#allocation21_spill] sm:$0xff] %v12484_v38  ;;  %v3027_v21 = vpop.f32.mrf.mxu1  ;;  %v4578_v23 = vsel %vm10957_vm7, %v4573_v9, %v4577_v28  ;;  %v4603_v18 = vshll.u32 %v314_v7, 16  ;;  %v12499_v36 = vsel %vm10957_vm7, %v4587_v39, %v4591_v16  ;;  %v4600_v25 = vor.u32 %v4599_v63, %v4596_v42 }
 0x21f   : > { %v3349_v45 = vpop.f32.mrf.mxu0  ;;  %v12492_v58 = vadd.f32 %v9379_v34, %v3106_v41  ;;  %v3104_v56 = vadd.f32 %v3027_v21, %v12152_v50  ;;  %v4836_v54 = vor.u32 %v4835_v43, %v4832_v12  ;;  %v4839_v0 = vshll.u32 %v316_v62, 16  ;;  %v10104_v50 = vld [vmem:[%s10243_s26 + $0xfc] sm:$0x1]  ;;  %v10106_v21 = vld [vmem:[%s10243_s26 + $0x4] sm:$0x1] }
 0x220   : > { %v9348_v35 = vpop.f32.mrf.mxu1  ;;  %9551 = vmatmul.mubr.msk.bf16.gmra.mxu1 %vm402_vm1, %v11926_v37  ;;  %v8312_v10 = vrot.slane %v10103_v17, 9  ;;  %v5412_v11 = vrot.slane %v10104_v50, 5  ;;  %v12511_v16 = vcombine.low %v12433_v24, %v4550_v33  ;;  %v8250_v42 = vcombine.low %v4550_v33, %v4564_v44  ;;  %v14690_v33 = vld [vmem:[#allocation31_spill] sm:$0xff]  ;;  %v10107_v50 = vld [vmem:[%s10243_s26 + $0x18] sm:$0xf] }
 0x221   : > { %v9382_v30 = vpop.f32.mrf.mxu0  ;;  %9585 = vmatmul.mubr.msk.bf16.gmra.mxu0 %vm402_vm1, %v12213_v59  ;;  %v12506_v60 = vadd.f32 %v3349_v45, %v3104_v56  ;;  %v3109_v59 = vadd.f32 %v9348_v35, %v12159_v26  ;;  %9554 = vmatprep.mubr.msk.bf16.mxu1 %vm402_vm1, %v8228_v8  ;;  %v4605_v61 = vrot.slane %v4603_v18, 5  ;;  %v8251_v63 = vcombine.low %v4578_v23, %v12499_v36  ;;  %v10105_v26 = vld [vmem:[%s10243_s26] sm:$0xf]  ;;  %v14692_v18 = vld [vmem:[#allocation27_spill] sm:$0xff] }
 0x222   : > { %9588 = vmatprep.mubr.msk.bf16.mxu0 %vm402_vm1, %v8249_v13  ;;  %v3040_v28 = vpop.f32.mrf.mxu1  ;;  %v12513_v13 = vcombine.low %v4564_v44, %v4578_v23  ;;  %v8287_v47 = vrot.slane %v10105_v26, 9  ;;  %v4601_v43 = vrot.slane %v4600_v25, 4  ;;  %v4837_v41 = vrot.slane %v4836_v54, 4 }
 0x223   : > { %v3362_v9 = vpop.f32.mrf.mxu0  ;;  %v12515_v34 = vadd.f32 %v9382_v30, %v3109_v59  ;;  %v3107_v7 = vadd.f32 %v3040_v28, %v12162_v55  ;;  %v4841_v45 = vrot.slane %v4839_v0, 5  ;;  %v12522_v24 = vsel %vm10713_vm4, %v8312_v10, %v5412_v11  ;;  %v10108_v59 = vld [vmem:[%s10243_s26 + $0x1c] sm:$0x1] }
 0x224   : > { %v9349_v12 = vpop.f32.mrf.mxu1  ;;  %v5312_v55 = vrot.slane %v10106_v21, 5  ;;  %v12530_v44 = vcombine.low %v12522_v24, %v14690_v33  ;;  %v12534_v56 = vcombine.low %v14692_v18, %v12217_v53  ;;  %v4606_v54 = vsel %vm10957_vm7, %v4601_v43, %v4605_v61 }
 0x225   : > { %v9383_v39 = vpop.f32.mrf.mxu0  ;;  %v12524_v46 = vadd.f32 %v3362_v9, %v3107_v7  ;;  %v3110_v8 = vadd.f32 %v9349_v12, %v12179_v14  ;;  %v12546_v0 = vsel %vm10957_vm7, %v4837_v41, %v4841_v45  ;;  %v8290_v11 = vrot.slane %v10107_v50, 9 }
 0x226   : > { %14691 = vst [vmem:[#allocation41_spill] sm:$0xff] %v12530_v44  ;;  %v3043_v23 = vpop.f32.mrf.mxu1  ;;  %14693 = vst [vmem:[#allocation32_spill] sm:$0xff] %v12534_v56  ;;  %v5313_v10 = vsel %vm10713_vm4, %v8287_v47, %v5312_v55  ;;  %v5324_v9 = vrot.slane %v10108_v59, 5  ;;  %v12571_v41 = vcombine.low %v12221_v40, %v12232_v51  ;;  %v10112_v51 = vld [vmem:[%s10243_s26 + $0x2c] sm:$0x1]  ;;  %v14716_v56 = vld [vmem:[#allocation25_spill] sm:$0xff] }
 0x227   : > { %v3365_v62 = vpop.f32.mrf.mxu0  ;;  %v12536_v30 = vadd.f32 %v9383_v39, %v3110_v8  ;;  %v3108_v25 = vadd.f32 %v3043_v23, %v12200_v20  ;;  %v8320_v26 = vcombine.low %v5313_v10, %v12263_v57  ;;  %v10111_v23 = vld [vmem:[%s10243_s26 + $0x28] sm:$0xf]  ;;  %v5332_v18 = vrot.slane %v10112_v51, 5  ;;  %v10113_v10 = vld [vmem:[%s10243_s26 + $0x34] sm:$0x1] }
 0x228   : > { %v9352_v14 = vpop.f32.mrf.mxu1  ;;  %9555 = vmatmul.mubr.msk.bf16.gmra.mxu1 %vm402_vm1, %v12511_v16  ;;  %14694 = vst [vmem:[#allocation54_spill] sm:$0xff] %v12571_v41  ;;  %v8292_v40 = vrot.slane %v10111_v23, 9  ;;  %v5336_v50 = vrot.slane %v10113_v10, 5  ;;  %v14699_v23 = vld [vmem:[#allocation3_spill] sm:$0xff] }
 0x229   : > { %v9386_v35 = vpop.f32.mrf.mxu0  ;;  %9589 = vmatmul.mubr.msk.bf16.gmra.mxu0 %vm402_vm1, %v8250_v42  ;;  %v12549_v53 = vadd.f32 %v3365_v62, %v3108_v25  ;;  %v3113_v20 = vadd.f32 %v9352_v14, %v12207_v15  ;;  %9558 = vmatprep.mubr.msk.bf16.mxu1 %vm402_vm1, %v12513_v13  ;;  %v8252_v15 = vcombine.low %v4606_v54, %v12546_v0  ;;  %v10110_v62 = vld [vmem:[%s10243_s26 + $0x24] sm:$0x1]  ;;  %v14723_v44 = vld [vmem:[#allocation11_spill] sm:$0xff] }
 0x22a   : > { %9592 = vmatprep.mubr.msk.bf16.mxu0 %vm402_vm1, %v8251_v63  ;;  %v3056_v28 = vpop.f32.mrf.mxu1  ;;  %v12563_v63 = vcombine.low %v12499_v36, %v4606_v54  ;;  %v10109_v36 = vld [vmem:[%s10243_s26 + $0x20] sm:$0xf]  ;;  %v5328_v21 = vrot.slane %v10110_v62, 5  ;;  %v14695_v54 = vld [vmem:[#allocation51_spill] sm:$0xff]  ;;  %v10116_v62 = vld [vmem:[%s10243_s26 + $0x3c] sm:$0x1] }
 0x22b   : > { %v3378_v17 = vpop.f32.mrf.mxu0  ;;  %v12558_v42 = vadd.f32 %v9386_v35, %v3113_v20  ;;  %v3111_v61 = vadd.f32 %v3056_v28, %v12223_v32  ;;  %v12575_v32 = vsel %vm10713_vm4, %v8290_v11, %v5324_v9  ;;  %v8291_v8 = vrot.slane %v10109_v36, 9  ;;  %v14696_v20 = vld [vmem:[#allocation24_spill] sm:$0xff]  ;;  %v14697_v9 = vld [vmem:[#allocation6_spill] sm:$0xff] }
 0x22c   : > { %v9353_v39 = vpop.f32.mrf.mxu1 }
 0x22d   : > { %v9387_v7 = vpop.f32.mrf.mxu0  ;;  %v12566_v47 = vadd.f32 %v3378_v17, %v3111_v61  ;;  %v3114_v12 = vadd.f32 %v9353_v39, %v12238_v5  ;;  %v12595_v17 = vcombine.low %v14696_v20, %v12575_v32  ;;  %v14698_v39 = vld [vmem:[#allocation52_spill] sm:$0xff] }
 0x22e   : > { %v3059_v45 = vpop.f32.mrf.mxu1 }
 0x22f   : > { %v3381_v43 = vpop.f32.mrf.mxu0  ;;  %v12579_v55 = vadd.f32 %v9387_v7, %v3114_v12  ;;  %v3112_v33 = vadd.f32 %v3059_v45, %v12253_v27  ;;  %v12607_v7 = vsel %vm10713_vm4, %v8292_v40, %v5332_v18  ;;  %v10114_v12 = vld [vmem:[%s10243_s26 + $0x30] sm:$0xf]  ;;  %v10115_v45 = vld [vmem:[%s10243_s26 + $0x38] sm:$0xf] }
 0x230   : > { %v9356_v25 = vpop.f32.mrf.mxu1  ;;  %9559 = vmatmul.mubr.msk.bf16.gmra.mxu1 %vm402_vm1, %v12563_v63  ;;  %v8294_v36 = vrot.slane %v10115_v45, 9  ;;  %v14703_v45 = vld [vmem:[#allocation45_spill] sm:$0xff] }
 0x231   : > { %v9390_v5 = vpop.f32.mrf.mxu0  ;;  %9593 = vmatmul.mubr.msk.bf16.gmra.mxu0 %vm402_vm1, %v8252_v15  ;;  %v12588_v35 = vadd.f32 %v3381_v43, %v3112_v33  ;;  %v3117_v14 = vadd.f32 %v9356_v25, %v12258_v31  ;;  %9598 = vmatprep.mubr.msk.bf16.mxu1 %vm402_vm1, %v14695_v54  ;;  %v12603_v31 = vsel %vm10713_vm4, %v8291_v8, %v5328_v21  ;;  %v8293_v43 = vrot.slane %v10114_v12, 9  ;;  %v10117_v21 = vld [vmem:[%s10243_s26 + $0x50] sm:$0xf] }
 0x232   : > { %9632 = vmatprep.mubr.msk.bf16.mxu0 %vm402_vm1, %v8320_v26  ;;  %v3072_v11 = vpop.f32.mrf.mxu1  ;;  %v6061_v26 = vsel %vm451_vm0, %v14698_v39, 0  ;;  %v5340_v33 = vrot.slane %v10116_v62, 5  ;;  %v8295_v25 = vrot.slane %v10117_v21, 9  ;;  %v14700_v54 = vld [vmem:[#allocation4_spill] sm:$0xff]  ;;  %v14702_v39 = vld [vmem:[#allocation13_spill] sm:$0xff]  ;;  %v14705_v21 = vld [vmem:[#allocation50_spill] sm:$0xff] }
 0x233   : > { %v3394_v27 = vpop.f32.mrf.mxu0  ;;  %v12598_v59 = vadd.f32 %v9390_v5, %v3117_v14  ;;  %v3115_v28 = vadd.f32 %v3072_v11, %v14697_v9  ;;  %v10118_v14 = vld [vmem:[%s10243_s26 + $0x54] sm:$0x1]  ;;  %v5823_v10 = vsel %vm451_vm0, %v14700_v54, 0  ;;  %v12623_v11 = vcombine.low %v12603_v31, %v12607_v7 }
 0x234   : > { %v9357_v15 = vpop.f32.mrf.mxu1  ;;  %v5344_v40 = vrot.slane %v10118_v14, 5  ;;  %v12643_v62 = vsel %vm10713_vm4, %v8294_v36, %v5340_v33  ;;  %v14708_v33 = vld [vmem:[#allocation22_spill] sm:$0xff] }
 0x235   : > { %v9391_v61 = vpop.f32.mrf.mxu0  ;;  %v12614_v5 = vadd.f32 %v3394_v27, %v3115_v28  ;;  %v3118_v51 = vadd.f32 %v9357_v15, %v14699_v23  ;;  %14701 = vst [vmem:[#allocation38_spill] sm:$0xff] %v12623_v11  ;;  %v12633_v15 = vld [vmem:[%s14181_s1 + $0x16] sm:$0x3]  ;;  %14704 = vst [vmem:[#allocation35_spill] sm:$0xff] %v12643_v62  ;;  %v12648_v23 = vld [vmem:[%s14181_s1 + $0x1c] sm:$0x3] }
 0x236   : > { %v3075_v18 = vpop.f32.mrf.mxu1 }
 0x237   : > { %v3397_v8 = vpop.f32.mrf.mxu0  ;;  %v12625_v9 = vadd.f32 %v9391_v61, %v3118_v51  ;;  %v3116_v27 = vadd.f32 %v3075_v18, %v14702_v39  ;;  %v12639_v61 = vsel %vm10713_vm4, %v8293_v43, %v5336_v50  ;;  %v5345_v50 = vsel %vm10713_vm4, %v8295_v25, %v5344_v40  ;;  %v14710_v40 = vld [vmem:[#allocation37_spill] sm:$0xff] }
 0x238   : > { %v9396_v12 = vpop.f32.mrf.mxu1  ;;  %9599 = vmatmul.mubr.msk.bf16.vlgmr.msra.gmra.mxu1 %vm402_vm1, %v14703_v45  ;;  %v12671_v39 = vcombine.low %v5345_v50, %v14710_v40  ;;  %v14718_v50 = vld [vmem:[#allocation23_spill] sm:$0xff] }
 0x239   : > { %v9430_v28 = vpop.f32.mrf.mxu0  ;;  %9633 = vmatmul.mubr.msk.bf16.vlgmr.msra.gmra.mxu0 %vm402_vm1, %v12595_v17  ;;  %v12650_v51 = vadd.f32 %v3397_v8, %v3116_v27  ;;  %v3685_v14 = vadd.f32 %v9396_v12, %v14705_v21  ;;  %9665 = vmatpush3.bf16.msra.mxu1 %v5823_v10  ;;  %v12666_v10 = vcombine.low %v12639_v61, %v12643_v62  ;;  %v14713_v12 = vld [vmem:[#allocation18_spill] sm:$0xff] }
 0x23a   : > { %9699 = vmatpush3.bf16.msra.mxu0 %v6061_v26  ;;  %v14706_v26 = vld [vmem:[#allocation56_spill] sm:$0xff]  ;;  %v3556_v43 = vpop.f32.mrf.mxu1  ;;  %9636 = vmatprep.mubr.msk.bf16.mxu0 %vm402_vm1, %v12623_v11  ;;  %14711 = vst [vmem:[#allocation55_spill] sm:$0xff] %v12671_v39 }
 0x23b   : > { %v3890_v18 = vpop.f32.mrf.mxu0  ;;  %9602 = vmatprep.mubr.msk.bf16.mxu1 %vm402_vm1, %v14706_v26  ;;  %9960 = vmatprep.subr.msk.bf16.mxu1 %vm451_vm0, %v12633_v15  ;;  %v12661_v36 = vadd.f32 %v9430_v28, %v3685_v14  ;;  %v3683_v8 = vadd.f32 %v3556_v43, %v14708_v33  ;;  %14709 = vst [vmem:[#allocation49_spill] sm:$0xff] %v12666_v10  ;;  %v14715_v26 = vld [vmem:[#allocation14_spill] sm:$0xff] }
 0x23c   : > { %9961 = vmatprep.subr.msk.bf16.mxu0 %vm451_vm0, %v12648_v23  ;;  %v9397_v25 = vpop.f32.mrf.mxu1 }
 0x23d   : > { %14707 = vst [vmem:[#allocation46_spill] sm:$0xff] %v12661_v36  ;;  %v9431_v54 = vpop.f32.mrf.mxu0  ;;  %v12673_v27 = vadd.f32 %v3890_v18, %v3683_v8  ;;  %v3686_v45 = vadd.f32 %v9397_v25, %v14713_v12  ;;  %v14719_v25 = vld [vmem:[#allocation40_spill] sm:$0xff] }
 0x23e   : > { %v3559_v21 = vpop.f32.mrf.mxu1  ;;  %v14728_v36 = vld [vmem:[#allocation20_spill] sm:$0xff] }
 0x23f   : > { %14712 = vst [vmem:[#allocation57_spill] sm:$0xff] %v12673_v27  ;;  %v3893_v28 = vpop.f32.mrf.mxu0  ;;  %v12676_v14 = vadd.f32 %v9431_v54, %v3686_v45  ;;  %v3684_v43 = vadd.f32 %v3559_v21, %v14715_v26  ;;  %v14721_v45 = vld [vmem:[#allocation48_spill] sm:$0xff]  ;;  %v10122_v27 = vld [vmem:[%s10243_s26 + $0xa4] sm:$0x1] }
 0x240   : > { %v9400_v41 = vpop.f32.mrf.mxu1  ;;  %9603 = vmatmul.mubr.msk.bf16.gmra.mxu1 %vm402_vm1, %v14716_v56  ;;  %v14722_v56 = vld [vmem:[#allocation30_spill] sm:$0xff] }
 0x241   : > { %14714 = vst [vmem:[#allocation31_spill] sm:$0xff] %v12676_v14  ;;  %v9434_v33 = vpop.f32.mrf.mxu0  ;;  %9637 = vmatmul.mubr.msk.bf16.gmra.mxu0 %vm402_vm1, %v12666_v10  ;;  %v12685_v18 = vadd.f32 %v3893_v28, %v3684_v43  ;;  %v3689_v8 = vadd.f32 %v9400_v41, %v14718_v50  ;;  %9606 = vmatprep.mubr.msk.bf16.mxu1 %vm402_vm1, %v14719_v25  ;;  %v14724_v43 = vld [vmem:[#allocation2_spill] sm:$0xff]  ;;  %v10119_v50 = vld [vmem:[%s10243_s26 + $0x88] sm:$0xf]  ;;  %v10120_v14 = vld [vmem:[%s10243_s26 + $0x8c] sm:$0x1] }
 0x242   : > { %9640 = vmatprep.mubr.msk.bf16.mxu0 %vm402_vm1, %v12671_v39  ;;  %v3572_v40 = vpop.f32.mrf.mxu1  ;;  %v12695_v38 = vcombine.low %v14723_v44, %v14722_v56  ;;  %v14725_v39 = vld [vmem:[#allocation16_spill] sm:$0xff]  ;;  %v5372_v25 = vrot.slane %v10120_v14, 5  ;;  %v5376_v10 = vrot.slane %v10122_v27, 5  ;;  %v14729_v14 = vld [vmem:[#allocation10_spill] sm:$0xff] }
 0x243   : > { %14717 = vst [vmem:[#allocation27_spill] sm:$0xff] %v12685_v18  ;;  %v3906_v54 = vpop.f32.mrf.mxu0  ;;  %v12690_v12 = vadd.f32 %v9434_v33, %v3689_v8  ;;  %v3687_v21 = vadd.f32 %v3572_v40, %v14721_v45  ;;  %v12699_v41 = vcombine.low %v14725_v39, %v14724_v43  ;;  %v8302_v18 = vrot.slane %v10119_v50, 9  ;;  %v14727_v33 = vld [vmem:[#allocation44_spill] sm:$0xff]  ;;  %v10121_v40 = vld [vmem:[%s10243_s26 + $0xa0] sm:$0xf] }
 0x244   : > { %v9401_v28 = vpop.f32.mrf.mxu1  ;;  %v8303_v45 = vrot.slane %v10121_v40, 9  ;;  %v14732_v40 = vld [vmem:[#allocation33_spill] sm:$0xff] }
 0x245   : > { %14720 = vst [vmem:[#allocation51_spill] sm:$0xff] %v12690_v12  ;;  %v9435_v26 = vpop.f32.mrf.mxu0  ;;  %14726 = vst [vmem:[#allocation24_spill] sm:$0xff] %v12699_v41  ;;  %v12703_v62 = vadd.f32 %v3906_v54, %v3687_v21  ;;  %v3690_v8 = vadd.f32 %v9401_v28, %v14727_v33  ;;  %v12719_v54 = vsel %vm10713_vm4, %v8302_v18, %v5372_v25  ;;  %v14730_v21 = vld [vmem:[#allocation58_spill] sm:$0xff]  ;;  %v14731_v28 = vld [vmem:[#allocation5_spill] sm:$0xff] }
 0x246   : > { %v3575_v44 = vpop.f32.mrf.mxu1  ;;  %v5377_v50 = vsel %vm10713_vm4, %v8303_v45, %v5376_v10  ;;  %v14733_v18 = vld [vmem:[#allocation17_spill] sm:$0xff] }
 0x247   : > { %v3909_v12 = vpop.f32.mrf.mxu0  ;;  %v12708_v56 = vadd.f32 %v9435_v26, %v3690_v8  ;;  %v3688_v11 = vadd.f32 %v3575_v44, %v14728_v36  ;;  %v12733_v25 = vcombine.low %v14733_v18, %v12719_v54  ;;  %v14737_v18 = vld [vmem:[#allocation15_spill] sm:$0xff] }
 0x248   : > { %v9404_v43 = vpop.f32.mrf.mxu1  ;;  %9607 = vmatmul.mubr.msk.bf16.gmra.mxu1 %vm402_vm1, %v14729_v14 }
 0x249   : > { %v9438_v39 = vpop.f32.mrf.mxu0  ;;  %9641 = vmatmul.mubr.msk.bf16.gmra.mxu0 %vm402_vm1, %v12695_v38  ;;  %v12721_v27 = vadd.f32 %v3909_v12, %v3688_v11  ;;  %v3693_v26 = vadd.f32 %v9404_v43, %v14730_v21  ;;  %9610 = vmatprep.mubr.msk.bf16.mxu1 %vm402_vm1, %v14731_v28  ;;  %v12736_v12 = vcombine.low %v5377_v50, %v12437_v52  ;;  %v14735_v21 = vld [vmem:[#allocation47_spill] sm:$0xff] }
 0x24a   : > { %9644 = vmatprep.mubr.msk.bf16.mxu0 %vm402_vm1, %v12699_v41  ;;  %v3588_v33 = vpop.f32.mrf.mxu1 }
 0x24b   : > { %v3922_v36 = vpop.f32.mrf.mxu0  ;;  %v12728_v8 = vadd.f32 %v9438_v39, %v3693_v26  ;;  %v3691_v44 = vadd.f32 %v3588_v33, %v14732_v40  ;;  %14734 = vst [vmem:[#allocation6_spill] sm:$0xff] %v12736_v12  ;;  %v14736_v39 = vld [vmem:[#allocation28_spill] sm:$0xff] }
 0x24c   : > { %v9405_v11 = vpop.f32.mrf.mxu1 }
 0x24d   : > { %v9439_v14 = vpop.f32.mrf.mxu0  ;;  %v12738_v43 = vadd.f32 %v3922_v36, %v3691_v44  ;;  %v3694_v28 = vadd.f32 %v9405_v11, %v14735_v21 }
 0x24e   : > { %v3591_v10 = vpop.f32.mrf.mxu1 }
 0x24f   : > { %v3925_v41 = vpop.f32.mrf.mxu0  ;;  %v12741_v45 = vadd.f32 %v9439_v14, %v3694_v28  ;;  %v3692_v26 = vadd.f32 %v3591_v10, %v14736_v39 }
 0x250   : > { %v9408_v40 = vpop.f32.mrf.mxu1  ;;  %9611 = vmatmul.mubr.msk.bf16.gmra.mxu1 %vm402_vm1, %v14737_v18 }
 0x251   : > { %v9442_v33 = vpop.f32.mrf.mxu0  ;;  %9645 = vmatmul.mubr.msk.bf16.gmra.mxu0 %vm402_vm1, %v12733_v25  ;;  %v12750_v52 = vadd.f32 %v3925_v41, %v3692_v26  ;;  %v3697_v36 = vadd.f32 %v9408_v40, %v12427_v19  ;;  %9614 = vmatprep.mubr.msk.bf16.mxu1 %vm402_vm1, %v11890_v6  ;;  %v10123_v26 = vld [vmem:[%s10243_s26 + $0xf0] sm:$0xf]  ;;  %v10124_v19 = vld [vmem:[%s10243_s26 + $0xf4] sm:$0x1] }
 0x252   : > { %9648 = vmatprep.mubr.msk.bf16.mxu0 %vm402_vm1, %v12736_v12  ;;  %v3604_v44 = vpop.f32.mrf.mxu1  ;;  %v8311_v18 = vrot.slane %v10123_v26, 9  ;;  %v5408_v40 = vrot.slane %v10124_v19, 5 }
 0x253   : > { %14738 = vst [vmem:[#allocation52_spill] sm:$0xff] %v12750_v52  ;;  %v3938_v50 = vpop.f32.mrf.mxu0  ;;  %v12755_v14 = vadd.f32 %v9442_v33, %v3697_v36  ;;  %v3695_v11 = vadd.f32 %v3604_v44, %v12439_v48  ;;  %v14740_v36 = vld [vmem:[#allocation8_spill] sm:$0xff]  ;;  %v10125_v48 = vld [vmem:[%s10243_s26 + $0x1d8] sm:$0xf] }
 0x254   : > { %v9409_v28 = vpop.f32.mrf.mxu1  ;;  %v5059_v44 = vshrl.u32 %v10125_v48, 16 }
 0x255   : > { %v9443_v21 = vpop.f32.mrf.mxu0  ;;  %v12758_v10 = vadd.f32 %v3938_v50, %v3695_v11  ;;  %v3698_v39 = vadd.f32 %v9409_v28, %v12451_v49  ;;  %v14741_v49 = vld [vmem:[#allocation59_spill] sm:$0xff]  ;;  %v5062_v11 = vshll.u32 %v10125_v48, 16 }
 0x256   : > { %v3607_v12 = vpop.f32.mrf.mxu1 }
 0x257   : > { %v3941_v41 = vpop.f32.mrf.mxu0  ;;  %v12763_v52 = vadd.f32 %v9443_v21, %v3698_v39  ;;  %v3696_v6 = vadd.f32 %v3607_v12, %v12461_v29  ;;  %v5409_v12 = vsel %vm10713_vm4, %v8311_v18, %v5408_v40 }
 0x258   : > { %v9412_v50 = vpop.f32.mrf.mxu1  ;;  %9615 = vmatmul.mubr.msk.bf16.gmra.mxu1 %vm402_vm1, %v11894_v3 }
 0x259   : > { %14739 = vst [vmem:[#allocation3_spill] sm:$0xff] %v12763_v52  ;;  %v9446_v33 = vpop.f32.mrf.mxu0  ;;  %9649 = vmatmul.mubr.msk.bf16.gmra.mxu0 %vm402_vm1, %v14740_v36  ;;  %v12773_v28 = vadd.f32 %v3941_v41, %v3696_v6  ;;  %v3701_v21 = vadd.f32 %v9412_v50, %v12466_v2  ;;  %9618 = vmatprep.mubr.msk.bf16.mxu1 %vm402_vm1, %v11926_v37  ;;  %v5061_v50 = vrot.slane %v5059_v44, 4  ;;  %v5064_v37 = vrot.slane %v5062_v11, 5  ;;  %v318_v52 = vld [vmem:[%s10243_s26 + $0x1dc] sm:$0x1] }
 0x25a   : > { %9652 = vmatprep.mubr.msk.bf16.mxu0 %vm402_vm1, %v14741_v49  ;;  %v3620_v39 = vpop.f32.mrf.mxu1  ;;  %v12784_v41 = vcombine.low %v5409_v12, %v12522_v24  ;;  %v14745_v24 = vld [vmem:[#allocation42_spill] sm:$0xff]  ;;  %v5068_v11 = vshll.u32 %v318_v52, 16 }
 0x25b   : > { %14742 = vst [vmem:[#allocation4_spill] sm:$0xff] %v12773_v28  ;;  %v3954_v29 = vpop.f32.mrf.mxu0  ;;  %v12780_v26 = vadd.f32 %v9446_v33, %v3701_v21  ;;  %v3699_v3 = vadd.f32 %v3620_v39, %v12472_v22  ;;  %v14744_v22 = vld [vmem:[#allocation26_spill] sm:$0xff] }
 0x25c   : > { %v9413_v49 = vpop.f32.mrf.mxu1  ;;  %14743 = vst [vmem:[#allocation13_spill] sm:$0xff] %v12784_v41 }
 0x25d   : > { %v9447_v19 = vpop.f32.mrf.mxu0  ;;  %v12786_v6 = vadd.f32 %v3954_v29, %v3699_v3  ;;  %v3702_v2 = vadd.f32 %v9413_v49, %v12492_v58 }
 0x25e   : > { %v3623_v28 = vpop.f32.mrf.mxu1 }
 0x25f   : > { %v3957_v48 = vpop.f32.mrf.mxu0  ;;  %v12790_v18 = vadd.f32 %v9447_v19, %v3702_v2  ;;  %v3700_v40 = vadd.f32 %v3623_v28, %v12506_v60  ;;  %v5065_v60 = vor.u32 %v5064_v37, %v5061_v50  ;;  %v14746_v50 = vld [vmem:[#allocation29_spill] sm:$0xff] }
 0x260   : > { %v9416_v21 = vpop.f32.mrf.mxu1  ;;  %9619 = vmatmul.mubr.msk.bf16.gmra.mxu1 %vm402_vm1, %v14745_v24 }
 0x261   : > { %v9450_v33 = vpop.f32.mrf.mxu0  ;;  %9653 = vmatmul.mubr.msk.bf16.gmra.mxu0 %vm402_vm1, %v14744_v22  ;;  %v12799_v58 = vadd.f32 %v3957_v48, %v3700_v40  ;;  %v3705_v44 = vadd.f32 %v9416_v21, %v12515_v34  ;;  %9622 = vmatprep.mubr.msk.bf16.mxu1 %vm402_vm1, %v12511_v16  ;;  %v5066_v40 = vrot.slane %v5065_v60, 4  ;;  %v5070_v34 = vrot.slane %v5068_v11, 5 }
 0x262   : > { %9656 = vmatprep.mubr.msk.bf16.mxu0 %vm402_vm1, %v12784_v41  ;;  %v3636_v28 = vpop.f32.mrf.mxu1 }
 0x263   : > { %v3970_v49 = vpop.f32.mrf.mxu0  ;;  %v12804_v29 = vadd.f32 %v9450_v33, %v3705_v44  ;;  %v3703_v12 = vadd.f32 %v3636_v28, %v12524_v46  ;;  %v14747_v46 = vld [vmem:[#allocation9_spill] sm:$0xff] }
 0x264   : > { %v9417_v3 = vpop.f32.mrf.mxu1 }
 0x265   : > { %v9451_v39 = vpop.f32.mrf.mxu0  ;;  %v12807_v19 = vadd.f32 %v3970_v49, %v3703_v12  ;;  %v3706_v2 = vadd.f32 %v9417_v3, %v12536_v30 }
 0x266   : > { %v3639_v21 = vpop.f32.mrf.mxu1 }
 0x267   : > { %v3973_v48 = vpop.f32.mrf.mxu0  ;;  %v12810_v24 = vadd.f32 %v9451_v39, %v3706_v2  ;;  %v3704_v16 = vadd.f32 %v3639_v21, %v12549_v53  ;;  %v5071_v53 = vsel %vm10957_vm7, %v5066_v40, %v5070_v34  ;;  %v14748_v40 = vld [vmem:[#allocation43_spill] sm:$0xff] }
 0x268   : > { %v9420_v37 = vpop.f32.mrf.mxu1  ;;  %9623 = vmatmul.mubr.msk.bf16.gmra.mxu1 %vm402_vm1, %v12513_v13  ;;  %v8270_v12 = vcombine.low %v12546_v0, %v5071_v53 }
 0x269   : > { %v9454_v52 = vpop.f32.mrf.mxu0  ;;  %9657 = vmatmul.mubr.msk.bf16.gmra.mxu0 %vm402_vm1, %v14746_v50  ;;  %v12819_v30 = vadd.f32 %v3973_v48, %v3704_v16  ;;  %v3709_v33 = vadd.f32 %v9420_v37, %v12558_v42  ;;  %9626 = vmatprep.mubr.msk.bf16.mxu1 %vm402_vm1, %v12563_v63  ;;  %v10126_v16 = vld [vmem:[%s10243_s26 + $0x48] sm:$0xf] }
 0x26a   : > { %9660 = vmatprep.mubr.msk.bf16.mxu0 %vm402_vm1, %v14747_v46  ;;  %v3652_v49 = vpop.f32.mrf.mxu1 }
 0x26b   : > { %v3986_v44 = vpop.f32.mrf.mxu0  ;;  %v12826_v60 = vadd.f32 %v9454_v52, %v3709_v33  ;;  %v3707_v11 = vadd.f32 %v3652_v49, %v12566_v47  ;;  %v8389_v52 = vrot.slane %v10126_v16, 9  ;;  %v10127_v49 = vld [vmem:[%s10243_s26 + $0x40] sm:$0xf]  ;;  %v14752_v16 = vld [vmem:[#allocation49_spill] sm:$0xff] }
 0x26c   : > { %v9421_v28 = vpop.f32.mrf.mxu1 }
 0x26d   : > { %v9455_v13 = vpop.f32.mrf.mxu0  ;;  %v12830_v39 = vadd.f32 %v3986_v44, %v3707_v11  ;;  %v3710_v42 = vadd.f32 %v9421_v28, %v12579_v55  ;;  %v10128_v11 = vld [vmem:[%s10243_s26 + $0x44] sm:$0x1]  ;;  %v10129_v28 = vld [vmem:[%s10243_s26 + $0x4c] sm:$0x1] }
 0x26e   : > { %v3655_v2 = vpop.f32.mrf.mxu1 }
 0x26f   : > { %v3989_v3 = vpop.f32.mrf.mxu0  ;;  %v12833_v63 = vadd.f32 %v9455_v13, %v3710_v42  ;;  %v3708_v4 = vadd.f32 %v3655_v2, %v12588_v35  ;;  %v14749_v35 = vcombine.low %v12263_v57, %v14696_v20  ;;  %v5738_v13 = vrot.slane %v10128_v11, 5 }
 0x270   : > { %v9424_v47 = vpop.f32.mrf.mxu1  ;;  %9627 = vmatmul.mubr.msk.bf16.gmra.mxu1 %vm402_vm1, %v8270_v12  ;;  %v6024_v57 = vrot.slane %v10129_v28, 5  ;;  %v14755_v28 = vld [vmem:[#allocation31_spill] sm:$0xff] }
 0x271   : > { %v9458_v48 = vpop.f32.mrf.mxu0  ;;  %9661 = vmatmul.mubr.msk.bf16.gmra.mxu0 %vm402_vm1, %v14748_v40  ;;  %v12841_v0 = vadd.f32 %v3989_v3, %v3708_v4  ;;  %v3713_v55 = vadd.f32 %v9424_v47, %v12598_v59  ;;  %9666 = vmatprep.mubr.msk.bf16.mxu1 %vm402_vm1, %v14749_v35  ;;  %v8352_v59 = vrot.slane %v10127_v49, 9  ;;  %v6543_v3 = vsel %vm451_vm0, %v12648_v23, 0  ;;  %v14750_v47 = vld [vmem:[#allocation38_spill] sm:$0xff] }
 0x272   : > { %9700 = vmatprep.mubr.msk.bf16.mxu0 %vm402_vm1, %v12595_v17  ;;  %v3668_v21 = vpop.f32.mrf.mxu1  ;;  %v8358_v17 = vcombine.low %v12575_v32, %v12603_v31  ;;  %v6323_v32 = vsel %vm451_vm0, %v12633_v15, 0  ;;  %v6025_v15 = vsel %vm10713_vm4, %v8389_v52, %v6024_v57 }
 0x273   : > { %v4002_v34 = vpop.f32.mrf.mxu0  ;;  %v12849_v37 = vadd.f32 %v9458_v48, %v3713_v55  ;;  %v3711_v33 = vadd.f32 %v3668_v21, %v12614_v5  ;;  %v8359_v5 = vcombine.low %v12607_v7, %v12639_v61  ;;  %v5739_v7 = vsel %vm10713_vm4, %v8352_v59, %v5738_v13  ;;  %v12884_v61 = vld [vmem:[%s14181_s1 + $0x28] sm:$0x3]  ;;  %v14751_v55 = vld [vmem:[#allocation46_spill] sm:$0xff] }
 0x274   : > { %v9425_v53 = vpop.f32.mrf.mxu1  ;;  %v14754_v59 = vld [vmem:[#allocation35_spill] sm:$0xff] }
 0x275   : > { %v9459_v44 = vpop.f32.mrf.mxu0  ;;  %v12857_v20 = vadd.f32 %v4002_v34, %v3711_v33  ;;  %v3714_v12 = vadd.f32 %v9425_v53, %v12625_v9  ;;  %v12874_v9 = vld [vmem:[%s14181_s1 + $0x22] sm:$0x3]  ;;  %v14753_v33 = vld [vmem:[#allocation57_spill] sm:$0xff]  ;;  %v8394_v53 = vcombine.low %v5739_v7, %v6025_v15  ;;  %v8360_v11 = vcombine.low %v14754_v59, %v5739_v7  ;;  %v14758_v15 = vld [vmem:[#allocation39_spill] sm:$0xff] }
 0x276   : > { %v3671_v2 = vpop.f32.mrf.mxu1 }
 0x277   : > { %v4005_v42 = vpop.f32.mrf.mxu0  ;;  %v12866_v31 = vadd.f32 %v9459_v44, %v3714_v12  ;;  %v3712_v4 = vadd.f32 %v3671_v2, %v12650_v51 }
 0x278   : > { %v9464_v23 = vpop.f32.mrf.mxu1  ;;  %9667 = vmatmul.mubr.msk.bf16.vlgmr.msra.gmra.mxu1 %vm402_vm1, %v8358_v17 }
 0x279   : > { %v9498_v48 = vpop.f32.mrf.mxu0  ;;  %9701 = vmatmul.mubr.msk.bf16.vlgmr.msra.gmra.mxu0 %vm402_vm1, %v14750_v47  ;;  %v12886_v51 = vadd.f32 %v4005_v42, %v3712_v4  ;;  %v4248_v34 = vadd.f32 %v9464_v23, %v14751_v55  ;;  %9733 = vmatpush3.bf16.msra.mxu1 %v6323_v32  ;;  %v14757_v47 = vld [vmem:[#allocation51_spill] sm:$0xff] }
 0x27a   : > { %9767 = vmatpush3.bf16.msra.mxu0 %v6543_v3  ;;  %9670 = vmatprep.mubr.msk.bf16.mxu1 %vm402_vm1, %v8359_v5  ;;  %v4119_v21 = vpop.f32.mrf.mxu1  ;;  %v14756_v5 = vld [vmem:[#allocation27_spill] sm:$0xff] }
 0x27b   : > { %v4336_v35 = vpop.f32.mrf.mxu0  ;;  %9704 = vmatprep.mubr.msk.bf16.mxu0 %vm402_vm1, %v14752_v16  ;;  %9962 = vmatprep.subr.msk.bf16.mxu1 %vm451_vm0, %v12874_v9  ;;  %v12894_v52 = vadd.f32 %v9498_v48, %v4248_v34  ;;  %v4246_v44 = vadd.f32 %v4119_v21, %v14753_v33  ;;  %v10130_v16 = vld [vmem:[%s10243_s26 + $0x98] sm:$0xf] }
 0x27c   : > { %9963 = vmatprep.subr.msk.bf16.mxu0 %vm451_vm0, %v12884_v61  ;;  %v9465_v49 = vpop.f32.mrf.mxu1  ;;  %v8390_v33 = vrot.slane %v10130_v16, 9 }
 0x27d   : > { %v9499_v17 = vpop.f32.mrf.mxu0  ;;  %v12900_v13 = vadd.f32 %v4336_v35, %v4246_v44  ;;  %v4249_v57 = vadd.f32 %v9465_v49, %v14755_v28  ;;  %v10132_v49 = vld [vmem:[%s10243_s26 + $0x94] sm:$0x1] }
 0x27e   : > { %v4122_v42 = vpop.f32.mrf.mxu1  ;;  %v5742_v59 = vrot.slane %v10132_v49, 5 }
 0x27f   : > { %v4339_v12 = vpop.f32.mrf.mxu0  ;;  %v12903_v3 = vadd.f32 %v9499_v17, %v4249_v57  ;;  %v4247_v2 = vadd.f32 %v4122_v42, %v14756_v5  ;;  %v10131_v17 = vld [vmem:[%s10243_s26 + $0x90] sm:$0xf] }
 0x280   : > { %v9468_v4 = vpop.f32.mrf.mxu1  ;;  %9671 = vmatmul.mubr.msk.bf16.gmra.mxu1 %vm402_vm1, %v8360_v11  ;;  %v10133_v11 = vld [vmem:[%s10243_s26 + $0x9c] sm:$0x1] }
 0x281   : > { %v9502_v32 = vpop.f32.mrf.mxu0  ;;  %9705 = vmatmul.mubr.msk.bf16.gmra.mxu0 %vm402_vm1, %v8394_v53  ;;  %v12910_v48 = vadd.f32 %v4339_v12, %v4247_v2  ;;  %v4252_v23 = vadd.f32 %v9468_v4, %v14757_v47  ;;  %9674 = vmatprep.mubr.msk.bf16.mxu1 %vm402_vm1, %v14758_v15  ;;  %v8353_v53 = vrot.slane %v10131_v17, 9  ;;  %v6028_v28 = vrot.slane %v10133_v11, 5  ;;  %v14759_v4 = vld [vmem:[#allocation24_spill] sm:$0xff] }
 0x282   : > { %9708 = vmatprep.mubr.msk.bf16.mxu0 %vm402_vm1, %v12695_v38  ;;  %v4135_v55 = vpop.f32.mrf.mxu1 }
 0x283   : > { %v4352_v7 = vpop.f32.mrf.mxu0  ;;  %v12915_v34 = vadd.f32 %v9502_v32, %v4252_v23  ;;  %v4250_v35 = vadd.f32 %v4135_v55, %v12703_v62  ;;  %v14760_v23 = vld [vmem:[#allocation34_spill] sm:$0xff] }
 0x284   : > { %v9469_v44 = vpop.f32.mrf.mxu1 }
 0x285   : > { %v9503_v21 = vpop.f32.mrf.mxu0  ;;  %v12922_v57 = vadd.f32 %v4352_v7, %v4250_v35  ;;  %v4253_v12 = vadd.f32 %v9469_v44, %v12708_v56  ;;  %v5743_v56 = vsel %vm10713_vm4, %v8353_v53, %v5742_v59  ;;  %v6029_v7 = vsel %vm10713_vm4, %v8390_v33, %v6028_v28 }
 0x286   : > { %v4138_v5 = vpop.f32.mrf.mxu1  ;;  %v12946_v11 = vcombine.low %v5743_v56, %v6029_v7  ;;  %v12949_v59 = vcombine.low %v12719_v54, %v5743_v56  ;;  %v14766_v56 = vld [vmem:[#allocation7_spill] sm:$0xff] }
 0x287   : > { %v4355_v42 = vpop.f32.mrf.mxu0  ;;  %v12925_v2 = vadd.f32 %v9503_v21, %v4253_v12  ;;  %v4251_v62 = vadd.f32 %v4138_v5, %v12721_v27  ;;  %v14761_v21 = vld [vmem:[#allocation19_spill] sm:$0xff]  ;;  %v14764_v5 = vld [vmem:[#allocation52_spill] sm:$0xff] }
 0x288   : > { %v9472_v47 = vpop.f32.mrf.mxu1  ;;  %9675 = vmatmul.mubr.msk.bf16.gmra.mxu1 %vm402_vm1, %v14760_v23  ;;  %14762 = vst [vmem:[#allocation45_spill] sm:$0xff] %v12946_v11 }
 0x289   : > { %v9506_v32 = vpop.f32.mrf.mxu0  ;;  %9709 = vmatmul.mubr.msk.bf16.gmra.mxu0 %vm402_vm1, %v14759_v4  ;;  %v12938_v55 = vadd.f32 %v4355_v42, %v4251_v62  ;;  %v4256_v27 = vadd.f32 %v9472_v47, %v12728_v8  ;;  %9678 = vmatprep.mubr.msk.bf16.mxu1 %vm402_vm1, %v14761_v21 }
 0x28a   : > { %9712 = vmatprep.mubr.msk.bf16.mxu0 %vm402_vm1, %v12733_v25  ;;  %v4151_v16 = vpop.f32.mrf.mxu1 }
 0x28b   : > { %v4368_v35 = vpop.f32.mrf.mxu0  ;;  %v12943_v44 = vadd.f32 %v9506_v32, %v4256_v27  ;;  %v4254_v17 = vadd.f32 %v4151_v16, %v12738_v43 }
 0x28c   : > { %v9473_v53 = vpop.f32.mrf.mxu1 }
 0x28d   : > { %v9507_v49 = vpop.f32.mrf.mxu0  ;;  %v12951_v33 = vadd.f32 %v4368_v35, %v4254_v17  ;;  %v4257_v8 = vadd.f32 %v9473_v53, %v12741_v45  ;;  %v10134_v17 = vld [vmem:[%s10243_s26 + $0xe8] sm:$0xf] }
 0x28e   : > { %v4154_v12 = vpop.f32.mrf.mxu1 }
 0x28f   : > { %v4371_v28 = vpop.f32.mrf.mxu0  ;;  %v12954_v42 = vadd.f32 %v9507_v49, %v4257_v8  ;;  %v4255_v62 = vadd.f32 %v4154_v12, %v14764_v5  ;;  %v8391_v49 = vrot.slane %v10134_v17, 9  ;;  %v10135_v8 = vld [vmem:[%s10243_s26 + $0xe0] sm:$0xf]  ;;  %v10136_v5 = vld [vmem:[%s10243_s26 + $0xe4] sm:$0x1] }
 0x290   : > { %v9476_v43 = vpop.f32.mrf.mxu1  ;;  %9679 = vmatmul.mubr.msk.bf16.gmra.mxu1 %vm402_vm1, %v12949_v59  ;;  %v8354_v12 = vrot.slane %v10135_v8, 9  ;;  %v14773_v8 = vld [vmem:[#allocation53_spill] sm:$0xff] }
 0x291   : > { %14763 = vst [vmem:[#allocation50_spill] sm:$0xff] %v12954_v42  ;;  %v9510_v32 = vpop.f32.mrf.mxu0  ;;  %9713 = vmatmul.mubr.msk.bf16.gmra.mxu0 %vm402_vm1, %v12946_v11  ;;  %v12963_v54 = vadd.f32 %v4371_v28, %v4255_v62  ;;  %v4260_v45 = vadd.f32 %v9476_v43, %v12755_v14  ;;  %9682 = vmatprep.mubr.msk.bf16.mxu1 %vm402_vm1, %v14766_v56  ;;  %v5746_v28 = vrot.slane %v10136_v5, 5  ;;  %v10137_v62 = vld [vmem:[%s10243_s26 + $0xec] sm:$0x1] }
 0x292   : > { %9716 = vmatprep.mubr.msk.bf16.mxu0 %vm402_vm1, %v14740_v36  ;;  %v4167_v7 = vpop.f32.mrf.mxu1  ;;  %v6032_v11 = vrot.slane %v10137_v62, 5  ;;  %v14769_v43 = vld [vmem:[#allocation3_spill] sm:$0xff] }
 0x293   : > { %14765 = vst [vmem:[#allocation56_spill] sm:$0xff] %v12963_v54  ;;  %v4384_v47 = vpop.f32.mrf.mxu0  ;;  %v12968_v27 = vadd.f32 %v9510_v32, %v4260_v45  ;;  %v4258_v35 = vadd.f32 %v4167_v7, %v12758_v10  ;;  %v14771_v45 = vld [vmem:[#allocation4_spill] sm:$0xff] }
 0x294   : > { %v9477_v53 = vpop.f32.mrf.mxu1 }
 0x295   : > { %14767 = vst [vmem:[#allocation22_spill] sm:$0xff] %v12968_v27  ;;  %v9511_v16 = vpop.f32.mrf.mxu0  ;;  %v12975_v14 = vadd.f32 %v4384_v47, %v4258_v35  ;;  %v4261_v41 = vadd.f32 %v9477_v53, %v14769_v43  ;;  %v14772_v27 = vld [vmem:[#allocation59_spill] sm:$0xff]  ;;  %v5747_v47 = vsel %vm10713_vm4, %v8354_v12, %v5746_v28  ;;  %v14774_v53 = vld [vmem:[#allocation21_spill] sm:$0xff]  ;;  %v14777_v28 = vld [vmem:[#allocation36_spill] sm:$0xff] }
 0x296   : > { %v4170_v42 = vpop.f32.mrf.mxu1 }
 0x297   : > { %14768 = vst [vmem:[#allocation37_spill] sm:$0xff] %v12975_v14  ;;  %v4387_v54 = vpop.f32.mrf.mxu0  ;;  %v12978_v32 = vadd.f32 %v9511_v16, %v4261_v41  ;;  %v4259_v10 = vadd.f32 %v4170_v42, %v14771_v45  ;;  %v6033_v41 = vsel %vm10713_vm4, %v8391_v49, %v6032_v11  ;;  %v13002_v14 = vcombine.low %v14777_v28, %v5747_v47  ;;  %v10139_v28 = vld [vmem:[%s10243_s26 + $0x134] sm:$0x1] }
 0x298   : > { %v9480_v17 = vpop.f32.mrf.mxu1  ;;  %9683 = vmatmul.mubr.msk.bf16.gmra.mxu1 %vm402_vm1, %v14773_v8 }
 0x299   : > { %14770 = vst [vmem:[#allocation18_spill] sm:$0xff] %v12978_v32  ;;  %v9514_v7 = vpop.f32.mrf.mxu0  ;;  %9717 = vmatmul.mubr.msk.bf16.gmra.mxu0 %vm402_vm1, %v14772_v27  ;;  %v12991_v35 = vadd.f32 %v4387_v54, %v4259_v10  ;;  %v4264_v42 = vadd.f32 %v9480_v17, %v12780_v26  ;;  %9686 = vmatprep.mubr.msk.bf16.mxu1 %vm402_vm1, %v14774_v53  ;;  %14778 = vst [vmem:[#allocation23_spill] sm:$0xff] %v13002_v14 }
 0x29a   : > { %9720 = vmatprep.mubr.msk.bf16.mxu0 %vm402_vm1, %v14744_v22  ;;  %v4183_v5 = vpop.f32.mrf.mxu1  ;;  %v12999_v32 = vcombine.low %v5747_v47, %v6033_v41 }
 0x29b   : > { %v4400_v16 = vpop.f32.mrf.mxu0  ;;  %v12996_v62 = vadd.f32 %v9514_v7, %v4264_v42  ;;  %v4262_v43 = vadd.f32 %v4183_v5, %v12786_v6 }
 0x29c   : > { %14776 = vst [vmem:[#allocation25_spill] sm:$0xff] %v12999_v32  ;;  %v9481_v12 = vpop.f32.mrf.mxu1 }
 0x29d   : > { %14775 = vst [vmem:[#allocation14_spill] sm:$0xff] %v12996_v62  ;;  %v9515_v45 = vpop.f32.mrf.mxu0  ;;  %v13004_v11 = vadd.f32 %v4400_v16, %v4262_v43  ;;  %v4265_v26 = vadd.f32 %v9481_v12, %v12790_v18  ;;  %v10149_v62 = vld [vmem:[%s10243_s26 + $0x1b4] sm:$0x1] }
 0x29e   : > { %v4186_v49 = vpop.f32.mrf.mxu1 }
 0x29f   : > { %14779 = vst [vmem:[#allocation40_spill] sm:$0xff] %v13004_v11  ;;  %v4403_v54 = vpop.f32.mrf.mxu0  ;;  %v13007_v10 = vadd.f32 %v9515_v45, %v4265_v26  ;;  %v4263_v7 = vadd.f32 %v4186_v49, %v12799_v58  ;;  %v14782_v58 = vld [vmem:[#allocation41_spill] sm:$0xff]  ;;  %v10138_v45 = vld [vmem:[%s10243_s26 + $0x130] sm:$0xf]  ;;  %v5750_v26 = vrot.slane %v10139_v28, 5 }
 0x2a0   : > { %v9484_v17 = vpop.f32.mrf.mxu1  ;;  %9687 = vmatmul.mubr.msk.bf16.gmra.mxu1 %vm402_vm1, %v13002_v14  ;;  %v8355_v12 = vrot.slane %v10138_v45, 9  ;;  %v10140_v49 = vld [vmem:[%s10243_s26 + $0x138] sm:$0xf]  ;;  %v14786_v28 = vld [vmem:[#allocation32_spill] sm:$0xff] }
 0x2a1   : > { %14780 = vst [vmem:[#allocation48_spill] sm:$0xff] %v13007_v10  ;;  %v9518_v6 = vpop.f32.mrf.mxu0  ;;  %9721 = vmatmul.mubr.msk.bf16.gmra.mxu0 %vm402_vm1, %v12999_v32  ;;  %v13016_v18 = vadd.f32 %v4403_v54, %v4263_v7  ;;  %v4268_v47 = vadd.f32 %v9484_v17, %v12804_v29  ;;  %9690 = vmatprep.mubr.msk.bf16.mxu1 %vm402_vm1, %v14782_v58  ;;  %v8392_v54 = vrot.slane %v10140_v49, 9  ;;  %v10141_v32 = vld [vmem:[%s10243_s26 + $0x13c] sm:$0x1] }
 0x2a2   : > { %9724 = vmatprep.mubr.msk.bf16.mxu0 %vm402_vm1, %v14746_v50  ;;  %v4199_v42 = vpop.f32.mrf.mxu1  ;;  %v6036_v29 = vrot.slane %v10141_v32, 5  ;;  %v5751_v45 = vsel %vm10713_vm4, %v8355_v12, %v5750_v26  ;;  %v10142_v32 = vld [vmem:[%s10243_s26 + $0x188] sm:$0xf]  ;;  %v14788_v12 = vld [vmem:[#allocation54_spill] sm:$0xff] }
 0x2a3   : > { %14781 = vst [vmem:[#allocation30_spill] sm:$0xff] %v13016_v18  ;;  %v4416_v41 = vpop.f32.mrf.mxu0  ;;  %v13021_v16 = vadd.f32 %v9518_v6, %v4268_v47  ;;  %v4266_v5 = vadd.f32 %v4199_v42, %v12807_v19  ;;  %v10143_v26 = vld [vmem:[%s10243_s26 + $0x180] sm:$0xf] }
 0x2a4   : > { %v9485_v7 = vpop.f32.mrf.mxu1  ;;  %v8443_v49 = vrot.slane %v10143_v26, 9 }
 0x2a5   : > { %14783 = vst [vmem:[#allocation11_spill] sm:$0xff] %v13021_v16  ;;  %v9519_v43 = vpop.f32.mrf.mxu0  ;;  %v13028_v17 = vadd.f32 %v4416_v41, %v4266_v5  ;;  %v4269_v18 = vadd.f32 %v9485_v7, %v12810_v24  ;;  %v8465_v41 = vrot.slane %v10142_v32, 9  ;;  %v6037_v24 = vsel %vm10713_vm4, %v8392_v54, %v6036_v29  ;;  %v10144_v7 = vld [vmem:[%s10243_s26 + $0x184] sm:$0x1]  ;;  %v10146_v16 = vld [vmem:[%s10243_s26 + $0x1a8] sm:$0xf] }
 0x2a6   : > { %v4202_v6 = vpop.f32.mrf.mxu1  ;;  %v13058_v29 = vcombine.low %v5751_v45, %v6037_v24  ;;  %v8487_v26 = vrot.slane %v10146_v16, 9 }
 0x2a7   : > { %14784 = vst [vmem:[#allocation2_spill] sm:$0xff] %v13028_v17  ;;  %v4419_v10 = vpop.f32.mrf.mxu0  ;;  %v13031_v47 = vadd.f32 %v9519_v43, %v4269_v18  ;;  %v4267_v19 = vadd.f32 %v4202_v6, %v12819_v30  ;;  %v6521_v6 = vrot.slane %v10144_v7, 5  ;;  %v10148_v7 = vld [vmem:[%s10243_s26 + $0x1b0] sm:$0xf] }
 0x2a8   : > { %v9488_v5 = vpop.f32.mrf.mxu1  ;;  %9691 = vmatmul.mubr.msk.bf16.gmra.mxu1 %vm402_vm1, %v14786_v28  ;;  %14791 = vst [vmem:[#allocation10_spill] sm:$0xff] %v13058_v29 }
 0x2a9   : > { %14785 = vst [vmem:[#allocation16_spill] sm:$0xff] %v13031_v47  ;;  %v9522_v42 = vpop.f32.mrf.mxu0  ;;  %9725 = vmatmul.mubr.msk.bf16.gmra.mxu0 %vm402_vm1, %v14747_v46  ;;  %v13045_v30 = vadd.f32 %v4419_v10, %v4267_v19  ;;  %v4272_v18 = vadd.f32 %v9488_v5, %v12826_v60  ;;  %9694 = vmatprep.mubr.msk.bf16.mxu1 %vm402_vm1, %v14788_v12  ;;  %v14789_v47 = vld [vmem:[#allocation12_spill] sm:$0xff]  ;;  %v10145_v19 = vld [vmem:[%s10243_s26 + $0x18c] sm:$0x1]  ;;  %v8488_v46 = vrot.slane %v10148_v7, 9  ;;  %v6972_v12 = vrot.slane %v10149_v62, 5 }
 0x2aa   : > { %9728 = vmatprep.mubr.msk.bf16.mxu0 %vm402_vm1, %v14748_v40  ;;  %v4215_v32 = vpop.f32.mrf.mxu1  ;;  %v13053_v17 = vcombine.low %v14789_v47, %v5751_v45  ;;  %v6741_v5 = vrot.slane %v10145_v19, 5  ;;  %v10147_v40 = vld [vmem:[%s10243_s26 + $0x1ac] sm:$0x1] }
 0x2ab   : > { %14787 = vst [vmem:[#allocation44_spill] sm:$0xff] %v13045_v30  ;;  %v4432_v43 = vpop.f32.mrf.mxu0  ;;  %v13055_v10 = vadd.f32 %v9522_v42, %v4272_v18  ;;  %v4270_v60 = vadd.f32 %v4215_v32, %v12830_v39  ;;  %v6968_v11 = vrot.slane %v10147_v40, 5  ;;  %v13070_v39 = vsel %vm10713_vm4, %v8443_v49, %v6521_v6  ;;  %v14795_v32 = vld [vmem:[#allocation55_spill] sm:$0xff] }
 0x2ac   : > { %14790 = vst [vmem:[#allocation20_spill] sm:$0xff] %v13053_v17  ;;  %v9489_v30 = vpop.f32.mrf.mxu1  ;;  %v6742_v45 = vsel %vm10713_vm4, %v8465_v41, %v6741_v5 }
 0x2ad   : > { %v9523_v54 = vpop.f32.mrf.mxu0  ;;  %v13065_v47 = vadd.f32 %v4432_v43, %v4270_v60  ;;  %v4273_v42 = vadd.f32 %v9489_v30, %v12833_v63  ;;  %v13075_v16 = vcombine.low %v13070_v39, %v6742_v45  ;;  %v13088_v41 = vsel %vm10713_vm4, %v8487_v26, %v6968_v11  ;;  %v14804_v60 = vld [vmem:[#allocation18_spill] sm:$0xff] }
 0x2ae   : > { %v4218_v24 = vpop.f32.mrf.mxu1  ;;  %14793 = vst [vmem:[#allocation5_spill] sm:$0xff] %v13088_v41  ;;  %v13092_v30 = vsel %vm10713_vm4, %v8488_v46, %v6972_v12 }
 0x2af   : > { %v4435_v18 = vpop.f32.mrf.mxu0  ;;  %14792 = vst [vmem:[#allocation58_spill] sm:$0xff] %v13075_v16  ;;  %v13077_v40 = vadd.f32 %v9523_v54, %v4273_v42  ;;  %v4271_v62 = vadd.f32 %v4218_v24, %v12841_v0  ;;  %14794 = vst [vmem:[#allocation33_spill] sm:$0xff] %v13092_v30  ;;  %v6751_v42 = vsel %vm451_vm0, %v12874_v9, 0  ;;  %v13126_v9 = vld [vmem:[%s14181_s1 + $0x34] sm:$0x3] }
 0x2b0   : > { %v9492_v63 = vpop.f32.mrf.mxu1  ;;  %9695 = vmatmul.mubr.msk.bf16.gmra.mxu1 %vm402_vm1, %v13053_v17  ;;  %v10160_v16 = vld [vmem:[%s10243_s26 + $0x168] sm:$0xf] }
 0x2b1   : > { %v9526_v43 = vpop.f32.mrf.mxu0  ;;  %9729 = vmatmul.mubr.msk.bf16.gmra.mxu0 %vm402_vm1, %v13058_v29  ;;  %v13094_v0 = vadd.f32 %v4435_v18, %v4271_v62  ;;  %v4276_v49 = vadd.f32 %v9492_v63, %v12849_v37  ;;  %9734 = vmatprep.mubr.msk.bf16.mxu1 %vm402_vm1, %v14795_v32  ;;  %v7013_v37 = vsel %vm451_vm0, %v12884_v61, 0  ;;  %v8419_v30 = vrot.slane %v10160_v16, 9  ;;  %v14816_v16 = vld [vmem:[#allocation30_spill] sm:$0xff] }
 0x2b2   : > { %9768 = vmatprep.mubr.msk.bf16.mxu0 %vm402_vm1, %v14758_v15  ;;  %v4231_v15 = vpop.f32.mrf.mxu1 }
 0x2b3   : > { %v4448_v6 = vpop.f32.mrf.mxu0  ;;  %v13101_v54 = vadd.f32 %v9526_v43, %v4276_v49  ;;  %v4274_v11 = vadd.f32 %v4231_v15, %v12857_v20  ;;  %v13119_v20 = vld [vmem:[%s14181_s1 + $0x2e] sm:$0x3] }
 0x2b4   : > { %v9493_v5 = vpop.f32.mrf.mxu1 }
 0x2b5   : > { %v9527_v19 = vpop.f32.mrf.mxu0  ;;  %v13104_v46 = vadd.f32 %v4448_v6, %v4274_v11  ;;  %v4277_v12 = vadd.f32 %v9493_v5, %v12866_v31 }
 0x2b6   : > { %v4234_v7 = vpop.f32.mrf.mxu1 }
 0x2b7   : > { %v4451_v26 = vpop.f32.mrf.mxu0  ;;  %v13111_v18 = vadd.f32 %v9527_v19, %v4277_v12  ;;  %v4275_v45 = vadd.f32 %v4234_v7, %v12886_v51 }
 0x2b8   : > { %v9532_v31 = vpop.f32.mrf.mxu1  ;;  %9735 = vmatmul.mubr.msk.bf16.vlgmr.msra.gmra.mxu1 %vm402_vm1, %v12695_v38 }
 0x2b9   : > { %v9566_v24 = vpop.f32.mrf.mxu0  ;;  %9769 = vmatmul.mubr.msk.bf16.vlgmr.msra.gmra.mxu0 %vm402_vm1, %v14760_v23  ;;  %v13128_v61 = vadd.f32 %v4451_v26, %v4275_v45  ;;  %v4799_v51 = vadd.f32 %v9532_v31, %v12894_v52  ;;  %9801 = vmatpush3.bf16.msra.mxu1 %v6751_v42 }
 0x2ba   : > { %9835 = vmatpush3.bf16.msra.mxu0 %v7013_v37  ;;  %9738 = vmatprep.mubr.msk.bf16.mxu1 %vm402_vm1, %v14759_v4  ;;  %v4670_v62 = vpop.f32.mrf.mxu1  ;;  %v14796_v37 = vld [vmem:[#allocation6_spill] sm:$0xff] }
 0x2bb   : > { %v4899_v23 = vpop.f32.mrf.mxu0  ;;  %9772 = vmatprep.mubr.msk.bf16.mxu0 %vm402_vm1, %v14761_v21  ;;  %9964 = vmatprep.subr.msk.bf16.mxu1 %vm451_vm0, %v13119_v20  ;;  %v13137_v43 = vadd.f32 %v9566_v24, %v4799_v51  ;;  %v4797_v63 = vadd.f32 %v4670_v62, %v12900_v13 }
 0x2bc   : > { %9965 = vmatprep.subr.msk.bf16.mxu0 %vm451_vm0, %v13126_v9  ;;  %v9533_v52 = vpop.f32.mrf.mxu1 }
 0x2bd   : > { %v9567_v49 = vpop.f32.mrf.mxu0  ;;  %v13142_v6 = vadd.f32 %v4899_v23, %v4797_v63  ;;  %v4800_v32 = vadd.f32 %v9533_v52, %v12903_v3 }
 0x2be   : > { %v4673_v11 = vpop.f32.mrf.mxu1 }
 0x2bf   : > { %v4902_v15 = vpop.f32.mrf.mxu0  ;;  %v13145_v19 = vadd.f32 %v9567_v49, %v4800_v32  ;;  %v4798_v21 = vadd.f32 %v4673_v11, %v12910_v48 }
 0x2c0   : > { %v9536_v13 = vpop.f32.mrf.mxu1  ;;  %9739 = vmatmul.mubr.msk.bf16.gmra.mxu1 %vm402_vm1, %v12733_v25 }
 0x2c1   : > { %v9570_v5 = vpop.f32.mrf.mxu0  ;;  %9773 = vmatmul.mubr.msk.bf16.gmra.mxu0 %vm402_vm1, %v12949_v59  ;;  %v13154_v12 = vadd.f32 %v4902_v15, %v4798_v21  ;;  %v4803_v3 = vadd.f32 %v9536_v13, %v12915_v34  ;;  %9742 = vmatprep.mubr.msk.bf16.mxu1 %vm402_vm1, %v14796_v37  ;;  %v14797_v13 = vld [vmem:[#allocation50_spill] sm:$0xff] }
 0x2c2   : > { %9776 = vmatprep.mubr.msk.bf16.mxu0 %vm402_vm1, %v14766_v56  ;;  %v4686_v48 = vpop.f32.mrf.mxu1 }
 0x2c3   : > { %v4915_v26 = vpop.f32.mrf.mxu0  ;;  %v13159_v7 = vadd.f32 %v9570_v5, %v4803_v3  ;;  %v4801_v59 = vadd.f32 %v4686_v48, %v12922_v57 }
 0x2c4   : > { %v9537_v45 = vpop.f32.mrf.mxu1 }
 0x2c5   : > { %v9571_v42 = vpop.f32.mrf.mxu0  ;;  %v13162_v24 = vadd.f32 %v4915_v26, %v4801_v59  ;;  %v4804_v31 = vadd.f32 %v9537_v45, %v12925_v2 }
 0x2c6   : > { %v4689_v23 = vpop.f32.mrf.mxu1 }
 0x2c7   : > { %v4918_v51 = vpop.f32.mrf.mxu0  ;;  %v13165_v62 = vadd.f32 %v9571_v42, %v4804_v31  ;;  %v4802_v34 = vadd.f32 %v4689_v23, %v12938_v55 }
 0x2c8   : > { %v9540_v49 = vpop.f32.mrf.mxu1  ;;  %9743 = vmatmul.mubr.msk.bf16.gmra.mxu1 %vm402_vm1, %v14740_v36 }
 0x2c9   : > { %v9574_v63 = vpop.f32.mrf.mxu0  ;;  %9777 = vmatmul.mubr.msk.bf16.gmra.mxu0 %vm402_vm1, %v14773_v8  ;;  %v13174_v57 = vadd.f32 %v4918_v51, %v4802_v34  ;;  %v4807_v2 = vadd.f32 %v9540_v49, %v12943_v44  ;;  %9746 = vmatprep.mubr.msk.bf16.mxu1 %vm402_vm1, %v14772_v27  ;;  %v14798_v44 = vld [vmem:[#allocation56_spill] sm:$0xff]  ;;  %v14799_v51 = vld [vmem:[#allocation22_spill] sm:$0xff] }
 0x2ca   : > { %9780 = vmatprep.mubr.msk.bf16.mxu0 %vm402_vm1, %v14774_v53  ;;  %v4702_v55 = vpop.f32.mrf.mxu1  ;;  %v10155_v53 = vld [vmem:[%s10243_s26 + $0x154] sm:$0x1] }
 0x2cb   : > { %v4931_v52 = vpop.f32.mrf.mxu0  ;;  %v13179_v32 = vadd.f32 %v9574_v63, %v4807_v2  ;;  %v4805_v15 = vadd.f32 %v4702_v55, %v12951_v33  ;;  %v14800_v63 = vld [vmem:[#allocation13_spill] sm:$0xff] }
 0x2cc   : > { %v9541_v21 = vpop.f32.mrf.mxu1 }
 0x2cd   : > { %v9575_v11 = vpop.f32.mrf.mxu0  ;;  %v13182_v5 = vadd.f32 %v4931_v52, %v4805_v15  ;;  %v4808_v3 = vadd.f32 %v9541_v21, %v14797_v13  ;;  %v14802_v52 = vld [vmem:[#allocation37_spill] sm:$0xff]  ;;  %v10150_v21 = vld [vmem:[%s10243_s26 + $0x140] sm:$0xf] }
 0x2ce   : > { %v4705_v48 = vpop.f32.mrf.mxu1  ;;  %v8414_v13 = vrot.slane %v10150_v21, 9 }
 0x2cf   : > { %v4934_v26 = vpop.f32.mrf.mxu0  ;;  %v13185_v59 = vadd.f32 %v9575_v11, %v4808_v3  ;;  %v4806_v42 = vadd.f32 %v4705_v48, %v14798_v44  ;;  %v10151_v3 = vld [vmem:[%s10243_s26 + $0x144] sm:$0x1]  ;;  %v10152_v48 = vld [vmem:[%s10243_s26 + $0x148] sm:$0xf] }
 0x2d0   : > { %v9544_v31 = vpop.f32.mrf.mxu1  ;;  %9747 = vmatmul.mubr.msk.bf16.gmra.mxu1 %vm402_vm1, %v14744_v22  ;;  %v8415_v44 = vrot.slane %v10152_v48, 9  ;;  %v14809_v48 = vld [vmem:[#allocation9_spill] sm:$0xff] }
 0x2d1   : > { %v9578_v45 = vpop.f32.mrf.mxu0  ;;  %9781 = vmatmul.mubr.msk.bf16.gmra.mxu0 %vm402_vm1, %v13002_v14  ;;  %v13194_v33 = vadd.f32 %v4934_v26, %v4806_v42  ;;  %v4811_v23 = vadd.f32 %v9544_v31, %v14799_v51  ;;  %9750 = vmatprep.mubr.msk.bf16.mxu1 %vm402_vm1, %v14800_v63  ;;  %v6266_v26 = vrot.slane %v10151_v3, 5  ;;  %v10153_v42 = vld [vmem:[%s10243_s26 + $0x14c] sm:$0x1] }
 0x2d2   : > { %9784 = vmatprep.mubr.msk.bf16.mxu0 %vm402_vm1, %v14782_v58  ;;  %v4718_v49 = vpop.f32.mrf.mxu1  ;;  %v6270_v31 = vrot.slane %v10153_v42, 5 }
 0x2d3   : > { %v4947_v34 = vpop.f32.mrf.mxu0  ;;  %v13199_v2 = vadd.f32 %v9578_v45, %v4811_v23  ;;  %v4809_v55 = vadd.f32 %v4718_v49, %v14802_v52  ;;  %v10154_v45 = vld [vmem:[%s10243_s26 + $0x150] sm:$0xf]  ;;  %v6274_v49 = vrot.slane %v10155_v53, 5  ;;  %v6267_v53 = vsel %vm10713_vm4, %v8414_v13, %v6266_v26  ;;  %v10157_v26 = vld [vmem:[%s10243_s26 + $0x158] sm:$0xf] }
 0x2d4   : > { %v9545_v11 = vpop.f32.mrf.mxu1  ;;  %v8416_v23 = vrot.slane %v10154_v45, 9  ;;  %v10156_v45 = vld [vmem:[%s10243_s26 + $0x164] sm:$0x1] }
 0x2d5   : > { %14801 = vst [vmem:[#allocation17_spill] sm:$0xff] %v13199_v2  ;;  %v9579_v15 = vpop.f32.mrf.mxu0  ;;  %v13206_v51 = vadd.f32 %v4947_v34, %v4809_v55  ;;  %v4812_v58 = vadd.f32 %v9545_v11, %v14804_v60  ;;  %v14806_v60 = vld [vmem:[#allocation54_spill] sm:$0xff] }
 0x2d6   : > { %v4721_v52 = vpop.f32.mrf.mxu1  ;;  %v14808_v55 = vld [vmem:[#allocation14_spill] sm:$0xff]  ;;  %v6275_v42 = vsel %vm10713_vm4, %v8416_v23, %v6274_v49 }
 0x2d7   : > { %14803 = vst [vmem:[#allocation47_spill] sm:$0xff] %v13206_v51  ;;  %v4950_v14 = vpop.f32.mrf.mxu0  ;;  %v13211_v8 = vadd.f32 %v9579_v15, %v4812_v58  ;;  %v4810_v21 = vadd.f32 %v4721_v52, %v12991_v35  ;;  %v6271_v58 = vsel %vm10713_vm4, %v8415_v44, %v6270_v31  ;;  %v6282_v52 = vrot.slane %v10156_v45, 5  ;;  %v10159_v23 = vld [vmem:[%s10243_s26 + $0x160] sm:$0xf] }
 0x2d8   : > { %v9548_v34 = vpop.f32.mrf.mxu1  ;;  %9751 = vmatmul.mubr.msk.bf16.gmra.mxu1 %vm402_vm1, %v14746_v50  ;;  %v8418_v49 = vrot.slane %v10159_v23, 9  ;;  %v13240_v45 = vcombine.low %v6271_v58, %v6275_v42  ;;  %v10164_v23 = vld [vmem:[%s10243_s26 + $0x1a4] sm:$0x1] }
 0x2d9   : > { %14805 = vst [vmem:[#allocation28_spill] sm:$0xff] %v13211_v8  ;;  %v9582_v3 = vpop.f32.mrf.mxu0  ;;  %9785 = vmatmul.mubr.msk.bf16.gmra.mxu0 %vm402_vm1, %v14786_v28  ;;  %v13224_v35 = vadd.f32 %v4950_v14, %v4810_v21  ;;  %v4815_v15 = vadd.f32 %v9548_v34, %v14808_v55  ;;  %9754 = vmatprep.mubr.msk.bf16.mxu1 %vm402_vm1, %v14809_v48  ;;  %v14811_v14 = vld [vmem:[#allocation40_spill] sm:$0xff]  ;;  %v10158_v55 = vld [vmem:[%s10243_s26 + $0x15c] sm:$0x1] }
 0x2da   : > { %9788 = vmatprep.mubr.msk.bf16.mxu0 %vm402_vm1, %v14806_v60  ;;  %v4734_v13 = vpop.f32.mrf.mxu1  ;;  %v8417_v60 = vrot.slane %v10157_v26, 9  ;;  %v13236_v34 = vcombine.low %v6267_v53, %v6271_v58  ;;  %v6278_v28 = vrot.slane %v10158_v55, 5  ;;  %14812 = vst [vmem:[#allocation26_spill] sm:$0xff] %v13240_v45  ;;  %v10161_v26 = vld [vmem:[%s10243_s26 + $0x16c] sm:$0x1]  ;;  %v6964_v58 = vrot.slane %v10164_v23, 5 }
 0x2db   : > { %14807 = vst [vmem:[#allocation15_spill] sm:$0xff] %v13224_v35  ;;  %v4963_v11 = vpop.f32.mrf.mxu0  ;;  %v13233_v44 = vadd.f32 %v9582_v3, %v4815_v15  ;;  %v4813_v31 = vadd.f32 %v4734_v13, %v14811_v14  ;;  %v6286_v3 = vrot.slane %v10161_v26, 5  ;;  %v14814_v13 = vld [vmem:[#allocation48_spill] sm:$0xff] }
 0x2dc   : > { %v9549_v56 = vpop.f32.mrf.mxu1  ;;  %v10162_v53 = vld [vmem:[%s10243_s26 + $0x170] sm:$0xf] }
 0x2dd   : > { %14810 = vst [vmem:[#allocation8_spill] sm:$0xff] %v13233_v44  ;;  %v9583_v21 = vpop.f32.mrf.mxu0  ;;  %v13244_v15 = vadd.f32 %v4963_v11, %v4813_v31  ;;  %v4816_v14 = vadd.f32 %v9549_v56, %v14814_v13  ;;  %v8420_v29 = vrot.slane %v10162_v53, 9  ;;  %v10163_v44 = vld [vmem:[%s10243_s26 + $0x174] sm:$0x1]  ;;  %v6279_v56 = vsel %vm10713_vm4, %v8417_v60, %v6278_v28  ;;  %v14817_v31 = vld [vmem:[#allocation43_spill] sm:$0xff] }
 0x2de   : > { %v6290_v55 = vrot.slane %v10163_v44, 5  ;;  %v4737_v35 = vpop.f32.mrf.mxu1  ;;  %v6283_v44 = vsel %vm10713_vm4, %v8418_v49, %v6282_v52  ;;  %v10167_v53 = vld [vmem:[%s10243_s26 + $0x1a0] sm:$0xf]  ;;  %v14819_v28 = vld [vmem:[#allocation11_spill] sm:$0xff]  ;;  %v6287_v52 = vsel %vm10713_vm4, %v8419_v30, %v6286_v3 }
 0x2df   : > { %14813 = vst [vmem:[#allocation42_spill] sm:$0xff] %v13244_v15  ;;  %v4966_v41 = vpop.f32.mrf.mxu0  ;;  %v13250_v8 = vadd.f32 %v9583_v21, %v4816_v14  ;;  %v4814_v51 = vadd.f32 %v4737_v35, %v14816_v16  ;;  %v10165_v21 = vld [vmem:[%s10243_s26 + $0x198] sm:$0xf]  ;;  %v10166_v35 = vld [vmem:[%s10243_s26 + $0x19c] sm:$0x1]  ;;  %v8486_v23 = vrot.slane %v10167_v53, 9 }
 0x2e0   : > { %v9552_v11 = vpop.f32.mrf.mxu1  ;;  %9755 = vmatmul.mubr.msk.bf16.gmra.mxu1 %vm402_vm1, %v14817_v31  ;;  %v8485_v13 = vrot.slane %v10165_v21, 9  ;;  %v6960_v14 = vrot.slane %v10166_v35, 5  ;;  %v6291_v49 = vsel %vm10713_vm4, %v8420_v29, %v6290_v55  ;;  %v14820_v53 = vld [vmem:[#allocation2_spill] sm:$0xff]  ;;  %v10169_v15 = vld [vmem:[%s10243_s26 + $0x17c] sm:$0x1]  ;;  %v14824_v55 = vld [vmem:[#allocation16_spill] sm:$0xff] }
 0x2e1   : > { %14815 = vst [vmem:[#allocation29_spill] sm:$0xff] %v13250_v8  ;;  %v9586_v26 = vpop.f32.mrf.mxu0  ;;  %9789 = vmatmul.mubr.msk.bf16.gmra.mxu0 %vm402_vm1, %v13053_v17  ;;  %v13266_v16 = vadd.f32 %v4966_v41, %v4814_v51  ;;  %v4819_v60 = vadd.f32 %v9552_v11, %v14819_v28  ;;  %9758 = vmatprep.mubr.msk.bf16.mxu1 %vm402_vm1, %v13236_v34  ;;  %v10168_v28 = vld [vmem:[%s10243_s26 + $0x178] sm:$0xf]  ;;  %v6294_v2 = vrot.slane %v10169_v15, 5 }
 0x2e2   : > { %9792 = vmatprep.mubr.msk.bf16.mxu0 %vm402_vm1, %v13240_v45  ;;  %v4750_v21 = vpop.f32.mrf.mxu1  ;;  %v13275_v45 = vcombine.low %v6275_v42, %v6279_v56  ;;  %v13280_v11 = vcombine.low %v6279_v56, %v6283_v44  ;;  %v13284_v30 = vcombine.low %v6287_v52, %v6291_v49  ;;  %v13288_v29 = vsel %vm10713_vm4, %v8485_v13, %v6960_v14  ;;  %v10170_v13 = vld [vmem:[%s10243_s26 + $0x1c4] sm:$0x1] }
 0x2e3   : > { %14818 = vst [vmem:[#allocation38_spill] sm:$0xff] %v13266_v16  ;;  %v4979_v17 = vpop.f32.mrf.mxu0  ;;  %v13277_v35 = vadd.f32 %v9586_v26, %v4819_v60  ;;  %v4817_v41 = vadd.f32 %v4750_v21, %v14820_v53  ;;  %v8421_v16 = vrot.slane %v10168_v28, 9  ;;  %v13292_v42 = vsel %vm10713_vm4, %v8486_v23, %v6964_v58  ;;  %v14825_v58 = vld [vmem:[#allocation44_spill] sm:$0xff] }
 0x2e4   : > { %14821 = vst [vmem:[#allocation46_spill] sm:$0xff] %v13280_v11  ;;  %v9553_v8 = vpop.f32.mrf.mxu1  ;;  %14822 = vst [vmem:[#allocation49_spill] sm:$0xff] %v13284_v30  ;;  %v13297_v60 = vcombine.low %v6283_v44, %v6287_v52  ;;  %v6980_v14 = vrot.slane %v10170_v13, 5  ;;  %v10171_v52 = vld [vmem:[%s10243_s26 + $0x1b8] sm:$0xf] }
 0x2e5   : > { %v9587_v51 = vpop.f32.mrf.mxu0  ;;  %14823 = vst [vmem:[#allocation57_spill] sm:$0xff] %v13292_v42  ;;  %v13294_v3 = vadd.f32 %v4979_v17, %v4817_v41  ;;  %v4820_v26 = vadd.f32 %v9553_v8, %v14824_v55  ;;  %v6295_v44 = vsel %vm10713_vm4, %v8421_v16, %v6294_v2  ;;  %v8489_v41 = vrot.slane %v10171_v52, 9  ;;  %v10173_v55 = vld [vmem:[%s10243_s26 + $0x1c0] sm:$0xf] }
 0x2e6   : > { %v4753_v21 = vpop.f32.mrf.mxu1  ;;  %v13325_v52 = vcombine.low %v6295_v44, %v13070_v39 }
 0x2e7   : > { %v4982_v56 = vpop.f32.mrf.mxu0  ;;  %v13302_v53 = vadd.f32 %v9587_v51, %v4820_v26  ;;  %v4818_v23 = vadd.f32 %v4753_v21, %v14825_v58  ;;  %v10172_v51 = vld [vmem:[%s10243_s26 + $0x1bc] sm:$0x1]  ;;  %v8490_v26 = vrot.slane %v10173_v55, 9 }
 0x2e8   : > { %v9556_v8 = vpop.f32.mrf.mxu1  ;;  %9759 = vmatmul.mubr.msk.bf16.gmra.mxu1 %vm402_vm1, %v13275_v45  ;;  %v6976_v28 = vrot.slane %v10172_v51, 5  ;;  %14826 = vst [vmem:[#allocation35_spill] sm:$0xff] %v13325_v52 }
 0x2e9   : > { %v9590_v17 = vpop.f32.mrf.mxu0  ;;  %9793 = vmatmul.mubr.msk.bf16.gmra.mxu0 %vm402_vm1, %v13280_v11  ;;  %v13316_v21 = vadd.f32 %v4982_v56, %v4818_v23  ;;  %v4823_v13 = vadd.f32 %v9556_v8, %v13055_v10  ;;  %9762 = vmatprep.mubr.msk.bf16.mxu1 %vm402_vm1, %v13297_v60  ;;  %v13335_v10 = vsel %vm10713_vm4, %v8490_v26, %v6980_v14 }
 0x2ea   : > { %9796 = vmatprep.mubr.msk.bf16.mxu0 %vm402_vm1, %v13284_v30  ;;  %v4766_v15 = vpop.f32.mrf.mxu1  ;;  %v13327_v30 = vcombine.low %v6291_v49, %v6295_v44  ;;  %v13331_v56 = vsel %vm10713_vm4, %v8489_v41, %v6976_v28  ;;  %v14837_v39 = vld [vmem:[#allocation38_spill] sm:$0xff] }
 0x2eb   : > { %v4995_v58 = vpop.f32.mrf.mxu0  ;;  %v13321_v11 = vadd.f32 %v9590_v17, %v4823_v13  ;;  %v4821_v2 = vadd.f32 %v4766_v15, %v13065_v47  ;;  %14827 = vst [vmem:[#allocation31_spill] sm:$0xff] %v13331_v56 }
 0x2ec   : > { %v9557_v51 = vpop.f32.mrf.mxu1 }
 0x2ed   : > { %v9591_v16 = vpop.f32.mrf.mxu0  ;;  %v13337_v23 = vadd.f32 %v4995_v58, %v4821_v2  ;;  %v4824_v17 = vadd.f32 %v9557_v51, %v13077_v40  ;;  %v7441_v51 = vsel %vm451_vm0, %v13126_v9, 0 }
 0x2ee   : > { %v4769_v15 = vpop.f32.mrf.mxu1 }
 0x2ef   : > { %v4998_v47 = vpop.f32.mrf.mxu0  ;;  %v13342_v8 = vadd.f32 %v9591_v16, %v4824_v17  ;;  %v4822_v49 = vadd.f32 %v4769_v15, %v13094_v0  ;;  %v7233_v17 = vsel %vm451_vm0, %v13119_v20, 0 }
 0x2f0   : > { %v9560_v41 = vpop.f32.mrf.mxu1  ;;  %9763 = vmatmul.mubr.msk.bf16.gmra.mxu1 %vm402_vm1, %v13327_v30 }
 0x2f1   : > { %v9594_v44 = vpop.f32.mrf.mxu0  ;;  %9797 = vmatmul.mubr.msk.bf16.gmra.mxu0 %vm402_vm1, %v13325_v52  ;;  %v13351_v40 = vadd.f32 %v4998_v47, %v4822_v49  ;;  %v4827_v14 = vadd.f32 %v9560_v41, %v13101_v54  ;;  %9802 = vmatprep.mubr.msk.bf16.mxu1 %vm402_vm1, %v12695_v38 }
 0x2f2   : > { %9836 = vmatprep.mubr.msk.bf16.mxu0 %vm402_vm1, %v14796_v37  ;;  %v4782_v0 = vpop.f32.mrf.mxu1 }
 0x2f3   : > { %v5011_v28 = vpop.f32.mrf.mxu0  ;;  %v13356_v55 = vadd.f32 %v9594_v44, %v4827_v14  ;;  %v4825_v26 = vadd.f32 %v4782_v0, %v13104_v46 }
 0x2f4   : > { %v9561_v58 = vpop.f32.mrf.mxu1 }
 0x2f5   : > { %v9595_v13 = vpop.f32.mrf.mxu0  ;;  %v13359_v2 = vadd.f32 %v5011_v28, %v4825_v26  ;;  %v4828_v16 = vadd.f32 %v9561_v58, %v13111_v18 }
 0x2f6   : > { %v4785_v54 = vpop.f32.mrf.mxu1 }
 0x2f7   : > { %v5014_v37 = vpop.f32.mrf.mxu0  ;;  %v13366_v38 = vadd.f32 %v9595_v13, %v4828_v16  ;;  %v4826_v47 = vadd.f32 %v4785_v54, %v13128_v61  ;;  %v14828_v16 = vld [vmem:[#allocation45_spill] sm:$0xff] }
 0x2f8   : > { %v9600_v46 = vpop.f32.mrf.mxu1  ;;  %9803 = vmatmul.mubr.msk.bf16.vlgmr.msra.gmra.mxu1 %vm402_vm1, %v14759_v4 }
 0x2f9   : > { %v9634_v15 = vpop.f32.mrf.mxu0  ;;  %9837 = vmatmul.mubr.msk.bf16.vlgmr.msra.gmra.mxu0 %vm402_vm1, %v14740_v36  ;;  %v13373_v18 = vadd.f32 %v5014_v37, %v4826_v47  ;;  %v5245_v9 = vadd.f32 %v9600_v46, %v13137_v43  ;;  %9869 = vmatpush3.bf16.msra.mxu1 %v7233_v17 }
 0x2fa   : > { %9903 = vmatpush3.bf16.msra.mxu0 %v7441_v51  ;;  %9806 = vmatprep.mubr.msk.bf16.mxu1 %vm402_vm1, %v12733_v25  ;;  %v5116_v20 = vpop.f32.mrf.mxu1 }
 0x2fb   : > { %v5573_v49 = vpop.f32.mrf.mxu0  ;;  %9840 = vmatprep.mubr.msk.bf16.mxu0 %vm402_vm1, %v14772_v27  ;;  %v13380_v61 = vadd.f32 %v9634_v15, %v5245_v9  ;;  %v5243_v44 = vadd.f32 %v5116_v20, %v13142_v6 }
 0x2fc   : > { %v9601_v4 = vpop.f32.mrf.mxu1 }
 0x2fd   : > { %v9635_v41 = vpop.f32.mrf.mxu0  ;;  %v13383_v14 = vadd.f32 %v5573_v49, %v5243_v44  ;;  %v5246_v28 = vadd.f32 %v9601_v4, %v13145_v19 }
 0x2fe   : > { %v5119_v0 = vpop.f32.mrf.mxu1 }
 0x2ff   : > { %v5576_v43 = vpop.f32.mrf.mxu0  ;;  %v13386_v26 = vadd.f32 %v9635_v41, %v5246_v28  ;;  %v5244_v25 = vadd.f32 %v5119_v0, %v13154_v12 }
 0x300   : > { %v9604_v58 = vpop.f32.mrf.mxu1  ;;  %9807 = vmatmul.mubr.msk.bf16.gmra.mxu1 %vm402_vm1, %v14828_v16 }
 0x301   : > { %v9638_v13 = vpop.f32.mrf.mxu0  ;;  %9841 = vmatmul.mubr.msk.bf16.gmra.mxu0 %vm402_vm1, %v14744_v22  ;;  %v13395_v6 = vadd.f32 %v5576_v43, %v5244_v25  ;;  %v5249_v19 = vadd.f32 %v9604_v58, %v13159_v7  ;;  %9810 = vmatprep.mubr.msk.bf16.mxu1 %vm402_vm1, %v14740_v36 }
 0x302   : > { %9844 = vmatprep.mubr.msk.bf16.mxu0 %vm402_vm1, %v14800_v63  ;;  %v5132_v12 = vpop.f32.mrf.mxu1 }
 0x303   : > { %v5589_v37 = vpop.f32.mrf.mxu0  ;;  %v13400_v51 = vadd.f32 %v9638_v13, %v5249_v19  ;;  %v5247_v54 = vadd.f32 %v5132_v12, %v13162_v24 }
 0x304   : > { %v9605_v47 = vpop.f32.mrf.mxu1 }
 0x305   : > { %v9639_v17 = vpop.f32.mrf.mxu0  ;;  %v13403_v15 = vadd.f32 %v5589_v37, %v5247_v54  ;;  %v5250_v46 = vadd.f32 %v9605_v47, %v13165_v62  ;;  %v14829_v54 = vld [vmem:[#allocation25_spill] sm:$0xff] }
 0x306   : > { %v5135_v9 = vpop.f32.mrf.mxu1 }
 0x307   : > { %v5592_v63 = vpop.f32.mrf.mxu0  ;;  %v13406_v49 = vadd.f32 %v9639_v17, %v5250_v46  ;;  %v5248_v7 = vadd.f32 %v5135_v9, %v13174_v57 }
 0x308   : > { %v9608_v44 = vpop.f32.mrf.mxu1  ;;  %9811 = vmatmul.mubr.msk.bf16.gmra.mxu1 %vm402_vm1, %v14772_v27 }
 0x309   : > { %v9642_v20 = vpop.f32.mrf.mxu0  ;;  %9845 = vmatmul.mubr.msk.bf16.gmra.mxu0 %vm402_vm1, %v14746_v50  ;;  %v13415_v24 = vadd.f32 %v5592_v63, %v5248_v7  ;;  %v5253_v62 = vadd.f32 %v9608_v44, %v13179_v32  ;;  %9814 = vmatprep.mubr.msk.bf16.mxu1 %vm402_vm1, %v14744_v22  ;;  %v14831_v63 = vld [vmem:[#allocation47_spill] sm:$0xff] }
 0x30a   : > { %9848 = vmatprep.mubr.msk.bf16.mxu0 %vm402_vm1, %v14809_v48  ;;  %v5148_v57 = vpop.f32.mrf.mxu1 }
 0x30b   : > { %v5605_v41 = vpop.f32.mrf.mxu0  ;;  %v13420_v4 = vadd.f32 %v9642_v20, %v5253_v62  ;;  %v5251_v28 = vadd.f32 %v5148_v57, %v13182_v5  ;;  %v14832_v62 = vld [vmem:[#allocation28_spill] sm:$0xff] }
 0x30c   : > { %v9609_v0 = vpop.f32.mrf.mxu1  ;;  %v10174_v57 = vld [vmem:[%s10243_s26 + $0x190] sm:$0xf] }
 0x30d   : > { %v9643_v43 = vpop.f32.mrf.mxu0  ;;  %v13423_v25 = vadd.f32 %v5605_v41, %v5251_v28  ;;  %v5254_v13 = vadd.f32 %v9609_v0, %v13185_v59  ;;  %v14830_v59 = vld [vmem:[#allocation17_spill] sm:$0xff]  ;;  %v8484_v28 = vrot.slane %v10174_v57, 9 }
 0x30e   : > { %v5151_v16 = vpop.f32.mrf.mxu1 }
 0x30f   : > { %v5608_v58 = vpop.f32.mrf.mxu0  ;;  %v13426_v19 = vadd.f32 %v9643_v43, %v5254_v13  ;;  %v5252_v32 = vadd.f32 %v5151_v16, %v13194_v33  ;;  %v10175_v43 = vld [vmem:[%s10243_s26 + $0x194] sm:$0x1]  ;;  %v14833_v16 = vld [vmem:[#allocation15_spill] sm:$0xff] }
 0x310   : > { %v9612_v12 = vpop.f32.mrf.mxu1  ;;  %9815 = vmatmul.mubr.msk.bf16.gmra.mxu1 %vm402_vm1, %v14829_v54  ;;  %v6956_v0 = vrot.slane %v10175_v43, 5 }
 0x311   : > { %v9646_v37 = vpop.f32.mrf.mxu0  ;;  %9849 = vmatmul.mubr.msk.bf16.gmra.mxu0 %vm402_vm1, %v14817_v31  ;;  %v13435_v5 = vadd.f32 %v5608_v58, %v5252_v32  ;;  %v5257_v17 = vadd.f32 %v9612_v12, %v14830_v59  ;;  %9818 = vmatprep.mubr.msk.bf16.mxu1 %vm402_vm1, %v14746_v50 }
 0x312   : > { %9852 = vmatprep.mubr.msk.bf16.mxu0 %vm402_vm1, %v13236_v34  ;;  %v5164_v33 = vpop.f32.mrf.mxu1 }
 0x313   : > { %v5621_v47 = vpop.f32.mrf.mxu0  ;;  %v13440_v46 = vadd.f32 %v9646_v37, %v5257_v17  ;;  %v5255_v9 = vadd.f32 %v5164_v33, %v14831_v63  ;;  %v14834_v17 = vld [vmem:[#allocation8_spill] sm:$0xff]  ;;  %v6957_v63 = vsel %vm10713_vm4, %v8484_v28, %v6956_v0 }
 0x314   : > { %v9613_v20 = vpop.f32.mrf.mxu1  ;;  %v8493_v43 = vcombine.low %v6957_v63, %v13288_v29 }
 0x315   : > { %v9647_v7 = vpop.f32.mrf.mxu0  ;;  %v13443_v44 = vadd.f32 %v5621_v47, %v5255_v9  ;;  %v5258_v41 = vadd.f32 %v9613_v20, %v14832_v62  ;;  %v14835_v20 = vld [vmem:[#allocation42_spill] sm:$0xff] }
 0x316   : > { %v5167_v13 = vpop.f32.mrf.mxu1 }
 0x317   : > { %v5624_v34 = vpop.f32.mrf.mxu0  ;;  %v13448_v58 = vadd.f32 %v9647_v7, %v5258_v41  ;;  %v5256_v32 = vadd.f32 %v5167_v13, %v14833_v16  ;;  %v14836_v13 = vld [vmem:[#allocation29_spill] sm:$0xff] }
 0x318   : > { %v9616_v12 = vpop.f32.mrf.mxu1  ;;  %9819 = vmatmul.mubr.msk.bf16.gmra.mxu1 %vm402_vm1, %v14809_v48 }
 0x319   : > { %v9650_v37 = vpop.f32.mrf.mxu0  ;;  %9853 = vmatmul.mubr.msk.bf16.gmra.mxu0 %vm402_vm1, %v13275_v45  ;;  %v13457_v59 = vadd.f32 %v5624_v34, %v5256_v32  ;;  %v5261_v47 = vadd.f32 %v9616_v12, %v14834_v17  ;;  %9822 = vmatprep.mubr.msk.bf16.mxu1 %vm402_vm1, %v14817_v31 }
 0x31a   : > { %9856 = vmatprep.mubr.msk.bf16.mxu0 %vm402_vm1, %v13297_v60  ;;  %v5180_v9 = vpop.f32.mrf.mxu1 }
 0x31b   : > { %v5637_v33 = vpop.f32.mrf.mxu0  ;;  %v13464_v7 = vadd.f32 %v9650_v37, %v5261_v47  ;;  %v5259_v62 = vadd.f32 %v5180_v9, %v14835_v20  ;;  %v14838_v37 = vld [vmem:[#allocation10_spill] sm:$0xff] }
 0x31c   : > { %v9617_v57 = vpop.f32.mrf.mxu1 }
 0x31d   : > { %v9651_v41 = vpop.f32.mrf.mxu0  ;;  %v13468_v34 = vadd.f32 %v5637_v33, %v5259_v62  ;;  %v5262_v16 = vadd.f32 %v9617_v57, %v14836_v13 }
 0x31e   : > { %v5183_v12 = vpop.f32.mrf.mxu1 }
 0x31f   : > { %v5640_v32 = vpop.f32.mrf.mxu0  ;;  %v13471_v17 = vadd.f32 %v9651_v41, %v5262_v16  ;;  %v5260_v52 = vadd.f32 %v5183_v12, %v14837_v39  ;;  %v14839_v41 = vld [vmem:[#allocation5_spill] sm:$0xff] }
 0x320   : > { %v9620_v0 = vpop.f32.mrf.mxu1  ;;  %9823 = vmatmul.mubr.msk.bf16.gmra.mxu1 %vm402_vm1, %v14838_v37  ;;  %v13489_v57 = vcombine.low %v13292_v42, %v14839_v41 }
 0x321   : > { %v9654_v28 = vpop.f32.mrf.mxu0  ;;  %9857 = vmatmul.mubr.msk.bf16.gmra.mxu0 %vm402_vm1, %v13327_v30  ;;  %v13479_v47 = vadd.f32 %v5640_v32, %v5260_v52  ;;  %v5265_v33 = vadd.f32 %v9620_v0, %v13277_v35  ;;  %9826 = vmatprep.mubr.msk.bf16.mxu1 %vm402_vm1, %v13275_v45  ;;  %v14840_v52 = vld [vmem:[#allocation33_spill] sm:$0xff]  ;;  %v10176_v35 = vld [vmem:[%s10243_s26 + $0x1c8] sm:$0xf]  ;;  %v10177_v32 = vld [vmem:[%s10243_s26 + $0x1cc] sm:$0x1] }
 0x322   : > { %9860 = vmatprep.mubr.msk.bf16.mxu0 %vm402_vm1, %v8493_v43  ;;  %v5196_v39 = vpop.f32.mrf.mxu1  ;;  %v13493_v43 = vcombine.low %v14840_v52, %v13331_v56  ;;  %v8491_v16 = vrot.slane %v10176_v35, 9  ;;  %v6984_v12 = vrot.slane %v10177_v32, 5 }
 0x323   : > { %v5653_v63 = vpop.f32.mrf.mxu0  ;;  %v13484_v9 = vadd.f32 %v9654_v28, %v5265_v33  ;;  %v5263_v20 = vadd.f32 %v5196_v39, %v13294_v3 }
 0x324   : > { %v9621_v13 = vpop.f32.mrf.mxu1 }
 0x325   : > { %v9655_v62 = vpop.f32.mrf.mxu0  ;;  %v13497_v0 = vadd.f32 %v5653_v63, %v5263_v20  ;;  %v5266_v28 = vadd.f32 %v9621_v13, %v13302_v53  ;;  %v13511_v53 = vsel %vm10713_vm4, %v8491_v16, %v6984_v12 }
 0x326   : > { %v5199_v3 = vpop.f32.mrf.mxu1  ;;  %14841 = vst [vmem:[#allocation27_spill] sm:$0xff] %v13511_v53 }
 0x327   : > { %v5656_v33 = vpop.f32.mrf.mxu0  ;;  %v13500_v39 = vadd.f32 %v9655_v62, %v5266_v28  ;;  %v5264_v41 = vadd.f32 %v5199_v3, %v13316_v21  ;;  %v13523_v28 = vcombine.low %v13335_v10, %v13511_v53 }
 0x328   : > { %v9624_v56 = vpop.f32.mrf.mxu1  ;;  %9827 = vmatmul.mubr.msk.bf16.gmra.mxu1 %vm402_vm1, %v13297_v60 }
 0x329   : > { %v9658_v42 = vpop.f32.mrf.mxu0  ;;  %9861 = vmatmul.mubr.msk.bf16.gmra.mxu0 %vm402_vm1, %v13489_v57  ;;  %v13513_v63 = vadd.f32 %v5656_v33, %v5264_v41  ;;  %v5269_v20 = vadd.f32 %v9624_v56, %v13321_v11  ;;  %9830 = vmatprep.mubr.msk.bf16.mxu1 %vm402_vm1, %v13327_v30 }
 0x32a   : > { %9864 = vmatprep.mubr.msk.bf16.mxu0 %vm402_vm1, %v13493_v43  ;;  %v5212_v62 = vpop.f32.mrf.mxu1 }
 0x32b   : > { %v5669_v21 = vpop.f32.mrf.mxu0  ;;  %v13518_v13 = vadd.f32 %v9658_v42, %v5269_v20  ;;  %v5267_v35 = vadd.f32 %v5212_v62, %v13337_v23  ;;  %v14843_v20 = vld [vmem:[#allocation58_spill] sm:$0xff] }
 0x32c   : > { %v9625_v16 = vpop.f32.mrf.mxu1 }
 0x32d   : > { %v9659_v32 = vpop.f32.mrf.mxu0  ;;  %v13525_v12 = vadd.f32 %v5669_v21, %v5267_v35  ;;  %v5270_v41 = vadd.f32 %v9625_v16, %v13342_v8  ;;  %v14844_v35 = vld [vmem:[#allocation7_spill] sm:$0xff] }
 0x32e   : > { %v5215_v56 = vpop.f32.mrf.mxu1  ;;  %v14862_v1 = vld [vmem:[#allocation27_spill] sm:$0xff] }
 0x32f   : > { %v5672_v11 = vpop.f32.mrf.mxu0  ;;  %v13528_v33 = vadd.f32 %v9659_v32, %v5270_v41  ;;  %v5268_v3 = vadd.f32 %v5215_v56, %v13351_v40 }
 0x330   : > { %v9628_v23 = vpop.f32.mrf.mxu1  ;;  %9831 = vmatmul.mubr.msk.bf16.gmra.mxu1 %vm402_vm1, %v14843_v20 }
 0x331   : > { %14842 = vst [vmem:[#allocation51_spill] sm:$0xff] %v13528_v33  ;;  %v9662_v42 = vpop.f32.mrf.mxu0  ;;  %9865 = vmatmul.mubr.msk.bf16.gmra.mxu0 %vm402_vm1, %v13523_v28  ;;  %v13537_v21 = vadd.f32 %v5672_v11, %v5268_v3  ;;  %v5273_v8 = vadd.f32 %v9628_v23, %v13356_v55  ;;  %9870 = vmatprep.mubr.msk.bf16.mxu1 %vm402_vm1, %v14844_v35 }
 0x332   : > { %9904 = vmatprep.mubr.msk.bf16.mxu0 %vm402_vm1, %v14740_v36  ;;  %v5228_v40 = vpop.f32.mrf.mxu1 }
 0x333   : > { %v5685_v62 = vpop.f32.mrf.mxu0  ;;  %v13542_v32 = vadd.f32 %v9662_v42, %v5273_v8  ;;  %v5271_v16 = vadd.f32 %v5228_v40, %v13359_v2  ;;  %v14845_v8 = vld [vmem:[#allocation53_spill] sm:$0xff] }
 0x334   : > { %v9629_v56 = vpop.f32.mrf.mxu1 }
 0x335   : > { %v9663_v41 = vpop.f32.mrf.mxu0  ;;  %v13545_v33 = vadd.f32 %v5685_v62, %v5271_v16  ;;  %v5274_v53 = vadd.f32 %v9629_v56, %v13366_v38 }
 0x336   : > { %v5231_v11 = vpop.f32.mrf.mxu1 }
 0x337   : > { %v5688_v36 = vpop.f32.mrf.mxu0  ;;  %v13548_v3 = vadd.f32 %v9663_v41, %v5274_v53  ;;  %v5272_v55 = vadd.f32 %v5231_v11, %v13373_v18  ;;  %v14846_v53 = vld [vmem:[#allocation21_spill] sm:$0xff] }
 0x338   : > { %v9668_v42 = vpop.f32.mrf.mxu1  ;;  %9871 = vmatmul.mubr.msk.bf16.vlgmr.msra.gmra.mxu1 %vm402_vm1, %v14845_v8 }
 0x339   : > { %v9702_v23 = vpop.f32.mrf.mxu0  ;;  %9905 = vmatmul.mubr.msk.bf16.vlgmr.msra.gmra.mxu0 %vm402_vm1, %v14772_v27  ;;  %v13557_v2 = vadd.f32 %v5688_v36, %v5272_v55  ;;  %v5988_v38 = vadd.f32 %v9668_v42, %v13380_v61  ;;  %9874 = vmatprep.mubr.msk.bf16.mxu1 %vm402_vm1, %v14846_v53  ;;  %v14847_v42 = vld [vmem:[#allocation23_spill] sm:$0xff] }
 0x33a   : > { %9908 = vmatprep.mubr.msk.bf16.mxu0 %vm402_vm1, %v14744_v22  ;;  %v5859_v18 = vpop.f32.mrf.mxu1 }
 0x33b   : > { %v6097_v62 = vpop.f32.mrf.mxu0  ;;  %v13562_v35 = vadd.f32 %v9702_v23, %v5988_v38  ;;  %v5986_v27 = vadd.f32 %v5859_v18, %v13383_v14  ;;  %v14848_v38 = vld [vmem:[#allocation41_spill] sm:$0xff] }
 0x33c   : > { %v9669_v16 = vpop.f32.mrf.mxu1 }
 0x33d   : > { %v9703_v40 = vpop.f32.mrf.mxu0  ;;  %v13565_v41 = vadd.f32 %v6097_v62, %v5986_v27  ;;  %v5989_v56 = vadd.f32 %v9669_v16, %v13386_v26 }
 0x33e   : > { %v5862_v36 = vpop.f32.mrf.mxu1 }
 0x33f   : > { %v6100_v22 = vpop.f32.mrf.mxu0  ;;  %v13568_v11 = vadd.f32 %v9703_v40, %v5989_v56  ;;  %v5987_v61 = vadd.f32 %v5862_v36, %v13395_v6 }
 0x340   : > { %v9672_v23 = vpop.f32.mrf.mxu1  ;;  %9875 = vmatmul.mubr.msk.bf16.gmra.mxu1 %vm402_vm1, %v14847_v42 }
 0x341   : > { %v9706_v55 = vpop.f32.mrf.mxu0  ;;  %9909 = vmatmul.mubr.msk.bf16.gmra.mxu0 %vm402_vm1, %v14829_v54  ;;  %v13577_v14 = vadd.f32 %v6100_v22, %v5987_v61  ;;  %v5992_v26 = vadd.f32 %v9672_v23, %v13400_v51  ;;  %9878 = vmatprep.mubr.msk.bf16.mxu1 %vm402_vm1, %v14848_v38  ;;  %v14849_v61 = vld [vmem:[#allocation32_spill] sm:$0xff]  ;;  %v14850_v23 = vld [vmem:[#allocation54_spill] sm:$0xff] }
 0x342   : > { %9912 = vmatprep.mubr.msk.bf16.mxu0 %vm402_vm1, %v14746_v50  ;;  %v5875_v6 = vpop.f32.mrf.mxu1 }
 0x343   : > { %v6113_v8 = vpop.f32.mrf.mxu0  ;;  %v13582_v62 = vadd.f32 %v9706_v55, %v5992_v26  ;;  %v5990_v54 = vadd.f32 %v5875_v6, %v13403_v15 }
 0x344   : > { %v9673_v18 = vpop.f32.mrf.mxu1 }
 0x345   : > { %v9707_v53 = vpop.f32.mrf.mxu0  ;;  %v13585_v27 = vadd.f32 %v6113_v8, %v5990_v54  ;;  %v5993_v40 = vadd.f32 %v9673_v18, %v13406_v49 }
 0x346   : > { %v5878_v16 = vpop.f32.mrf.mxu1 }
 0x347   : > { %v6116_v50 = vpop.f32.mrf.mxu0  ;;  %v13588_v56 = vadd.f32 %v9707_v53, %v5993_v40  ;;  %v5991_v51 = vadd.f32 %v5878_v16, %v13415_v24 }
 0x348   : > { %v9676_v36 = vpop.f32.mrf.mxu1  ;;  %9879 = vmatmul.mubr.msk.bf16.gmra.mxu1 %vm402_vm1, %v14849_v61 }
 0x349   : > { %v9710_v22 = vpop.f32.mrf.mxu0  ;;  %9913 = vmatmul.mubr.msk.bf16.gmra.mxu0 %vm402_vm1, %v14809_v48  ;;  %v13597_v15 = vadd.f32 %v6116_v50, %v5991_v51  ;;  %v5996_v49 = vadd.f32 %v9676_v36, %v13420_v4  ;;  %9882 = vmatprep.mubr.msk.bf16.mxu1 %vm402_vm1, %v14850_v23  ;;  %v14851_v50 = vld [vmem:[#allocation20_spill] sm:$0xff]  ;;  %v14852_v51 = vld [vmem:[#allocation26_spill] sm:$0xff] }
 0x34a   : > { %9916 = vmatprep.mubr.msk.bf16.mxu0 %vm402_vm1, %v14817_v31  ;;  %v5891_v24 = vpop.f32.mrf.mxu1 }
 0x34b   : > { %v6129_v55 = vpop.f32.mrf.mxu0  ;;  %v13602_v42 = vadd.f32 %v9710_v22, %v5996_v49  ;;  %v5994_v48 = vadd.f32 %v5891_v24, %v13423_v25 }
 0x34c   : > { %v9677_v8 = vpop.f32.mrf.mxu1 }
 0x34d   : > { %v9711_v26 = vpop.f32.mrf.mxu0  ;;  %v13605_v38 = vadd.f32 %v6129_v55, %v5994_v48  ;;  %v5997_v6 = vadd.f32 %v9677_v8, %v13426_v19  ;;  %v14853_v8 = vld [vmem:[#allocation46_spill] sm:$0xff] }
 0x34e   : > { %v5894_v54 = vpop.f32.mrf.mxu1 }
 0x34f   : > { %v6132_v31 = vpop.f32.mrf.mxu0  ;;  %v13608_v53 = vadd.f32 %v9711_v26, %v5997_v6  ;;  %v5995_v4 = vadd.f32 %v5894_v54, %v13435_v5 }
 0x350   : > { %v9680_v40 = vpop.f32.mrf.mxu1  ;;  %9883 = vmatmul.mubr.msk.bf16.gmra.mxu1 %vm402_vm1, %v14851_v50 }
 0x351   : > { %v9714_v18 = vpop.f32.mrf.mxu0  ;;  %9917 = vmatmul.mubr.msk.bf16.gmra.mxu0 %vm402_vm1, %v14838_v37  ;;  %v13617_v25 = vadd.f32 %v6132_v31, %v5995_v4  ;;  %v6000_v19 = vadd.f32 %v9680_v40, %v13440_v46  ;;  %9886 = vmatprep.mubr.msk.bf16.mxu1 %vm402_vm1, %v14852_v51  ;;  %v14854_v31 = vld [vmem:[#allocation49_spill] sm:$0xff] }
 0x352   : > { %9920 = vmatprep.mubr.msk.bf16.mxu0 %vm402_vm1, %v13275_v45  ;;  %v5907_v5 = vpop.f32.mrf.mxu1 }
 0x353   : > { %v6145_v16 = vpop.f32.mrf.mxu0  ;;  %v13622_v22 = vadd.f32 %v9714_v18, %v6000_v19  ;;  %v5998_v37 = vadd.f32 %v5907_v5, %v13443_v44 }
 0x354   : > { %v9681_v61 = vpop.f32.mrf.mxu1 }
 0x355   : > { %v9715_v36 = vpop.f32.mrf.mxu0  ;;  %v13625_v49 = vadd.f32 %v6145_v16, %v5998_v37  ;;  %v6001_v55 = vadd.f32 %v9681_v61, %v13448_v58 }
 0x356   : > { %v5910_v23 = vpop.f32.mrf.mxu1 }
 0x357   : > { %v6148_v45 = vpop.f32.mrf.mxu0  ;;  %v13628_v24 = vadd.f32 %v9715_v36, %v6001_v55  ;;  %v5999_v46 = vadd.f32 %v5910_v23, %v13457_v59 }
 0x358   : > { %v9684_v26 = vpop.f32.mrf.mxu1  ;;  %9887 = vmatmul.mubr.msk.bf16.gmra.mxu1 %vm402_vm1, %v14853_v8 }
 0x359   : > { %v9718_v48 = vpop.f32.mrf.mxu0  ;;  %9921 = vmatmul.mubr.msk.bf16.gmra.mxu0 %vm402_vm1, %v13297_v60  ;;  %v13637_v44 = vadd.f32 %v6148_v45, %v5999_v46  ;;  %v6004_v58 = vadd.f32 %v9684_v26, %v13464_v7  ;;  %9890 = vmatprep.mubr.msk.bf16.mxu1 %vm402_vm1, %v14854_v31  ;;  %v10179_v26 = vld [vmem:[%s10243_s26 + $0x1d4] sm:$0x1] }
 0x35a   : > { %9924 = vmatprep.mubr.msk.bf16.mxu0 %vm402_vm1, %v13327_v30  ;;  %v5923_v59 = vpop.f32.mrf.mxu1  ;;  %v7211_v8 = vrot.slane %v10179_v26, 5 }
 0x35b   : > { %v6161_v6 = vpop.f32.mrf.mxu0  ;;  %v13642_v54 = vadd.f32 %v9718_v48, %v6004_v58  ;;  %v6002_v60 = vadd.f32 %v5923_v59, %v13468_v34  ;;  %v14855_v34 = vld [vmem:[#allocation35_spill] sm:$0xff]  ;;  %v10178_v48 = vld [vmem:[%s10243_s26 + $0x1d0] sm:$0xf]  ;;  %v10180_v58 = vld [vmem:[%s10243_s26 + $0x1d8] sm:$0xf] }
 0x35c   : > { %v9685_v18 = vpop.f32.mrf.mxu1 }
 0x35d   : > { %v9719_v4 = vpop.f32.mrf.mxu0  ;;  %v13645_v40 = vadd.f32 %v6161_v6, %v6002_v60  ;;  %v6005_v50 = vadd.f32 %v9685_v18, %v13471_v17  ;;  %v8535_v6 = vrot.slane %v10180_v58, 9 }
 0x35e   : > { %v5926_v19 = vpop.f32.mrf.mxu1 }
 0x35f   : > { %v6164_v30 = vpop.f32.mrf.mxu0  ;;  %v13648_v16 = vadd.f32 %v9719_v4, %v6005_v50  ;;  %v6003_v7 = vadd.f32 %v5926_v19, %v13479_v47  ;;  %v14856_v47 = vld [vmem:[#allocation57_spill] sm:$0xff] }
 0x360   : > { %v9688_v5 = vpop.f32.mrf.mxu1  ;;  %9891 = vmatmul.mubr.msk.bf16.gmra.mxu1 %vm402_vm1, %v14855_v34  ;;  %v14857_v61 = vcombine.low %v13288_v29, %v14856_v47  ;;  %v14858_v19 = vld [vmem:[#allocation5_spill] sm:$0xff]  ;;  %v14860_v34 = vld [vmem:[#allocation31_spill] sm:$0xff] }
 0x361   : > { %v9722_v51 = vpop.f32.mrf.mxu0  ;;  %9925 = vmatmul.mubr.msk.bf16.gmra.mxu0 %vm402_vm1, %v14843_v20  ;;  %v13657_v17 = vadd.f32 %v6164_v30, %v6003_v7  ;;  %v6008_v37 = vadd.f32 %v9688_v5, %v13484_v9  ;;  %v10181_v9 = vld [vmem:[%s10243_s26 + $0x1dc] sm:$0x1]  ;;  %v14859_v7 = vcombine.low %v14858_v19, %v14840_v52 }
 0x362   : > { %9928 = vmatprep.mubr.msk.bf16.mxu0 %vm402_vm1, %v13489_v57  ;;  %9894 = vmatprep.mubr.msk.bf16.mxu1 %vm402_vm1, %v14857_v61  ;;  %v5939_v20 = vpop.f32.mrf.mxu1  ;;  %v8513_v57 = vrot.slane %v10178_v48, 9  ;;  %v7431_v31 = vrot.slane %v10181_v9, 5 }
 0x363   : > { %v6177_v36 = vpop.f32.mrf.mxu0  ;;  %v13664_v55 = vadd.f32 %v9722_v51, %v6008_v37  ;;  %v6006_v45 = vadd.f32 %v5939_v20, %v13497_v0  ;;  %v14861_v37 = vcombine.low %v14860_v34, %v13335_v10 }
 0x364   : > { %v9689_v46 = vpop.f32.mrf.mxu1  ;;  %v7432_v51 = vsel %vm10713_vm4, %v8535_v6, %v7431_v31 }
 0x365   : > { %v9723_v23 = vpop.f32.mrf.mxu0  ;;  %v13671_v59 = vadd.f32 %v6177_v36, %v6006_v45  ;;  %v6009_v29 = vadd.f32 %v9689_v46, %v13500_v39  ;;  %v7212_v39 = vsel %vm10713_vm4, %v8513_v57, %v7211_v8  ;;  %v14863_v46 = vld [vmem:[#allocation51_spill] sm:$0xff] }
 0x366   : > { %v5942_v4 = vpop.f32.mrf.mxu1  ;;  %v8537_v61 = vcombine.low %v7212_v39, %v7432_v51  ;;  %v8518_v45 = vcombine.low %v14862_v1, %v7212_v39 }
 0x367   : > { %v6180_v60 = vpop.f32.mrf.mxu0  ;;  %v13674_v18 = vadd.f32 %v9723_v23, %v6009_v29  ;;  %v6007_v0 = vadd.f32 %v5942_v4, %v13513_v63 }
 0x368   : > { %v9692_v30 = vpop.f32.mrf.mxu1  ;;  %9895 = vmatmul.mubr.msk.bf16.gmra.mxu1 %vm402_vm1, %v14859_v7 }
 0x369   : > { %v9726_v50 = vpop.f32.mrf.mxu0  ;;  %9929 = vmatmul.mubr.msk.bf16.gmra.mxu0 %vm402_vm1, %v13493_v43  ;;  %v13689_v63 = vadd.f32 %v6180_v60, %v6007_v0  ;;  %v6012_v5 = vadd.f32 %v9692_v30, %v13518_v13  ;;  %9898 = vmatprep.mubr.msk.bf16.mxu1 %vm402_vm1, %v14861_v37 }
 0x36a   : > { %9932 = vmatprep.mubr.msk.bf16.mxu0 %vm402_vm1, %v13523_v28  ;;  %v5955_v52 = vpop.f32.mrf.mxu1 }
 0x36b   : > { %v6193_v43 = vpop.f32.mrf.mxu0  ;;  %v13696_v36 = vadd.f32 %v9726_v50, %v6012_v5  ;;  %v6010_v28 = vadd.f32 %v5955_v52, %v13525_v12 }
 0x36c   : > { %v9693_v20 = vpop.f32.mrf.mxu1 }
 0x36d   : > { %v9727_v47 = vpop.f32.mrf.mxu0  ;;  %v13700_v23 = vadd.f32 %v6193_v43, %v6010_v28  ;;  %v6013_v13 = vadd.f32 %v9693_v20, %v14863_v46 }
 0x36e   : > { %v5958_v57 = vpop.f32.mrf.mxu1 }
 0x36f   : > { %v6196_v48 = vpop.f32.mrf.mxu0  ;;  %v13703_v26 = vadd.f32 %v9727_v47, %v6013_v13  ;;  %v6011_v10 = vadd.f32 %v5958_v57, %v13537_v21 }
 0x370   : > { %v9696_v58 = vpop.f32.mrf.mxu1  ;;  %9899 = vmatmul.mubr.msk.bf16.gmra.mxu1 %vm402_vm1, %v8518_v45 }
 0x371   : > { %v9730_v8 = vpop.f32.mrf.mxu0  ;;  %9933 = vmatmul.mubr.msk.bf16.gmra.mxu0 %vm402_vm1, %v8537_v61  ;;  %v13708_v12 = vadd.f32 %v6196_v48, %v6011_v10  ;;  %v6016_v6 = vadd.f32 %v9696_v58, %v13542_v32 }
 0x372   : > { %v5971_v31 = vpop.f32.mrf.mxu1 }
 0x373   : > { %v6209_v9 = vpop.f32.mrf.mxu0  ;;  %v13711_v29 = vadd.f32 %v9730_v8, %v6016_v6  ;;  %v6014_v60 = vadd.f32 %v5971_v31, %v13545_v33 }
 0x374   : > { %v9697_v0 = vpop.f32.mrf.mxu1 }
 0x375   : > { %v9731_v4 = vpop.f32.mrf.mxu0  ;;  %v13714_v50 = vadd.f32 %v6209_v9, %v6014_v60  ;;  %v6017_v21 = vadd.f32 %v9697_v0, %v13548_v3 }
 0x376   : > { %v5974_v19 = vpop.f32.mrf.mxu1 }
 0x377   : > { %v6212_v30 = vpop.f32.mrf.mxu0  ;;  %v13717_v7 = vadd.f32 %v9731_v4, %v6017_v21  ;;  %v6015_v39 = vadd.f32 %v5974_v19, %v13557_v2 }
 0x378   : > { %v9736_v32 = vpop.f32.mrf.mxu1 }
 0x379   : > { %v9770_v51 = vpop.f32.mrf.mxu0  ;;  %v13720_v5 = vadd.f32 %v6212_v30, %v6015_v39  ;;  %v6488_v43 = vadd.f32 %v9736_v32, %v13562_v35 }
 0x37a   : > { %v6359_v33 = vpop.f32.mrf.mxu1 }
 0x37b   : > { %v6579_v34 = vpop.f32.mrf.mxu0  ;;  %v13723_v37 = vadd.f32 %v9770_v51, %v6488_v43  ;;  %v6486_v52 = vadd.f32 %v6359_v33, %v13565_v41 }
 0x37c   : > { %v9737_v3 = vpop.f32.mrf.mxu1 }
 0x37d   : > { %v9771_v28 = vpop.f32.mrf.mxu0  ;;  %v13726_v47 = vadd.f32 %v6579_v34, %v6486_v52  ;;  %v6489_v61 = vadd.f32 %v9737_v3, %v13568_v11 }
 0x37e   : > { %v6362_v2 = vpop.f32.mrf.mxu1 }
 0x37f   : > { %v6582_v20 = vpop.f32.mrf.mxu0  ;;  %v13729_v1 = vadd.f32 %v9771_v28, %v6489_v61  ;;  %v6487_v45 = vadd.f32 %v6362_v2, %v13577_v14 }
 0x380   : > { %v9740_v35 = vpop.f32.mrf.mxu1 }
 0x381   : > { %v9774_v46 = vpop.f32.mrf.mxu0  ;;  %v13732_v13 = vadd.f32 %v6582_v20, %v6487_v45  ;;  %v6492_v48 = vadd.f32 %v9740_v35, %v13582_v62 }
 0x382   : > { %v6375_v41 = vpop.f32.mrf.mxu1 }
 0x383   : > { %v6595_v57 = vpop.f32.mrf.mxu0  ;;  %v13735_v10 = vadd.f32 %v9774_v46, %v6492_v48  ;;  %v6490_v8 = vadd.f32 %v6375_v41, %v13585_v27 }
 0x384   : > { %v9741_v11 = vpop.f32.mrf.mxu1 }
 0x385   : > { %v9775_v58 = vpop.f32.mrf.mxu0  ;;  %v13738_v6 = vadd.f32 %v6595_v57, %v6490_v8  ;;  %v6493_v9 = vadd.f32 %v9741_v11, %v13588_v56 }
 0x386   : > { %v6378_v14 = vpop.f32.mrf.mxu1 }
 0x387   : > { %v6598_v31 = vpop.f32.mrf.mxu0  ;;  %v13741_v60 = vadd.f32 %v9775_v58, %v6493_v9  ;;  %v6491_v4 = vadd.f32 %v6378_v14, %v13597_v15 }
 0x388   : > { %v9744_v62 = vpop.f32.mrf.mxu1 }
 0x389   : > { %v9778_v0 = vpop.f32.mrf.mxu0  ;;  %v13744_v21 = vadd.f32 %v6598_v31, %v6491_v4  ;;  %v6496_v30 = vadd.f32 %v9744_v62, %v13602_v42 }
 0x38a   : > { %v6391_v27 = vpop.f32.mrf.mxu1 }
 0x38b   : > { %v6611_v19 = vpop.f32.mrf.mxu0  ;;  %v13747_v39 = vadd.f32 %v9778_v0, %v6496_v30  ;;  %v6494_v51 = vadd.f32 %v6391_v27, %v13605_v38 }
 0x38c   : > { %v9745_v56 = vpop.f32.mrf.mxu1 }
 0x38d   : > { %v9779_v32 = vpop.f32.mrf.mxu0  ;;  %v13750_v43 = vadd.f32 %v6611_v19, %v6494_v51  ;;  %v6497_v34 = vadd.f32 %v9745_v56, %v13608_v53 }
 0x38e   : > { %v6394_v15 = vpop.f32.mrf.mxu1 }
 0x38f   : > { %v6614_v33 = vpop.f32.mrf.mxu0  ;;  %v13753_v52 = vadd.f32 %v9779_v32, %v6497_v34  ;;  %v6495_v28 = vadd.f32 %v6394_v15, %v13617_v25 }
 0x390   : > { %v9748_v42 = vpop.f32.mrf.mxu1 }
 0x391   : > { %v9782_v3 = vpop.f32.mrf.mxu0  ;;  %v13756_v61 = vadd.f32 %v6614_v33, %v6495_v28  ;;  %v6500_v20 = vadd.f32 %v9748_v42, %v13622_v22 }
 0x392   : > { %v6407_v38 = vpop.f32.mrf.mxu1 }
 0x393   : > { %v6627_v2 = vpop.f32.mrf.mxu0  ;;  %v13759_v45 = vadd.f32 %v9782_v3, %v6500_v20  ;;  %v6498_v46 = vadd.f32 %v6407_v38, %v13625_v49 }
 0x394   : > { %v9749_v53 = vpop.f32.mrf.mxu1 }
 0x395   : > { %v9783_v35 = vpop.f32.mrf.mxu0  ;;  %v13762_v48 = vadd.f32 %v6627_v2, %v6498_v46  ;;  %v6501_v57 = vadd.f32 %v9749_v53, %v13628_v24 }
 0x396   : > { %v6410_v25 = vpop.f32.mrf.mxu1 }
 0x397   : > { %v6630_v41 = vpop.f32.mrf.mxu0  ;;  %v13765_v8 = vadd.f32 %v9783_v35, %v6501_v57  ;;  %v6499_v58 = vadd.f32 %v6410_v25, %v13637_v44 }
 0x398   : > { %v9752_v22 = vpop.f32.mrf.mxu1 }
 0x399   : > { %v9786_v11 = vpop.f32.mrf.mxu0  ;;  %v13768_v9 = vadd.f32 %v6630_v41, %v6499_v58  ;;  %v6504_v31 = vadd.f32 %v9752_v22, %v13642_v54 }
 0x39a   : > { %v6423_v49 = vpop.f32.mrf.mxu1 }
 0x39b   : > { %v6643_v14 = vpop.f32.mrf.mxu0  ;;  %v13771_v4 = vadd.f32 %v9786_v11, %v6504_v31  ;;  %v6502_v0 = vadd.f32 %v6423_v49, %v13645_v40 }
 0x39c   : > { %v9753_v24 = vpop.f32.mrf.mxu1 }
 0x39d   : > { %v9787_v62 = vpop.f32.mrf.mxu0  ;;  %v13774_v30 = vadd.f32 %v6643_v14, %v6502_v0  ;;  %v6505_v19 = vadd.f32 %v9753_v24, %v13648_v16 }
 0x39e   : > { %v6426_v44 = vpop.f32.mrf.mxu1 }
 0x39f   : > { %v6646_v27 = vpop.f32.mrf.mxu0  ;;  %v13777_v51 = vadd.f32 %v9787_v62, %v6505_v19  ;;  %v6503_v32 = vadd.f32 %v6426_v44, %v13657_v17 }
 0x3a0   : > { %v9756_v54 = vpop.f32.mrf.mxu1 }
 0x3a1   : > { %14864 = vst [vmem:[#allocation39_spill] sm:$0xff] %v13777_v51  ;;  %v9790_v56 = vpop.f32.mrf.mxu0  ;;  %v13780_v34 = vadd.f32 %v6646_v27, %v6503_v32  ;;  %v6508_v33 = vadd.f32 %v9756_v54, %v13664_v55 }
 0x3a2   : > { %v6439_v40 = vpop.f32.mrf.mxu1 }
 0x3a3   : > { %14865 = vst [vmem:[#allocation24_spill] sm:$0xff] %v13780_v34  ;;  %v6659_v15 = vpop.f32.mrf.mxu0  ;;  %v13783_v28 = vadd.f32 %v9790_v56, %v6508_v33  ;;  %v6506_v3 = vadd.f32 %v6439_v40, %v13671_v59 }
 0x3a4   : > { %v9757_v16 = vpop.f32.mrf.mxu1 }
 0x3a5   : > { %14866 = vst [vmem:[#allocation34_spill] sm:$0xff] %v13783_v28  ;;  %v9791_v42 = vpop.f32.mrf.mxu0  ;;  %v13786_v20 = vadd.f32 %v6659_v15, %v6506_v3  ;;  %v6509_v2 = vadd.f32 %v9757_v16, %v13674_v18 }
 0x3a6   : > { %v6442_v17 = vpop.f32.mrf.mxu1 }
 0x3a7   : > { %14867 = vst [vmem:[#allocation19_spill] sm:$0xff] %v13786_v20  ;;  %v6662_v38 = vpop.f32.mrf.mxu0  ;;  %v13789_v46 = vadd.f32 %v9791_v42, %v6509_v2  ;;  %v6507_v35 = vadd.f32 %v6442_v17, %v13689_v63 }
 0x3a8   : > { %v9760_v55 = vpop.f32.mrf.mxu1 }
 0x3a9   : > { %14868 = vst [vmem:[#allocation52_spill] sm:$0xff] %v13789_v46  ;;  %v9794_v53 = vpop.f32.mrf.mxu0  ;;  %v13792_v57 = vadd.f32 %v6662_v38, %v6507_v35  ;;  %v6512_v41 = vadd.f32 %v9760_v55, %v13696_v36 }
 0x3aa   : > { %v6455_v59 = vpop.f32.mrf.mxu1 }
 0x3ab   : > { %14869 = vst [vmem:[#allocation3_spill] sm:$0xff] %v13792_v57  ;;  %v6675_v25 = vpop.f32.mrf.mxu0  ;;  %v13795_v58 = vadd.f32 %v9794_v53, %v6512_v41  ;;  %v6510_v11 = vadd.f32 %v6455_v59, %v13700_v23 }
 0x3ac   : > { %v9761_v18 = vpop.f32.mrf.mxu1 }
 0x3ad   : > { %14870 = vst [vmem:[#allocation4_spill] sm:$0xff] %v13795_v58  ;;  %v9795_v22 = vpop.f32.mrf.mxu0  ;;  %v13798_v31 = vadd.f32 %v6675_v25, %v6510_v11  ;;  %v6513_v14 = vadd.f32 %v9761_v18, %v13703_v26 }
 0x3ae   : > { %v6458_v63 = vpop.f32.mrf.mxu1 }
 0x3af   : > { %14871 = vst [vmem:[#allocation59_spill] sm:$0xff] %v13798_v31  ;;  %v6678_v49 = vpop.f32.mrf.mxu0  ;;  %v13801_v0 = vadd.f32 %v9795_v22, %v6513_v14  ;;  %v6511_v62 = vadd.f32 %v6458_v63, %v13708_v12 }
 0x3b0   : > { %v9764_v36 = vpop.f32.mrf.mxu1 }
 0x3b1   : > { %14872 = vst [vmem:[#allocation36_spill] sm:$0xff] %v13801_v0  ;;  %v9798_v24 = vpop.f32.mrf.mxu0  ;;  %v13804_v19 = vadd.f32 %v6678_v49, %v6511_v62  ;;  %v6516_v27 = vadd.f32 %v9764_v36, %v13711_v29 }
 0x3b2   : > { %v6471_v23 = vpop.f32.mrf.mxu1 }
 0x3b3   : > { %14873 = vst [vmem:[#allocation12_spill] sm:$0xff] %v13804_v19  ;;  %v6691_v44 = vpop.f32.mrf.mxu0  ;;  %v13807_v32 = vadd.f32 %v9798_v24, %v6516_v27  ;;  %v6514_v56 = vadd.f32 %v6471_v23, %v13714_v50 }
 0x3b4   : > { %v9765_v26 = vpop.f32.mrf.mxu1 }
 0x3b5   : > { %14874 = vst [vmem:[#allocation55_spill] sm:$0xff] %v13807_v32  ;;  %v9799_v54 = vpop.f32.mrf.mxu0  ;;  %v13810_v33 = vadd.f32 %v6691_v44, %v6514_v56  ;;  %v6517_v15 = vadd.f32 %v9765_v26, %v13717_v7 }
 0x3b6   : > { %v6474_v12 = vpop.f32.mrf.mxu1 }
 0x3b7   : > { %14875 = vst [vmem:[#allocation6_spill] sm:$0xff] %v13810_v33  ;;  %v6694_v40 = vpop.f32.mrf.mxu0  ;;  %v13813_v3 = vadd.f32 %v9799_v54, %v6517_v15  ;;  %v6515_v42 = vadd.f32 %v6474_v12, %v13720_v5 }
 0x3b8   : > { %v9804_v29 = vpop.f32.mrf.mxu1 }
 0x3b9   : > { %14876 = vst [vmem:[#allocation50_spill] sm:$0xff] %v13813_v3  ;;  %v13816_v16 = vpop.f32.mrf.mxu0  ;;  %v13818_v2 = vadd.f32 %v6694_v40, %v6515_v42 }
 0x3ba   : > { %v6787_v50 = vpop.f32.mrf.mxu1 }
 0x3bb   : > { %14877 = vst [vmem:[#allocation56_spill] sm:$0xff] %v13818_v2  ;;  %v13820_v38 = vpop.f32.mrf.mxu0 }
 0x3bc   : > { %v9805_v35 = vpop.f32.mrf.mxu1 }
 0x3bd   : > { %v13822_v17 = vpop.f32.mrf.mxu0 }
 0x3be   : > { %v13826_v7 = vpop.f32.mrf.mxu1 }
 0x3bf   : > { %v13824_v53 = vpop.f32.mrf.mxu0 }
 0x3c0   : > { %v13830_v41 = vpop.f32.mrf.mxu1 }
 0x3c1   : > { %v13828_v55 = vpop.f32.mrf.mxu0 }
 0x3c2   : > { %v13834_v25 = vpop.f32.mrf.mxu1 }
 0x3c3   : > { %v13832_v5 = vpop.f32.mrf.mxu0 }
 0x3c4   : > { %v13838_v11 = vpop.f32.mrf.mxu1 }
 0x3c5   : > { %v13836_v59 = vpop.f32.mrf.mxu0 }
 0x3c6   : > { %v13842_v18 = vpop.f32.mrf.mxu1 }
 0x3c7   : > { %v13840_v22 = vpop.f32.mrf.mxu0 }
 0x3c8   : > { %v13846_v49 = vpop.f32.mrf.mxu1 }
 0x3c9   : > { %v13844_v14 = vpop.f32.mrf.mxu0 }
 0x3ca   : > { %v13850_v62 = vpop.f32.mrf.mxu1 }
 0x3cb   : > { %v13848_v63 = vpop.f32.mrf.mxu0 }
 0x3cc   : > { %v13854_v36 = vpop.f32.mrf.mxu1 }
 0x3cd   : > { %v13852_v24 = vpop.f32.mrf.mxu0 }
 0x3ce   : > { %v13858_v44 = vpop.f32.mrf.mxu1 }
 0x3cf   : > { %v13856_v27 = vpop.f32.mrf.mxu0 }
 0x3d0   : > { %v13862_v56 = vpop.f32.mrf.mxu1 }
 0x3d1   : > { %v13860_v23 = vpop.f32.mrf.mxu0 }
 0x3d2   : > { %v13866_v26 = vpop.f32.mrf.mxu1 }
 0x3d3   : > { %v13864_v54 = vpop.f32.mrf.mxu0 }
 0x3d4   : > { %v13870_v40 = vpop.f32.mrf.mxu1 }
 0x3d5   : > { %v13868_v15 = vpop.f32.mrf.mxu0 }
 0x3d6   : > { %v13874_v42 = vpop.f32.mrf.mxu1 }
 0x3d7   : > { %v13872_v12 = vpop.f32.mrf.mxu0 }
 0x3d8   : > { %v13878_v3 = vpop.f32.mrf.mxu1 }
 0x3d9   : > { %v13876_v2 = vpop.f32.mrf.mxu0 }
 0x3da   : > { %v13882_v32 = vpop.f32.mrf.mxu1 }
 0x3db   : > { %v13880_v33 = vpop.f32.mrf.mxu0 }
 0x3dc   : > { %14878 = vst [vmem:[#allocation22_spill] sm:$0xff] %v13880_v33  ;;  %v13886_v0 = vpop.f32.mrf.mxu1 }
 0x3dd   : > { %v13884_v19 = vpop.f32.mrf.mxu0  ;;  %14880 = vst [vmem:[#allocation37_spill] sm:$0xff] %v13886_v0 }
 0x3de   : > { %14879 = vst [vmem:[#allocation13_spill] sm:$0xff] %v13884_v19  ;;  %v13890_v58 = vpop.f32.mrf.mxu1 }
 0x3df   : > { %v13888_v31 = vpop.f32.mrf.mxu0  ;;  %14882 = vst [vmem:[#allocation14_spill] sm:$0xff] %v13890_v58 }
 0x3e0   : > { %14881 = vst [vmem:[#allocation18_spill] sm:$0xff] %v13888_v31  ;;  %v13894_v46 = vpop.f32.mrf.mxu1 }
 0x3e1   : > { %v13892_v57 = vpop.f32.mrf.mxu0  ;;  %14884 = vst [vmem:[#allocation40_spill] sm:$0xff] %v13894_v46 }
 0x3e2   : > { %14883 = vst [vmem:[#allocation9_spill] sm:$0xff] %v13892_v57  ;;  %v13898_v28 = vpop.f32.mrf.mxu1 }
 0x3e3   : > { %v13896_v20 = vpop.f32.mrf.mxu0  ;;  %14886 = vst [vmem:[#allocation30_spill] sm:$0xff] %v13898_v28 }
 0x3e4   : > { %14885 = vst [vmem:[#allocation48_spill] sm:$0xff] %v13896_v20  ;;  %v13902_v33 = vpop.f32.mrf.mxu1 }
 0x3e5   : > { %v13900_v34 = vpop.f32.mrf.mxu0  ;;  %14888 = vst [vmem:[#allocation11_spill] sm:$0xff] %v13902_v33 }
 0x3e6   : > { %14887 = vst [vmem:[#allocation43_spill] sm:$0xff] %v13900_v34  ;;  %v13906_v19 = vpop.f32.mrf.mxu1 }
 0x3e7   : > { %v13904_v51 = vpop.f32.mrf.mxu0  ;;  %14890 = vst [vmem:[#allocation16_spill] sm:$0xff] %v13906_v19 }
 0x3e8   : > { %14889 = vst [vmem:[#allocation2_spill] sm:$0xff] %v13904_v51  ;;  %v13910_v31 = vpop.f32.mrf.mxu1 }
 0x3e9   : > { %v13908_v0 = vpop.f32.mrf.mxu0  ;;  %14892 = vst [vmem:[#allocation45_spill] sm:$0xff] %v13910_v31 }
 0x3ea   : > { %14891 = vst [vmem:[#allocation44_spill] sm:$0xff] %v13908_v0  ;;  %v13914_v57 = vpop.f32.mrf.mxu1 }
 0x3eb   : > { %v13912_v58 = vpop.f32.mrf.mxu0  ;;  %14894 = vst [vmem:[#allocation17_spill] sm:$0xff] %v13914_v57 }
 0x3ec   : > { %14893 = vst [vmem:[#allocation25_spill] sm:$0xff] %v13912_v58  ;;  %v13918_v20 = vpop.f32.mrf.mxu1  ;;  %v6916_v58 = vadd.f32 %v9804_v29, %v13723_v37  ;;  %v6915_v37 = vadd.f32 %v13826_v7, %v13732_v13  ;;  %v13958_v13 = vld [vmem:[%s14183_s3] ss:$0 sm:$0xff] }
 0x3ed   : > { %v13916_v46 = vpop.f32.mrf.mxu0  ;;  %14896 = vst [vmem:[#allocation28_spill] sm:$0xff] %v13918_v20 }
 0x3ee   : > { %14895 = vst [vmem:[#allocation47_spill] sm:$0xff] %v13916_v46  ;;  %v13922_v34 = vpop.f32.mrf.mxu1  ;;  %v6914_v46 = vadd.f32 %v6787_v50, %v13726_v47  ;;  %v13950_v47 = vld [vmem:[%s14182_s2] ss:$0 sm:$0xff] }
 0x3ef   : > { %v13920_v28 = vpop.f32.mrf.mxu0  ;;  %14898 = vst [vmem:[#allocation8_spill] sm:$0xff] %v13922_v34 }
 0x3f0   : > { %14897 = vst [vmem:[#allocation15_spill] sm:$0xff] %v13920_v28  ;;  %v13926_v51 = vpop.f32.mrf.mxu1 }
 0x3f1   : > { %v13924_v33 = vpop.f32.mrf.mxu0  ;;  %14900 = vst [vmem:[#allocation29_spill] sm:$0xff] %v13926_v51  ;;  %v6917_v51 = vadd.f32 %v9805_v35, %v13729_v1 }
 0x3f2   : > { %14899 = vst [vmem:[#allocation42_spill] sm:$0xff] %v13924_v33  ;;  %v13930_v0 = vpop.f32.mrf.mxu1  ;;  %v7178_v33 = vadd.f32 %v13816_v16, %v6916_v58 }
 0x3f3   : > { %v13928_v19 = vpop.f32.mrf.mxu0  ;;  %14902 = vst [vmem:[#allocation10_spill] sm:$0xff] %v13930_v0  ;;  %v7176_v0 = vadd.f32 %v13820_v38, %v6914_v46  ;;  %v7179_v58 = vadd.f32 %v13822_v17, %v6917_v51  ;;  %v6920_v46 = vadd.f32 %v13830_v41, %v13735_v10  ;;  %v6918_v51 = vadd.f32 %v13834_v25, %v13738_v6 }
 0x3f4   : > { %14901 = vst [vmem:[#allocation38_spill] sm:$0xff] %v13928_v19  ;;  %v13935_v57 = vpop.f32.mrf.mxu1 }
 0x3f5   : > { %v13933_v31 = vpop.f32.mrf.mxu0 }
 0x3f6   : > { %14903 = vst [vmem:[#allocation33_spill] sm:$0xff] %v13933_v31  ;;  %v13940_v28 = vpop.f32.mrf.mxu1 }
 0x3f7   : > { %v13938_v20 = vpop.f32.mrf.mxu0  ;;  %14905 = vst [vmem:[#allocation7_spill] sm:$0xff] %v13940_v28 }
 0x3f8   : > { %14904 = vst [vmem:[#allocation58_spill] sm:$0xff] %v13938_v20  ;;  %v9872_v19 = vpop.f32.mrf.mxu1 }
 0x3f9   : > { %v9906_v34 = vpop.f32.mrf.mxu0  ;;  %v7398_v29 = vadd.f32 %v9872_v19, %v7178_v33  ;;  %v7177_v33 = vadd.f32 %v13824_v53, %v6915_v37  ;;  %v7182_v37 = vadd.f32 %v13828_v55, %v6920_v46 }
 0x3fa   : > { %v7269_v50 = vpop.f32.mrf.mxu1 }
 0x3fb   : > { %v7477_v31 = vpop.f32.mrf.mxu0  ;;  %v7606_v16 = vadd.f32 %v9906_v34, %v7398_v29  ;;  %v7396_v1 = vadd.f32 %v7269_v50, %v7176_v0  ;;  %v6921_v34 = vadd.f32 %v13838_v11, %v13741_v60 }
 0x3fc   : > { %v9873_v19 = vpop.f32.mrf.mxu1 }
 0x3fd   : > { %v9907_v35 = vpop.f32.mrf.mxu0  ;;  %v7645_v38 = vmul.f32 %v13950_v47, %v7606_v16  ;;  %v7604_v7 = vadd.f32 %v7477_v31, %v7396_v1  ;;  %v7399_v20 = vadd.f32 %v9873_v19, %v7179_v58  ;;  %v6919_v31 = vadd.f32 %v13842_v18, %v13744_v21 }
 0x3fe   : > { %v7272_v10 = vpop.f32.mrf.mxu1  ;;  %v7180_v16 = vadd.f32 %v13832_v5, %v6918_v51  ;;  %v6924_v1 = vadd.f32 %v13846_v49, %v13747_v39  ;;  %v6922_v39 = vadd.f32 %v13850_v62, %v13750_v43 }
 0x3ff   : > { %v7480_v28 = vpop.f32.mrf.mxu0  ;;  %v7684_v0 = vadd.f32 %v13958_v13, %v7645_v38  ;;  %v7643_v17 = vmul.f32 %v13950_v47, %v7604_v7  ;;  %v7607_v41 = vadd.f32 %v9907_v35, %v7399_v20  ;;  %v7397_v29 = vadd.f32 %v7272_v10, %v7177_v33 }
 0x400   : > { %v9876_v50 = vpop.f32.mrf.mxu1  ;;  %v7183_v20 = vadd.f32 %v13836_v59, %v6921_v34  ;;  %v7181_v59 = vadd.f32 %v13840_v22, %v6919_v31  ;;  %v6925_v22 = vadd.f32 %v13854_v36, %v13753_v52 }
 0x401   : > { %v9910_v53 = vpop.f32.mrf.mxu0  ;;  %v7716_v6 = vmax.f32 %v7684_v0, 0.0  ;;  %v7682_v25 = vadd.f32 %v13958_v13, %v7643_v17  ;;  %v7646_v60 = vmul.f32 %v13950_v47, %v7607_v41  ;;  %v7605_v11 = vadd.f32 %v7480_v28, %v7397_v29 }
 0x402   : > { %v7402_v21 = vadd.f32 %v9876_v50, %v7182_v37  ;;  %v7285_v55 = vpop.f32.mrf.mxu1  ;;  %v7186_v0 = vadd.f32 %v13844_v14, %v6924_v1  ;;  %v7184_v50 = vadd.f32 %v13848_v63, %v6922_v39  ;;  %v6923_v14 = vadd.f32 %v13858_v44, %v13756_v61 }
 0x403   : > { %v7493_v58 = vpop.f32.mrf.mxu0  ;;  %v7748_v18 = vpack.c.bf16 %v7716_v6, %v7716_v6  ;;  %v7714_v35 = vmax.f32 %v7682_v25, 0.0  ;;  %v7685_v28 = vadd.f32 %v13958_v13, %v7646_v60  ;;  %v7644_v46 = vmul.f32 %v13950_v47, %v7605_v11 }
 0x404   : > { %v7610_v49 = vadd.f32 %v9910_v53, %v7402_v21  ;;  %v7400_v19 = vadd.f32 %v7285_v55, %v7180_v16  ;;  %v9877_v33 = vpop.f32.mrf.mxu1  ;;  %v6928_v63 = vadd.f32 %v13862_v56, %v13759_v45 }
 0x405   : > { %v9911_v5 = vpop.f32.mrf.mxu0  ;;  %7781 = vst.msk [vmem:[%s13981_s8 + $0x8] sm:$0xf] %vm7778_vm8, %v7748_v18  ;;  %v7746_v38 = vpack.c.bf16 %v7714_v35, %v7714_v35  ;;  %v7717_v7 = vmax.f32 %v7685_v28, 0.0  ;;  %v7683_v51 = vadd.f32 %v13958_v13, %v7644_v46  ;;  %v7403_v34 = vadd.f32 %v9877_v33, %v7183_v20 }
 0x406   : > { %v7649_v17 = vmul.f32 %v13950_v47, %v7610_v49  ;;  %v7608_v43 = vadd.f32 %v7493_v58, %v7400_v19  ;;  %v7288_v62 = vpop.f32.mrf.mxu1  ;;  %v7187_v20 = vadd.f32 %v13852_v24, %v6925_v22  ;;  %v7185_v46 = vadd.f32 %v13856_v27, %v6923_v14 }
 0x407   : > { %v7496_v10 = vpop.f32.mrf.mxu0  ;;  %7779 = vst.msk [vmem:[%s13981_s8] sm:$0xf] %vm7778_vm8, %v7746_v38  ;;  %v7749_v41 = vpack.c.bf16 %v7717_v7, %v7717_v7  ;;  %v7715_v29 = vmax.f32 %v7683_v51, 0.0  ;;  %v7611_v53 = vadd.f32 %v9911_v5, %v7403_v34  ;;  %v7401_v37 = vadd.f32 %v7288_v62, %v7181_v59 }
 0x408   : > { %v7688_v6 = vadd.f32 %v13958_v13, %v7649_v17  ;;  %v7647_v52 = vmul.f32 %v13950_v47, %v7608_v43  ;;  %v9880_v36 = vpop.f32.mrf.mxu1  ;;  %v6926_v24 = vadd.f32 %v13866_v26, %v13762_v48  ;;  %v7190_v38 = vadd.f32 %v13860_v23, %v6928_v63 }
 0x409   : > { %v9914_v31 = vpop.f32.mrf.mxu0  ;;  %7782 = vst.msk [vmem:[%s13981_s8 + $0xc] sm:$0xf] %vm7778_vm8, %v7749_v41  ;;  %v7747_v25 = vpack.c.bf16 %v7715_v29, %v7715_v29  ;;  %v7650_v60 = vmul.f32 %v13950_v47, %v7611_v53  ;;  %v7609_v11 = vadd.f32 %v7496_v10, %v7401_v37  ;;  %v7406_v58 = vadd.f32 %v9880_v36, %v7186_v0 }
 0x40a   : > { %v7720_v1 = vmax.f32 %v7688_v6, 0.0  ;;  %v7686_v61 = vadd.f32 %v13958_v13, %v7647_v52  ;;  %v7301_v44 = vpop.f32.mrf.mxu1  ;;  %v6929_v7 = vadd.f32 %v13870_v40, %v13765_v8  ;;  %v7188_v17 = vadd.f32 %v13864_v54, %v6926_v24 }
 0x40b   : > { %v7509_v16 = vpop.f32.mrf.mxu0  ;;  %7780 = vst.msk [vmem:[%s13981_s8 + $0x4] sm:$0xf] %vm7778_vm8, %v7747_v25  ;;  %v7689_v21 = vadd.f32 %v13958_v13, %v7650_v60  ;;  %v7648_v55 = vmul.f32 %v13950_v47, %v7609_v11  ;;  %v7614_v18 = vadd.f32 %v9914_v31, %v7406_v58  ;;  %v7404_v35 = vadd.f32 %v7301_v44, %v7184_v50  ;;  %v14907_v44 = vld [vmem:[#allocation37_spill] sm:$0xff] }
 0x40c   : > { %v7752_v45 = vpack.c.bf16 %v7720_v1, %v7720_v1  ;;  %v7718_v56 = vmax.f32 %v7686_v61, 0.0  ;;  %v9881_v5 = vpop.f32.mrf.mxu1  ;;  %v6927_v23 = vadd.f32 %v13874_v42, %v13768_v9  ;;  %v7191_v31 = vadd.f32 %v13868_v15, %v6929_v7 }
 0x40d   : > { %v9915_v28 = vpop.f32.mrf.mxu0  ;;  %v7721_v59 = vmax.f32 %v7689_v21, 0.0  ;;  %v7687_v39 = vadd.f32 %v13958_v13, %v7648_v55  ;;  %v7653_v49 = vmul.f32 %v13950_v47, %v7614_v18  ;;  %v7612_v19 = vadd.f32 %v7509_v16, %v7404_v35 }
 0x40e   : > { %7785 = vst.msk [vmem:[%s13981_s8 + $0x18] sm:$0xf] %vm7778_vm8, %v7752_v45  ;;  %v7750_v48 = vpack.c.bf16 %v7718_v56, %v7718_v56  ;;  %v7407_v27 = vadd.f32 %v9881_v5, %v7187_v20  ;;  %v7304_v26 = vpop.f32.mrf.mxu1  ;;  %v6932_v9 = vadd.f32 %v13878_v3, %v13771_v4  ;;  %v7189_v60 = vadd.f32 %v13872_v12, %v6927_v23  ;;  %v14906_v12 = vld [vmem:[#allocation39_spill] sm:$0xff]  ;;  %v14908_v45 = vld [vmem:[#allocation22_spill] sm:$0xff] }
 0x40f   : > { %v7512_v33 = vpop.f32.mrf.mxu0  ;;  %v7753_v51 = vpack.c.bf16 %v7721_v59, %v7721_v59  ;;  %v7719_v34 = vmax.f32 %v7687_v39, 0.0  ;;  %v7692_v10 = vadd.f32 %v13958_v13, %v7653_v49  ;;  %v7651_v0 = vmul.f32 %v13950_v47, %v7612_v19  ;;  %v14910_v5 = vld [vmem:[#allocation14_spill] sm:$0xff] }
 0x410   : > { %7783 = vst.msk [vmem:[%s13981_s8 + $0x10] sm:$0xf] %vm7778_vm8, %v7750_v48  ;;  %v7615_v8 = vadd.f32 %v9915_v28, %v7407_v27  ;;  %v7405_v40 = vadd.f32 %v7304_v26, %v7185_v46  ;;  %v9884_v43 = vpop.f32.mrf.mxu1  ;;  %v6930_v15 = vadd.f32 %v13882_v32, %v13774_v30  ;;  %v7194_v61 = vadd.f32 %v13876_v2, %v6932_v9  ;;  %v14909_v2 = vld [vmem:[#allocation24_spill] sm:$0xff]  ;;  %v14911_v26 = vld [vmem:[#allocation13_spill] sm:$0xff] }
 0x411   : > { %v9918_v22 = vpop.f32.mrf.mxu0  ;;  %7786 = vst.msk [vmem:[%s13981_s8 + $0x1c] sm:$0xf] %vm7778_vm8, %v7753_v51  ;;  %v7751_v62 = vpack.c.bf16 %v7719_v34, %v7719_v34  ;;  %v7724_v41 = vmax.f32 %v7692_v10, 0.0  ;;  %v7690_v29 = vadd.f32 %v13958_v13, %v7651_v0  ;;  %v7410_v53 = vadd.f32 %v9884_v43, %v7190_v38  ;;  %v14912_v34 = vld [vmem:[#allocation34_spill] sm:$0xff]  ;;  %v14913_v10 = vld [vmem:[#allocation40_spill] sm:$0xff] }
 0x412   : > { %v7654_v54 = vmul.f32 %v13950_v47, %v7615_v8  ;;  %v7613_v42 = vadd.f32 %v7512_v33, %v7405_v40  ;;  %v7317_v50 = vpop.f32.mrf.mxu1  ;;  %v6933_v21 = vadd.f32 %v14907_v44, %v14906_v12  ;;  %v7192_v56 = vadd.f32 %v14908_v45, %v6930_v15 }
 0x413   : > { %v7525_v37 = vpop.f32.mrf.mxu0  ;;  %7784 = vst.msk [vmem:[%s13981_s8 + $0x14] sm:$0xf] %vm7778_vm8, %v7751_v62  ;;  %v7756_v14 = vpack.c.bf16 %v7724_v41, %v7724_v41  ;;  %v7722_v6 = vmax.f32 %v7690_v29, 0.0  ;;  %v7618_v52 = vadd.f32 %v9918_v22, %v7410_v53  ;;  %v7408_v36 = vadd.f32 %v7317_v50, %v7188_v17  ;;  %v14914_v29 = vld [vmem:[#allocation18_spill] sm:$0xff] }
 0x414   : > { %v7693_v11 = vadd.f32 %v13958_v13, %v7654_v54  ;;  %v7652_v4 = vmul.f32 %v13950_v47, %v7613_v42  ;;  %v9885_v3 = vpop.f32.mrf.mxu1  ;;  %v6931_v59 = vadd.f32 %v14910_v5, %v14909_v2  ;;  %v7195_v51 = vadd.f32 %v14911_v26, %v6933_v21  ;;  %v14920_v21 = vld [vmem:[#allocation48_spill] sm:$0xff] }
 0x415   : > { %v9919_v25 = vpop.f32.mrf.mxu0  ;;  %7789 = vst.msk [vmem:[%s13981_s8 + $0x28] sm:$0xf] %vm7778_vm8, %v7756_v14  ;;  %v7754_v58 = vpack.c.bf16 %v7722_v6, %v7722_v6  ;;  %v7657_v16 = vmul.f32 %v13950_v47, %v7618_v52  ;;  %v7616_v20 = vadd.f32 %v7525_v37, %v7408_v36  ;;  %v7411_v63 = vadd.f32 %v9885_v3, %v7191_v31  ;;  %v14915_v37 = vld [vmem:[#allocation19_spill] sm:$0xff]  ;;  %v14916_v31 = vld [vmem:[#allocation30_spill] sm:$0xff] }
 0x416   : > { %v7725_v55 = vmax.f32 %v7693_v11, 0.0  ;;  %v7691_v30 = vadd.f32 %v13958_v13, %v7652_v4  ;;  %v7320_v32 = vpop.f32.mrf.mxu1  ;;  %v6936_v0 = vadd.f32 %v14913_v10, %v14912_v34  ;;  %v7193_v53 = vadd.f32 %v14914_v29, %v6931_v59  ;;  %v14918_v11 = vld [vmem:[#allocation52_spill] sm:$0xff]  ;;  %v14919_v4 = vld [vmem:[#allocation11_spill] sm:$0xff] }
 0x417   : > { %v7528_v1 = vpop.f32.mrf.mxu0  ;;  %7787 = vst.msk [vmem:[%s13981_s8 + $0x20] sm:$0xf] %vm7778_vm8, %v7754_v58  ;;  %v7696_v18 = vadd.f32 %v13958_v13, %v7657_v16  ;;  %v7655_v35 = vmul.f32 %v13950_v47, %v7616_v20  ;;  %v7619_v28 = vadd.f32 %v9919_v25, %v7411_v63  ;;  %v7409_v46 = vadd.f32 %v7320_v32, %v7189_v60  ;;  %v14917_v60 = vld [vmem:[#allocation9_spill] sm:$0xff]  ;;  %v14922_v32 = vld [vmem:[#allocation16_spill] sm:$0xff]  ;;  %v14923_v59 = vld [vmem:[#allocation43_spill] sm:$0xff] }
 0x418   : > { %v7757_v39 = vpack.c.bf16 %v7725_v55, %v7725_v55  ;;  %v7723_v49 = vmax.f32 %v7691_v30, 0.0  ;;  %v9888_v19 = vpop.f32.mrf.mxu1  ;;  %v6934_v9 = vadd.f32 %v14916_v31, %v14915_v37  ;;  %v7198_v15 = vadd.f32 %v14917_v60, %v6936_v0  ;;  %v14921_v30 = vld [vmem:[#allocation3_spill] sm:$0xff]  ;;  %v14926_v0 = vld [vmem:[#allocation2_spill] sm:$0xff] }
 0x419   : > { %v9922_v24 = vpop.f32.mrf.mxu0  ;;  %v7728_v33 = vmax.f32 %v7696_v18, 0.0  ;;  %v7694_v38 = vadd.f32 %v13958_v13, %v7655_v35  ;;  %v7658_v7 = vmul.f32 %v13950_v47, %v7619_v28  ;;  %v7617_v48 = vadd.f32 %v7528_v1, %v7409_v46 }
 0x41a   : > { %7790 = vst.msk [vmem:[%s13981_s8 + $0x2c] sm:$0xf] %vm7778_vm8, %v7757_v39  ;;  %v7755_v22 = vpack.c.bf16 %v7723_v49, %v7723_v49  ;;  %v7414_v17 = vadd.f32 %v9888_v19, %v7194_v61  ;;  %v7333_v23 = vpop.f32.mrf.mxu1  ;;  %v6937_v3 = vadd.f32 %v14919_v4, %v14918_v11  ;;  %v7196_v55 = vadd.f32 %v14920_v21, %v6934_v9  ;;  %v14924_v49 = vld [vmem:[#allocation4_spill] sm:$0xff]  ;;  %v14925_v19 = vld [vmem:[#allocation45_spill] sm:$0xff] }
 0x41b   : > { %v7541_v27 = vpop.f32.mrf.mxu0  ;;  %v7760_v8 = vpack.c.bf16 %v7728_v33, %v7728_v33  ;;  %v7726_v40 = vmax.f32 %v7694_v38, 0.0  ;;  %v7697_v43 = vadd.f32 %v13958_v13, %v7658_v7  ;;  %v7656_v62 = vmul.f32 %v13950_v47, %v7617_v48  ;;  %v14929_v9 = vld [vmem:[#allocation44_spill] sm:$0xff] }
 0x41c   : > { %7788 = vst.msk [vmem:[%s13981_s8 + $0x24] sm:$0xf] %vm7778_vm8, %v7755_v22  ;;  %v7622_v54 = vadd.f32 %v9922_v24, %v7414_v17  ;;  %v7412_v42 = vadd.f32 %v7333_v23, %v7192_v56  ;;  %v9889_v50 = vpop.f32.mrf.mxu1  ;;  %v6935_v18 = vadd.f32 %v14922_v32, %v14921_v30  ;;  %v7199_v39 = vadd.f32 %v14923_v59, %v6937_v3  ;;  %v14927_v17 = vld [vmem:[#allocation59_spill] sm:$0xff]  ;;  %v14928_v23 = vld [vmem:[#allocation17_spill] sm:$0xff] }
 0x41d   : > { %v9923_v41 = vpop.f32.mrf.mxu0  ;;  %7793 = vst.msk [vmem:[%s13981_s8 + $0x38] sm:$0xf] %vm7778_vm8, %v7760_v8  ;;  %v7758_v14 = vpack.c.bf16 %v7726_v40, %v7726_v40  ;;  %v7729_v6 = vmax.f32 %v7697_v43, 0.0  ;;  %v7695_v52 = vadd.f32 %v13958_v13, %v7656_v62  ;;  %v7415_v36 = vadd.f32 %v9889_v50, %v7195_v51  ;;  %v14931_v50 = vld [vmem:[#allocation28_spill] sm:$0xff]  ;;  %v14932_v3 = vld [vmem:[#allocation25_spill] sm:$0xff] }
 0x41e   : > { %v7661_v58 = vmul.f32 %v13950_v47, %v7622_v54  ;;  %v7620_v16 = vadd.f32 %v7541_v27, %v7412_v42  ;;  %v7336_v20 = vpop.f32.mrf.mxu1  ;;  %v6940_v33 = vadd.f32 %v14925_v19, %v14924_v49  ;;  %v7197_v22 = vadd.f32 %v14926_v0, %v6935_v18  ;;  %v14930_v42 = vld [vmem:[#allocation36_spill] sm:$0xff]  ;;  %v14935_v18 = vld [vmem:[#allocation47_spill] sm:$0xff] }
 0x41f   : > { %v7544_v25 = vpop.f32.mrf.mxu0  ;;  %7791 = vst.msk [vmem:[%s13981_s8 + $0x30] sm:$0xf] %vm7778_vm8, %v7758_v14  ;;  %v7761_v63 = vpack.c.bf16 %v7729_v6, %v7729_v6  ;;  %v7727_v1 = vmax.f32 %v7695_v52, 0.0  ;;  %v7623_v61 = vadd.f32 %v9923_v41, %v7415_v36  ;;  %v7413_v12 = vadd.f32 %v7336_v20, %v7193_v53  ;;  %v14934_v20 = vld [vmem:[#allocation8_spill] sm:$0xff]  ;;  %v14937_v19 = vld [vmem:[#allocation55_spill] sm:$0xff] }
 0x420   : > { %v7700_v35 = vadd.f32 %v13958_v13, %v7661_v58  ;;  %v7659_v28 = vmul.f32 %v13950_v47, %v7620_v16  ;;  %v9892_v46 = vpop.f32.mrf.mxu1  ;;  %v6938_v8 = vadd.f32 %v14928_v23, %v14927_v17  ;;  %v7202_v54 = vadd.f32 %v14929_v9, %v6940_v33  ;;  %v14933_v16 = vld [vmem:[#allocation12_spill] sm:$0xff]  ;;  %v14938_v33 = vld [vmem:[#allocation29_spill] sm:$0xff]  ;;  %v14940_v17 = vld [vmem:[#allocation10_spill] sm:$0xff] }
 0x421   : > { %v9926_v44 = vpop.f32.mrf.mxu0  ;;  %7794 = vst.msk [vmem:[%s13981_s8 + $0x3c] sm:$0xf] %vm7778_vm8, %v7761_v63  ;;  %v7759_v24 = vpack.c.bf16 %v7727_v1, %v7727_v1  ;;  %v7662_v45 = vmul.f32 %v13950_v47, %v7623_v61  ;;  %v7621_v56 = vadd.f32 %v7544_v25, %v7413_v12  ;;  %v7418_v2 = vadd.f32 %v9892_v46, %v7198_v15 }
 0x422   : > { %v7732_v38 = vmax.f32 %v7700_v35, 0.0  ;;  %v7698_v7 = vadd.f32 %v13958_v13, %v7659_v28  ;;  %v7349_v48 = vpop.f32.mrf.mxu1  ;;  %v6941_v14 = vadd.f32 %v14931_v50, %v14930_v42  ;;  %v7200_v58 = vadd.f32 %v14932_v3, %v6938_v8  ;;  %v14941_v8 = vld [vmem:[#allocation50_spill] sm:$0xff]  ;;  %v14943_v50 = vld [vmem:[#allocation56_spill] sm:$0xff] }
 0x423   : > { %v7557_v5 = vpop.f32.mrf.mxu0  ;;  %7792 = vst.msk [vmem:[%s13981_s8 + $0x34] sm:$0xf] %vm7778_vm8, %v7759_v24  ;;  %v7701_v27 = vadd.f32 %v13958_v13, %v7662_v45  ;;  %v7660_v26 = vmul.f32 %v13950_v47, %v7621_v56  ;;  %v7626_v51 = vadd.f32 %v9926_v44, %v7418_v2  ;;  %v7416_v34 = vadd.f32 %v7349_v48, %v7196_v55  ;;  %v14945_v3 = vld [vmem:[#allocation38_spill] sm:$0xff] }
 0x424   : > { %v7764_v40 = vpack.c.bf16 %v7732_v38, %v7732_v38  ;;  %v7730_v43 = vmax.f32 %v7698_v7, 0.0  ;;  %v9893_v62 = vpop.f32.mrf.mxu1  ;;  %v6939_v63 = vadd.f32 %v14934_v20, %v14933_v16  ;;  %v7203_v35 = vadd.f32 %v14935_v18, %v6941_v14  ;;  %v14944_v14 = vld [vmem:[#allocation7_spill] sm:$0xff]  ;;  %v14946_v16 = vld [vmem:[#allocation33_spill] sm:$0xff] }
 0x425   : > { %v9927_v10 = vpop.f32.mrf.mxu0  ;;  %v7733_v41 = vmax.f32 %v7701_v27, 0.0  ;;  %v7699_v29 = vadd.f32 %v13958_v13, %v7660_v26  ;;  %v7665_v53 = vmul.f32 %v13950_v47, %v7626_v51  ;;  %v7624_v37 = vadd.f32 %v7557_v5, %v7416_v34 }
 0x426   : > { %7797 = vst.msk [vmem:[%s13981_s8 + $0x48] sm:$0xf] %vm7778_vm8, %v7764_v40  ;;  %v7762_v6 = vpack.c.bf16 %v7730_v43, %v7730_v43  ;;  %v7419_v52 = vadd.f32 %v9893_v62, %v7199_v39  ;;  %v7352_v36 = vpop.f32.mrf.mxu1  ;;  %v14936_v39 = vld [vmem:[#allocation15_spill] sm:$0xff]  ;;  %v6944_v38 = vadd.f32 %v14938_v33, %v14937_v19  ;;  %v6945_v40 = vadd.f32 %v13935_v57, %v14941_v8 }
 0x427   : > { %v7560_v31 = vpop.f32.mrf.mxu0  ;;  %v7765_v25 = vpack.c.bf16 %v7733_v41, %v7733_v41  ;;  %v7731_v60 = vmax.f32 %v7699_v29, 0.0  ;;  %v7704_v15 = vadd.f32 %v13958_v13, %v7665_v53  ;;  %v7663_v11 = vmul.f32 %v13950_v47, %v7624_v37 }
 0x428   : > { %7795 = vst.msk [vmem:[%s13981_s8 + $0x40] sm:$0xf] %vm7778_vm8, %v7762_v6  ;;  %v7627_v1 = vadd.f32 %v9927_v10, %v7419_v52  ;;  %v7417_v61 = vadd.f32 %v7352_v36, %v7197_v22  ;;  %v9896_v12 = vpop.f32.mrf.mxu1  ;;  %v7201_v49 = vadd.f32 %v14936_v39, %v6939_v63  ;;  %v14939_v22 = vld [vmem:[#allocation6_spill] sm:$0xff]  ;;  %v6943_v6 = vadd.f32 %v14944_v14, %v14943_v50 }
 0x429   : > { %v9930_v4 = vpop.f32.mrf.mxu0  ;;  %7798 = vst.msk [vmem:[%s13981_s8 + $0x4c] sm:$0xf] %vm7778_vm8, %v7765_v25  ;;  %v7763_v44 = vpack.c.bf16 %v7731_v60, %v7731_v60  ;;  %v7736_v21 = vmax.f32 %v7704_v15, 0.0  ;;  %v7702_v55 = vadd.f32 %v13958_v13, %v7663_v11  ;;  %v7422_v30 = vadd.f32 %v9896_v12, %v7202_v54  ;;  %v14942_v54 = vld [vmem:[#allocation42_spill] sm:$0xff] }
 0x42a   : > { %v7666_v28 = vmul.f32 %v13950_v47, %v7627_v1  ;;  %v7625_v46 = vadd.f32 %v7560_v31, %v7417_v61  ;;  %v7365_v24 = vpop.f32.mrf.mxu1  ;;  %v6942_v23 = vadd.f32 %v14940_v17, %v14939_v22  ;;  %v7206_v42 = vadd.f32 %v14942_v54, %v6944_v38 }
 0x42b   : > { %v7573_v32 = vpop.f32.mrf.mxu0  ;;  %7796 = vst.msk [vmem:[%s13981_s8 + $0x44] sm:$0xf] %vm7778_vm8, %v7763_v44  ;;  %v7768_v45 = vpack.c.bf16 %v7736_v21, %v7736_v21  ;;  %v7734_v56 = vmax.f32 %v7702_v55, 0.0  ;;  %v7630_v2 = vadd.f32 %v9930_v4, %v7422_v30  ;;  %v7420_v5 = vadd.f32 %v7365_v24, %v7200_v58  ;;  %v14947_v30 = vld [vmem:[#allocation58_spill] sm:$0xff] }
 0x42c   : > { %v7705_v7 = vadd.f32 %v13958_v13, %v7666_v28  ;;  %v7664_v48 = vmul.f32 %v13950_v47, %v7625_v46  ;;  %v9897_v27 = vpop.f32.mrf.mxu1  ;;  %v7204_v58 = vadd.f32 %v14945_v3, %v6942_v23  ;;  %v7207_v20 = vadd.f32 %v14946_v16, %v6945_v40 }
 0x42d   : > { %v9931_v59 = vpop.f32.mrf.mxu0  ;;  %7801 = vst.msk [vmem:[%s13981_s8 + $0x58] sm:$0xf] %vm7778_vm8, %v7768_v45  ;;  %v7766_v26 = vpack.c.bf16 %v7734_v56, %v7734_v56  ;;  %v7669_v51 = vmul.f32 %v13950_v47, %v7630_v2  ;;  %v7628_v34 = vadd.f32 %v7573_v32, %v7420_v5  ;;  %v7423_v10 = vadd.f32 %v9897_v27, %v7203_v35 }
 0x42e   : > { %v7737_v43 = vmax.f32 %v7705_v7, 0.0  ;;  %v7703_v62 = vadd.f32 %v13958_v13, %v7664_v48  ;;  %v7368_v41 = vpop.f32.mrf.mxu1  ;;  %v7205_v32 = vadd.f32 %v14947_v30, %v6943_v6 }
 0x42f   : > { %v7576_v0 = vpop.f32.mrf.mxu0  ;;  %7799 = vst.msk [vmem:[%s13981_s8 + $0x50] sm:$0xf] %vm7778_vm8, %v7766_v26  ;;  %v7708_v29 = vadd.f32 %v13958_v13, %v7669_v51  ;;  %v7667_v53 = vmul.f32 %v13950_v47, %v7628_v34  ;;  %v7631_v37 = vadd.f32 %v9931_v59, %v7423_v10  ;;  %v7421_v31 = vadd.f32 %v7368_v41, %v7201_v49 }
 0x430   : > { %v7769_v57 = vpack.c.bf16 %v7737_v43, %v7737_v43  ;;  %v7735_v52 = vmax.f32 %v7703_v62, 0.0  ;;  %v9900_v36 = vpop.f32.mrf.mxu1 }
 0x431   : > { %v9934_v9 = vpop.f32.mrf.mxu0  ;;  %v7740_v25 = vmax.f32 %v7708_v29, 0.0  ;;  %v7706_v60 = vadd.f32 %v13958_v13, %v7667_v53  ;;  %v7670_v15 = vmul.f32 %v13950_v47, %v7631_v37  ;;  %v7629_v11 = vadd.f32 %v7576_v0, %v7421_v31 }
 0x432   : > { %7802 = vst.msk [vmem:[%s13981_s8 + $0x5c] sm:$0xf] %vm7778_vm8, %v7769_v57  ;;  %v7767_v63 = vpack.c.bf16 %v7735_v52, %v7735_v52  ;;  %v7426_v1 = vadd.f32 %v9900_v36, %v7206_v42  ;;  %v7381_v61 = vpop.f32.mrf.mxu1 }
 0x433   : > { %v7589_v4 = vpop.f32.mrf.mxu0  ;;  %v7772_v12 = vpack.c.bf16 %v7740_v25, %v7740_v25  ;;  %v7738_v44 = vmax.f32 %v7706_v60, 0.0  ;;  %v7709_v21 = vadd.f32 %v13958_v13, %v7670_v15  ;;  %v7668_v55 = vmul.f32 %v13950_v47, %v7629_v11 }
 0x434   : > { %7800 = vst.msk [vmem:[%s13981_s8 + $0x54] sm:$0xf] %vm7778_vm8, %v7767_v63  ;;  %v7634_v18 = vadd.f32 %v9934_v9, %v7426_v1  ;;  %v7424_v35 = vadd.f32 %v7381_v61, %v7204_v58  ;;  %v9901_v28 = vpop.f32.mrf.mxu1 }
 0x435   : > { %v9935_v46 = vpop.f32.mrf.mxu0  ;;  %7805 = vst.msk [vmem:[%s13981_s8 + $0x68] sm:$0xf] %vm7778_vm8, %v7772_v12  ;;  %v7770_v24 = vpack.c.bf16 %v7738_v44, %v7738_v44  ;;  %v7741_v45 = vmax.f32 %v7709_v21, 0.0  ;;  %v7707_v56 = vadd.f32 %v13958_v13, %v7668_v55  ;;  %v7427_v2 = vadd.f32 %v9901_v28, %v7207_v20 }
 0x436   : > { %v7673_v5 = vmul.f32 %v13950_v47, %v7634_v18  ;;  %v7632_v59 = vadd.f32 %v7589_v4, %v7424_v35  ;;  %v7384_v39 = vpop.f32.mrf.mxu1 }
 0x437   : > { %7803 = vst.msk [vmem:[%s13981_s8 + $0x60] sm:$0xf] %vm7778_vm8, %v7770_v24  ;;  %v7773_v49 = vpack.c.bf16 %v7741_v45, %v7741_v45  ;;  %v7739_v19 = vmax.f32 %v7707_v56, 0.0  ;;  %v7635_v33 = vadd.f32 %v9935_v46, %v7427_v2  ;;  %v7425_v38 = vadd.f32 %v7384_v39, %v7205_v32  ;;  %v7592_v27 = vpop.f32.mrf.mxu0 }
 0x438   : > { %v7712_v7 = vadd.f32 %v13958_v13, %v7673_v5  ;;  %v7671_v48 = vmul.f32 %v13950_v47, %v7632_v59 }
 0x439   : > { %7806 = vst.msk [vmem:[%s13981_s8 + $0x6c] sm:$0xf] %vm7778_vm8, %v7773_v49  ;;  %v7771_v26 = vpack.c.bf16 %v7739_v19, %v7739_v19  ;;  %v7674_v51 = vmul.f32 %v13950_v47, %v7635_v33  ;;  %v7633_v34 = vadd.f32 %v7592_v27, %v7425_v38 }
 0x43a   : > { %v7744_v10 = vmax.f32 %v7712_v7, 0.0  ;;  %v7710_v0 = vadd.f32 %v13958_v13, %v7671_v48 }
 0x43b   : > { %7804 = vst.msk [vmem:[%s13981_s8 + $0x64] sm:$0xf] %vm7778_vm8, %v7771_v26  ;;  %v7713_v22 = vadd.f32 %v13958_v13, %v7674_v51  ;;  %v7672_v17 = vmul.f32 %v13950_v47, %v7633_v34 }
 0x43c   : > { %v7776_v23 = vpack.c.bf16 %v7744_v10, %v7744_v10  ;;  %v7742_v8 = vmax.f32 %v7710_v0, 0.0 }
 0x43d   : > { %v7745_v40 = vmax.f32 %v7713_v22, 0.0  ;;  %v7711_v43 = vadd.f32 %v13958_v13, %v7672_v17 }
 0x43e   : > { %7809 = vst.msk [vmem:[%s13981_s8 + $0x78] sm:$0xf] %vm7778_vm8, %v7776_v23  ;;  %v7774_v62 = vpack.c.bf16 %v7742_v8, %v7742_v8 }
 0x43f   : > { %v7777_v41 = vpack.c.bf16 %v7745_v40, %v7745_v40  ;;  %v7743_v29 = vmax.f32 %v7711_v43, 0.0 }
 0x440   : > { %7807 = vst.msk [vmem:[%s13981_s8 + $0x70] sm:$0xf] %vm7778_vm8, %v7774_v62 }
 0x441   : > { %7810 = vst.msk [vmem:[%s13981_s8 + $0x7c] sm:$0xf] %vm7778_vm8, %v7777_v41  ;;  %v7775_v53 = vpack.c.bf16 %v7743_v29, %v7743_v29 }
 0x443   : > { %7808 = vst.msk [vmem:[%s13981_s8 + $0x74] sm:$0xf] %vm7778_vm8, %v7775_v53 }
 0x444 PF: > { %s14_s15 = sadd.s32 1, %s10188_s15  }
 0x445   : > { %p11_p4 = scmp.ge.s32.totalorder %s14_s15, 4  }
 0x447   :  { %13 = sbr.rel (!%p11_p4) target bundleno = 1 (0x1), region = 92 }

</bundles_post_ra>
